<compile_context>
chip_gen: v7x
topology: tpu7x:2x2x1
jax: 0.10.0
libtpu: 0.0.40
codegen_flags: <defaults>
</compile_context>

<pallas_src>
import functools

import numpy as np
import jax
import jax.numpy as jnp
from jax import lax
from jax.experimental import pallas as pl
from jax.experimental.pallas import tpu as pltpu

_PHASE_TAPS = ((0, 0), (0, 1), (1, 0), (1, 1))  # (dh, dw) taps for the stride-2 deconv
_SUB = 8                                        # sublane height of one batch sub-block


def _make_upsample_kernel(Ci, C1, Co, H, W, K1, NB):
    S = H * W
    P1 = K1 // 2
    NSUB = NB // _SUB
    taps1 = [(dh, dw) for dh in range(-P1, P1 + 1) for dw in range(-P1, P1 + 1)]

    # static validity table for the stride-2 deconv: which output phases (r,c)
    # use tap (dh,dw)  (kernel index (r+1-2dh, c+1-2dw) must be inside the 3x3).
    tap2_phases = []
    for (dh, dw) in _PHASE_TAPS:
        ph = []
        for r in range(2):
            for c in range(2):
                kh, kw = r + 1 - 2 * dh, c + 1 - 2 * dw
                if 0 <= kh < 3 and 0 <= kw < 3:
                    ph.append(r * 2 + c)
        tap2_phases.append(ph)

    def kernel(x_ref, w1_ref, b1_ref, w2_ref, b2_ref, m1_ref, m2_ref, o_ref):
        # x_ref : (Ci, NB, S)  VMEM   -- batch on sublanes, spatial on lanes
        # w*/b* : flat f32     SMEM   -- scalar tables
        # m1/m2 : (25,8,S)/(4,8,S)    -- masks pre-replicated to 8 sublanes
        # o_ref : (4*Co, NB, S) VMEM  -- rows = (2r+c)*Co + co (phase-major)

        def sub_block(off):
            x = [x_ref[ci, pl.ds(off, _SUB), :] for ci in range(Ci)]   # Ci x (8,S)

            # ---- deconv1: ConvTranspose2d(Ci->C1, k=K1, s=1, p=K1//2) + ReLU ----
            acc1 = [None] * C1
            for t, (dh, dw) in enumerate(taps1):
                d = dh * W + dw
                mask = None if (dh == 0 and dw == 0) else m1_ref[t]    # (8,S)
                for ci in range(Ci):
                    xs = x[ci] if d == 0 else pltpu.roll(x[ci], shift=(-d) % S, axis=1)
                    if mask is not None:
                        xs = xs * mask                                  # full-vreg vmul
                    for co in range(C1):
                        w = w1_ref[(t * C1 + co) * Ci + ci]             # SMEM scalar
                        p = xs * w
                        acc1[co] = p if acc1[co] is None else acc1[co] + p
            z1 = [jnp.maximum(acc1[co] + b1_ref[co], 0.0) for co in range(C1)]

            # ---- deconv2: ConvTranspose2d(C1->Co, k=3, s=2, p=1, op=1) + ReLU ---
            # sub-pixel phases; statically invalid (tap,phase) pairs are skipped.
            acc2 = [None] * (4 * Co)
            for t2, (dh, dw) in enumerate(_PHASE_TAPS):
                phases = tap2_phases[t2]
                if not phases:
                    continue
                d = dh * W + dw
                mask = None if (dh == 0 and dw == 0) else m2_ref[t2]
                for ci in range(C1):
                    zs = z1[ci] if d == 0 else pltpu.roll(z1[ci], shift=(-d) % S, axis=1)
                    if mask is not None:
                        zs = zs * mask
                    for ph in phases:
                        for co in range(Co):
                            w = w2_ref[((t2 * 4 + ph) * Co + co) * C1 + ci]
                            p = zs * w
                            k = ph * Co + co
                            acc2[k] = p if acc2[k] is None else acc2[k] + p

            # lane-dense, unmasked (8,S) stores
            for ph in range(4):
                for co in range(Co):
                    k = ph * Co + co
                    o_ref[k, pl.ds(off, _SUB), :] = jnp.maximum(acc2[k] + b2_ref[co], 0.0)

        if NSUB == 1:
            sub_block(0)
        else:
            def body(sb, carry):
                sub_block(pl.multiple_of(sb * _SUB, _SUB))
                return carry
            lax.fori_loop(0, NSUB, body, 0, unroll=True)

    return kernel


def prepare_params(params, H, W):
    """Run-once preprocessing: SMEM scalar weight tables, biases, replicated masks."""
    wt1, b1 = params["wt1"], params["b1"]      # (Ci, C1, K1, K1), (C1,)
    wt2, b2 = params["wt2"], params["b2"]      # (C1, Co, 3, 3),   (Co,)
    Ci, C1, K1, _ = wt1.shape
    _, Co, K2, _ = wt2.shape
    P1 = K1 // 2
    S = H * W

    # deconv1 scalar table: w1[t, co, ci] = wt1[ci, co, P1-dh, P1-dw]
    w1 = jnp.stack(
        [wt1[:, :, P1 - dh, P1 - dw].T
         for dh in range(-P1, P1 + 1) for dw in range(-P1, P1 + 1)],
        axis=0).astype(jnp.float32)                               # (K1*K1, C1, Ci)

    # deconv2 scalar table: w2[t2, phase, co, ci] = wt2[ci, co, r+1-2dh, c+1-2dw]
    # (zeros for statically invalid entries; those are never read by the kernel)
    w2_entries = []
    for (dh, dw) in _PHASE_TAPS:
        for r in range(2):
            for c in range(2):
                kh, kw = r + 1 - 2 * dh, c + 1 - 2 * dw
                if 0 <= kh < K2 and 0 <= kw < K2:
                    w2_entries.append(wt2[:, :, kh, kw].T)        # (Co, C1)
                else:
                    w2_entries.append(jnp.zeros((Co, C1), wt2.dtype))
    w2 = jnp.stack(w2_entries, 0).reshape(4, 4, Co, C1).astype(jnp.float32)

    # 0/1 boundary masks on the flattened spatial axis, replicated to 8 sublanes
    ii, jj = np.meshgrid(np.arange(H), np.arange(W), indexing="ij")
    ii, jj = ii.reshape(-1), jj.reshape(-1)
    m1 = np.stack(
        [((ii + dh >= 0) & (ii + dh < H) & (jj + dw >= 0) & (jj + dw < W))
         for dh in range(-P1, P1 + 1) for dw in range(-P1, P1 + 1)],
        axis=0).astype(np.float32)                                # (K1*K1, S)
    m2 = np.stack(
        [((ii + dh < H) & (jj + dw < W)) for (dh, dw) in _PHASE_TAPS],
        axis=0).astype(np.float32)                                # (4, S)
    m1 = np.ascontiguousarray(np.broadcast_to(m1[:, None, :], (K1 * K1, _SUB, S)))
    m2 = np.ascontiguousarray(np.broadcast_to(m2[:, None, :], (4, _SUB, S)))

    return dict(w1=w1, b1=b1.astype(jnp.float32),
                w2=w2, b2=b2.astype(jnp.float32),
                m1=jnp.asarray(m1), m2=jnp.asarray(m2))


def _upsample_forward_impl(x_nchw, prep, block_batch=32):
    N, Ci, H, W = x_nchw.shape
    S = H * W
    K1K1, C1, Ci_w = prep["w1"].shape
    assert Ci_w == Ci
    K1 = int(round(K1K1 ** 0.5))
    Co = prep["w2"].shape[2]
    assert block_batch % _SUB == 0

    # per-grid-step batch (multiple of 8, capped by block_batch), padded batch
    NB = max(_SUB, min(block_batch, _SUB * ((N + _SUB - 1) // _SUB)))
    Np = NB * ((N + NB - 1) // NB)

    # (N,Ci,H,W) -> (Ci, Np, S): batch on sublanes, flattened spatial on lanes
    x = x_nchw.reshape(N, Ci, S).astype(jnp.float32).transpose(1, 0, 2)
    if Np != N:
        x = jnp.pad(x, ((0, 0), (0, Np - N), (0, 0)))

    kernel = _make_upsample_kernel(Ci, C1, Co, H, W, K1, NB)
    smem = pl.BlockSpec(memory_space=pltpu.MemorySpace.SMEM)

    out = pl.pallas_call(
        kernel,
        out_shape=jax.ShapeDtypeStruct((4 * Co, Np, S), jnp.float32),
        grid=(Np // NB,),
        in_specs=[
            pl.BlockSpec((Ci, NB, S), lambda n: (0, n, 0)),       # activations (VMEM)
            smem, smem, smem, smem,                               # w1, b1, w2, b2 (SMEM)
            pl.BlockSpec((K1K1, _SUB, S), lambda n: (0, 0, 0)),   # m1 (grid-invariant)
            pl.BlockSpec((4, _SUB, S), lambda n: (0, 0, 0)),      # m2 (grid-invariant)
        ],
        out_specs=pl.BlockSpec((4 * Co, NB, S), lambda n: (0, n, 0)),
        compiler_params=pltpu.CompilerParams(
            dimension_semantics=("parallel",)),
    )(x, prep["w1"].reshape(-1), prep["b1"],
      prep["w2"].reshape(-1), prep["b2"], prep["m1"], prep["m2"])

    # de-interleave the 4 sub-pixel phases: rows (r,c,co), cols i*W+j -> (N,Co,2H,2W)
    y = out.reshape(2, 2, Co, Np, H, W).transpose(3, 2, 4, 0, 5, 1)
    return y.reshape(Np, Co, 2 * H, 2 * W)[:N]


upsample_forward = jax.jit(_upsample_forward_impl, static_argnames=("block_batch",))


def init_params(key, in_channels, out_channels):
    k1, k2, k3, k4 = jax.random.split(key, 4)
    return dict(
        wt1=0.1 * jax.random.normal(k1, (in_channels, in_channels, 5, 5), jnp.float32),
        b1=0.1 * jax.random.normal(k2, (in_channels,), jnp.float32),
        wt2=0.1 * jax.random.normal(k3, (in_channels, out_channels, 3, 3), jnp.float32),
        b2=0.1 * jax.random.normal(k4, (out_channels,), jnp.float32),
    )


def _ref_conv_transpose_relu(x_nhwc, wt, bias, stride, padding, output_padding):
    """Pure-XLA reference for ConvTranspose2d + ReLU (PyTorch semantics)."""
    K = wt.shape[2]
    w = jnp.flip(wt, axis=(2, 3)).transpose(2, 3, 0, 1)  # HWIO
    lo = K - 1 - padding
    hi = lo + output_padding
    y = lax.conv_general_dilated(
        x_nhwc, w, window_strides=(1, 1),
        padding=((lo, hi), (lo, hi)),
        lhs_dilation=(stride, stride),
        dimension_numbers=("NHWC", "HWIO", "NHWC"),
        precision=lax.Precision.HIGHEST)
    return jax.nn.relu(y + bias)


if __name__ == "__main__":
    key = jax.random.PRNGKey(0)
    kx, kp = jax.random.split(key)
    in_ch, out_ch = 4, 3
    H = W = 16
    x = jax.random.normal(kx, (2, in_ch, H, W), jnp.float32)   # NCHW, like PyTorch
    params = init_params(kp, in_ch, out_ch)
    prep = prepare_params(params, H, W)                        # hoisted, run once

    y = upsample_forward(x, prep)
    y = jax.block_until_ready(y)
    assert y.shape == (2, out_ch, 2 * H, 2 * W), y.shape

    # cross-check against a pure-XLA transposed-conv reference
    xh = jnp.transpose(x, (0, 2, 3, 1))
    r = _ref_conv_transpose_relu(xh, params["wt1"], params["b1"], 1, 2, 0)
    r = _ref_conv_transpose_relu(r, params["wt2"], params["b2"], 2, 1, 1)
    r = jnp.transpose(r, (0, 3, 1, 2))
    err = float(jnp.max(jnp.abs(y - r)))
    assert jnp.allclose(y, r, atol=1e-3, rtol=1e-3), err

    print("KERNEL_OK")
</pallas_src>

<mosaic_0001>
module attributes {stable_mosaic.version = 11 : i64} {
  func.func @kernel(%arg0: i32, %arg1: memref<4x8x256xf32, #tpu.memory_space<vmem>>, %arg2: memref<400xf32, #tpu.memory_space<smem>>, %arg3: memref<4xf32, #tpu.memory_space<smem>>, %arg4: memref<192xf32, #tpu.memory_space<smem>>, %arg5: memref<3xf32, #tpu.memory_space<smem>>, %arg6: memref<25x8x256xf32, #tpu.memory_space<vmem>>, %arg7: memref<4x8x256xf32, #tpu.memory_space<vmem>>, %arg8: memref<12x8x256xf32, #tpu.memory_space<vmem>>) attributes {dimension_semantics = [#tpu.dimension_semantics<parallel>], iteration_bounds = array<i64: 1>, scalar_prefetch = 0 : i64, scratch_operands = 0 : i64, tpu.core_type = #tpu.core_type<tc>, window_params = [{transform_indices = @transform_0, window_bounds = array<i64: 4, 8, 256>}, {transform_indices = @transform_1, window_bounds = array<i64: 400>}, {transform_indices = @transform_2, window_bounds = array<i64: 4>}, {transform_indices = @transform_3, window_bounds = array<i64: 192>}, {transform_indices = @transform_4, window_bounds = array<i64: 3>}, {pipeline_mode = #tpu.pipeline_mode<synchronous>, transform_indices = @transform_5, window_bounds = array<i64: 25, 8, 256>}, {pipeline_mode = #tpu.pipeline_mode<synchronous>, transform_indices = @transform_6, window_bounds = array<i64: 4, 8, 256>}, {transform_indices = @transform_7, window_bounds = array<i64: 12, 8, 256>}]} {
    %c0 = arith.constant 0 : index
    %c0_0 = arith.constant 0 : index
    %c0_1 = arith.constant 0 : index
    %0 = vector.load %arg1[%c0, %c0_0, %c0_1] : memref<4x8x256xf32, #tpu.memory_space<vmem>>, vector<1x8x256xf32>
    %1 = vector.shape_cast %0 : vector<1x8x256xf32> to vector<8x256xf32>
    %c1 = arith.constant 1 : index
    %c0_2 = arith.constant 0 : index
    %c0_3 = arith.constant 0 : index
    %2 = vector.load %arg1[%c1, %c0_2, %c0_3] : memref<4x8x256xf32, #tpu.memory_space<vmem>>, vector<1x8x256xf32>
    %3 = vector.shape_cast %2 : vector<1x8x256xf32> to vector<8x256xf32>
    %c2 = arith.constant 2 : index
    %c0_4 = arith.constant 0 : index
    %c0_5 = arith.constant 0 : index
    %4 = vector.load %arg1[%c2, %c0_4, %c0_5] : memref<4x8x256xf32, #tpu.memory_space<vmem>>, vector<1x8x256xf32>
    %5 = vector.shape_cast %4 : vector<1x8x256xf32> to vector<8x256xf32>
    %c3 = arith.constant 3 : index
    %c0_6 = arith.constant 0 : index
    %c0_7 = arith.constant 0 : index
    %6 = vector.load %arg1[%c3, %c0_6, %c0_7] : memref<4x8x256xf32, #tpu.memory_space<vmem>>, vector<1x8x256xf32>
    %7 = vector.shape_cast %6 : vector<1x8x256xf32> to vector<8x256xf32>
    %c0_8 = arith.constant 0 : index
    %c0_9 = arith.constant 0 : index
    %c0_10 = arith.constant 0 : index
    %8 = vector.load %arg6[%c0_8, %c0_9, %c0_10] : memref<25x8x256xf32, #tpu.memory_space<vmem>>, vector<1x8x256xf32>
    %9 = vector.shape_cast %8 : vector<1x8x256xf32> to vector<8x256xf32>
    %c34_i32 = arith.constant 34 : i32
    %10 = tpu.dynamic_rotate %1 by %c34_i32 dim 1 : vector<8x256xf32>, i32 -> vector<8x256xf32>
    %11 = arith.mulf %10, %9 : vector<8x256xf32>
    %c0_11 = arith.constant 0 : index
    %12 = memref.load %arg2[%c0_11] : memref<400xf32, #tpu.memory_space<smem>>
    %13 = vector.broadcast %12 : f32 to vector<8x256xf32>
    %14 = arith.mulf %11, %13 : vector<8x256xf32>
    %c4 = arith.constant 4 : index
    %15 = memref.load %arg2[%c4] : memref<400xf32, #tpu.memory_space<smem>>
    %16 = vector.broadcast %15 : f32 to vector<8x256xf32>
    %17 = arith.mulf %11, %16 : vector<8x256xf32>
    %c8 = arith.constant 8 : index
    %18 = memref.load %arg2[%c8] : memref<400xf32, #tpu.memory_space<smem>>
    %19 = vector.broadcast %18 : f32 to vector<8x256xf32>
    %20 = arith.mulf %11, %19 : vector<8x256xf32>
    %c12 = arith.constant 12 : index
    %21 = memref.load %arg2[%c12] : memref<400xf32, #tpu.memory_space<smem>>
    %22 = vector.broadcast %21 : f32 to vector<8x256xf32>
    %23 = arith.mulf %11, %22 : vector<8x256xf32>
    %c34_i32_12 = arith.constant 34 : i32
    %24 = tpu.dynamic_rotate %3 by %c34_i32_12 dim 1 : vector<8x256xf32>, i32 -> vector<8x256xf32>
    %25 = arith.mulf %24, %9 : vector<8x256xf32>
    %c1_13 = arith.constant 1 : index
    %26 = memref.load %arg2[%c1_13] : memref<400xf32, #tpu.memory_space<smem>>
    %27 = vector.broadcast %26 : f32 to vector<8x256xf32>
    %28 = arith.mulf %25, %27 : vector<8x256xf32>
    %29 = arith.addf %14, %28 : vector<8x256xf32>
    %c5 = arith.constant 5 : index
    %30 = memref.load %arg2[%c5] : memref<400xf32, #tpu.memory_space<smem>>
    %31 = vector.broadcast %30 : f32 to vector<8x256xf32>
    %32 = arith.mulf %25, %31 : vector<8x256xf32>
    %33 = arith.addf %17, %32 : vector<8x256xf32>
    %c9 = arith.constant 9 : index
    %34 = memref.load %arg2[%c9] : memref<400xf32, #tpu.memory_space<smem>>
    %35 = vector.broadcast %34 : f32 to vector<8x256xf32>
    %36 = arith.mulf %25, %35 : vector<8x256xf32>
    %37 = arith.addf %20, %36 : vector<8x256xf32>
    %c13 = arith.constant 13 : index
    %38 = memref.load %arg2[%c13] : memref<400xf32, #tpu.memory_space<smem>>
    %39 = vector.broadcast %38 : f32 to vector<8x256xf32>
    %40 = arith.mulf %25, %39 : vector<8x256xf32>
    %41 = arith.addf %23, %40 : vector<8x256xf32>
    %c34_i32_14 = arith.constant 34 : i32
    %42 = tpu.dynamic_rotate %5 by %c34_i32_14 dim 1 : vector<8x256xf32>, i32 -> vector<8x256xf32>
    %43 = arith.mulf %42, %9 : vector<8x256xf32>
    %c2_15 = arith.constant 2 : index
    %44 = memref.load %arg2[%c2_15] : memref<400xf32, #tpu.memory_space<smem>>
    %45 = vector.broadcast %44 : f32 to vector<8x256xf32>
    %46 = arith.mulf %43, %45 : vector<8x256xf32>
    %47 = arith.addf %29, %46 : vector<8x256xf32>
    %c6 = arith.constant 6 : index
    %48 = memref.load %arg2[%c6] : memref<400xf32, #tpu.memory_space<smem>>
    %49 = vector.broadcast %48 : f32 to vector<8x256xf32>
    %50 = arith.mulf %43, %49 : vector<8x256xf32>
    %51 = arith.addf %33, %50 : vector<8x256xf32>
    %c10 = arith.constant 10 : index
    %52 = memref.load %arg2[%c10] : memref<400xf32, #tpu.memory_space<smem>>
    %53 = vector.broadcast %52 : f32 to vector<8x256xf32>
    %54 = arith.mulf %43, %53 : vector<8x256xf32>
    %55 = arith.addf %37, %54 : vector<8x256xf32>
    %c14 = arith.constant 14 : index
    %56 = memref.load %arg2[%c14] : memref<400xf32, #tpu.memory_space<smem>>
    %57 = vector.broadcast %56 : f32 to vector<8x256xf32>
    %58 = arith.mulf %43, %57 : vector<8x256xf32>
    %59 = arith.addf %41, %58 : vector<8x256xf32>
    %c34_i32_16 = arith.constant 34 : i32
    %60 = tpu.dynamic_rotate %7 by %c34_i32_16 dim 1 : vector<8x256xf32>, i32 -> vector<8x256xf32>
    %61 = arith.mulf %60, %9 : vector<8x256xf32>
    %c3_17 = arith.constant 3 : index
    %62 = memref.load %arg2[%c3_17] : memref<400xf32, #tpu.memory_space<smem>>
    %63 = vector.broadcast %62 : f32 to vector<8x256xf32>
    %64 = arith.mulf %61, %63 : vector<8x256xf32>
    %65 = arith.addf %47, %64 : vector<8x256xf32>
    %c7 = arith.constant 7 : index
    %66 = memref.load %arg2[%c7] : memref<400xf32, #tpu.memory_space<smem>>
    %67 = vector.broadcast %66 : f32 to vector<8x256xf32>
    %68 = arith.mulf %61, %67 : vector<8x256xf32>
    %69 = arith.addf %51, %68 : vector<8x256xf32>
    %c11 = arith.constant 11 : index
    %70 = memref.load %arg2[%c11] : memref<400xf32, #tpu.memory_space<smem>>
    %71 = vector.broadcast %70 : f32 to vector<8x256xf32>
    %72 = arith.mulf %61, %71 : vector<8x256xf32>
    %73 = arith.addf %55, %72 : vector<8x256xf32>
    %c15 = arith.constant 15 : index
    %74 = memref.load %arg2[%c15] : memref<400xf32, #tpu.memory_space<smem>>
    %75 = vector.broadcast %74 : f32 to vector<8x256xf32>
    %76 = arith.mulf %61, %75 : vector<8x256xf32>
    %77 = arith.addf %59, %76 : vector<8x256xf32>
    %c1_18 = arith.constant 1 : index
    %c0_19 = arith.constant 0 : index
    %c0_20 = arith.constant 0 : index
    %78 = vector.load %arg6[%c1_18, %c0_19, %c0_20] : memref<25x8x256xf32, #tpu.memory_space<vmem>>, vector<1x8x256xf32>
    %79 = vector.shape_cast %78 : vector<1x8x256xf32> to vector<8x256xf32>
    %c33_i32 = arith.constant 33 : i32
    %80 = tpu.dynamic_rotate %1 by %c33_i32 dim 1 : vector<8x256xf32>, i32 -> vector<8x256xf32>
    %81 = arith.mulf %80, %79 : vector<8x256xf32>
    %c16 = arith.constant 16 : index
    %82 = memref.load %arg2[%c16] : memref<400xf32, #tpu.memory_space<smem>>
    %83 = vector.broadcast %82 : f32 to vector<8x256xf32>
    %84 = arith.mulf %81, %83 : vector<8x256xf32>
    %85 = arith.addf %65, %84 : vector<8x256xf32>
    %c20 = arith.constant 20 : index
    %86 = memref.load %arg2[%c20] : memref<400xf32, #tpu.memory_space<smem>>
    %87 = vector.broadcast %86 : f32 to vector<8x256xf32>
    %88 = arith.mulf %81, %87 : vector<8x256xf32>
    %89 = arith.addf %69, %88 : vector<8x256xf32>
    %c24 = arith.constant 24 : index
    %90 = memref.load %arg2[%c24] : memref<400xf32, #tpu.memory_space<smem>>
    %91 = vector.broadcast %90 : f32 to vector<8x256xf32>
    %92 = arith.mulf %81, %91 : vector<8x256xf32>
    %93 = arith.addf %73, %92 : vector<8x256xf32>
    %c28 = arith.constant 28 : index
    %94 = memref.load %arg2[%c28] : memref<400xf32, #tpu.memory_space<smem>>
    %95 = vector.broadcast %94 : f32 to vector<8x256xf32>
    %96 = arith.mulf %81, %95 : vector<8x256xf32>
    %97 = arith.addf %77, %96 : vector<8x256xf32>
    %c33_i32_21 = arith.constant 33 : i32
    %98 = tpu.dynamic_rotate %3 by %c33_i32_21 dim 1 : vector<8x256xf32>, i32 -> vector<8x256xf32>
    %99 = arith.mulf %98, %79 : vector<8x256xf32>
    %c17 = arith.constant 17 : index
    %100 = memref.load %arg2[%c17] : memref<400xf32, #tpu.memory_space<smem>>
    %101 = vector.broadcast %100 : f32 to vector<8x256xf32>
    %102 = arith.mulf %99, %101 : vector<8x256xf32>
    %103 = arith.addf %85, %102 : vector<8x256xf32>
    %c21 = arith.constant 21 : index
    %104 = memref.load %arg2[%c21] : memref<400xf32, #tpu.memory_space<smem>>
    %105 = vector.broadcast %104 : f32 to vector<8x256xf32>
    %106 = arith.mulf %99, %105 : vector<8x256xf32>
    %107 = arith.addf %89, %106 : vector<8x256xf32>
    %c25 = arith.constant 25 : index
    %108 = memref.load %arg2[%c25] : memref<400xf32, #tpu.memory_space<smem>>
    %109 = vector.broadcast %108 : f32 to vector<8x256xf32>
    %110 = arith.mulf %99, %109 : vector<8x256xf32>
    %111 = arith.addf %93, %110 : vector<8x256xf32>
    %c29 = arith.constant 29 : index
    %112 = memref.load %arg2[%c29] : memref<400xf32, #tpu.memory_space<smem>>
    %113 = vector.broadcast %112 : f32 to vector<8x256xf32>
    %114 = arith.mulf %99, %113 : vector<8x256xf32>
    %115 = arith.addf %97, %114 : vector<8x256xf32>
    %c33_i32_22 = arith.constant 33 : i32
    %116 = tpu.dynamic_rotate %5 by %c33_i32_22 dim 1 : vector<8x256xf32>, i32 -> vector<8x256xf32>
    %117 = arith.mulf %116, %79 : vector<8x256xf32>
    %c18 = arith.constant 18 : index
    %118 = memref.load %arg2[%c18] : memref<400xf32, #tpu.memory_space<smem>>
    %119 = vector.broadcast %118 : f32 to vector<8x256xf32>
    %120 = arith.mulf %117, %119 : vector<8x256xf32>
    %121 = arith.addf %103, %120 : vector<8x256xf32>
    %c22 = arith.constant 22 : index
    %122 = memref.load %arg2[%c22] : memref<400xf32, #tpu.memory_space<smem>>
    %123 = vector.broadcast %122 : f32 to vector<8x256xf32>
    %124 = arith.mulf %117, %123 : vector<8x256xf32>
    %125 = arith.addf %107, %124 : vector<8x256xf32>
    %c26 = arith.constant 26 : index
    %126 = memref.load %arg2[%c26] : memref<400xf32, #tpu.memory_space<smem>>
    %127 = vector.broadcast %126 : f32 to vector<8x256xf32>
    %128 = arith.mulf %117, %127 : vector<8x256xf32>
    %129 = arith.addf %111, %128 : vector<8x256xf32>
    %c30 = arith.constant 30 : index
    %130 = memref.load %arg2[%c30] : memref<400xf32, #tpu.memory_space<smem>>
    %131 = vector.broadcast %130 : f32 to vector<8x256xf32>
    %132 = arith.mulf %117, %131 : vector<8x256xf32>
    %133 = arith.addf %115, %132 : vector<8x256xf32>
    %c33_i32_23 = arith.constant 33 : i32
    %134 = tpu.dynamic_rotate %7 by %c33_i32_23 dim 1 : vector<8x256xf32>, i32 -> vector<8x256xf32>
    %135 = arith.mulf %134, %79 : vector<8x256xf32>
    %c19 = arith.constant 19 : index
    %136 = memref.load %arg2[%c19] : memref<400xf32, #tpu.memory_space<smem>>
    %137 = vector.broadcast %136 : f32 to vector<8x256xf32>
    %138 = arith.mulf %135, %137 : vector<8x256xf32>
    %139 = arith.addf %121, %138 : vector<8x256xf32>
    %c23 = arith.constant 23 : index
    %140 = memref.load %arg2[%c23] : memref<400xf32, #tpu.memory_space<smem>>
    %141 = vector.broadcast %140 : f32 to vector<8x256xf32>
    %142 = arith.mulf %135, %141 : vector<8x256xf32>
    %143 = arith.addf %125, %142 : vector<8x256xf32>
    %c27 = arith.constant 27 : index
    %144 = memref.load %arg2[%c27] : memref<400xf32, #tpu.memory_space<smem>>
    %145 = vector.broadcast %144 : f32 to vector<8x256xf32>
    %146 = arith.mulf %135, %145 : vector<8x256xf32>
    %147 = arith.addf %129, %146 : vector<8x256xf32>
    %c31 = arith.constant 31 : index
    %148 = memref.load %arg2[%c31] : memref<400xf32, #tpu.memory_space<smem>>
    %149 = vector.broadcast %148 : f32 to vector<8x256xf32>
    %150 = arith.mulf %135, %149 : vector<8x256xf32>
    %151 = arith.addf %133, %150 : vector<8x256xf32>
    %c2_24 = arith.constant 2 : index
    %c0_25 = arith.constant 0 : index
    %c0_26 = arith.constant 0 : index
    %152 = vector.load %arg6[%c2_24, %c0_25, %c0_26] : memref<25x8x256xf32, #tpu.memory_space<vmem>>, vector<1x8x256xf32>
    %153 = vector.shape_cast %152 : vector<1x8x256xf32> to vector<8x256xf32>
    %c32_i32 = arith.constant 32 : i32
    %154 = tpu.dynamic_rotate %1 by %c32_i32 dim 1 : vector<8x256xf32>, i32 -> vector<8x256xf32>
    %155 = arith.mulf %154, %153 : vector<8x256xf32>
    %c32 = arith.constant 32 : index
    %156 = memref.load %arg2[%c32] : memref<400xf32, #tpu.memory_space<smem>>
    %157 = vector.broadcast %156 : f32 to vector<8x256xf32>
    %158 = arith.mulf %155, %157 : vector<8x256xf32>
    %159 = arith.addf %139, %158 : vector<8x256xf32>
    %c36 = arith.constant 36 : index
    %160 = memref.load %arg2[%c36] : memref<400xf32, #tpu.memory_space<smem>>
    %161 = vector.broadcast %160 : f32 to vector<8x256xf32>
    %162 = arith.mulf %155, %161 : vector<8x256xf32>
    %163 = arith.addf %143, %162 : vector<8x256xf32>
    %c40 = arith.constant 40 : index
    %164 = memref.load %arg2[%c40] : memref<400xf32, #tpu.memory_space<smem>>
    %165 = vector.broadcast %164 : f32 to vector<8x256xf32>
    %166 = arith.mulf %155, %165 : vector<8x256xf32>
    %167 = arith.addf %147, %166 : vector<8x256xf32>
    %c44 = arith.constant 44 : index
    %168 = memref.load %arg2[%c44] : memref<400xf32, #tpu.memory_space<smem>>
    %169 = vector.broadcast %168 : f32 to vector<8x256xf32>
    %170 = arith.mulf %155, %169 : vector<8x256xf32>
    %171 = arith.addf %151, %170 : vector<8x256xf32>
    %c32_i32_27 = arith.constant 32 : i32
    %172 = tpu.dynamic_rotate %3 by %c32_i32_27 dim 1 : vector<8x256xf32>, i32 -> vector<8x256xf32>
    %173 = arith.mulf %172, %153 : vector<8x256xf32>
    %c33 = arith.constant 33 : index
    %174 = memref.load %arg2[%c33] : memref<400xf32, #tpu.memory_space<smem>>
    %175 = vector.broadcast %174 : f32 to vector<8x256xf32>
    %176 = arith.mulf %173, %175 : vector<8x256xf32>
    %177 = arith.addf %159, %176 : vector<8x256xf32>
    %c37 = arith.constant 37 : index
    %178 = memref.load %arg2[%c37] : memref<400xf32, #tpu.memory_space<smem>>
    %179 = vector.broadcast %178 : f32 to vector<8x256xf32>
    %180 = arith.mulf %173, %179 : vector<8x256xf32>
    %181 = arith.addf %163, %180 : vector<8x256xf32>
    %c41 = arith.constant 41 : index
    %182 = memref.load %arg2[%c41] : memref<400xf32, #tpu.memory_space<smem>>
    %183 = vector.broadcast %182 : f32 to vector<8x256xf32>
    %184 = arith.mulf %173, %183 : vector<8x256xf32>
    %185 = arith.addf %167, %184 : vector<8x256xf32>
    %c45 = arith.constant 45 : index
    %186 = memref.load %arg2[%c45] : memref<400xf32, #tpu.memory_space<smem>>
    %187 = vector.broadcast %186 : f32 to vector<8x256xf32>
    %188 = arith.mulf %173, %187 : vector<8x256xf32>
    %189 = arith.addf %171, %188 : vector<8x256xf32>
    %c32_i32_28 = arith.constant 32 : i32
    %190 = tpu.dynamic_rotate %5 by %c32_i32_28 dim 1 : vector<8x256xf32>, i32 -> vector<8x256xf32>
    %191 = arith.mulf %190, %153 : vector<8x256xf32>
    %c34 = arith.constant 34 : index
    %192 = memref.load %arg2[%c34] : memref<400xf32, #tpu.memory_space<smem>>
    %193 = vector.broadcast %192 : f32 to vector<8x256xf32>
    %194 = arith.mulf %191, %193 : vector<8x256xf32>
    %195 = arith.addf %177, %194 : vector<8x256xf32>
    %c38 = arith.constant 38 : index
    %196 = memref.load %arg2[%c38] : memref<400xf32, #tpu.memory_space<smem>>
    %197 = vector.broadcast %196 : f32 to vector<8x256xf32>
    %198 = arith.mulf %191, %197 : vector<8x256xf32>
    %199 = arith.addf %181, %198 : vector<8x256xf32>
    %c42 = arith.constant 42 : index
    %200 = memref.load %arg2[%c42] : memref<400xf32, #tpu.memory_space<smem>>
    %201 = vector.broadcast %200 : f32 to vector<8x256xf32>
    %202 = arith.mulf %191, %201 : vector<8x256xf32>
    %203 = arith.addf %185, %202 : vector<8x256xf32>
    %c46 = arith.constant 46 : index
    %204 = memref.load %arg2[%c46] : memref<400xf32, #tpu.memory_space<smem>>
    %205 = vector.broadcast %204 : f32 to vector<8x256xf32>
    %206 = arith.mulf %191, %205 : vector<8x256xf32>
    %207 = arith.addf %189, %206 : vector<8x256xf32>
    %c32_i32_29 = arith.constant 32 : i32
    %208 = tpu.dynamic_rotate %7 by %c32_i32_29 dim 1 : vector<8x256xf32>, i32 -> vector<8x256xf32>
    %209 = arith.mulf %208, %153 : vector<8x256xf32>
    %c35 = arith.constant 35 : index
    %210 = memref.load %arg2[%c35] : memref<400xf32, #tpu.memory_space<smem>>
    %211 = vector.broadcast %210 : f32 to vector<8x256xf32>
    %212 = arith.mulf %209, %211 : vector<8x256xf32>
    %213 = arith.addf %195, %212 : vector<8x256xf32>
    %c39 = arith.constant 39 : index
    %214 = memref.load %arg2[%c39] : memref<400xf32, #tpu.memory_space<smem>>
    %215 = vector.broadcast %214 : f32 to vector<8x256xf32>
    %216 = arith.mulf %209, %215 : vector<8x256xf32>
    %217 = arith.addf %199, %216 : vector<8x256xf32>
    %c43 = arith.constant 43 : index
    %218 = memref.load %arg2[%c43] : memref<400xf32, #tpu.memory_space<smem>>
    %219 = vector.broadcast %218 : f32 to vector<8x256xf32>
    %220 = arith.mulf %209, %219 : vector<8x256xf32>
    %221 = arith.addf %203, %220 : vector<8x256xf32>
    %c47 = arith.constant 47 : index
    %222 = memref.load %arg2[%c47] : memref<400xf32, #tpu.memory_space<smem>>
    %223 = vector.broadcast %222 : f32 to vector<8x256xf32>
    %224 = arith.mulf %209, %223 : vector<8x256xf32>
    %225 = arith.addf %207, %224 : vector<8x256xf32>
    %c3_30 = arith.constant 3 : index
    %c0_31 = arith.constant 0 : index
    %c0_32 = arith.constant 0 : index
    %226 = vector.load %arg6[%c3_30, %c0_31, %c0_32] : memref<25x8x256xf32, #tpu.memory_space<vmem>>, vector<1x8x256xf32>
    %227 = vector.shape_cast %226 : vector<1x8x256xf32> to vector<8x256xf32>
    %c31_i32 = arith.constant 31 : i32
    %228 = tpu.dynamic_rotate %1 by %c31_i32 dim 1 : vector<8x256xf32>, i32 -> vector<8x256xf32>
    %229 = arith.mulf %228, %227 : vector<8x256xf32>
    %c48 = arith.constant 48 : index
    %230 = memref.load %arg2[%c48] : memref<400xf32, #tpu.memory_space<smem>>
    %231 = vector.broadcast %230 : f32 to vector<8x256xf32>
    %232 = arith.mulf %229, %231 : vector<8x256xf32>
    %233 = arith.addf %213, %232 : vector<8x256xf32>
    %c52 = arith.constant 52 : index
    %234 = memref.load %arg2[%c52] : memref<400xf32, #tpu.memory_space<smem>>
    %235 = vector.broadcast %234 : f32 to vector<8x256xf32>
    %236 = arith.mulf %229, %235 : vector<8x256xf32>
    %237 = arith.addf %217, %236 : vector<8x256xf32>
    %c56 = arith.constant 56 : index
    %238 = memref.load %arg2[%c56] : memref<400xf32, #tpu.memory_space<smem>>
    %239 = vector.broadcast %238 : f32 to vector<8x256xf32>
    %240 = arith.mulf %229, %239 : vector<8x256xf32>
    %241 = arith.addf %221, %240 : vector<8x256xf32>
    %c60 = arith.constant 60 : index
    %242 = memref.load %arg2[%c60] : memref<400xf32, #tpu.memory_space<smem>>
    %243 = vector.broadcast %242 : f32 to vector<8x256xf32>
    %244 = arith.mulf %229, %243 : vector<8x256xf32>
    %245 = arith.addf %225, %244 : vector<8x256xf32>
    %c31_i32_33 = arith.constant 31 : i32
    %246 = tpu.dynamic_rotate %3 by %c31_i32_33 dim 1 : vector<8x256xf32>, i32 -> vector<8x256xf32>
    %247 = arith.mulf %246, %227 : vector<8x256xf32>
    %c49 = arith.constant 49 : index
    %248 = memref.load %arg2[%c49] : memref<400xf32, #tpu.memory_space<smem>>
    %249 = vector.broadcast %248 : f32 to vector<8x256xf32>
    %250 = arith.mulf %247, %249 : vector<8x256xf32>
    %251 = arith.addf %233, %250 : vector<8x256xf32>
    %c53 = arith.constant 53 : index
    %252 = memref.load %arg2[%c53] : memref<400xf32, #tpu.memory_space<smem>>
    %253 = vector.broadcast %252 : f32 to vector<8x256xf32>
    %254 = arith.mulf %247, %253 : vector<8x256xf32>
    %255 = arith.addf %237, %254 : vector<8x256xf32>
    %c57 = arith.constant 57 : index
    %256 = memref.load %arg2[%c57] : memref<400xf32, #tpu.memory_space<smem>>
    %257 = vector.broadcast %256 : f32 to vector<8x256xf32>
    %258 = arith.mulf %247, %257 : vector<8x256xf32>
    %259 = arith.addf %241, %258 : vector<8x256xf32>
    %c61 = arith.constant 61 : index
    %260 = memref.load %arg2[%c61] : memref<400xf32, #tpu.memory_space<smem>>
    %261 = vector.broadcast %260 : f32 to vector<8x256xf32>
    %262 = arith.mulf %247, %261 : vector<8x256xf32>
    %263 = arith.addf %245, %262 : vector<8x256xf32>
    %c31_i32_34 = arith.constant 31 : i32
    %264 = tpu.dynamic_rotate %5 by %c31_i32_34 dim 1 : vector<8x256xf32>, i32 -> vector<8x256xf32>
    %265 = arith.mulf %264, %227 : vector<8x256xf32>
    %c50 = arith.constant 50 : index
    %266 = memref.load %arg2[%c50] : memref<400xf32, #tpu.memory_space<smem>>
    %267 = vector.broadcast %266 : f32 to vector<8x256xf32>
    %268 = arith.mulf %265, %267 : vector<8x256xf32>
    %269 = arith.addf %251, %268 : vector<8x256xf32>
    %c54 = arith.constant 54 : index
    %270 = memref.load %arg2[%c54] : memref<400xf32, #tpu.memory_space<smem>>
    %271 = vector.broadcast %270 : f32 to vector<8x256xf32>
    %272 = arith.mulf %265, %271 : vector<8x256xf32>
    %273 = arith.addf %255, %272 : vector<8x256xf32>
    %c58 = arith.constant 58 : index
    %274 = memref.load %arg2[%c58] : memref<400xf32, #tpu.memory_space<smem>>
    %275 = vector.broadcast %274 : f32 to vector<8x256xf32>
    %276 = arith.mulf %265, %275 : vector<8x256xf32>
    %277 = arith.addf %259, %276 : vector<8x256xf32>
    %c62 = arith.constant 62 : index
    %278 = memref.load %arg2[%c62] : memref<400xf32, #tpu.memory_space<smem>>
    %279 = vector.broadcast %278 : f32 to vector<8x256xf32>
    %280 = arith.mulf %265, %279 : vector<8x256xf32>
    %281 = arith.addf %263, %280 : vector<8x256xf32>
    %c31_i32_35 = arith.constant 31 : i32
    %282 = tpu.dynamic_rotate %7 by %c31_i32_35 dim 1 : vector<8x256xf32>, i32 -> vector<8x256xf32>
    %283 = arith.mulf %282, %227 : vector<8x256xf32>
    %c51 = arith.constant 51 : index
    %284 = memref.load %arg2[%c51] : memref<400xf32, #tpu.memory_space<smem>>
    %285 = vector.broadcast %284 : f32 to vector<8x256xf32>
    %286 = arith.mulf %283, %285 : vector<8x256xf32>
    %287 = arith.addf %269, %286 : vector<8x256xf32>
    %c55 = arith.constant 55 : index
    %288 = memref.load %arg2[%c55] : memref<400xf32, #tpu.memory_space<smem>>
    %289 = vector.broadcast %288 : f32 to vector<8x256xf32>
    %290 = arith.mulf %283, %289 : vector<8x256xf32>
    %291 = arith.addf %273, %290 : vector<8x256xf32>
    %c59 = arith.constant 59 : index
    %292 = memref.load %arg2[%c59] : memref<400xf32, #tpu.memory_space<smem>>
    %293 = vector.broadcast %292 : f32 to vector<8x256xf32>
    %294 = arith.mulf %283, %293 : vector<8x256xf32>
    %295 = arith.addf %277, %294 : vector<8x256xf32>
    %c63 = arith.constant 63 : index
    %296 = memref.load %arg2[%c63] : memref<400xf32, #tpu.memory_space<smem>>
    %297 = vector.broadcast %296 : f32 to vector<8x256xf32>
    %298 = arith.mulf %283, %297 : vector<8x256xf32>
    %299 = arith.addf %281, %298 : vector<8x256xf32>
    %c4_36 = arith.constant 4 : index
    %c0_37 = arith.constant 0 : index
    %c0_38 = arith.constant 0 : index
    %300 = vector.load %arg6[%c4_36, %c0_37, %c0_38] : memref<25x8x256xf32, #tpu.memory_space<vmem>>, vector<1x8x256xf32>
    %301 = vector.shape_cast %300 : vector<1x8x256xf32> to vector<8x256xf32>
    %c30_i32 = arith.constant 30 : i32
    %302 = tpu.dynamic_rotate %1 by %c30_i32 dim 1 : vector<8x256xf32>, i32 -> vector<8x256xf32>
    %303 = arith.mulf %302, %301 : vector<8x256xf32>
    %c64 = arith.constant 64 : index
    %304 = memref.load %arg2[%c64] : memref<400xf32, #tpu.memory_space<smem>>
    %305 = vector.broadcast %304 : f32 to vector<8x256xf32>
    %306 = arith.mulf %303, %305 : vector<8x256xf32>
    %307 = arith.addf %287, %306 : vector<8x256xf32>
    %c68 = arith.constant 68 : index
    %308 = memref.load %arg2[%c68] : memref<400xf32, #tpu.memory_space<smem>>
    %309 = vector.broadcast %308 : f32 to vector<8x256xf32>
    %310 = arith.mulf %303, %309 : vector<8x256xf32>
    %311 = arith.addf %291, %310 : vector<8x256xf32>
    %c72 = arith.constant 72 : index
    %312 = memref.load %arg2[%c72] : memref<400xf32, #tpu.memory_space<smem>>
    %313 = vector.broadcast %312 : f32 to vector<8x256xf32>
    %314 = arith.mulf %303, %313 : vector<8x256xf32>
    %315 = arith.addf %295, %314 : vector<8x256xf32>
    %c76 = arith.constant 76 : index
    %316 = memref.load %arg2[%c76] : memref<400xf32, #tpu.memory_space<smem>>
    %317 = vector.broadcast %316 : f32 to vector<8x256xf32>
    %318 = arith.mulf %303, %317 : vector<8x256xf32>
    %319 = arith.addf %299, %318 : vector<8x256xf32>
    %c30_i32_39 = arith.constant 30 : i32
    %320 = tpu.dynamic_rotate %3 by %c30_i32_39 dim 1 : vector<8x256xf32>, i32 -> vector<8x256xf32>
    %321 = arith.mulf %320, %301 : vector<8x256xf32>
    %c65 = arith.constant 65 : index
    %322 = memref.load %arg2[%c65] : memref<400xf32, #tpu.memory_space<smem>>
    %323 = vector.broadcast %322 : f32 to vector<8x256xf32>
    %324 = arith.mulf %321, %323 : vector<8x256xf32>
    %325 = arith.addf %307, %324 : vector<8x256xf32>
    %c69 = arith.constant 69 : index
    %326 = memref.load %arg2[%c69] : memref<400xf32, #tpu.memory_space<smem>>
    %327 = vector.broadcast %326 : f32 to vector<8x256xf32>
    %328 = arith.mulf %321, %327 : vector<8x256xf32>
    %329 = arith.addf %311, %328 : vector<8x256xf32>
    %c73 = arith.constant 73 : index
    %330 = memref.load %arg2[%c73] : memref<400xf32, #tpu.memory_space<smem>>
    %331 = vector.broadcast %330 : f32 to vector<8x256xf32>
    %332 = arith.mulf %321, %331 : vector<8x256xf32>
    %333 = arith.addf %315, %332 : vector<8x256xf32>
    %c77 = arith.constant 77 : index
    %334 = memref.load %arg2[%c77] : memref<400xf32, #tpu.memory_space<smem>>
    %335 = vector.broadcast %334 : f32 to vector<8x256xf32>
    %336 = arith.mulf %321, %335 : vector<8x256xf32>
    %337 = arith.addf %319, %336 : vector<8x256xf32>
    %c30_i32_40 = arith.constant 30 : i32
    %338 = tpu.dynamic_rotate %5 by %c30_i32_40 dim 1 : vector<8x256xf32>, i32 -> vector<8x256xf32>
    %339 = arith.mulf %338, %301 : vector<8x256xf32>
    %c66 = arith.constant 66 : index
    %340 = memref.load %arg2[%c66] : memref<400xf32, #tpu.memory_space<smem>>
    %341 = vector.broadcast %340 : f32 to vector<8x256xf32>
    %342 = arith.mulf %339, %341 : vector<8x256xf32>
    %343 = arith.addf %325, %342 : vector<8x256xf32>
    %c70 = arith.constant 70 : index
    %344 = memref.load %arg2[%c70] : memref<400xf32, #tpu.memory_space<smem>>
    %345 = vector.broadcast %344 : f32 to vector<8x256xf32>
    %346 = arith.mulf %339, %345 : vector<8x256xf32>
    %347 = arith.addf %329, %346 : vector<8x256xf32>
    %c74 = arith.constant 74 : index
    %348 = memref.load %arg2[%c74] : memref<400xf32, #tpu.memory_space<smem>>
    %349 = vector.broadcast %348 : f32 to vector<8x256xf32>
    %350 = arith.mulf %339, %349 : vector<8x256xf32>
    %351 = arith.addf %333, %350 : vector<8x256xf32>
    %c78 = arith.constant 78 : index
    %352 = memref.load %arg2[%c78] : memref<400xf32, #tpu.memory_space<smem>>
    %353 = vector.broadcast %352 : f32 to vector<8x256xf32>
    %354 = arith.mulf %339, %353 : vector<8x256xf32>
    %355 = arith.addf %337, %354 : vector<8x256xf32>
    %c30_i32_41 = arith.constant 30 : i32
    %356 = tpu.dynamic_rotate %7 by %c30_i32_41 dim 1 : vector<8x256xf32>, i32 -> vector<8x256xf32>
    %357 = arith.mulf %356, %301 : vector<8x256xf32>
    %c67 = arith.constant 67 : index
    %358 = memref.load %arg2[%c67] : memref<400xf32, #tpu.memory_space<smem>>
    %359 = vector.broadcast %358 : f32 to vector<8x256xf32>
    %360 = arith.mulf %357, %359 : vector<8x256xf32>
    %361 = arith.addf %343, %360 : vector<8x256xf32>
    %c71 = arith.constant 71 : index
    %362 = memref.load %arg2[%c71] : memref<400xf32, #tpu.memory_space<smem>>
    %363 = vector.broadcast %362 : f32 to vector<8x256xf32>
    %364 = arith.mulf %357, %363 : vector<8x256xf32>
    %365 = arith.addf %347, %364 : vector<8x256xf32>
    %c75 = arith.constant 75 : index
    %366 = memref.load %arg2[%c75] : memref<400xf32, #tpu.memory_space<smem>>
    %367 = vector.broadcast %366 : f32 to vector<8x256xf32>
    %368 = arith.mulf %357, %367 : vector<8x256xf32>
    %369 = arith.addf %351, %368 : vector<8x256xf32>
    %c79 = arith.constant 79 : index
    %370 = memref.load %arg2[%c79] : memref<400xf32, #tpu.memory_space<smem>>
    %371 = vector.broadcast %370 : f32 to vector<8x256xf32>
    %372 = arith.mulf %357, %371 : vector<8x256xf32>
    %373 = arith.addf %355, %372 : vector<8x256xf32>
    %c5_42 = arith.constant 5 : index
    %c0_43 = arith.constant 0 : index
    %c0_44 = arith.constant 0 : index
    %374 = vector.load %arg6[%c5_42, %c0_43, %c0_44] : memref<25x8x256xf32, #tpu.memory_space<vmem>>, vector<1x8x256xf32>
    %375 = vector.shape_cast %374 : vector<1x8x256xf32> to vector<8x256xf32>
    %c18_i32 = arith.constant 18 : i32
    %376 = tpu.dynamic_rotate %1 by %c18_i32 dim 1 : vector<8x256xf32>, i32 -> vector<8x256xf32>
    %377 = arith.mulf %376, %375 : vector<8x256xf32>
    %c80 = arith.constant 80 : index
    %378 = memref.load %arg2[%c80] : memref<400xf32, #tpu.memory_space<smem>>
    %379 = vector.broadcast %378 : f32 to vector<8x256xf32>
    %380 = arith.mulf %377, %379 : vector<8x256xf32>
    %381 = arith.addf %361, %380 : vector<8x256xf32>
    %c84 = arith.constant 84 : index
    %382 = memref.load %arg2[%c84] : memref<400xf32, #tpu.memory_space<smem>>
    %383 = vector.broadcast %382 : f32 to vector<8x256xf32>
    %384 = arith.mulf %377, %383 : vector<8x256xf32>
    %385 = arith.addf %365, %384 : vector<8x256xf32>
    %c88 = arith.constant 88 : index
    %386 = memref.load %arg2[%c88] : memref<400xf32, #tpu.memory_space<smem>>
    %387 = vector.broadcast %386 : f32 to vector<8x256xf32>
    %388 = arith.mulf %377, %387 : vector<8x256xf32>
    %389 = arith.addf %369, %388 : vector<8x256xf32>
    %c92 = arith.constant 92 : index
    %390 = memref.load %arg2[%c92] : memref<400xf32, #tpu.memory_space<smem>>
    %391 = vector.broadcast %390 : f32 to vector<8x256xf32>
    %392 = arith.mulf %377, %391 : vector<8x256xf32>
    %393 = arith.addf %373, %392 : vector<8x256xf32>
    %c18_i32_45 = arith.constant 18 : i32
    %394 = tpu.dynamic_rotate %3 by %c18_i32_45 dim 1 : vector<8x256xf32>, i32 -> vector<8x256xf32>
    %395 = arith.mulf %394, %375 : vector<8x256xf32>
    %c81 = arith.constant 81 : index
    %396 = memref.load %arg2[%c81] : memref<400xf32, #tpu.memory_space<smem>>
    %397 = vector.broadcast %396 : f32 to vector<8x256xf32>
    %398 = arith.mulf %395, %397 : vector<8x256xf32>
    %399 = arith.addf %381, %398 : vector<8x256xf32>
    %c85 = arith.constant 85 : index
    %400 = memref.load %arg2[%c85] : memref<400xf32, #tpu.memory_space<smem>>
    %401 = vector.broadcast %400 : f32 to vector<8x256xf32>
    %402 = arith.mulf %395, %401 : vector<8x256xf32>
    %403 = arith.addf %385, %402 : vector<8x256xf32>
    %c89 = arith.constant 89 : index
    %404 = memref.load %arg2[%c89] : memref<400xf32, #tpu.memory_space<smem>>
    %405 = vector.broadcast %404 : f32 to vector<8x256xf32>
    %406 = arith.mulf %395, %405 : vector<8x256xf32>
    %407 = arith.addf %389, %406 : vector<8x256xf32>
    %c93 = arith.constant 93 : index
    %408 = memref.load %arg2[%c93] : memref<400xf32, #tpu.memory_space<smem>>
    %409 = vector.broadcast %408 : f32 to vector<8x256xf32>
    %410 = arith.mulf %395, %409 : vector<8x256xf32>
    %411 = arith.addf %393, %410 : vector<8x256xf32>
    %c18_i32_46 = arith.constant 18 : i32
    %412 = tpu.dynamic_rotate %5 by %c18_i32_46 dim 1 : vector<8x256xf32>, i32 -> vector<8x256xf32>
    %413 = arith.mulf %412, %375 : vector<8x256xf32>
    %c82 = arith.constant 82 : index
    %414 = memref.load %arg2[%c82] : memref<400xf32, #tpu.memory_space<smem>>
    %415 = vector.broadcast %414 : f32 to vector<8x256xf32>
    %416 = arith.mulf %413, %415 : vector<8x256xf32>
    %417 = arith.addf %399, %416 : vector<8x256xf32>
    %c86 = arith.constant 86 : index
    %418 = memref.load %arg2[%c86] : memref<400xf32, #tpu.memory_space<smem>>
    %419 = vector.broadcast %418 : f32 to vector<8x256xf32>
    %420 = arith.mulf %413, %419 : vector<8x256xf32>
    %421 = arith.addf %403, %420 : vector<8x256xf32>
    %c90 = arith.constant 90 : index
    %422 = memref.load %arg2[%c90] : memref<400xf32, #tpu.memory_space<smem>>
    %423 = vector.broadcast %422 : f32 to vector<8x256xf32>
    %424 = arith.mulf %413, %423 : vector<8x256xf32>
    %425 = arith.addf %407, %424 : vector<8x256xf32>
    %c94 = arith.constant 94 : index
    %426 = memref.load %arg2[%c94] : memref<400xf32, #tpu.memory_space<smem>>
    %427 = vector.broadcast %426 : f32 to vector<8x256xf32>
    %428 = arith.mulf %413, %427 : vector<8x256xf32>
    %429 = arith.addf %411, %428 : vector<8x256xf32>
    %c18_i32_47 = arith.constant 18 : i32
    %430 = tpu.dynamic_rotate %7 by %c18_i32_47 dim 1 : vector<8x256xf32>, i32 -> vector<8x256xf32>
    %431 = arith.mulf %430, %375 : vector<8x256xf32>
    %c83 = arith.constant 83 : index
    %432 = memref.load %arg2[%c83] : memref<400xf32, #tpu.memory_space<smem>>
    %433 = vector.broadcast %432 : f32 to vector<8x256xf32>
    %434 = arith.mulf %431, %433 : vector<8x256xf32>
    %435 = arith.addf %417, %434 : vector<8x256xf32>
    %c87 = arith.constant 87 : index
    %436 = memref.load %arg2[%c87] : memref<400xf32, #tpu.memory_space<smem>>
    %437 = vector.broadcast %436 : f32 to vector<8x256xf32>
    %438 = arith.mulf %431, %437 : vector<8x256xf32>
    %439 = arith.addf %421, %438 : vector<8x256xf32>
    %c91 = arith.constant 91 : index
    %440 = memref.load %arg2[%c91] : memref<400xf32, #tpu.memory_space<smem>>
    %441 = vector.broadcast %440 : f32 to vector<8x256xf32>
    %442 = arith.mulf %431, %441 : vector<8x256xf32>
    %443 = arith.addf %425, %442 : vector<8x256xf32>
    %c95 = arith.constant 95 : index
    %444 = memref.load %arg2[%c95] : memref<400xf32, #tpu.memory_space<smem>>
    %445 = vector.broadcast %444 : f32 to vector<8x256xf32>
    %446 = arith.mulf %431, %445 : vector<8x256xf32>
    %447 = arith.addf %429, %446 : vector<8x256xf32>
    %c6_48 = arith.constant 6 : index
    %c0_49 = arith.constant 0 : index
    %c0_50 = arith.constant 0 : index
    %448 = vector.load %arg6[%c6_48, %c0_49, %c0_50] : memref<25x8x256xf32, #tpu.memory_space<vmem>>, vector<1x8x256xf32>
    %449 = vector.shape_cast %448 : vector<1x8x256xf32> to vector<8x256xf32>
    %c17_i32 = arith.constant 17 : i32
    %450 = tpu.dynamic_rotate %1 by %c17_i32 dim 1 : vector<8x256xf32>, i32 -> vector<8x256xf32>
    %451 = arith.mulf %450, %449 : vector<8x256xf32>
    %c96 = arith.constant 96 : index
    %452 = memref.load %arg2[%c96] : memref<400xf32, #tpu.memory_space<smem>>
    %453 = vector.broadcast %452 : f32 to vector<8x256xf32>
    %454 = arith.mulf %451, %453 : vector<8x256xf32>
    %455 = arith.addf %435, %454 : vector<8x256xf32>
    %c100 = arith.constant 100 : index
    %456 = memref.load %arg2[%c100] : memref<400xf32, #tpu.memory_space<smem>>
    %457 = vector.broadcast %456 : f32 to vector<8x256xf32>
    %458 = arith.mulf %451, %457 : vector<8x256xf32>
    %459 = arith.addf %439, %458 : vector<8x256xf32>
    %c104 = arith.constant 104 : index
    %460 = memref.load %arg2[%c104] : memref<400xf32, #tpu.memory_space<smem>>
    %461 = vector.broadcast %460 : f32 to vector<8x256xf32>
    %462 = arith.mulf %451, %461 : vector<8x256xf32>
    %463 = arith.addf %443, %462 : vector<8x256xf32>
    %c108 = arith.constant 108 : index
    %464 = memref.load %arg2[%c108] : memref<400xf32, #tpu.memory_space<smem>>
    %465 = vector.broadcast %464 : f32 to vector<8x256xf32>
    %466 = arith.mulf %451, %465 : vector<8x256xf32>
    %467 = arith.addf %447, %466 : vector<8x256xf32>
    %c17_i32_51 = arith.constant 17 : i32
    %468 = tpu.dynamic_rotate %3 by %c17_i32_51 dim 1 : vector<8x256xf32>, i32 -> vector<8x256xf32>
    %469 = arith.mulf %468, %449 : vector<8x256xf32>
    %c97 = arith.constant 97 : index
    %470 = memref.load %arg2[%c97] : memref<400xf32, #tpu.memory_space<smem>>
    %471 = vector.broadcast %470 : f32 to vector<8x256xf32>
    %472 = arith.mulf %469, %471 : vector<8x256xf32>
    %473 = arith.addf %455, %472 : vector<8x256xf32>
    %c101 = arith.constant 101 : index
    %474 = memref.load %arg2[%c101] : memref<400xf32, #tpu.memory_space<smem>>
    %475 = vector.broadcast %474 : f32 to vector<8x256xf32>
    %476 = arith.mulf %469, %475 : vector<8x256xf32>
    %477 = arith.addf %459, %476 : vector<8x256xf32>
    %c105 = arith.constant 105 : index
    %478 = memref.load %arg2[%c105] : memref<400xf32, #tpu.memory_space<smem>>
    %479 = vector.broadcast %478 : f32 to vector<8x256xf32>
    %480 = arith.mulf %469, %479 : vector<8x256xf32>
    %481 = arith.addf %463, %480 : vector<8x256xf32>
    %c109 = arith.constant 109 : index
    %482 = memref.load %arg2[%c109] : memref<400xf32, #tpu.memory_space<smem>>
    %483 = vector.broadcast %482 : f32 to vector<8x256xf32>
    %484 = arith.mulf %469, %483 : vector<8x256xf32>
    %485 = arith.addf %467, %484 : vector<8x256xf32>
    %c17_i32_52 = arith.constant 17 : i32
    %486 = tpu.dynamic_rotate %5 by %c17_i32_52 dim 1 : vector<8x256xf32>, i32 -> vector<8x256xf32>
    %487 = arith.mulf %486, %449 : vector<8x256xf32>
    %c98 = arith.constant 98 : index
    %488 = memref.load %arg2[%c98] : memref<400xf32, #tpu.memory_space<smem>>
    %489 = vector.broadcast %488 : f32 to vector<8x256xf32>
    %490 = arith.mulf %487, %489 : vector<8x256xf32>
    %491 = arith.addf %473, %490 : vector<8x256xf32>
    %c102 = arith.constant 102 : index
    %492 = memref.load %arg2[%c102] : memref<400xf32, #tpu.memory_space<smem>>
    %493 = vector.broadcast %492 : f32 to vector<8x256xf32>
    %494 = arith.mulf %487, %493 : vector<8x256xf32>
    %495 = arith.addf %477, %494 : vector<8x256xf32>
    %c106 = arith.constant 106 : index
    %496 = memref.load %arg2[%c106] : memref<400xf32, #tpu.memory_space<smem>>
    %497 = vector.broadcast %496 : f32 to vector<8x256xf32>
    %498 = arith.mulf %487, %497 : vector<8x256xf32>
    %499 = arith.addf %481, %498 : vector<8x256xf32>
    %c110 = arith.constant 110 : index
    %500 = memref.load %arg2[%c110] : memref<400xf32, #tpu.memory_space<smem>>
    %501 = vector.broadcast %500 : f32 to vector<8x256xf32>
    %502 = arith.mulf %487, %501 : vector<8x256xf32>
    %503 = arith.addf %485, %502 : vector<8x256xf32>
    %c17_i32_53 = arith.constant 17 : i32
    %504 = tpu.dynamic_rotate %7 by %c17_i32_53 dim 1 : vector<8x256xf32>, i32 -> vector<8x256xf32>
    %505 = arith.mulf %504, %449 : vector<8x256xf32>
    %c99 = arith.constant 99 : index
    %506 = memref.load %arg2[%c99] : memref<400xf32, #tpu.memory_space<smem>>
    %507 = vector.broadcast %506 : f32 to vector<8x256xf32>
    %508 = arith.mulf %505, %507 : vector<8x256xf32>
    %509 = arith.addf %491, %508 : vector<8x256xf32>
    %c103 = arith.constant 103 : index
    %510 = memref.load %arg2[%c103] : memref<400xf32, #tpu.memory_space<smem>>
    %511 = vector.broadcast %510 : f32 to vector<8x256xf32>
    %512 = arith.mulf %505, %511 : vector<8x256xf32>
    %513 = arith.addf %495, %512 : vector<8x256xf32>
    %c107 = arith.constant 107 : index
    %514 = memref.load %arg2[%c107] : memref<400xf32, #tpu.memory_space<smem>>
    %515 = vector.broadcast %514 : f32 to vector<8x256xf32>
    %516 = arith.mulf %505, %515 : vector<8x256xf32>
    %517 = arith.addf %499, %516 : vector<8x256xf32>
    %c111 = arith.constant 111 : index
    %518 = memref.load %arg2[%c111] : memref<400xf32, #tpu.memory_space<smem>>
    %519 = vector.broadcast %518 : f32 to vector<8x256xf32>
    %520 = arith.mulf %505, %519 : vector<8x256xf32>
    %521 = arith.addf %503, %520 : vector<8x256xf32>
    %c7_54 = arith.constant 7 : index
    %c0_55 = arith.constant 0 : index
    %c0_56 = arith.constant 0 : index
    %522 = vector.load %arg6[%c7_54, %c0_55, %c0_56] : memref<25x8x256xf32, #tpu.memory_space<vmem>>, vector<1x8x256xf32>
    %523 = vector.shape_cast %522 : vector<1x8x256xf32> to vector<8x256xf32>
    %c16_i32 = arith.constant 16 : i32
    %524 = tpu.dynamic_rotate %1 by %c16_i32 dim 1 : vector<8x256xf32>, i32 -> vector<8x256xf32>
    %525 = arith.mulf %524, %523 : vector<8x256xf32>
    %c112 = arith.constant 112 : index
    %526 = memref.load %arg2[%c112] : memref<400xf32, #tpu.memory_space<smem>>
    %527 = vector.broadcast %526 : f32 to vector<8x256xf32>
    %528 = arith.mulf %525, %527 : vector<8x256xf32>
    %529 = arith.addf %509, %528 : vector<8x256xf32>
    %c116 = arith.constant 116 : index
    %530 = memref.load %arg2[%c116] : memref<400xf32, #tpu.memory_space<smem>>
    %531 = vector.broadcast %530 : f32 to vector<8x256xf32>
    %532 = arith.mulf %525, %531 : vector<8x256xf32>
    %533 = arith.addf %513, %532 : vector<8x256xf32>
    %c120 = arith.constant 120 : index
    %534 = memref.load %arg2[%c120] : memref<400xf32, #tpu.memory_space<smem>>
    %535 = vector.broadcast %534 : f32 to vector<8x256xf32>
    %536 = arith.mulf %525, %535 : vector<8x256xf32>
    %537 = arith.addf %517, %536 : vector<8x256xf32>
    %c124 = arith.constant 124 : index
    %538 = memref.load %arg2[%c124] : memref<400xf32, #tpu.memory_space<smem>>
    %539 = vector.broadcast %538 : f32 to vector<8x256xf32>
    %540 = arith.mulf %525, %539 : vector<8x256xf32>
    %541 = arith.addf %521, %540 : vector<8x256xf32>
    %c16_i32_57 = arith.constant 16 : i32
    %542 = tpu.dynamic_rotate %3 by %c16_i32_57 dim 1 : vector<8x256xf32>, i32 -> vector<8x256xf32>
    %543 = arith.mulf %542, %523 : vector<8x256xf32>
    %c113 = arith.constant 113 : index
    %544 = memref.load %arg2[%c113] : memref<400xf32, #tpu.memory_space<smem>>
    %545 = vector.broadcast %544 : f32 to vector<8x256xf32>
    %546 = arith.mulf %543, %545 : vector<8x256xf32>
    %547 = arith.addf %529, %546 : vector<8x256xf32>
    %c117 = arith.constant 117 : index
    %548 = memref.load %arg2[%c117] : memref<400xf32, #tpu.memory_space<smem>>
    %549 = vector.broadcast %548 : f32 to vector<8x256xf32>
    %550 = arith.mulf %543, %549 : vector<8x256xf32>
    %551 = arith.addf %533, %550 : vector<8x256xf32>
    %c121 = arith.constant 121 : index
    %552 = memref.load %arg2[%c121] : memref<400xf32, #tpu.memory_space<smem>>
    %553 = vector.broadcast %552 : f32 to vector<8x256xf32>
    %554 = arith.mulf %543, %553 : vector<8x256xf32>
    %555 = arith.addf %537, %554 : vector<8x256xf32>
    %c125 = arith.constant 125 : index
    %556 = memref.load %arg2[%c125] : memref<400xf32, #tpu.memory_space<smem>>
    %557 = vector.broadcast %556 : f32 to vector<8x256xf32>
    %558 = arith.mulf %543, %557 : vector<8x256xf32>
    %559 = arith.addf %541, %558 : vector<8x256xf32>
    %c16_i32_58 = arith.constant 16 : i32
    %560 = tpu.dynamic_rotate %5 by %c16_i32_58 dim 1 : vector<8x256xf32>, i32 -> vector<8x256xf32>
    %561 = arith.mulf %560, %523 : vector<8x256xf32>
    %c114 = arith.constant 114 : index
    %562 = memref.load %arg2[%c114] : memref<400xf32, #tpu.memory_space<smem>>
    %563 = vector.broadcast %562 : f32 to vector<8x256xf32>
    %564 = arith.mulf %561, %563 : vector<8x256xf32>
    %565 = arith.addf %547, %564 : vector<8x256xf32>
    %c118 = arith.constant 118 : index
    %566 = memref.load %arg2[%c118] : memref<400xf32, #tpu.memory_space<smem>>
    %567 = vector.broadcast %566 : f32 to vector<8x256xf32>
    %568 = arith.mulf %561, %567 : vector<8x256xf32>
    %569 = arith.addf %551, %568 : vector<8x256xf32>
    %c122 = arith.constant 122 : index
    %570 = memref.load %arg2[%c122] : memref<400xf32, #tpu.memory_space<smem>>
    %571 = vector.broadcast %570 : f32 to vector<8x256xf32>
    %572 = arith.mulf %561, %571 : vector<8x256xf32>
    %573 = arith.addf %555, %572 : vector<8x256xf32>
    %c126 = arith.constant 126 : index
    %574 = memref.load %arg2[%c126] : memref<400xf32, #tpu.memory_space<smem>>
    %575 = vector.broadcast %574 : f32 to vector<8x256xf32>
    %576 = arith.mulf %561, %575 : vector<8x256xf32>
    %577 = arith.addf %559, %576 : vector<8x256xf32>
    %c16_i32_59 = arith.constant 16 : i32
    %578 = tpu.dynamic_rotate %7 by %c16_i32_59 dim 1 : vector<8x256xf32>, i32 -> vector<8x256xf32>
    %579 = arith.mulf %578, %523 : vector<8x256xf32>
    %c115 = arith.constant 115 : index
    %580 = memref.load %arg2[%c115] : memref<400xf32, #tpu.memory_space<smem>>
    %581 = vector.broadcast %580 : f32 to vector<8x256xf32>
    %582 = arith.mulf %579, %581 : vector<8x256xf32>
    %583 = arith.addf %565, %582 : vector<8x256xf32>
    %c119 = arith.constant 119 : index
    %584 = memref.load %arg2[%c119] : memref<400xf32, #tpu.memory_space<smem>>
    %585 = vector.broadcast %584 : f32 to vector<8x256xf32>
    %586 = arith.mulf %579, %585 : vector<8x256xf32>
    %587 = arith.addf %569, %586 : vector<8x256xf32>
    %c123 = arith.constant 123 : index
    %588 = memref.load %arg2[%c123] : memref<400xf32, #tpu.memory_space<smem>>
    %589 = vector.broadcast %588 : f32 to vector<8x256xf32>
    %590 = arith.mulf %579, %589 : vector<8x256xf32>
    %591 = arith.addf %573, %590 : vector<8x256xf32>
    %c127 = arith.constant 127 : index
    %592 = memref.load %arg2[%c127] : memref<400xf32, #tpu.memory_space<smem>>
    %593 = vector.broadcast %592 : f32 to vector<8x256xf32>
    %594 = arith.mulf %579, %593 : vector<8x256xf32>
    %595 = arith.addf %577, %594 : vector<8x256xf32>
    %c8_60 = arith.constant 8 : index
    %c0_61 = arith.constant 0 : index
    %c0_62 = arith.constant 0 : index
    %596 = vector.load %arg6[%c8_60, %c0_61, %c0_62] : memref<25x8x256xf32, #tpu.memory_space<vmem>>, vector<1x8x256xf32>
    %597 = vector.shape_cast %596 : vector<1x8x256xf32> to vector<8x256xf32>
    %c15_i32 = arith.constant 15 : i32
    %598 = tpu.dynamic_rotate %1 by %c15_i32 dim 1 : vector<8x256xf32>, i32 -> vector<8x256xf32>
    %599 = arith.mulf %598, %597 : vector<8x256xf32>
    %c128 = arith.constant 128 : index
    %600 = memref.load %arg2[%c128] : memref<400xf32, #tpu.memory_space<smem>>
    %601 = vector.broadcast %600 : f32 to vector<8x256xf32>
    %602 = arith.mulf %599, %601 : vector<8x256xf32>
    %603 = arith.addf %583, %602 : vector<8x256xf32>
    %c132 = arith.constant 132 : index
    %604 = memref.load %arg2[%c132] : memref<400xf32, #tpu.memory_space<smem>>
    %605 = vector.broadcast %604 : f32 to vector<8x256xf32>
    %606 = arith.mulf %599, %605 : vector<8x256xf32>
    %607 = arith.addf %587, %606 : vector<8x256xf32>
    %c136 = arith.constant 136 : index
    %608 = memref.load %arg2[%c136] : memref<400xf32, #tpu.memory_space<smem>>
    %609 = vector.broadcast %608 : f32 to vector<8x256xf32>
    %610 = arith.mulf %599, %609 : vector<8x256xf32>
    %611 = arith.addf %591, %610 : vector<8x256xf32>
    %c140 = arith.constant 140 : index
    %612 = memref.load %arg2[%c140] : memref<400xf32, #tpu.memory_space<smem>>
    %613 = vector.broadcast %612 : f32 to vector<8x256xf32>
    %614 = arith.mulf %599, %613 : vector<8x256xf32>
    %615 = arith.addf %595, %614 : vector<8x256xf32>
    %c15_i32_63 = arith.constant 15 : i32
    %616 = tpu.dynamic_rotate %3 by %c15_i32_63 dim 1 : vector<8x256xf32>, i32 -> vector<8x256xf32>
    %617 = arith.mulf %616, %597 : vector<8x256xf32>
    %c129 = arith.constant 129 : index
    %618 = memref.load %arg2[%c129] : memref<400xf32, #tpu.memory_space<smem>>
    %619 = vector.broadcast %618 : f32 to vector<8x256xf32>
    %620 = arith.mulf %617, %619 : vector<8x256xf32>
    %621 = arith.addf %603, %620 : vector<8x256xf32>
    %c133 = arith.constant 133 : index
    %622 = memref.load %arg2[%c133] : memref<400xf32, #tpu.memory_space<smem>>
    %623 = vector.broadcast %622 : f32 to vector<8x256xf32>
    %624 = arith.mulf %617, %623 : vector<8x256xf32>
    %625 = arith.addf %607, %624 : vector<8x256xf32>
    %c137 = arith.constant 137 : index
    %626 = memref.load %arg2[%c137] : memref<400xf32, #tpu.memory_space<smem>>
    %627 = vector.broadcast %626 : f32 to vector<8x256xf32>
    %628 = arith.mulf %617, %627 : vector<8x256xf32>
    %629 = arith.addf %611, %628 : vector<8x256xf32>
    %c141 = arith.constant 141 : index
    %630 = memref.load %arg2[%c141] : memref<400xf32, #tpu.memory_space<smem>>
    %631 = vector.broadcast %630 : f32 to vector<8x256xf32>
    %632 = arith.mulf %617, %631 : vector<8x256xf32>
    %633 = arith.addf %615, %632 : vector<8x256xf32>
    %c15_i32_64 = arith.constant 15 : i32
    %634 = tpu.dynamic_rotate %5 by %c15_i32_64 dim 1 : vector<8x256xf32>, i32 -> vector<8x256xf32>
    %635 = arith.mulf %634, %597 : vector<8x256xf32>
    %c130 = arith.constant 130 : index
    %636 = memref.load %arg2[%c130] : memref<400xf32, #tpu.memory_space<smem>>
    %637 = vector.broadcast %636 : f32 to vector<8x256xf32>
    %638 = arith.mulf %635, %637 : vector<8x256xf32>
    %639 = arith.addf %621, %638 : vector<8x256xf32>
    %c134 = arith.constant 134 : index
    %640 = memref.load %arg2[%c134] : memref<400xf32, #tpu.memory_space<smem>>
    %641 = vector.broadcast %640 : f32 to vector<8x256xf32>
    %642 = arith.mulf %635, %641 : vector<8x256xf32>
    %643 = arith.addf %625, %642 : vector<8x256xf32>
    %c138 = arith.constant 138 : index
    %644 = memref.load %arg2[%c138] : memref<400xf32, #tpu.memory_space<smem>>
    %645 = vector.broadcast %644 : f32 to vector<8x256xf32>
    %646 = arith.mulf %635, %645 : vector<8x256xf32>
    %647 = arith.addf %629, %646 : vector<8x256xf32>
    %c142 = arith.constant 142 : index
    %648 = memref.load %arg2[%c142] : memref<400xf32, #tpu.memory_space<smem>>
    %649 = vector.broadcast %648 : f32 to vector<8x256xf32>
    %650 = arith.mulf %635, %649 : vector<8x256xf32>
    %651 = arith.addf %633, %650 : vector<8x256xf32>
    %c15_i32_65 = arith.constant 15 : i32
    %652 = tpu.dynamic_rotate %7 by %c15_i32_65 dim 1 : vector<8x256xf32>, i32 -> vector<8x256xf32>
    %653 = arith.mulf %652, %597 : vector<8x256xf32>
    %c131 = arith.constant 131 : index
    %654 = memref.load %arg2[%c131] : memref<400xf32, #tpu.memory_space<smem>>
    %655 = vector.broadcast %654 : f32 to vector<8x256xf32>
    %656 = arith.mulf %653, %655 : vector<8x256xf32>
    %657 = arith.addf %639, %656 : vector<8x256xf32>
    %c135 = arith.constant 135 : index
    %658 = memref.load %arg2[%c135] : memref<400xf32, #tpu.memory_space<smem>>
    %659 = vector.broadcast %658 : f32 to vector<8x256xf32>
    %660 = arith.mulf %653, %659 : vector<8x256xf32>
    %661 = arith.addf %643, %660 : vector<8x256xf32>
    %c139 = arith.constant 139 : index
    %662 = memref.load %arg2[%c139] : memref<400xf32, #tpu.memory_space<smem>>
    %663 = vector.broadcast %662 : f32 to vector<8x256xf32>
    %664 = arith.mulf %653, %663 : vector<8x256xf32>
    %665 = arith.addf %647, %664 : vector<8x256xf32>
    %c143 = arith.constant 143 : index
    %666 = memref.load %arg2[%c143] : memref<400xf32, #tpu.memory_space<smem>>
    %667 = vector.broadcast %666 : f32 to vector<8x256xf32>
    %668 = arith.mulf %653, %667 : vector<8x256xf32>
    %669 = arith.addf %651, %668 : vector<8x256xf32>
    %c9_66 = arith.constant 9 : index
    %c0_67 = arith.constant 0 : index
    %c0_68 = arith.constant 0 : index
    %670 = vector.load %arg6[%c9_66, %c0_67, %c0_68] : memref<25x8x256xf32, #tpu.memory_space<vmem>>, vector<1x8x256xf32>
    %671 = vector.shape_cast %670 : vector<1x8x256xf32> to vector<8x256xf32>
    %c14_i32 = arith.constant 14 : i32
    %672 = tpu.dynamic_rotate %1 by %c14_i32 dim 1 : vector<8x256xf32>, i32 -> vector<8x256xf32>
    %673 = arith.mulf %672, %671 : vector<8x256xf32>
    %c144 = arith.constant 144 : index
    %674 = memref.load %arg2[%c144] : memref<400xf32, #tpu.memory_space<smem>>
    %675 = vector.broadcast %674 : f32 to vector<8x256xf32>
    %676 = arith.mulf %673, %675 : vector<8x256xf32>
    %677 = arith.addf %657, %676 : vector<8x256xf32>
    %c148 = arith.constant 148 : index
    %678 = memref.load %arg2[%c148] : memref<400xf32, #tpu.memory_space<smem>>
    %679 = vector.broadcast %678 : f32 to vector<8x256xf32>
    %680 = arith.mulf %673, %679 : vector<8x256xf32>
    %681 = arith.addf %661, %680 : vector<8x256xf32>
    %c152 = arith.constant 152 : index
    %682 = memref.load %arg2[%c152] : memref<400xf32, #tpu.memory_space<smem>>
    %683 = vector.broadcast %682 : f32 to vector<8x256xf32>
    %684 = arith.mulf %673, %683 : vector<8x256xf32>
    %685 = arith.addf %665, %684 : vector<8x256xf32>
    %c156 = arith.constant 156 : index
    %686 = memref.load %arg2[%c156] : memref<400xf32, #tpu.memory_space<smem>>
    %687 = vector.broadcast %686 : f32 to vector<8x256xf32>
    %688 = arith.mulf %673, %687 : vector<8x256xf32>
    %689 = arith.addf %669, %688 : vector<8x256xf32>
    %c14_i32_69 = arith.constant 14 : i32
    %690 = tpu.dynamic_rotate %3 by %c14_i32_69 dim 1 : vector<8x256xf32>, i32 -> vector<8x256xf32>
    %691 = arith.mulf %690, %671 : vector<8x256xf32>
    %c145 = arith.constant 145 : index
    %692 = memref.load %arg2[%c145] : memref<400xf32, #tpu.memory_space<smem>>
    %693 = vector.broadcast %692 : f32 to vector<8x256xf32>
    %694 = arith.mulf %691, %693 : vector<8x256xf32>
    %695 = arith.addf %677, %694 : vector<8x256xf32>
    %c149 = arith.constant 149 : index
    %696 = memref.load %arg2[%c149] : memref<400xf32, #tpu.memory_space<smem>>
    %697 = vector.broadcast %696 : f32 to vector<8x256xf32>
    %698 = arith.mulf %691, %697 : vector<8x256xf32>
    %699 = arith.addf %681, %698 : vector<8x256xf32>
    %c153 = arith.constant 153 : index
    %700 = memref.load %arg2[%c153] : memref<400xf32, #tpu.memory_space<smem>>
    %701 = vector.broadcast %700 : f32 to vector<8x256xf32>
    %702 = arith.mulf %691, %701 : vector<8x256xf32>
    %703 = arith.addf %685, %702 : vector<8x256xf32>
    %c157 = arith.constant 157 : index
    %704 = memref.load %arg2[%c157] : memref<400xf32, #tpu.memory_space<smem>>
    %705 = vector.broadcast %704 : f32 to vector<8x256xf32>
    %706 = arith.mulf %691, %705 : vector<8x256xf32>
    %707 = arith.addf %689, %706 : vector<8x256xf32>
    %c14_i32_70 = arith.constant 14 : i32
    %708 = tpu.dynamic_rotate %5 by %c14_i32_70 dim 1 : vector<8x256xf32>, i32 -> vector<8x256xf32>
    %709 = arith.mulf %708, %671 : vector<8x256xf32>
    %c146 = arith.constant 146 : index
    %710 = memref.load %arg2[%c146] : memref<400xf32, #tpu.memory_space<smem>>
    %711 = vector.broadcast %710 : f32 to vector<8x256xf32>
    %712 = arith.mulf %709, %711 : vector<8x256xf32>
    %713 = arith.addf %695, %712 : vector<8x256xf32>
    %c150 = arith.constant 150 : index
    %714 = memref.load %arg2[%c150] : memref<400xf32, #tpu.memory_space<smem>>
    %715 = vector.broadcast %714 : f32 to vector<8x256xf32>
    %716 = arith.mulf %709, %715 : vector<8x256xf32>
    %717 = arith.addf %699, %716 : vector<8x256xf32>
    %c154 = arith.constant 154 : index
    %718 = memref.load %arg2[%c154] : memref<400xf32, #tpu.memory_space<smem>>
    %719 = vector.broadcast %718 : f32 to vector<8x256xf32>
    %720 = arith.mulf %709, %719 : vector<8x256xf32>
    %721 = arith.addf %703, %720 : vector<8x256xf32>
    %c158 = arith.constant 158 : index
    %722 = memref.load %arg2[%c158] : memref<400xf32, #tpu.memory_space<smem>>
    %723 = vector.broadcast %722 : f32 to vector<8x256xf32>
    %724 = arith.mulf %709, %723 : vector<8x256xf32>
    %725 = arith.addf %707, %724 : vector<8x256xf32>
    %c14_i32_71 = arith.constant 14 : i32
    %726 = tpu.dynamic_rotate %7 by %c14_i32_71 dim 1 : vector<8x256xf32>, i32 -> vector<8x256xf32>
    %727 = arith.mulf %726, %671 : vector<8x256xf32>
    %c147 = arith.constant 147 : index
    %728 = memref.load %arg2[%c147] : memref<400xf32, #tpu.memory_space<smem>>
    %729 = vector.broadcast %728 : f32 to vector<8x256xf32>
    %730 = arith.mulf %727, %729 : vector<8x256xf32>
    %731 = arith.addf %713, %730 : vector<8x256xf32>
    %c151 = arith.constant 151 : index
    %732 = memref.load %arg2[%c151] : memref<400xf32, #tpu.memory_space<smem>>
    %733 = vector.broadcast %732 : f32 to vector<8x256xf32>
    %734 = arith.mulf %727, %733 : vector<8x256xf32>
    %735 = arith.addf %717, %734 : vector<8x256xf32>
    %c155 = arith.constant 155 : index
    %736 = memref.load %arg2[%c155] : memref<400xf32, #tpu.memory_space<smem>>
    %737 = vector.broadcast %736 : f32 to vector<8x256xf32>
    %738 = arith.mulf %727, %737 : vector<8x256xf32>
    %739 = arith.addf %721, %738 : vector<8x256xf32>
    %c159 = arith.constant 159 : index
    %740 = memref.load %arg2[%c159] : memref<400xf32, #tpu.memory_space<smem>>
    %741 = vector.broadcast %740 : f32 to vector<8x256xf32>
    %742 = arith.mulf %727, %741 : vector<8x256xf32>
    %743 = arith.addf %725, %742 : vector<8x256xf32>
    %c10_72 = arith.constant 10 : index
    %c0_73 = arith.constant 0 : index
    %c0_74 = arith.constant 0 : index
    %744 = vector.load %arg6[%c10_72, %c0_73, %c0_74] : memref<25x8x256xf32, #tpu.memory_space<vmem>>, vector<1x8x256xf32>
    %745 = vector.shape_cast %744 : vector<1x8x256xf32> to vector<8x256xf32>
    %c2_i32 = arith.constant 2 : i32
    %746 = tpu.dynamic_rotate %1 by %c2_i32 dim 1 : vector<8x256xf32>, i32 -> vector<8x256xf32>
    %747 = arith.mulf %746, %745 : vector<8x256xf32>
    %c160 = arith.constant 160 : index
    %748 = memref.load %arg2[%c160] : memref<400xf32, #tpu.memory_space<smem>>
    %749 = vector.broadcast %748 : f32 to vector<8x256xf32>
    %750 = arith.mulf %747, %749 : vector<8x256xf32>
    %751 = arith.addf %731, %750 : vector<8x256xf32>
    %c164 = arith.constant 164 : index
    %752 = memref.load %arg2[%c164] : memref<400xf32, #tpu.memory_space<smem>>
    %753 = vector.broadcast %752 : f32 to vector<8x256xf32>
    %754 = arith.mulf %747, %753 : vector<8x256xf32>
    %755 = arith.addf %735, %754 : vector<8x256xf32>
    %c168 = arith.constant 168 : index
    %756 = memref.load %arg2[%c168] : memref<400xf32, #tpu.memory_space<smem>>
    %757 = vector.broadcast %756 : f32 to vector<8x256xf32>
    %758 = arith.mulf %747, %757 : vector<8x256xf32>
    %759 = arith.addf %739, %758 : vector<8x256xf32>
    %c172 = arith.constant 172 : index
    %760 = memref.load %arg2[%c172] : memref<400xf32, #tpu.memory_space<smem>>
    %761 = vector.broadcast %760 : f32 to vector<8x256xf32>
    %762 = arith.mulf %747, %761 : vector<8x256xf32>
    %763 = arith.addf %743, %762 : vector<8x256xf32>
    %c2_i32_75 = arith.constant 2 : i32
    %764 = tpu.dynamic_rotate %3 by %c2_i32_75 dim 1 : vector<8x256xf32>, i32 -> vector<8x256xf32>
    %765 = arith.mulf %764, %745 : vector<8x256xf32>
    %c161 = arith.constant 161 : index
    %766 = memref.load %arg2[%c161] : memref<400xf32, #tpu.memory_space<smem>>
    %767 = vector.broadcast %766 : f32 to vector<8x256xf32>
    %768 = arith.mulf %765, %767 : vector<8x256xf32>
    %769 = arith.addf %751, %768 : vector<8x256xf32>
    %c165 = arith.constant 165 : index
    %770 = memref.load %arg2[%c165] : memref<400xf32, #tpu.memory_space<smem>>
    %771 = vector.broadcast %770 : f32 to vector<8x256xf32>
    %772 = arith.mulf %765, %771 : vector<8x256xf32>
    %773 = arith.addf %755, %772 : vector<8x256xf32>
    %c169 = arith.constant 169 : index
    %774 = memref.load %arg2[%c169] : memref<400xf32, #tpu.memory_space<smem>>
    %775 = vector.broadcast %774 : f32 to vector<8x256xf32>
    %776 = arith.mulf %765, %775 : vector<8x256xf32>
    %777 = arith.addf %759, %776 : vector<8x256xf32>
    %c173 = arith.constant 173 : index
    %778 = memref.load %arg2[%c173] : memref<400xf32, #tpu.memory_space<smem>>
    %779 = vector.broadcast %778 : f32 to vector<8x256xf32>
    %780 = arith.mulf %765, %779 : vector<8x256xf32>
    %781 = arith.addf %763, %780 : vector<8x256xf32>
    %c2_i32_76 = arith.constant 2 : i32
    %782 = tpu.dynamic_rotate %5 by %c2_i32_76 dim 1 : vector<8x256xf32>, i32 -> vector<8x256xf32>
    %783 = arith.mulf %782, %745 : vector<8x256xf32>
    %c162 = arith.constant 162 : index
    %784 = memref.load %arg2[%c162] : memref<400xf32, #tpu.memory_space<smem>>
    %785 = vector.broadcast %784 : f32 to vector<8x256xf32>
    %786 = arith.mulf %783, %785 : vector<8x256xf32>
    %787 = arith.addf %769, %786 : vector<8x256xf32>
    %c166 = arith.constant 166 : index
    %788 = memref.load %arg2[%c166] : memref<400xf32, #tpu.memory_space<smem>>
    %789 = vector.broadcast %788 : f32 to vector<8x256xf32>
    %790 = arith.mulf %783, %789 : vector<8x256xf32>
    %791 = arith.addf %773, %790 : vector<8x256xf32>
    %c170 = arith.constant 170 : index
    %792 = memref.load %arg2[%c170] : memref<400xf32, #tpu.memory_space<smem>>
    %793 = vector.broadcast %792 : f32 to vector<8x256xf32>
    %794 = arith.mulf %783, %793 : vector<8x256xf32>
    %795 = arith.addf %777, %794 : vector<8x256xf32>
    %c174 = arith.constant 174 : index
    %796 = memref.load %arg2[%c174] : memref<400xf32, #tpu.memory_space<smem>>
    %797 = vector.broadcast %796 : f32 to vector<8x256xf32>
    %798 = arith.mulf %783, %797 : vector<8x256xf32>
    %799 = arith.addf %781, %798 : vector<8x256xf32>
    %c2_i32_77 = arith.constant 2 : i32
    %800 = tpu.dynamic_rotate %7 by %c2_i32_77 dim 1 : vector<8x256xf32>, i32 -> vector<8x256xf32>
    %801 = arith.mulf %800, %745 : vector<8x256xf32>
    %c163 = arith.constant 163 : index
    %802 = memref.load %arg2[%c163] : memref<400xf32, #tpu.memory_space<smem>>
    %803 = vector.broadcast %802 : f32 to vector<8x256xf32>
    %804 = arith.mulf %801, %803 : vector<8x256xf32>
    %805 = arith.addf %787, %804 : vector<8x256xf32>
    %c167 = arith.constant 167 : index
    %806 = memref.load %arg2[%c167] : memref<400xf32, #tpu.memory_space<smem>>
    %807 = vector.broadcast %806 : f32 to vector<8x256xf32>
    %808 = arith.mulf %801, %807 : vector<8x256xf32>
    %809 = arith.addf %791, %808 : vector<8x256xf32>
    %c171 = arith.constant 171 : index
    %810 = memref.load %arg2[%c171] : memref<400xf32, #tpu.memory_space<smem>>
    %811 = vector.broadcast %810 : f32 to vector<8x256xf32>
    %812 = arith.mulf %801, %811 : vector<8x256xf32>
    %813 = arith.addf %795, %812 : vector<8x256xf32>
    %c175 = arith.constant 175 : index
    %814 = memref.load %arg2[%c175] : memref<400xf32, #tpu.memory_space<smem>>
    %815 = vector.broadcast %814 : f32 to vector<8x256xf32>
    %816 = arith.mulf %801, %815 : vector<8x256xf32>
    %817 = arith.addf %799, %816 : vector<8x256xf32>
    %c11_78 = arith.constant 11 : index
    %c0_79 = arith.constant 0 : index
    %c0_80 = arith.constant 0 : index
    %818 = vector.load %arg6[%c11_78, %c0_79, %c0_80] : memref<25x8x256xf32, #tpu.memory_space<vmem>>, vector<1x8x256xf32>
    %819 = vector.shape_cast %818 : vector<1x8x256xf32> to vector<8x256xf32>
    %c1_i32 = arith.constant 1 : i32
    %820 = tpu.dynamic_rotate %1 by %c1_i32 dim 1 : vector<8x256xf32>, i32 -> vector<8x256xf32>
    %821 = arith.mulf %820, %819 : vector<8x256xf32>
    %c176 = arith.constant 176 : index
    %822 = memref.load %arg2[%c176] : memref<400xf32, #tpu.memory_space<smem>>
    %823 = vector.broadcast %822 : f32 to vector<8x256xf32>
    %824 = arith.mulf %821, %823 : vector<8x256xf32>
    %825 = arith.addf %805, %824 : vector<8x256xf32>
    %c180 = arith.constant 180 : index
    %826 = memref.load %arg2[%c180] : memref<400xf32, #tpu.memory_space<smem>>
    %827 = vector.broadcast %826 : f32 to vector<8x256xf32>
    %828 = arith.mulf %821, %827 : vector<8x256xf32>
    %829 = arith.addf %809, %828 : vector<8x256xf32>
    %c184 = arith.constant 184 : index
    %830 = memref.load %arg2[%c184] : memref<400xf32, #tpu.memory_space<smem>>
    %831 = vector.broadcast %830 : f32 to vector<8x256xf32>
    %832 = arith.mulf %821, %831 : vector<8x256xf32>
    %833 = arith.addf %813, %832 : vector<8x256xf32>
    %c188 = arith.constant 188 : index
    %834 = memref.load %arg2[%c188] : memref<400xf32, #tpu.memory_space<smem>>
    %835 = vector.broadcast %834 : f32 to vector<8x256xf32>
    %836 = arith.mulf %821, %835 : vector<8x256xf32>
    %837 = arith.addf %817, %836 : vector<8x256xf32>
    %c1_i32_81 = arith.constant 1 : i32
    %838 = tpu.dynamic_rotate %3 by %c1_i32_81 dim 1 : vector<8x256xf32>, i32 -> vector<8x256xf32>
    %839 = arith.mulf %838, %819 : vector<8x256xf32>
    %c177 = arith.constant 177 : index
    %840 = memref.load %arg2[%c177] : memref<400xf32, #tpu.memory_space<smem>>
    %841 = vector.broadcast %840 : f32 to vector<8x256xf32>
    %842 = arith.mulf %839, %841 : vector<8x256xf32>
    %843 = arith.addf %825, %842 : vector<8x256xf32>
    %c181 = arith.constant 181 : index
    %844 = memref.load %arg2[%c181] : memref<400xf32, #tpu.memory_space<smem>>
    %845 = vector.broadcast %844 : f32 to vector<8x256xf32>
    %846 = arith.mulf %839, %845 : vector<8x256xf32>
    %847 = arith.addf %829, %846 : vector<8x256xf32>
    %c185 = arith.constant 185 : index
    %848 = memref.load %arg2[%c185] : memref<400xf32, #tpu.memory_space<smem>>
    %849 = vector.broadcast %848 : f32 to vector<8x256xf32>
    %850 = arith.mulf %839, %849 : vector<8x256xf32>
    %851 = arith.addf %833, %850 : vector<8x256xf32>
    %c189 = arith.constant 189 : index
    %852 = memref.load %arg2[%c189] : memref<400xf32, #tpu.memory_space<smem>>
    %853 = vector.broadcast %852 : f32 to vector<8x256xf32>
    %854 = arith.mulf %839, %853 : vector<8x256xf32>
    %855 = arith.addf %837, %854 : vector<8x256xf32>
    %c1_i32_82 = arith.constant 1 : i32
    %856 = tpu.dynamic_rotate %5 by %c1_i32_82 dim 1 : vector<8x256xf32>, i32 -> vector<8x256xf32>
    %857 = arith.mulf %856, %819 : vector<8x256xf32>
    %c178 = arith.constant 178 : index
    %858 = memref.load %arg2[%c178] : memref<400xf32, #tpu.memory_space<smem>>
    %859 = vector.broadcast %858 : f32 to vector<8x256xf32>
    %860 = arith.mulf %857, %859 : vector<8x256xf32>
    %861 = arith.addf %843, %860 : vector<8x256xf32>
    %c182 = arith.constant 182 : index
    %862 = memref.load %arg2[%c182] : memref<400xf32, #tpu.memory_space<smem>>
    %863 = vector.broadcast %862 : f32 to vector<8x256xf32>
    %864 = arith.mulf %857, %863 : vector<8x256xf32>
    %865 = arith.addf %847, %864 : vector<8x256xf32>
    %c186 = arith.constant 186 : index
    %866 = memref.load %arg2[%c186] : memref<400xf32, #tpu.memory_space<smem>>
    %867 = vector.broadcast %866 : f32 to vector<8x256xf32>
    %868 = arith.mulf %857, %867 : vector<8x256xf32>
    %869 = arith.addf %851, %868 : vector<8x256xf32>
    %c190 = arith.constant 190 : index
    %870 = memref.load %arg2[%c190] : memref<400xf32, #tpu.memory_space<smem>>
    %871 = vector.broadcast %870 : f32 to vector<8x256xf32>
    %872 = arith.mulf %857, %871 : vector<8x256xf32>
    %873 = arith.addf %855, %872 : vector<8x256xf32>
    %c1_i32_83 = arith.constant 1 : i32
    %874 = tpu.dynamic_rotate %7 by %c1_i32_83 dim 1 : vector<8x256xf32>, i32 -> vector<8x256xf32>
    %875 = arith.mulf %874, %819 : vector<8x256xf32>
    %c179 = arith.constant 179 : index
    %876 = memref.load %arg2[%c179] : memref<400xf32, #tpu.memory_space<smem>>
    %877 = vector.broadcast %876 : f32 to vector<8x256xf32>
    %878 = arith.mulf %875, %877 : vector<8x256xf32>
    %879 = arith.addf %861, %878 : vector<8x256xf32>
    %c183 = arith.constant 183 : index
    %880 = memref.load %arg2[%c183] : memref<400xf32, #tpu.memory_space<smem>>
    %881 = vector.broadcast %880 : f32 to vector<8x256xf32>
    %882 = arith.mulf %875, %881 : vector<8x256xf32>
    %883 = arith.addf %865, %882 : vector<8x256xf32>
    %c187 = arith.constant 187 : index
    %884 = memref.load %arg2[%c187] : memref<400xf32, #tpu.memory_space<smem>>
    %885 = vector.broadcast %884 : f32 to vector<8x256xf32>
    %886 = arith.mulf %875, %885 : vector<8x256xf32>
    %887 = arith.addf %869, %886 : vector<8x256xf32>
    %c191 = arith.constant 191 : index
    %888 = memref.load %arg2[%c191] : memref<400xf32, #tpu.memory_space<smem>>
    %889 = vector.broadcast %888 : f32 to vector<8x256xf32>
    %890 = arith.mulf %875, %889 : vector<8x256xf32>
    %891 = arith.addf %873, %890 : vector<8x256xf32>
    %c192 = arith.constant 192 : index
    %892 = memref.load %arg2[%c192] : memref<400xf32, #tpu.memory_space<smem>>
    %893 = vector.broadcast %892 : f32 to vector<8x256xf32>
    %894 = arith.mulf %1, %893 : vector<8x256xf32>
    %895 = arith.addf %879, %894 : vector<8x256xf32>
    %c196 = arith.constant 196 : index
    %896 = memref.load %arg2[%c196] : memref<400xf32, #tpu.memory_space<smem>>
    %897 = vector.broadcast %896 : f32 to vector<8x256xf32>
    %898 = arith.mulf %1, %897 : vector<8x256xf32>
    %899 = arith.addf %883, %898 : vector<8x256xf32>
    %c200 = arith.constant 200 : index
    %900 = memref.load %arg2[%c200] : memref<400xf32, #tpu.memory_space<smem>>
    %901 = vector.broadcast %900 : f32 to vector<8x256xf32>
    %902 = arith.mulf %1, %901 : vector<8x256xf32>
    %903 = arith.addf %887, %902 : vector<8x256xf32>
    %c204 = arith.constant 204 : index
    %904 = memref.load %arg2[%c204] : memref<400xf32, #tpu.memory_space<smem>>
    %905 = vector.broadcast %904 : f32 to vector<8x256xf32>
    %906 = arith.mulf %1, %905 : vector<8x256xf32>
    %907 = arith.addf %891, %906 : vector<8x256xf32>
    %c193 = arith.constant 193 : index
    %908 = memref.load %arg2[%c193] : memref<400xf32, #tpu.memory_space<smem>>
    %909 = vector.broadcast %908 : f32 to vector<8x256xf32>
    %910 = arith.mulf %3, %909 : vector<8x256xf32>
    %911 = arith.addf %895, %910 : vector<8x256xf32>
    %c197 = arith.constant 197 : index
    %912 = memref.load %arg2[%c197] : memref<400xf32, #tpu.memory_space<smem>>
    %913 = vector.broadcast %912 : f32 to vector<8x256xf32>
    %914 = arith.mulf %3, %913 : vector<8x256xf32>
    %915 = arith.addf %899, %914 : vector<8x256xf32>
    %c201 = arith.constant 201 : index
    %916 = memref.load %arg2[%c201] : memref<400xf32, #tpu.memory_space<smem>>
    %917 = vector.broadcast %916 : f32 to vector<8x256xf32>
    %918 = arith.mulf %3, %917 : vector<8x256xf32>
    %919 = arith.addf %903, %918 : vector<8x256xf32>
    %c205 = arith.constant 205 : index
    %920 = memref.load %arg2[%c205] : memref<400xf32, #tpu.memory_space<smem>>
    %921 = vector.broadcast %920 : f32 to vector<8x256xf32>
    %922 = arith.mulf %3, %921 : vector<8x256xf32>
    %923 = arith.addf %907, %922 : vector<8x256xf32>
    %c194 = arith.constant 194 : index
    %924 = memref.load %arg2[%c194] : memref<400xf32, #tpu.memory_space<smem>>
    %925 = vector.broadcast %924 : f32 to vector<8x256xf32>
    %926 = arith.mulf %5, %925 : vector<8x256xf32>
    %927 = arith.addf %911, %926 : vector<8x256xf32>
    %c198 = arith.constant 198 : index
    %928 = memref.load %arg2[%c198] : memref<400xf32, #tpu.memory_space<smem>>
    %929 = vector.broadcast %928 : f32 to vector<8x256xf32>
    %930 = arith.mulf %5, %929 : vector<8x256xf32>
    %931 = arith.addf %915, %930 : vector<8x256xf32>
    %c202 = arith.constant 202 : index
    %932 = memref.load %arg2[%c202] : memref<400xf32, #tpu.memory_space<smem>>
    %933 = vector.broadcast %932 : f32 to vector<8x256xf32>
    %934 = arith.mulf %5, %933 : vector<8x256xf32>
    %935 = arith.addf %919, %934 : vector<8x256xf32>
    %c206 = arith.constant 206 : index
    %936 = memref.load %arg2[%c206] : memref<400xf32, #tpu.memory_space<smem>>
    %937 = vector.broadcast %936 : f32 to vector<8x256xf32>
    %938 = arith.mulf %5, %937 : vector<8x256xf32>
    %939 = arith.addf %923, %938 : vector<8x256xf32>
    %c195 = arith.constant 195 : index
    %940 = memref.load %arg2[%c195] : memref<400xf32, #tpu.memory_space<smem>>
    %941 = vector.broadcast %940 : f32 to vector<8x256xf32>
    %942 = arith.mulf %7, %941 : vector<8x256xf32>
    %943 = arith.addf %927, %942 : vector<8x256xf32>
    %c199 = arith.constant 199 : index
    %944 = memref.load %arg2[%c199] : memref<400xf32, #tpu.memory_space<smem>>
    %945 = vector.broadcast %944 : f32 to vector<8x256xf32>
    %946 = arith.mulf %7, %945 : vector<8x256xf32>
    %947 = arith.addf %931, %946 : vector<8x256xf32>
    %c203 = arith.constant 203 : index
    %948 = memref.load %arg2[%c203] : memref<400xf32, #tpu.memory_space<smem>>
    %949 = vector.broadcast %948 : f32 to vector<8x256xf32>
    %950 = arith.mulf %7, %949 : vector<8x256xf32>
    %951 = arith.addf %935, %950 : vector<8x256xf32>
    %c207 = arith.constant 207 : index
    %952 = memref.load %arg2[%c207] : memref<400xf32, #tpu.memory_space<smem>>
    %953 = vector.broadcast %952 : f32 to vector<8x256xf32>
    %954 = arith.mulf %7, %953 : vector<8x256xf32>
    %955 = arith.addf %939, %954 : vector<8x256xf32>
    %c13_84 = arith.constant 13 : index
    %c0_85 = arith.constant 0 : index
    %c0_86 = arith.constant 0 : index
    %956 = vector.load %arg6[%c13_84, %c0_85, %c0_86] : memref<25x8x256xf32, #tpu.memory_space<vmem>>, vector<1x8x256xf32>
    %957 = vector.shape_cast %956 : vector<1x8x256xf32> to vector<8x256xf32>
    %c255_i32 = arith.constant 255 : i32
    %958 = tpu.dynamic_rotate %1 by %c255_i32 dim 1 : vector<8x256xf32>, i32 -> vector<8x256xf32>
    %959 = arith.mulf %958, %957 : vector<8x256xf32>
    %c208 = arith.constant 208 : index
    %960 = memref.load %arg2[%c208] : memref<400xf32, #tpu.memory_space<smem>>
    %961 = vector.broadcast %960 : f32 to vector<8x256xf32>
    %962 = arith.mulf %959, %961 : vector<8x256xf32>
    %963 = arith.addf %943, %962 : vector<8x256xf32>
    %c212 = arith.constant 212 : index
    %964 = memref.load %arg2[%c212] : memref<400xf32, #tpu.memory_space<smem>>
    %965 = vector.broadcast %964 : f32 to vector<8x256xf32>
    %966 = arith.mulf %959, %965 : vector<8x256xf32>
    %967 = arith.addf %947, %966 : vector<8x256xf32>
    %c216 = arith.constant 216 : index
    %968 = memref.load %arg2[%c216] : memref<400xf32, #tpu.memory_space<smem>>
    %969 = vector.broadcast %968 : f32 to vector<8x256xf32>
    %970 = arith.mulf %959, %969 : vector<8x256xf32>
    %971 = arith.addf %951, %970 : vector<8x256xf32>
    %c220 = arith.constant 220 : index
    %972 = memref.load %arg2[%c220] : memref<400xf32, #tpu.memory_space<smem>>
    %973 = vector.broadcast %972 : f32 to vector<8x256xf32>
    %974 = arith.mulf %959, %973 : vector<8x256xf32>
    %975 = arith.addf %955, %974 : vector<8x256xf32>
    %c255_i32_87 = arith.constant 255 : i32
    %976 = tpu.dynamic_rotate %3 by %c255_i32_87 dim 1 : vector<8x256xf32>, i32 -> vector<8x256xf32>
    %977 = arith.mulf %976, %957 : vector<8x256xf32>
    %c209 = arith.constant 209 : index
    %978 = memref.load %arg2[%c209] : memref<400xf32, #tpu.memory_space<smem>>
    %979 = vector.broadcast %978 : f32 to vector<8x256xf32>
    %980 = arith.mulf %977, %979 : vector<8x256xf32>
    %981 = arith.addf %963, %980 : vector<8x256xf32>
    %c213 = arith.constant 213 : index
    %982 = memref.load %arg2[%c213] : memref<400xf32, #tpu.memory_space<smem>>
    %983 = vector.broadcast %982 : f32 to vector<8x256xf32>
    %984 = arith.mulf %977, %983 : vector<8x256xf32>
    %985 = arith.addf %967, %984 : vector<8x256xf32>
    %c217 = arith.constant 217 : index
    %986 = memref.load %arg2[%c217] : memref<400xf32, #tpu.memory_space<smem>>
    %987 = vector.broadcast %986 : f32 to vector<8x256xf32>
    %988 = arith.mulf %977, %987 : vector<8x256xf32>
    %989 = arith.addf %971, %988 : vector<8x256xf32>
    %c221 = arith.constant 221 : index
    %990 = memref.load %arg2[%c221] : memref<400xf32, #tpu.memory_space<smem>>
    %991 = vector.broadcast %990 : f32 to vector<8x256xf32>
    %992 = arith.mulf %977, %991 : vector<8x256xf32>
    %993 = arith.addf %975, %992 : vector<8x256xf32>
    %c255_i32_88 = arith.constant 255 : i32
    %994 = tpu.dynamic_rotate %5 by %c255_i32_88 dim 1 : vector<8x256xf32>, i32 -> vector<8x256xf32>
    %995 = arith.mulf %994, %957 : vector<8x256xf32>
    %c210 = arith.constant 210 : index
    %996 = memref.load %arg2[%c210] : memref<400xf32, #tpu.memory_space<smem>>
    %997 = vector.broadcast %996 : f32 to vector<8x256xf32>
    %998 = arith.mulf %995, %997 : vector<8x256xf32>
    %999 = arith.addf %981, %998 : vector<8x256xf32>
    %c214 = arith.constant 214 : index
    %1000 = memref.load %arg2[%c214] : memref<400xf32, #tpu.memory_space<smem>>
    %1001 = vector.broadcast %1000 : f32 to vector<8x256xf32>
    %1002 = arith.mulf %995, %1001 : vector<8x256xf32>
    %1003 = arith.addf %985, %1002 : vector<8x256xf32>
    %c218 = arith.constant 218 : index
    %1004 = memref.load %arg2[%c218] : memref<400xf32, #tpu.memory_space<smem>>
    %1005 = vector.broadcast %1004 : f32 to vector<8x256xf32>
    %1006 = arith.mulf %995, %1005 : vector<8x256xf32>
    %1007 = arith.addf %989, %1006 : vector<8x256xf32>
    %c222 = arith.constant 222 : index
    %1008 = memref.load %arg2[%c222] : memref<400xf32, #tpu.memory_space<smem>>
    %1009 = vector.broadcast %1008 : f32 to vector<8x256xf32>
    %1010 = arith.mulf %995, %1009 : vector<8x256xf32>
    %1011 = arith.addf %993, %1010 : vector<8x256xf32>
    %c255_i32_89 = arith.constant 255 : i32
    %1012 = tpu.dynamic_rotate %7 by %c255_i32_89 dim 1 : vector<8x256xf32>, i32 -> vector<8x256xf32>
    %1013 = arith.mulf %1012, %957 : vector<8x256xf32>
    %c211 = arith.constant 211 : index
    %1014 = memref.load %arg2[%c211] : memref<400xf32, #tpu.memory_space<smem>>
    %1015 = vector.broadcast %1014 : f32 to vector<8x256xf32>
    %1016 = arith.mulf %1013, %1015 : vector<8x256xf32>
    %1017 = arith.addf %999, %1016 : vector<8x256xf32>
    %c215 = arith.constant 215 : index
    %1018 = memref.load %arg2[%c215] : memref<400xf32, #tpu.memory_space<smem>>
    %1019 = vector.broadcast %1018 : f32 to vector<8x256xf32>
    %1020 = arith.mulf %1013, %1019 : vector<8x256xf32>
    %1021 = arith.addf %1003, %1020 : vector<8x256xf32>
    %c219 = arith.constant 219 : index
    %1022 = memref.load %arg2[%c219] : memref<400xf32, #tpu.memory_space<smem>>
    %1023 = vector.broadcast %1022 : f32 to vector<8x256xf32>
    %1024 = arith.mulf %1013, %1023 : vector<8x256xf32>
    %1025 = arith.addf %1007, %1024 : vector<8x256xf32>
    %c223 = arith.constant 223 : index
    %1026 = memref.load %arg2[%c223] : memref<400xf32, #tpu.memory_space<smem>>
    %1027 = vector.broadcast %1026 : f32 to vector<8x256xf32>
    %1028 = arith.mulf %1013, %1027 : vector<8x256xf32>
    %1029 = arith.addf %1011, %1028 : vector<8x256xf32>
    %c14_90 = arith.constant 14 : index
    %c0_91 = arith.constant 0 : index
    %c0_92 = arith.constant 0 : index
    %1030 = vector.load %arg6[%c14_90, %c0_91, %c0_92] : memref<25x8x256xf32, #tpu.memory_space<vmem>>, vector<1x8x256xf32>
    %1031 = vector.shape_cast %1030 : vector<1x8x256xf32> to vector<8x256xf32>
    %c254_i32 = arith.constant 254 : i32
    %1032 = tpu.dynamic_rotate %1 by %c254_i32 dim 1 : vector<8x256xf32>, i32 -> vector<8x256xf32>
    %1033 = arith.mulf %1032, %1031 : vector<8x256xf32>
    %c224 = arith.constant 224 : index
    %1034 = memref.load %arg2[%c224] : memref<400xf32, #tpu.memory_space<smem>>
    %1035 = vector.broadcast %1034 : f32 to vector<8x256xf32>
    %1036 = arith.mulf %1033, %1035 : vector<8x256xf32>
    %1037 = arith.addf %1017, %1036 : vector<8x256xf32>
    %c228 = arith.constant 228 : index
    %1038 = memref.load %arg2[%c228] : memref<400xf32, #tpu.memory_space<smem>>
    %1039 = vector.broadcast %1038 : f32 to vector<8x256xf32>
    %1040 = arith.mulf %1033, %1039 : vector<8x256xf32>
    %1041 = arith.addf %1021, %1040 : vector<8x256xf32>
    %c232 = arith.constant 232 : index
    %1042 = memref.load %arg2[%c232] : memref<400xf32, #tpu.memory_space<smem>>
    %1043 = vector.broadcast %1042 : f32 to vector<8x256xf32>
    %1044 = arith.mulf %1033, %1043 : vector<8x256xf32>
    %1045 = arith.addf %1025, %1044 : vector<8x256xf32>
    %c236 = arith.constant 236 : index
    %1046 = memref.load %arg2[%c236] : memref<400xf32, #tpu.memory_space<smem>>
    %1047 = vector.broadcast %1046 : f32 to vector<8x256xf32>
    %1048 = arith.mulf %1033, %1047 : vector<8x256xf32>
    %1049 = arith.addf %1029, %1048 : vector<8x256xf32>
    %c254_i32_93 = arith.constant 254 : i32
    %1050 = tpu.dynamic_rotate %3 by %c254_i32_93 dim 1 : vector<8x256xf32>, i32 -> vector<8x256xf32>
    %1051 = arith.mulf %1050, %1031 : vector<8x256xf32>
    %c225 = arith.constant 225 : index
    %1052 = memref.load %arg2[%c225] : memref<400xf32, #tpu.memory_space<smem>>
    %1053 = vector.broadcast %1052 : f32 to vector<8x256xf32>
    %1054 = arith.mulf %1051, %1053 : vector<8x256xf32>
    %1055 = arith.addf %1037, %1054 : vector<8x256xf32>
    %c229 = arith.constant 229 : index
    %1056 = memref.load %arg2[%c229] : memref<400xf32, #tpu.memory_space<smem>>
    %1057 = vector.broadcast %1056 : f32 to vector<8x256xf32>
    %1058 = arith.mulf %1051, %1057 : vector<8x256xf32>
    %1059 = arith.addf %1041, %1058 : vector<8x256xf32>
    %c233 = arith.constant 233 : index
    %1060 = memref.load %arg2[%c233] : memref<400xf32, #tpu.memory_space<smem>>
    %1061 = vector.broadcast %1060 : f32 to vector<8x256xf32>
    %1062 = arith.mulf %1051, %1061 : vector<8x256xf32>
    %1063 = arith.addf %1045, %1062 : vector<8x256xf32>
    %c237 = arith.constant 237 : index
    %1064 = memref.load %arg2[%c237] : memref<400xf32, #tpu.memory_space<smem>>
    %1065 = vector.broadcast %1064 : f32 to vector<8x256xf32>
    %1066 = arith.mulf %1051, %1065 : vector<8x256xf32>
    %1067 = arith.addf %1049, %1066 : vector<8x256xf32>
    %c254_i32_94 = arith.constant 254 : i32
    %1068 = tpu.dynamic_rotate %5 by %c254_i32_94 dim 1 : vector<8x256xf32>, i32 -> vector<8x256xf32>
    %1069 = arith.mulf %1068, %1031 : vector<8x256xf32>
    %c226 = arith.constant 226 : index
    %1070 = memref.load %arg2[%c226] : memref<400xf32, #tpu.memory_space<smem>>
    %1071 = vector.broadcast %1070 : f32 to vector<8x256xf32>
    %1072 = arith.mulf %1069, %1071 : vector<8x256xf32>
    %1073 = arith.addf %1055, %1072 : vector<8x256xf32>
    %c230 = arith.constant 230 : index
    %1074 = memref.load %arg2[%c230] : memref<400xf32, #tpu.memory_space<smem>>
    %1075 = vector.broadcast %1074 : f32 to vector<8x256xf32>
    %1076 = arith.mulf %1069, %1075 : vector<8x256xf32>
    %1077 = arith.addf %1059, %1076 : vector<8x256xf32>
    %c234 = arith.constant 234 : index
    %1078 = memref.load %arg2[%c234] : memref<400xf32, #tpu.memory_space<smem>>
    %1079 = vector.broadcast %1078 : f32 to vector<8x256xf32>
    %1080 = arith.mulf %1069, %1079 : vector<8x256xf32>
    %1081 = arith.addf %1063, %1080 : vector<8x256xf32>
    %c238 = arith.constant 238 : index
    %1082 = memref.load %arg2[%c238] : memref<400xf32, #tpu.memory_space<smem>>
    %1083 = vector.broadcast %1082 : f32 to vector<8x256xf32>
    %1084 = arith.mulf %1069, %1083 : vector<8x256xf32>
    %1085 = arith.addf %1067, %1084 : vector<8x256xf32>
    %c254_i32_95 = arith.constant 254 : i32
    %1086 = tpu.dynamic_rotate %7 by %c254_i32_95 dim 1 : vector<8x256xf32>, i32 -> vector<8x256xf32>
    %1087 = arith.mulf %1086, %1031 : vector<8x256xf32>
    %c227 = arith.constant 227 : index
    %1088 = memref.load %arg2[%c227] : memref<400xf32, #tpu.memory_space<smem>>
    %1089 = vector.broadcast %1088 : f32 to vector<8x256xf32>
    %1090 = arith.mulf %1087, %1089 : vector<8x256xf32>
    %1091 = arith.addf %1073, %1090 : vector<8x256xf32>
    %c231 = arith.constant 231 : index
    %1092 = memref.load %arg2[%c231] : memref<400xf32, #tpu.memory_space<smem>>
    %1093 = vector.broadcast %1092 : f32 to vector<8x256xf32>
    %1094 = arith.mulf %1087, %1093 : vector<8x256xf32>
    %1095 = arith.addf %1077, %1094 : vector<8x256xf32>
    %c235 = arith.constant 235 : index
    %1096 = memref.load %arg2[%c235] : memref<400xf32, #tpu.memory_space<smem>>
    %1097 = vector.broadcast %1096 : f32 to vector<8x256xf32>
    %1098 = arith.mulf %1087, %1097 : vector<8x256xf32>
    %1099 = arith.addf %1081, %1098 : vector<8x256xf32>
    %c239 = arith.constant 239 : index
    %1100 = memref.load %arg2[%c239] : memref<400xf32, #tpu.memory_space<smem>>
    %1101 = vector.broadcast %1100 : f32 to vector<8x256xf32>
    %1102 = arith.mulf %1087, %1101 : vector<8x256xf32>
    %1103 = arith.addf %1085, %1102 : vector<8x256xf32>
    %c15_96 = arith.constant 15 : index
    %c0_97 = arith.constant 0 : index
    %c0_98 = arith.constant 0 : index
    %1104 = vector.load %arg6[%c15_96, %c0_97, %c0_98] : memref<25x8x256xf32, #tpu.memory_space<vmem>>, vector<1x8x256xf32>
    %1105 = vector.shape_cast %1104 : vector<1x8x256xf32> to vector<8x256xf32>
    %c242_i32 = arith.constant 242 : i32
    %1106 = tpu.dynamic_rotate %1 by %c242_i32 dim 1 : vector<8x256xf32>, i32 -> vector<8x256xf32>
    %1107 = arith.mulf %1106, %1105 : vector<8x256xf32>
    %c240 = arith.constant 240 : index
    %1108 = memref.load %arg2[%c240] : memref<400xf32, #tpu.memory_space<smem>>
    %1109 = vector.broadcast %1108 : f32 to vector<8x256xf32>
    %1110 = arith.mulf %1107, %1109 : vector<8x256xf32>
    %1111 = arith.addf %1091, %1110 : vector<8x256xf32>
    %c244 = arith.constant 244 : index
    %1112 = memref.load %arg2[%c244] : memref<400xf32, #tpu.memory_space<smem>>
    %1113 = vector.broadcast %1112 : f32 to vector<8x256xf32>
    %1114 = arith.mulf %1107, %1113 : vector<8x256xf32>
    %1115 = arith.addf %1095, %1114 : vector<8x256xf32>
    %c248 = arith.constant 248 : index
    %1116 = memref.load %arg2[%c248] : memref<400xf32, #tpu.memory_space<smem>>
    %1117 = vector.broadcast %1116 : f32 to vector<8x256xf32>
    %1118 = arith.mulf %1107, %1117 : vector<8x256xf32>
    %1119 = arith.addf %1099, %1118 : vector<8x256xf32>
    %c252 = arith.constant 252 : index
    %1120 = memref.load %arg2[%c252] : memref<400xf32, #tpu.memory_space<smem>>
    %1121 = vector.broadcast %1120 : f32 to vector<8x256xf32>
    %1122 = arith.mulf %1107, %1121 : vector<8x256xf32>
    %1123 = arith.addf %1103, %1122 : vector<8x256xf32>
    %c242_i32_99 = arith.constant 242 : i32
    %1124 = tpu.dynamic_rotate %3 by %c242_i32_99 dim 1 : vector<8x256xf32>, i32 -> vector<8x256xf32>
    %1125 = arith.mulf %1124, %1105 : vector<8x256xf32>
    %c241 = arith.constant 241 : index
    %1126 = memref.load %arg2[%c241] : memref<400xf32, #tpu.memory_space<smem>>
    %1127 = vector.broadcast %1126 : f32 to vector<8x256xf32>
    %1128 = arith.mulf %1125, %1127 : vector<8x256xf32>
    %1129 = arith.addf %1111, %1128 : vector<8x256xf32>
    %c245 = arith.constant 245 : index
    %1130 = memref.load %arg2[%c245] : memref<400xf32, #tpu.memory_space<smem>>
    %1131 = vector.broadcast %1130 : f32 to vector<8x256xf32>
    %1132 = arith.mulf %1125, %1131 : vector<8x256xf32>
    %1133 = arith.addf %1115, %1132 : vector<8x256xf32>
    %c249 = arith.constant 249 : index
    %1134 = memref.load %arg2[%c249] : memref<400xf32, #tpu.memory_space<smem>>
    %1135 = vector.broadcast %1134 : f32 to vector<8x256xf32>
    %1136 = arith.mulf %1125, %1135 : vector<8x256xf32>
    %1137 = arith.addf %1119, %1136 : vector<8x256xf32>
    %c253 = arith.constant 253 : index
    %1138 = memref.load %arg2[%c253] : memref<400xf32, #tpu.memory_space<smem>>
    %1139 = vector.broadcast %1138 : f32 to vector<8x256xf32>
    %1140 = arith.mulf %1125, %1139 : vector<8x256xf32>
    %1141 = arith.addf %1123, %1140 : vector<8x256xf32>
    %c242_i32_100 = arith.constant 242 : i32
    %1142 = tpu.dynamic_rotate %5 by %c242_i32_100 dim 1 : vector<8x256xf32>, i32 -> vector<8x256xf32>
    %1143 = arith.mulf %1142, %1105 : vector<8x256xf32>
    %c242 = arith.constant 242 : index
    %1144 = memref.load %arg2[%c242] : memref<400xf32, #tpu.memory_space<smem>>
    %1145 = vector.broadcast %1144 : f32 to vector<8x256xf32>
    %1146 = arith.mulf %1143, %1145 : vector<8x256xf32>
    %1147 = arith.addf %1129, %1146 : vector<8x256xf32>
    %c246 = arith.constant 246 : index
    %1148 = memref.load %arg2[%c246] : memref<400xf32, #tpu.memory_space<smem>>
    %1149 = vector.broadcast %1148 : f32 to vector<8x256xf32>
    %1150 = arith.mulf %1143, %1149 : vector<8x256xf32>
    %1151 = arith.addf %1133, %1150 : vector<8x256xf32>
    %c250 = arith.constant 250 : index
    %1152 = memref.load %arg2[%c250] : memref<400xf32, #tpu.memory_space<smem>>
    %1153 = vector.broadcast %1152 : f32 to vector<8x256xf32>
    %1154 = arith.mulf %1143, %1153 : vector<8x256xf32>
    %1155 = arith.addf %1137, %1154 : vector<8x256xf32>
    %c254 = arith.constant 254 : index
    %1156 = memref.load %arg2[%c254] : memref<400xf32, #tpu.memory_space<smem>>
    %1157 = vector.broadcast %1156 : f32 to vector<8x256xf32>
    %1158 = arith.mulf %1143, %1157 : vector<8x256xf32>
    %1159 = arith.addf %1141, %1158 : vector<8x256xf32>
    %c242_i32_101 = arith.constant 242 : i32
    %1160 = tpu.dynamic_rotate %7 by %c242_i32_101 dim 1 : vector<8x256xf32>, i32 -> vector<8x256xf32>
    %1161 = arith.mulf %1160, %1105 : vector<8x256xf32>
    %c243 = arith.constant 243 : index
    %1162 = memref.load %arg2[%c243] : memref<400xf32, #tpu.memory_space<smem>>
    %1163 = vector.broadcast %1162 : f32 to vector<8x256xf32>
    %1164 = arith.mulf %1161, %1163 : vector<8x256xf32>
    %1165 = arith.addf %1147, %1164 : vector<8x256xf32>
    %c247 = arith.constant 247 : index
    %1166 = memref.load %arg2[%c247] : memref<400xf32, #tpu.memory_space<smem>>
    %1167 = vector.broadcast %1166 : f32 to vector<8x256xf32>
    %1168 = arith.mulf %1161, %1167 : vector<8x256xf32>
    %1169 = arith.addf %1151, %1168 : vector<8x256xf32>
    %c251 = arith.constant 251 : index
    %1170 = memref.load %arg2[%c251] : memref<400xf32, #tpu.memory_space<smem>>
    %1171 = vector.broadcast %1170 : f32 to vector<8x256xf32>
    %1172 = arith.mulf %1161, %1171 : vector<8x256xf32>
    %1173 = arith.addf %1155, %1172 : vector<8x256xf32>
    %c255 = arith.constant 255 : index
    %1174 = memref.load %arg2[%c255] : memref<400xf32, #tpu.memory_space<smem>>
    %1175 = vector.broadcast %1174 : f32 to vector<8x256xf32>
    %1176 = arith.mulf %1161, %1175 : vector<8x256xf32>
    %1177 = arith.addf %1159, %1176 : vector<8x256xf32>
    %c16_102 = arith.constant 16 : index
    %c0_103 = arith.constant 0 : index
    %c0_104 = arith.constant 0 : index
    %1178 = vector.load %arg6[%c16_102, %c0_103, %c0_104] : memref<25x8x256xf32, #tpu.memory_space<vmem>>, vector<1x8x256xf32>
    %1179 = vector.shape_cast %1178 : vector<1x8x256xf32> to vector<8x256xf32>
    %c241_i32 = arith.constant 241 : i32
    %1180 = tpu.dynamic_rotate %1 by %c241_i32 dim 1 : vector<8x256xf32>, i32 -> vector<8x256xf32>
    %1181 = arith.mulf %1180, %1179 : vector<8x256xf32>
    %c256 = arith.constant 256 : index
    %1182 = memref.load %arg2[%c256] : memref<400xf32, #tpu.memory_space<smem>>
    %1183 = vector.broadcast %1182 : f32 to vector<8x256xf32>
    %1184 = arith.mulf %1181, %1183 : vector<8x256xf32>
    %1185 = arith.addf %1165, %1184 : vector<8x256xf32>
    %c260 = arith.constant 260 : index
    %1186 = memref.load %arg2[%c260] : memref<400xf32, #tpu.memory_space<smem>>
    %1187 = vector.broadcast %1186 : f32 to vector<8x256xf32>
    %1188 = arith.mulf %1181, %1187 : vector<8x256xf32>
    %1189 = arith.addf %1169, %1188 : vector<8x256xf32>
    %c264 = arith.constant 264 : index
    %1190 = memref.load %arg2[%c264] : memref<400xf32, #tpu.memory_space<smem>>
    %1191 = vector.broadcast %1190 : f32 to vector<8x256xf32>
    %1192 = arith.mulf %1181, %1191 : vector<8x256xf32>
    %1193 = arith.addf %1173, %1192 : vector<8x256xf32>
    %c268 = arith.constant 268 : index
    %1194 = memref.load %arg2[%c268] : memref<400xf32, #tpu.memory_space<smem>>
    %1195 = vector.broadcast %1194 : f32 to vector<8x256xf32>
    %1196 = arith.mulf %1181, %1195 : vector<8x256xf32>
    %1197 = arith.addf %1177, %1196 : vector<8x256xf32>
    %c241_i32_105 = arith.constant 241 : i32
    %1198 = tpu.dynamic_rotate %3 by %c241_i32_105 dim 1 : vector<8x256xf32>, i32 -> vector<8x256xf32>
    %1199 = arith.mulf %1198, %1179 : vector<8x256xf32>
    %c257 = arith.constant 257 : index
    %1200 = memref.load %arg2[%c257] : memref<400xf32, #tpu.memory_space<smem>>
    %1201 = vector.broadcast %1200 : f32 to vector<8x256xf32>
    %1202 = arith.mulf %1199, %1201 : vector<8x256xf32>
    %1203 = arith.addf %1185, %1202 : vector<8x256xf32>
    %c261 = arith.constant 261 : index
    %1204 = memref.load %arg2[%c261] : memref<400xf32, #tpu.memory_space<smem>>
    %1205 = vector.broadcast %1204 : f32 to vector<8x256xf32>
    %1206 = arith.mulf %1199, %1205 : vector<8x256xf32>
    %1207 = arith.addf %1189, %1206 : vector<8x256xf32>
    %c265 = arith.constant 265 : index
    %1208 = memref.load %arg2[%c265] : memref<400xf32, #tpu.memory_space<smem>>
    %1209 = vector.broadcast %1208 : f32 to vector<8x256xf32>
    %1210 = arith.mulf %1199, %1209 : vector<8x256xf32>
    %1211 = arith.addf %1193, %1210 : vector<8x256xf32>
    %c269 = arith.constant 269 : index
    %1212 = memref.load %arg2[%c269] : memref<400xf32, #tpu.memory_space<smem>>
    %1213 = vector.broadcast %1212 : f32 to vector<8x256xf32>
    %1214 = arith.mulf %1199, %1213 : vector<8x256xf32>
    %1215 = arith.addf %1197, %1214 : vector<8x256xf32>
    %c241_i32_106 = arith.constant 241 : i32
    %1216 = tpu.dynamic_rotate %5 by %c241_i32_106 dim 1 : vector<8x256xf32>, i32 -> vector<8x256xf32>
    %1217 = arith.mulf %1216, %1179 : vector<8x256xf32>
    %c258 = arith.constant 258 : index
    %1218 = memref.load %arg2[%c258] : memref<400xf32, #tpu.memory_space<smem>>
    %1219 = vector.broadcast %1218 : f32 to vector<8x256xf32>
    %1220 = arith.mulf %1217, %1219 : vector<8x256xf32>
    %1221 = arith.addf %1203, %1220 : vector<8x256xf32>
    %c262 = arith.constant 262 : index
    %1222 = memref.load %arg2[%c262] : memref<400xf32, #tpu.memory_space<smem>>
    %1223 = vector.broadcast %1222 : f32 to vector<8x256xf32>
    %1224 = arith.mulf %1217, %1223 : vector<8x256xf32>
    %1225 = arith.addf %1207, %1224 : vector<8x256xf32>
    %c266 = arith.constant 266 : index
    %1226 = memref.load %arg2[%c266] : memref<400xf32, #tpu.memory_space<smem>>
    %1227 = vector.broadcast %1226 : f32 to vector<8x256xf32>
    %1228 = arith.mulf %1217, %1227 : vector<8x256xf32>
    %1229 = arith.addf %1211, %1228 : vector<8x256xf32>
    %c270 = arith.constant 270 : index
    %1230 = memref.load %arg2[%c270] : memref<400xf32, #tpu.memory_space<smem>>
    %1231 = vector.broadcast %1230 : f32 to vector<8x256xf32>
    %1232 = arith.mulf %1217, %1231 : vector<8x256xf32>
    %1233 = arith.addf %1215, %1232 : vector<8x256xf32>
    %c241_i32_107 = arith.constant 241 : i32
    %1234 = tpu.dynamic_rotate %7 by %c241_i32_107 dim 1 : vector<8x256xf32>, i32 -> vector<8x256xf32>
    %1235 = arith.mulf %1234, %1179 : vector<8x256xf32>
    %c259 = arith.constant 259 : index
    %1236 = memref.load %arg2[%c259] : memref<400xf32, #tpu.memory_space<smem>>
    %1237 = vector.broadcast %1236 : f32 to vector<8x256xf32>
    %1238 = arith.mulf %1235, %1237 : vector<8x256xf32>
    %1239 = arith.addf %1221, %1238 : vector<8x256xf32>
    %c263 = arith.constant 263 : index
    %1240 = memref.load %arg2[%c263] : memref<400xf32, #tpu.memory_space<smem>>
    %1241 = vector.broadcast %1240 : f32 to vector<8x256xf32>
    %1242 = arith.mulf %1235, %1241 : vector<8x256xf32>
    %1243 = arith.addf %1225, %1242 : vector<8x256xf32>
    %c267 = arith.constant 267 : index
    %1244 = memref.load %arg2[%c267] : memref<400xf32, #tpu.memory_space<smem>>
    %1245 = vector.broadcast %1244 : f32 to vector<8x256xf32>
    %1246 = arith.mulf %1235, %1245 : vector<8x256xf32>
    %1247 = arith.addf %1229, %1246 : vector<8x256xf32>
    %c271 = arith.constant 271 : index
    %1248 = memref.load %arg2[%c271] : memref<400xf32, #tpu.memory_space<smem>>
    %1249 = vector.broadcast %1248 : f32 to vector<8x256xf32>
    %1250 = arith.mulf %1235, %1249 : vector<8x256xf32>
    %1251 = arith.addf %1233, %1250 : vector<8x256xf32>
    %c17_108 = arith.constant 17 : index
    %c0_109 = arith.constant 0 : index
    %c0_110 = arith.constant 0 : index
    %1252 = vector.load %arg6[%c17_108, %c0_109, %c0_110] : memref<25x8x256xf32, #tpu.memory_space<vmem>>, vector<1x8x256xf32>
    %1253 = vector.shape_cast %1252 : vector<1x8x256xf32> to vector<8x256xf32>
    %c240_i32 = arith.constant 240 : i32
    %1254 = tpu.dynamic_rotate %1 by %c240_i32 dim 1 : vector<8x256xf32>, i32 -> vector<8x256xf32>
    %1255 = arith.mulf %1254, %1253 : vector<8x256xf32>
    %c272 = arith.constant 272 : index
    %1256 = memref.load %arg2[%c272] : memref<400xf32, #tpu.memory_space<smem>>
    %1257 = vector.broadcast %1256 : f32 to vector<8x256xf32>
    %1258 = arith.mulf %1255, %1257 : vector<8x256xf32>
    %1259 = arith.addf %1239, %1258 : vector<8x256xf32>
    %c276 = arith.constant 276 : index
    %1260 = memref.load %arg2[%c276] : memref<400xf32, #tpu.memory_space<smem>>
    %1261 = vector.broadcast %1260 : f32 to vector<8x256xf32>
    %1262 = arith.mulf %1255, %1261 : vector<8x256xf32>
    %1263 = arith.addf %1243, %1262 : vector<8x256xf32>
    %c280 = arith.constant 280 : index
    %1264 = memref.load %arg2[%c280] : memref<400xf32, #tpu.memory_space<smem>>
    %1265 = vector.broadcast %1264 : f32 to vector<8x256xf32>
    %1266 = arith.mulf %1255, %1265 : vector<8x256xf32>
    %1267 = arith.addf %1247, %1266 : vector<8x256xf32>
    %c284 = arith.constant 284 : index
    %1268 = memref.load %arg2[%c284] : memref<400xf32, #tpu.memory_space<smem>>
    %1269 = vector.broadcast %1268 : f32 to vector<8x256xf32>
    %1270 = arith.mulf %1255, %1269 : vector<8x256xf32>
    %1271 = arith.addf %1251, %1270 : vector<8x256xf32>
    %c240_i32_111 = arith.constant 240 : i32
    %1272 = tpu.dynamic_rotate %3 by %c240_i32_111 dim 1 : vector<8x256xf32>, i32 -> vector<8x256xf32>
    %1273 = arith.mulf %1272, %1253 : vector<8x256xf32>
    %c273 = arith.constant 273 : index
    %1274 = memref.load %arg2[%c273] : memref<400xf32, #tpu.memory_space<smem>>
    %1275 = vector.broadcast %1274 : f32 to vector<8x256xf32>
    %1276 = arith.mulf %1273, %1275 : vector<8x256xf32>
    %1277 = arith.addf %1259, %1276 : vector<8x256xf32>
    %c277 = arith.constant 277 : index
    %1278 = memref.load %arg2[%c277] : memref<400xf32, #tpu.memory_space<smem>>
    %1279 = vector.broadcast %1278 : f32 to vector<8x256xf32>
    %1280 = arith.mulf %1273, %1279 : vector<8x256xf32>
    %1281 = arith.addf %1263, %1280 : vector<8x256xf32>
    %c281 = arith.constant 281 : index
    %1282 = memref.load %arg2[%c281] : memref<400xf32, #tpu.memory_space<smem>>
    %1283 = vector.broadcast %1282 : f32 to vector<8x256xf32>
    %1284 = arith.mulf %1273, %1283 : vector<8x256xf32>
    %1285 = arith.addf %1267, %1284 : vector<8x256xf32>
    %c285 = arith.constant 285 : index
    %1286 = memref.load %arg2[%c285] : memref<400xf32, #tpu.memory_space<smem>>
    %1287 = vector.broadcast %1286 : f32 to vector<8x256xf32>
    %1288 = arith.mulf %1273, %1287 : vector<8x256xf32>
    %1289 = arith.addf %1271, %1288 : vector<8x256xf32>
    %c240_i32_112 = arith.constant 240 : i32
    %1290 = tpu.dynamic_rotate %5 by %c240_i32_112 dim 1 : vector<8x256xf32>, i32 -> vector<8x256xf32>
    %1291 = arith.mulf %1290, %1253 : vector<8x256xf32>
    %c274 = arith.constant 274 : index
    %1292 = memref.load %arg2[%c274] : memref<400xf32, #tpu.memory_space<smem>>
    %1293 = vector.broadcast %1292 : f32 to vector<8x256xf32>
    %1294 = arith.mulf %1291, %1293 : vector<8x256xf32>
    %1295 = arith.addf %1277, %1294 : vector<8x256xf32>
    %c278 = arith.constant 278 : index
    %1296 = memref.load %arg2[%c278] : memref<400xf32, #tpu.memory_space<smem>>
    %1297 = vector.broadcast %1296 : f32 to vector<8x256xf32>
    %1298 = arith.mulf %1291, %1297 : vector<8x256xf32>
    %1299 = arith.addf %1281, %1298 : vector<8x256xf32>
    %c282 = arith.constant 282 : index
    %1300 = memref.load %arg2[%c282] : memref<400xf32, #tpu.memory_space<smem>>
    %1301 = vector.broadcast %1300 : f32 to vector<8x256xf32>
    %1302 = arith.mulf %1291, %1301 : vector<8x256xf32>
    %1303 = arith.addf %1285, %1302 : vector<8x256xf32>
    %c286 = arith.constant 286 : index
    %1304 = memref.load %arg2[%c286] : memref<400xf32, #tpu.memory_space<smem>>
    %1305 = vector.broadcast %1304 : f32 to vector<8x256xf32>
    %1306 = arith.mulf %1291, %1305 : vector<8x256xf32>
    %1307 = arith.addf %1289, %1306 : vector<8x256xf32>
    %c240_i32_113 = arith.constant 240 : i32
    %1308 = tpu.dynamic_rotate %7 by %c240_i32_113 dim 1 : vector<8x256xf32>, i32 -> vector<8x256xf32>
    %1309 = arith.mulf %1308, %1253 : vector<8x256xf32>
    %c275 = arith.constant 275 : index
    %1310 = memref.load %arg2[%c275] : memref<400xf32, #tpu.memory_space<smem>>
    %1311 = vector.broadcast %1310 : f32 to vector<8x256xf32>
    %1312 = arith.mulf %1309, %1311 : vector<8x256xf32>
    %1313 = arith.addf %1295, %1312 : vector<8x256xf32>
    %c279 = arith.constant 279 : index
    %1314 = memref.load %arg2[%c279] : memref<400xf32, #tpu.memory_space<smem>>
    %1315 = vector.broadcast %1314 : f32 to vector<8x256xf32>
    %1316 = arith.mulf %1309, %1315 : vector<8x256xf32>
    %1317 = arith.addf %1299, %1316 : vector<8x256xf32>
    %c283 = arith.constant 283 : index
    %1318 = memref.load %arg2[%c283] : memref<400xf32, #tpu.memory_space<smem>>
    %1319 = vector.broadcast %1318 : f32 to vector<8x256xf32>
    %1320 = arith.mulf %1309, %1319 : vector<8x256xf32>
    %1321 = arith.addf %1303, %1320 : vector<8x256xf32>
    %c287 = arith.constant 287 : index
    %1322 = memref.load %arg2[%c287] : memref<400xf32, #tpu.memory_space<smem>>
    %1323 = vector.broadcast %1322 : f32 to vector<8x256xf32>
    %1324 = arith.mulf %1309, %1323 : vector<8x256xf32>
    %1325 = arith.addf %1307, %1324 : vector<8x256xf32>
    %c18_114 = arith.constant 18 : index
    %c0_115 = arith.constant 0 : index
    %c0_116 = arith.constant 0 : index
    %1326 = vector.load %arg6[%c18_114, %c0_115, %c0_116] : memref<25x8x256xf32, #tpu.memory_space<vmem>>, vector<1x8x256xf32>
    %1327 = vector.shape_cast %1326 : vector<1x8x256xf32> to vector<8x256xf32>
    %c239_i32 = arith.constant 239 : i32
    %1328 = tpu.dynamic_rotate %1 by %c239_i32 dim 1 : vector<8x256xf32>, i32 -> vector<8x256xf32>
    %1329 = arith.mulf %1328, %1327 : vector<8x256xf32>
    %c288 = arith.constant 288 : index
    %1330 = memref.load %arg2[%c288] : memref<400xf32, #tpu.memory_space<smem>>
    %1331 = vector.broadcast %1330 : f32 to vector<8x256xf32>
    %1332 = arith.mulf %1329, %1331 : vector<8x256xf32>
    %1333 = arith.addf %1313, %1332 : vector<8x256xf32>
    %c292 = arith.constant 292 : index
    %1334 = memref.load %arg2[%c292] : memref<400xf32, #tpu.memory_space<smem>>
    %1335 = vector.broadcast %1334 : f32 to vector<8x256xf32>
    %1336 = arith.mulf %1329, %1335 : vector<8x256xf32>
    %1337 = arith.addf %1317, %1336 : vector<8x256xf32>
    %c296 = arith.constant 296 : index
    %1338 = memref.load %arg2[%c296] : memref<400xf32, #tpu.memory_space<smem>>
    %1339 = vector.broadcast %1338 : f32 to vector<8x256xf32>
    %1340 = arith.mulf %1329, %1339 : vector<8x256xf32>
    %1341 = arith.addf %1321, %1340 : vector<8x256xf32>
    %c300 = arith.constant 300 : index
    %1342 = memref.load %arg2[%c300] : memref<400xf32, #tpu.memory_space<smem>>
    %1343 = vector.broadcast %1342 : f32 to vector<8x256xf32>
    %1344 = arith.mulf %1329, %1343 : vector<8x256xf32>
    %1345 = arith.addf %1325, %1344 : vector<8x256xf32>
    %c239_i32_117 = arith.constant 239 : i32
    %1346 = tpu.dynamic_rotate %3 by %c239_i32_117 dim 1 : vector<8x256xf32>, i32 -> vector<8x256xf32>
    %1347 = arith.mulf %1346, %1327 : vector<8x256xf32>
    %c289 = arith.constant 289 : index
    %1348 = memref.load %arg2[%c289] : memref<400xf32, #tpu.memory_space<smem>>
    %1349 = vector.broadcast %1348 : f32 to vector<8x256xf32>
    %1350 = arith.mulf %1347, %1349 : vector<8x256xf32>
    %1351 = arith.addf %1333, %1350 : vector<8x256xf32>
    %c293 = arith.constant 293 : index
    %1352 = memref.load %arg2[%c293] : memref<400xf32, #tpu.memory_space<smem>>
    %1353 = vector.broadcast %1352 : f32 to vector<8x256xf32>
    %1354 = arith.mulf %1347, %1353 : vector<8x256xf32>
    %1355 = arith.addf %1337, %1354 : vector<8x256xf32>
    %c297 = arith.constant 297 : index
    %1356 = memref.load %arg2[%c297] : memref<400xf32, #tpu.memory_space<smem>>
    %1357 = vector.broadcast %1356 : f32 to vector<8x256xf32>
    %1358 = arith.mulf %1347, %1357 : vector<8x256xf32>
    %1359 = arith.addf %1341, %1358 : vector<8x256xf32>
    %c301 = arith.constant 301 : index
    %1360 = memref.load %arg2[%c301] : memref<400xf32, #tpu.memory_space<smem>>
    %1361 = vector.broadcast %1360 : f32 to vector<8x256xf32>
    %1362 = arith.mulf %1347, %1361 : vector<8x256xf32>
    %1363 = arith.addf %1345, %1362 : vector<8x256xf32>
    %c239_i32_118 = arith.constant 239 : i32
    %1364 = tpu.dynamic_rotate %5 by %c239_i32_118 dim 1 : vector<8x256xf32>, i32 -> vector<8x256xf32>
    %1365 = arith.mulf %1364, %1327 : vector<8x256xf32>
    %c290 = arith.constant 290 : index
    %1366 = memref.load %arg2[%c290] : memref<400xf32, #tpu.memory_space<smem>>
    %1367 = vector.broadcast %1366 : f32 to vector<8x256xf32>
    %1368 = arith.mulf %1365, %1367 : vector<8x256xf32>
    %1369 = arith.addf %1351, %1368 : vector<8x256xf32>
    %c294 = arith.constant 294 : index
    %1370 = memref.load %arg2[%c294] : memref<400xf32, #tpu.memory_space<smem>>
    %1371 = vector.broadcast %1370 : f32 to vector<8x256xf32>
    %1372 = arith.mulf %1365, %1371 : vector<8x256xf32>
    %1373 = arith.addf %1355, %1372 : vector<8x256xf32>
    %c298 = arith.constant 298 : index
    %1374 = memref.load %arg2[%c298] : memref<400xf32, #tpu.memory_space<smem>>
    %1375 = vector.broadcast %1374 : f32 to vector<8x256xf32>
    %1376 = arith.mulf %1365, %1375 : vector<8x256xf32>
    %1377 = arith.addf %1359, %1376 : vector<8x256xf32>
    %c302 = arith.constant 302 : index
    %1378 = memref.load %arg2[%c302] : memref<400xf32, #tpu.memory_space<smem>>
    %1379 = vector.broadcast %1378 : f32 to vector<8x256xf32>
    %1380 = arith.mulf %1365, %1379 : vector<8x256xf32>
    %1381 = arith.addf %1363, %1380 : vector<8x256xf32>
    %c239_i32_119 = arith.constant 239 : i32
    %1382 = tpu.dynamic_rotate %7 by %c239_i32_119 dim 1 : vector<8x256xf32>, i32 -> vector<8x256xf32>
    %1383 = arith.mulf %1382, %1327 : vector<8x256xf32>
    %c291 = arith.constant 291 : index
    %1384 = memref.load %arg2[%c291] : memref<400xf32, #tpu.memory_space<smem>>
    %1385 = vector.broadcast %1384 : f32 to vector<8x256xf32>
    %1386 = arith.mulf %1383, %1385 : vector<8x256xf32>
    %1387 = arith.addf %1369, %1386 : vector<8x256xf32>
    %c295 = arith.constant 295 : index
    %1388 = memref.load %arg2[%c295] : memref<400xf32, #tpu.memory_space<smem>>
    %1389 = vector.broadcast %1388 : f32 to vector<8x256xf32>
    %1390 = arith.mulf %1383, %1389 : vector<8x256xf32>
    %1391 = arith.addf %1373, %1390 : vector<8x256xf32>
    %c299 = arith.constant 299 : index
    %1392 = memref.load %arg2[%c299] : memref<400xf32, #tpu.memory_space<smem>>
    %1393 = vector.broadcast %1392 : f32 to vector<8x256xf32>
    %1394 = arith.mulf %1383, %1393 : vector<8x256xf32>
    %1395 = arith.addf %1377, %1394 : vector<8x256xf32>
    %c303 = arith.constant 303 : index
    %1396 = memref.load %arg2[%c303] : memref<400xf32, #tpu.memory_space<smem>>
    %1397 = vector.broadcast %1396 : f32 to vector<8x256xf32>
    %1398 = arith.mulf %1383, %1397 : vector<8x256xf32>
    %1399 = arith.addf %1381, %1398 : vector<8x256xf32>
    %c19_120 = arith.constant 19 : index
    %c0_121 = arith.constant 0 : index
    %c0_122 = arith.constant 0 : index
    %1400 = vector.load %arg6[%c19_120, %c0_121, %c0_122] : memref<25x8x256xf32, #tpu.memory_space<vmem>>, vector<1x8x256xf32>
    %1401 = vector.shape_cast %1400 : vector<1x8x256xf32> to vector<8x256xf32>
    %c238_i32 = arith.constant 238 : i32
    %1402 = tpu.dynamic_rotate %1 by %c238_i32 dim 1 : vector<8x256xf32>, i32 -> vector<8x256xf32>
    %1403 = arith.mulf %1402, %1401 : vector<8x256xf32>
    %c304 = arith.constant 304 : index
    %1404 = memref.load %arg2[%c304] : memref<400xf32, #tpu.memory_space<smem>>
    %1405 = vector.broadcast %1404 : f32 to vector<8x256xf32>
    %1406 = arith.mulf %1403, %1405 : vector<8x256xf32>
    %1407 = arith.addf %1387, %1406 : vector<8x256xf32>
    %c308 = arith.constant 308 : index
    %1408 = memref.load %arg2[%c308] : memref<400xf32, #tpu.memory_space<smem>>
    %1409 = vector.broadcast %1408 : f32 to vector<8x256xf32>
    %1410 = arith.mulf %1403, %1409 : vector<8x256xf32>
    %1411 = arith.addf %1391, %1410 : vector<8x256xf32>
    %c312 = arith.constant 312 : index
    %1412 = memref.load %arg2[%c312] : memref<400xf32, #tpu.memory_space<smem>>
    %1413 = vector.broadcast %1412 : f32 to vector<8x256xf32>
    %1414 = arith.mulf %1403, %1413 : vector<8x256xf32>
    %1415 = arith.addf %1395, %1414 : vector<8x256xf32>
    %c316 = arith.constant 316 : index
    %1416 = memref.load %arg2[%c316] : memref<400xf32, #tpu.memory_space<smem>>
    %1417 = vector.broadcast %1416 : f32 to vector<8x256xf32>
    %1418 = arith.mulf %1403, %1417 : vector<8x256xf32>
    %1419 = arith.addf %1399, %1418 : vector<8x256xf32>
    %c238_i32_123 = arith.constant 238 : i32
    %1420 = tpu.dynamic_rotate %3 by %c238_i32_123 dim 1 : vector<8x256xf32>, i32 -> vector<8x256xf32>
    %1421 = arith.mulf %1420, %1401 : vector<8x256xf32>
    %c305 = arith.constant 305 : index
    %1422 = memref.load %arg2[%c305] : memref<400xf32, #tpu.memory_space<smem>>
    %1423 = vector.broadcast %1422 : f32 to vector<8x256xf32>
    %1424 = arith.mulf %1421, %1423 : vector<8x256xf32>
    %1425 = arith.addf %1407, %1424 : vector<8x256xf32>
    %c309 = arith.constant 309 : index
    %1426 = memref.load %arg2[%c309] : memref<400xf32, #tpu.memory_space<smem>>
    %1427 = vector.broadcast %1426 : f32 to vector<8x256xf32>
    %1428 = arith.mulf %1421, %1427 : vector<8x256xf32>
    %1429 = arith.addf %1411, %1428 : vector<8x256xf32>
    %c313 = arith.constant 313 : index
    %1430 = memref.load %arg2[%c313] : memref<400xf32, #tpu.memory_space<smem>>
    %1431 = vector.broadcast %1430 : f32 to vector<8x256xf32>
    %1432 = arith.mulf %1421, %1431 : vector<8x256xf32>
    %1433 = arith.addf %1415, %1432 : vector<8x256xf32>
    %c317 = arith.constant 317 : index
    %1434 = memref.load %arg2[%c317] : memref<400xf32, #tpu.memory_space<smem>>
    %1435 = vector.broadcast %1434 : f32 to vector<8x256xf32>
    %1436 = arith.mulf %1421, %1435 : vector<8x256xf32>
    %1437 = arith.addf %1419, %1436 : vector<8x256xf32>
    %c238_i32_124 = arith.constant 238 : i32
    %1438 = tpu.dynamic_rotate %5 by %c238_i32_124 dim 1 : vector<8x256xf32>, i32 -> vector<8x256xf32>
    %1439 = arith.mulf %1438, %1401 : vector<8x256xf32>
    %c306 = arith.constant 306 : index
    %1440 = memref.load %arg2[%c306] : memref<400xf32, #tpu.memory_space<smem>>
    %1441 = vector.broadcast %1440 : f32 to vector<8x256xf32>
    %1442 = arith.mulf %1439, %1441 : vector<8x256xf32>
    %1443 = arith.addf %1425, %1442 : vector<8x256xf32>
    %c310 = arith.constant 310 : index
    %1444 = memref.load %arg2[%c310] : memref<400xf32, #tpu.memory_space<smem>>
    %1445 = vector.broadcast %1444 : f32 to vector<8x256xf32>
    %1446 = arith.mulf %1439, %1445 : vector<8x256xf32>
    %1447 = arith.addf %1429, %1446 : vector<8x256xf32>
    %c314 = arith.constant 314 : index
    %1448 = memref.load %arg2[%c314] : memref<400xf32, #tpu.memory_space<smem>>
    %1449 = vector.broadcast %1448 : f32 to vector<8x256xf32>
    %1450 = arith.mulf %1439, %1449 : vector<8x256xf32>
    %1451 = arith.addf %1433, %1450 : vector<8x256xf32>
    %c318 = arith.constant 318 : index
    %1452 = memref.load %arg2[%c318] : memref<400xf32, #tpu.memory_space<smem>>
    %1453 = vector.broadcast %1452 : f32 to vector<8x256xf32>
    %1454 = arith.mulf %1439, %1453 : vector<8x256xf32>
    %1455 = arith.addf %1437, %1454 : vector<8x256xf32>
    %c238_i32_125 = arith.constant 238 : i32
    %1456 = tpu.dynamic_rotate %7 by %c238_i32_125 dim 1 : vector<8x256xf32>, i32 -> vector<8x256xf32>
    %1457 = arith.mulf %1456, %1401 : vector<8x256xf32>
    %c307 = arith.constant 307 : index
    %1458 = memref.load %arg2[%c307] : memref<400xf32, #tpu.memory_space<smem>>
    %1459 = vector.broadcast %1458 : f32 to vector<8x256xf32>
    %1460 = arith.mulf %1457, %1459 : vector<8x256xf32>
    %1461 = arith.addf %1443, %1460 : vector<8x256xf32>
    %c311 = arith.constant 311 : index
    %1462 = memref.load %arg2[%c311] : memref<400xf32, #tpu.memory_space<smem>>
    %1463 = vector.broadcast %1462 : f32 to vector<8x256xf32>
    %1464 = arith.mulf %1457, %1463 : vector<8x256xf32>
    %1465 = arith.addf %1447, %1464 : vector<8x256xf32>
    %c315 = arith.constant 315 : index
    %1466 = memref.load %arg2[%c315] : memref<400xf32, #tpu.memory_space<smem>>
    %1467 = vector.broadcast %1466 : f32 to vector<8x256xf32>
    %1468 = arith.mulf %1457, %1467 : vector<8x256xf32>
    %1469 = arith.addf %1451, %1468 : vector<8x256xf32>
    %c319 = arith.constant 319 : index
    %1470 = memref.load %arg2[%c319] : memref<400xf32, #tpu.memory_space<smem>>
    %1471 = vector.broadcast %1470 : f32 to vector<8x256xf32>
    %1472 = arith.mulf %1457, %1471 : vector<8x256xf32>
    %1473 = arith.addf %1455, %1472 : vector<8x256xf32>
    %c20_126 = arith.constant 20 : index
    %c0_127 = arith.constant 0 : index
    %c0_128 = arith.constant 0 : index
    %1474 = vector.load %arg6[%c20_126, %c0_127, %c0_128] : memref<25x8x256xf32, #tpu.memory_space<vmem>>, vector<1x8x256xf32>
    %1475 = vector.shape_cast %1474 : vector<1x8x256xf32> to vector<8x256xf32>
    %c226_i32 = arith.constant 226 : i32
    %1476 = tpu.dynamic_rotate %1 by %c226_i32 dim 1 : vector<8x256xf32>, i32 -> vector<8x256xf32>
    %1477 = arith.mulf %1476, %1475 : vector<8x256xf32>
    %c320 = arith.constant 320 : index
    %1478 = memref.load %arg2[%c320] : memref<400xf32, #tpu.memory_space<smem>>
    %1479 = vector.broadcast %1478 : f32 to vector<8x256xf32>
    %1480 = arith.mulf %1477, %1479 : vector<8x256xf32>
    %1481 = arith.addf %1461, %1480 : vector<8x256xf32>
    %c324 = arith.constant 324 : index
    %1482 = memref.load %arg2[%c324] : memref<400xf32, #tpu.memory_space<smem>>
    %1483 = vector.broadcast %1482 : f32 to vector<8x256xf32>
    %1484 = arith.mulf %1477, %1483 : vector<8x256xf32>
    %1485 = arith.addf %1465, %1484 : vector<8x256xf32>
    %c328 = arith.constant 328 : index
    %1486 = memref.load %arg2[%c328] : memref<400xf32, #tpu.memory_space<smem>>
    %1487 = vector.broadcast %1486 : f32 to vector<8x256xf32>
    %1488 = arith.mulf %1477, %1487 : vector<8x256xf32>
    %1489 = arith.addf %1469, %1488 : vector<8x256xf32>
    %c332 = arith.constant 332 : index
    %1490 = memref.load %arg2[%c332] : memref<400xf32, #tpu.memory_space<smem>>
    %1491 = vector.broadcast %1490 : f32 to vector<8x256xf32>
    %1492 = arith.mulf %1477, %1491 : vector<8x256xf32>
    %1493 = arith.addf %1473, %1492 : vector<8x256xf32>
    %c226_i32_129 = arith.constant 226 : i32
    %1494 = tpu.dynamic_rotate %3 by %c226_i32_129 dim 1 : vector<8x256xf32>, i32 -> vector<8x256xf32>
    %1495 = arith.mulf %1494, %1475 : vector<8x256xf32>
    %c321 = arith.constant 321 : index
    %1496 = memref.load %arg2[%c321] : memref<400xf32, #tpu.memory_space<smem>>
    %1497 = vector.broadcast %1496 : f32 to vector<8x256xf32>
    %1498 = arith.mulf %1495, %1497 : vector<8x256xf32>
    %1499 = arith.addf %1481, %1498 : vector<8x256xf32>
    %c325 = arith.constant 325 : index
    %1500 = memref.load %arg2[%c325] : memref<400xf32, #tpu.memory_space<smem>>
    %1501 = vector.broadcast %1500 : f32 to vector<8x256xf32>
    %1502 = arith.mulf %1495, %1501 : vector<8x256xf32>
    %1503 = arith.addf %1485, %1502 : vector<8x256xf32>
    %c329 = arith.constant 329 : index
    %1504 = memref.load %arg2[%c329] : memref<400xf32, #tpu.memory_space<smem>>
    %1505 = vector.broadcast %1504 : f32 to vector<8x256xf32>
    %1506 = arith.mulf %1495, %1505 : vector<8x256xf32>
    %1507 = arith.addf %1489, %1506 : vector<8x256xf32>
    %c333 = arith.constant 333 : index
    %1508 = memref.load %arg2[%c333] : memref<400xf32, #tpu.memory_space<smem>>
    %1509 = vector.broadcast %1508 : f32 to vector<8x256xf32>
    %1510 = arith.mulf %1495, %1509 : vector<8x256xf32>
    %1511 = arith.addf %1493, %1510 : vector<8x256xf32>
    %c226_i32_130 = arith.constant 226 : i32
    %1512 = tpu.dynamic_rotate %5 by %c226_i32_130 dim 1 : vector<8x256xf32>, i32 -> vector<8x256xf32>
    %1513 = arith.mulf %1512, %1475 : vector<8x256xf32>
    %c322 = arith.constant 322 : index
    %1514 = memref.load %arg2[%c322] : memref<400xf32, #tpu.memory_space<smem>>
    %1515 = vector.broadcast %1514 : f32 to vector<8x256xf32>
    %1516 = arith.mulf %1513, %1515 : vector<8x256xf32>
    %1517 = arith.addf %1499, %1516 : vector<8x256xf32>
    %c326 = arith.constant 326 : index
    %1518 = memref.load %arg2[%c326] : memref<400xf32, #tpu.memory_space<smem>>
    %1519 = vector.broadcast %1518 : f32 to vector<8x256xf32>
    %1520 = arith.mulf %1513, %1519 : vector<8x256xf32>
    %1521 = arith.addf %1503, %1520 : vector<8x256xf32>
    %c330 = arith.constant 330 : index
    %1522 = memref.load %arg2[%c330] : memref<400xf32, #tpu.memory_space<smem>>
    %1523 = vector.broadcast %1522 : f32 to vector<8x256xf32>
    %1524 = arith.mulf %1513, %1523 : vector<8x256xf32>
    %1525 = arith.addf %1507, %1524 : vector<8x256xf32>
    %c334 = arith.constant 334 : index
    %1526 = memref.load %arg2[%c334] : memref<400xf32, #tpu.memory_space<smem>>
    %1527 = vector.broadcast %1526 : f32 to vector<8x256xf32>
    %1528 = arith.mulf %1513, %1527 : vector<8x256xf32>
    %1529 = arith.addf %1511, %1528 : vector<8x256xf32>
    %c226_i32_131 = arith.constant 226 : i32
    %1530 = tpu.dynamic_rotate %7 by %c226_i32_131 dim 1 : vector<8x256xf32>, i32 -> vector<8x256xf32>
    %1531 = arith.mulf %1530, %1475 : vector<8x256xf32>
    %c323 = arith.constant 323 : index
    %1532 = memref.load %arg2[%c323] : memref<400xf32, #tpu.memory_space<smem>>
    %1533 = vector.broadcast %1532 : f32 to vector<8x256xf32>
    %1534 = arith.mulf %1531, %1533 : vector<8x256xf32>
    %1535 = arith.addf %1517, %1534 : vector<8x256xf32>
    %c327 = arith.constant 327 : index
    %1536 = memref.load %arg2[%c327] : memref<400xf32, #tpu.memory_space<smem>>
    %1537 = vector.broadcast %1536 : f32 to vector<8x256xf32>
    %1538 = arith.mulf %1531, %1537 : vector<8x256xf32>
    %1539 = arith.addf %1521, %1538 : vector<8x256xf32>
    %c331 = arith.constant 331 : index
    %1540 = memref.load %arg2[%c331] : memref<400xf32, #tpu.memory_space<smem>>
    %1541 = vector.broadcast %1540 : f32 to vector<8x256xf32>
    %1542 = arith.mulf %1531, %1541 : vector<8x256xf32>
    %1543 = arith.addf %1525, %1542 : vector<8x256xf32>
    %c335 = arith.constant 335 : index
    %1544 = memref.load %arg2[%c335] : memref<400xf32, #tpu.memory_space<smem>>
    %1545 = vector.broadcast %1544 : f32 to vector<8x256xf32>
    %1546 = arith.mulf %1531, %1545 : vector<8x256xf32>
    %1547 = arith.addf %1529, %1546 : vector<8x256xf32>
    %c21_132 = arith.constant 21 : index
    %c0_133 = arith.constant 0 : index
    %c0_134 = arith.constant 0 : index
    %1548 = vector.load %arg6[%c21_132, %c0_133, %c0_134] : memref<25x8x256xf32, #tpu.memory_space<vmem>>, vector<1x8x256xf32>
    %1549 = vector.shape_cast %1548 : vector<1x8x256xf32> to vector<8x256xf32>
    %c225_i32 = arith.constant 225 : i32
    %1550 = tpu.dynamic_rotate %1 by %c225_i32 dim 1 : vector<8x256xf32>, i32 -> vector<8x256xf32>
    %1551 = arith.mulf %1550, %1549 : vector<8x256xf32>
    %c336 = arith.constant 336 : index
    %1552 = memref.load %arg2[%c336] : memref<400xf32, #tpu.memory_space<smem>>
    %1553 = vector.broadcast %1552 : f32 to vector<8x256xf32>
    %1554 = arith.mulf %1551, %1553 : vector<8x256xf32>
    %1555 = arith.addf %1535, %1554 : vector<8x256xf32>
    %c340 = arith.constant 340 : index
    %1556 = memref.load %arg2[%c340] : memref<400xf32, #tpu.memory_space<smem>>
    %1557 = vector.broadcast %1556 : f32 to vector<8x256xf32>
    %1558 = arith.mulf %1551, %1557 : vector<8x256xf32>
    %1559 = arith.addf %1539, %1558 : vector<8x256xf32>
    %c344 = arith.constant 344 : index
    %1560 = memref.load %arg2[%c344] : memref<400xf32, #tpu.memory_space<smem>>
    %1561 = vector.broadcast %1560 : f32 to vector<8x256xf32>
    %1562 = arith.mulf %1551, %1561 : vector<8x256xf32>
    %1563 = arith.addf %1543, %1562 : vector<8x256xf32>
    %c348 = arith.constant 348 : index
    %1564 = memref.load %arg2[%c348] : memref<400xf32, #tpu.memory_space<smem>>
    %1565 = vector.broadcast %1564 : f32 to vector<8x256xf32>
    %1566 = arith.mulf %1551, %1565 : vector<8x256xf32>
    %1567 = arith.addf %1547, %1566 : vector<8x256xf32>
    %c225_i32_135 = arith.constant 225 : i32
    %1568 = tpu.dynamic_rotate %3 by %c225_i32_135 dim 1 : vector<8x256xf32>, i32 -> vector<8x256xf32>
    %1569 = arith.mulf %1568, %1549 : vector<8x256xf32>
    %c337 = arith.constant 337 : index
    %1570 = memref.load %arg2[%c337] : memref<400xf32, #tpu.memory_space<smem>>
    %1571 = vector.broadcast %1570 : f32 to vector<8x256xf32>
    %1572 = arith.mulf %1569, %1571 : vector<8x256xf32>
    %1573 = arith.addf %1555, %1572 : vector<8x256xf32>
    %c341 = arith.constant 341 : index
    %1574 = memref.load %arg2[%c341] : memref<400xf32, #tpu.memory_space<smem>>
    %1575 = vector.broadcast %1574 : f32 to vector<8x256xf32>
    %1576 = arith.mulf %1569, %1575 : vector<8x256xf32>
    %1577 = arith.addf %1559, %1576 : vector<8x256xf32>
    %c345 = arith.constant 345 : index
    %1578 = memref.load %arg2[%c345] : memref<400xf32, #tpu.memory_space<smem>>
    %1579 = vector.broadcast %1578 : f32 to vector<8x256xf32>
    %1580 = arith.mulf %1569, %1579 : vector<8x256xf32>
    %1581 = arith.addf %1563, %1580 : vector<8x256xf32>
    %c349 = arith.constant 349 : index
    %1582 = memref.load %arg2[%c349] : memref<400xf32, #tpu.memory_space<smem>>
    %1583 = vector.broadcast %1582 : f32 to vector<8x256xf32>
    %1584 = arith.mulf %1569, %1583 : vector<8x256xf32>
    %1585 = arith.addf %1567, %1584 : vector<8x256xf32>
    %c225_i32_136 = arith.constant 225 : i32
    %1586 = tpu.dynamic_rotate %5 by %c225_i32_136 dim 1 : vector<8x256xf32>, i32 -> vector<8x256xf32>
    %1587 = arith.mulf %1586, %1549 : vector<8x256xf32>
    %c338 = arith.constant 338 : index
    %1588 = memref.load %arg2[%c338] : memref<400xf32, #tpu.memory_space<smem>>
    %1589 = vector.broadcast %1588 : f32 to vector<8x256xf32>
    %1590 = arith.mulf %1587, %1589 : vector<8x256xf32>
    %1591 = arith.addf %1573, %1590 : vector<8x256xf32>
    %c342 = arith.constant 342 : index
    %1592 = memref.load %arg2[%c342] : memref<400xf32, #tpu.memory_space<smem>>
    %1593 = vector.broadcast %1592 : f32 to vector<8x256xf32>
    %1594 = arith.mulf %1587, %1593 : vector<8x256xf32>
    %1595 = arith.addf %1577, %1594 : vector<8x256xf32>
    %c346 = arith.constant 346 : index
    %1596 = memref.load %arg2[%c346] : memref<400xf32, #tpu.memory_space<smem>>
    %1597 = vector.broadcast %1596 : f32 to vector<8x256xf32>
    %1598 = arith.mulf %1587, %1597 : vector<8x256xf32>
    %1599 = arith.addf %1581, %1598 : vector<8x256xf32>
    %c350 = arith.constant 350 : index
    %1600 = memref.load %arg2[%c350] : memref<400xf32, #tpu.memory_space<smem>>
    %1601 = vector.broadcast %1600 : f32 to vector<8x256xf32>
    %1602 = arith.mulf %1587, %1601 : vector<8x256xf32>
    %1603 = arith.addf %1585, %1602 : vector<8x256xf32>
    %c225_i32_137 = arith.constant 225 : i32
    %1604 = tpu.dynamic_rotate %7 by %c225_i32_137 dim 1 : vector<8x256xf32>, i32 -> vector<8x256xf32>
    %1605 = arith.mulf %1604, %1549 : vector<8x256xf32>
    %c339 = arith.constant 339 : index
    %1606 = memref.load %arg2[%c339] : memref<400xf32, #tpu.memory_space<smem>>
    %1607 = vector.broadcast %1606 : f32 to vector<8x256xf32>
    %1608 = arith.mulf %1605, %1607 : vector<8x256xf32>
    %1609 = arith.addf %1591, %1608 : vector<8x256xf32>
    %c343 = arith.constant 343 : index
    %1610 = memref.load %arg2[%c343] : memref<400xf32, #tpu.memory_space<smem>>
    %1611 = vector.broadcast %1610 : f32 to vector<8x256xf32>
    %1612 = arith.mulf %1605, %1611 : vector<8x256xf32>
    %1613 = arith.addf %1595, %1612 : vector<8x256xf32>
    %c347 = arith.constant 347 : index
    %1614 = memref.load %arg2[%c347] : memref<400xf32, #tpu.memory_space<smem>>
    %1615 = vector.broadcast %1614 : f32 to vector<8x256xf32>
    %1616 = arith.mulf %1605, %1615 : vector<8x256xf32>
    %1617 = arith.addf %1599, %1616 : vector<8x256xf32>
    %c351 = arith.constant 351 : index
    %1618 = memref.load %arg2[%c351] : memref<400xf32, #tpu.memory_space<smem>>
    %1619 = vector.broadcast %1618 : f32 to vector<8x256xf32>
    %1620 = arith.mulf %1605, %1619 : vector<8x256xf32>
    %1621 = arith.addf %1603, %1620 : vector<8x256xf32>
    %c22_138 = arith.constant 22 : index
    %c0_139 = arith.constant 0 : index
    %c0_140 = arith.constant 0 : index
    %1622 = vector.load %arg6[%c22_138, %c0_139, %c0_140] : memref<25x8x256xf32, #tpu.memory_space<vmem>>, vector<1x8x256xf32>
    %1623 = vector.shape_cast %1622 : vector<1x8x256xf32> to vector<8x256xf32>
    %c224_i32 = arith.constant 224 : i32
    %1624 = tpu.dynamic_rotate %1 by %c224_i32 dim 1 : vector<8x256xf32>, i32 -> vector<8x256xf32>
    %1625 = arith.mulf %1624, %1623 : vector<8x256xf32>
    %c352 = arith.constant 352 : index
    %1626 = memref.load %arg2[%c352] : memref<400xf32, #tpu.memory_space<smem>>
    %1627 = vector.broadcast %1626 : f32 to vector<8x256xf32>
    %1628 = arith.mulf %1625, %1627 : vector<8x256xf32>
    %1629 = arith.addf %1609, %1628 : vector<8x256xf32>
    %c356 = arith.constant 356 : index
    %1630 = memref.load %arg2[%c356] : memref<400xf32, #tpu.memory_space<smem>>
    %1631 = vector.broadcast %1630 : f32 to vector<8x256xf32>
    %1632 = arith.mulf %1625, %1631 : vector<8x256xf32>
    %1633 = arith.addf %1613, %1632 : vector<8x256xf32>
    %c360 = arith.constant 360 : index
    %1634 = memref.load %arg2[%c360] : memref<400xf32, #tpu.memory_space<smem>>
    %1635 = vector.broadcast %1634 : f32 to vector<8x256xf32>
    %1636 = arith.mulf %1625, %1635 : vector<8x256xf32>
    %1637 = arith.addf %1617, %1636 : vector<8x256xf32>
    %c364 = arith.constant 364 : index
    %1638 = memref.load %arg2[%c364] : memref<400xf32, #tpu.memory_space<smem>>
    %1639 = vector.broadcast %1638 : f32 to vector<8x256xf32>
    %1640 = arith.mulf %1625, %1639 : vector<8x256xf32>
    %1641 = arith.addf %1621, %1640 : vector<8x256xf32>
    %c224_i32_141 = arith.constant 224 : i32
    %1642 = tpu.dynamic_rotate %3 by %c224_i32_141 dim 1 : vector<8x256xf32>, i32 -> vector<8x256xf32>
    %1643 = arith.mulf %1642, %1623 : vector<8x256xf32>
    %c353 = arith.constant 353 : index
    %1644 = memref.load %arg2[%c353] : memref<400xf32, #tpu.memory_space<smem>>
    %1645 = vector.broadcast %1644 : f32 to vector<8x256xf32>
    %1646 = arith.mulf %1643, %1645 : vector<8x256xf32>
    %1647 = arith.addf %1629, %1646 : vector<8x256xf32>
    %c357 = arith.constant 357 : index
    %1648 = memref.load %arg2[%c357] : memref<400xf32, #tpu.memory_space<smem>>
    %1649 = vector.broadcast %1648 : f32 to vector<8x256xf32>
    %1650 = arith.mulf %1643, %1649 : vector<8x256xf32>
    %1651 = arith.addf %1633, %1650 : vector<8x256xf32>
    %c361 = arith.constant 361 : index
    %1652 = memref.load %arg2[%c361] : memref<400xf32, #tpu.memory_space<smem>>
    %1653 = vector.broadcast %1652 : f32 to vector<8x256xf32>
    %1654 = arith.mulf %1643, %1653 : vector<8x256xf32>
    %1655 = arith.addf %1637, %1654 : vector<8x256xf32>
    %c365 = arith.constant 365 : index
    %1656 = memref.load %arg2[%c365] : memref<400xf32, #tpu.memory_space<smem>>
    %1657 = vector.broadcast %1656 : f32 to vector<8x256xf32>
    %1658 = arith.mulf %1643, %1657 : vector<8x256xf32>
    %1659 = arith.addf %1641, %1658 : vector<8x256xf32>
    %c224_i32_142 = arith.constant 224 : i32
    %1660 = tpu.dynamic_rotate %5 by %c224_i32_142 dim 1 : vector<8x256xf32>, i32 -> vector<8x256xf32>
    %1661 = arith.mulf %1660, %1623 : vector<8x256xf32>
    %c354 = arith.constant 354 : index
    %1662 = memref.load %arg2[%c354] : memref<400xf32, #tpu.memory_space<smem>>
    %1663 = vector.broadcast %1662 : f32 to vector<8x256xf32>
    %1664 = arith.mulf %1661, %1663 : vector<8x256xf32>
    %1665 = arith.addf %1647, %1664 : vector<8x256xf32>
    %c358 = arith.constant 358 : index
    %1666 = memref.load %arg2[%c358] : memref<400xf32, #tpu.memory_space<smem>>
    %1667 = vector.broadcast %1666 : f32 to vector<8x256xf32>
    %1668 = arith.mulf %1661, %1667 : vector<8x256xf32>
    %1669 = arith.addf %1651, %1668 : vector<8x256xf32>
    %c362 = arith.constant 362 : index
    %1670 = memref.load %arg2[%c362] : memref<400xf32, #tpu.memory_space<smem>>
    %1671 = vector.broadcast %1670 : f32 to vector<8x256xf32>
    %1672 = arith.mulf %1661, %1671 : vector<8x256xf32>
    %1673 = arith.addf %1655, %1672 : vector<8x256xf32>
    %c366 = arith.constant 366 : index
    %1674 = memref.load %arg2[%c366] : memref<400xf32, #tpu.memory_space<smem>>
    %1675 = vector.broadcast %1674 : f32 to vector<8x256xf32>
    %1676 = arith.mulf %1661, %1675 : vector<8x256xf32>
    %1677 = arith.addf %1659, %1676 : vector<8x256xf32>
    %c224_i32_143 = arith.constant 224 : i32
    %1678 = tpu.dynamic_rotate %7 by %c224_i32_143 dim 1 : vector<8x256xf32>, i32 -> vector<8x256xf32>
    %1679 = arith.mulf %1678, %1623 : vector<8x256xf32>
    %c355 = arith.constant 355 : index
    %1680 = memref.load %arg2[%c355] : memref<400xf32, #tpu.memory_space<smem>>
    %1681 = vector.broadcast %1680 : f32 to vector<8x256xf32>
    %1682 = arith.mulf %1679, %1681 : vector<8x256xf32>
    %1683 = arith.addf %1665, %1682 : vector<8x256xf32>
    %c359 = arith.constant 359 : index
    %1684 = memref.load %arg2[%c359] : memref<400xf32, #tpu.memory_space<smem>>
    %1685 = vector.broadcast %1684 : f32 to vector<8x256xf32>
    %1686 = arith.mulf %1679, %1685 : vector<8x256xf32>
    %1687 = arith.addf %1669, %1686 : vector<8x256xf32>
    %c363 = arith.constant 363 : index
    %1688 = memref.load %arg2[%c363] : memref<400xf32, #tpu.memory_space<smem>>
    %1689 = vector.broadcast %1688 : f32 to vector<8x256xf32>
    %1690 = arith.mulf %1679, %1689 : vector<8x256xf32>
    %1691 = arith.addf %1673, %1690 : vector<8x256xf32>
    %c367 = arith.constant 367 : index
    %1692 = memref.load %arg2[%c367] : memref<400xf32, #tpu.memory_space<smem>>
    %1693 = vector.broadcast %1692 : f32 to vector<8x256xf32>
    %1694 = arith.mulf %1679, %1693 : vector<8x256xf32>
    %1695 = arith.addf %1677, %1694 : vector<8x256xf32>
    %c23_144 = arith.constant 23 : index
    %c0_145 = arith.constant 0 : index
    %c0_146 = arith.constant 0 : index
    %1696 = vector.load %arg6[%c23_144, %c0_145, %c0_146] : memref<25x8x256xf32, #tpu.memory_space<vmem>>, vector<1x8x256xf32>
    %1697 = vector.shape_cast %1696 : vector<1x8x256xf32> to vector<8x256xf32>
    %c223_i32 = arith.constant 223 : i32
    %1698 = tpu.dynamic_rotate %1 by %c223_i32 dim 1 : vector<8x256xf32>, i32 -> vector<8x256xf32>
    %1699 = arith.mulf %1698, %1697 : vector<8x256xf32>
    %c368 = arith.constant 368 : index
    %1700 = memref.load %arg2[%c368] : memref<400xf32, #tpu.memory_space<smem>>
    %1701 = vector.broadcast %1700 : f32 to vector<8x256xf32>
    %1702 = arith.mulf %1699, %1701 : vector<8x256xf32>
    %1703 = arith.addf %1683, %1702 : vector<8x256xf32>
    %c372 = arith.constant 372 : index
    %1704 = memref.load %arg2[%c372] : memref<400xf32, #tpu.memory_space<smem>>
    %1705 = vector.broadcast %1704 : f32 to vector<8x256xf32>
    %1706 = arith.mulf %1699, %1705 : vector<8x256xf32>
    %1707 = arith.addf %1687, %1706 : vector<8x256xf32>
    %c376 = arith.constant 376 : index
    %1708 = memref.load %arg2[%c376] : memref<400xf32, #tpu.memory_space<smem>>
    %1709 = vector.broadcast %1708 : f32 to vector<8x256xf32>
    %1710 = arith.mulf %1699, %1709 : vector<8x256xf32>
    %1711 = arith.addf %1691, %1710 : vector<8x256xf32>
    %c380 = arith.constant 380 : index
    %1712 = memref.load %arg2[%c380] : memref<400xf32, #tpu.memory_space<smem>>
    %1713 = vector.broadcast %1712 : f32 to vector<8x256xf32>
    %1714 = arith.mulf %1699, %1713 : vector<8x256xf32>
    %1715 = arith.addf %1695, %1714 : vector<8x256xf32>
    %c223_i32_147 = arith.constant 223 : i32
    %1716 = tpu.dynamic_rotate %3 by %c223_i32_147 dim 1 : vector<8x256xf32>, i32 -> vector<8x256xf32>
    %1717 = arith.mulf %1716, %1697 : vector<8x256xf32>
    %c369 = arith.constant 369 : index
    %1718 = memref.load %arg2[%c369] : memref<400xf32, #tpu.memory_space<smem>>
    %1719 = vector.broadcast %1718 : f32 to vector<8x256xf32>
    %1720 = arith.mulf %1717, %1719 : vector<8x256xf32>
    %1721 = arith.addf %1703, %1720 : vector<8x256xf32>
    %c373 = arith.constant 373 : index
    %1722 = memref.load %arg2[%c373] : memref<400xf32, #tpu.memory_space<smem>>
    %1723 = vector.broadcast %1722 : f32 to vector<8x256xf32>
    %1724 = arith.mulf %1717, %1723 : vector<8x256xf32>
    %1725 = arith.addf %1707, %1724 : vector<8x256xf32>
    %c377 = arith.constant 377 : index
    %1726 = memref.load %arg2[%c377] : memref<400xf32, #tpu.memory_space<smem>>
    %1727 = vector.broadcast %1726 : f32 to vector<8x256xf32>
    %1728 = arith.mulf %1717, %1727 : vector<8x256xf32>
    %1729 = arith.addf %1711, %1728 : vector<8x256xf32>
    %c381 = arith.constant 381 : index
    %1730 = memref.load %arg2[%c381] : memref<400xf32, #tpu.memory_space<smem>>
    %1731 = vector.broadcast %1730 : f32 to vector<8x256xf32>
    %1732 = arith.mulf %1717, %1731 : vector<8x256xf32>
    %1733 = arith.addf %1715, %1732 : vector<8x256xf32>
    %c223_i32_148 = arith.constant 223 : i32
    %1734 = tpu.dynamic_rotate %5 by %c223_i32_148 dim 1 : vector<8x256xf32>, i32 -> vector<8x256xf32>
    %1735 = arith.mulf %1734, %1697 : vector<8x256xf32>
    %c370 = arith.constant 370 : index
    %1736 = memref.load %arg2[%c370] : memref<400xf32, #tpu.memory_space<smem>>
    %1737 = vector.broadcast %1736 : f32 to vector<8x256xf32>
    %1738 = arith.mulf %1735, %1737 : vector<8x256xf32>
    %1739 = arith.addf %1721, %1738 : vector<8x256xf32>
    %c374 = arith.constant 374 : index
    %1740 = memref.load %arg2[%c374] : memref<400xf32, #tpu.memory_space<smem>>
    %1741 = vector.broadcast %1740 : f32 to vector<8x256xf32>
    %1742 = arith.mulf %1735, %1741 : vector<8x256xf32>
    %1743 = arith.addf %1725, %1742 : vector<8x256xf32>
    %c378 = arith.constant 378 : index
    %1744 = memref.load %arg2[%c378] : memref<400xf32, #tpu.memory_space<smem>>
    %1745 = vector.broadcast %1744 : f32 to vector<8x256xf32>
    %1746 = arith.mulf %1735, %1745 : vector<8x256xf32>
    %1747 = arith.addf %1729, %1746 : vector<8x256xf32>
    %c382 = arith.constant 382 : index
    %1748 = memref.load %arg2[%c382] : memref<400xf32, #tpu.memory_space<smem>>
    %1749 = vector.broadcast %1748 : f32 to vector<8x256xf32>
    %1750 = arith.mulf %1735, %1749 : vector<8x256xf32>
    %1751 = arith.addf %1733, %1750 : vector<8x256xf32>
    %c223_i32_149 = arith.constant 223 : i32
    %1752 = tpu.dynamic_rotate %7 by %c223_i32_149 dim 1 : vector<8x256xf32>, i32 -> vector<8x256xf32>
    %1753 = arith.mulf %1752, %1697 : vector<8x256xf32>
    %c371 = arith.constant 371 : index
    %1754 = memref.load %arg2[%c371] : memref<400xf32, #tpu.memory_space<smem>>
    %1755 = vector.broadcast %1754 : f32 to vector<8x256xf32>
    %1756 = arith.mulf %1753, %1755 : vector<8x256xf32>
    %1757 = arith.addf %1739, %1756 : vector<8x256xf32>
    %c375 = arith.constant 375 : index
    %1758 = memref.load %arg2[%c375] : memref<400xf32, #tpu.memory_space<smem>>
    %1759 = vector.broadcast %1758 : f32 to vector<8x256xf32>
    %1760 = arith.mulf %1753, %1759 : vector<8x256xf32>
    %1761 = arith.addf %1743, %1760 : vector<8x256xf32>
    %c379 = arith.constant 379 : index
    %1762 = memref.load %arg2[%c379] : memref<400xf32, #tpu.memory_space<smem>>
    %1763 = vector.broadcast %1762 : f32 to vector<8x256xf32>
    %1764 = arith.mulf %1753, %1763 : vector<8x256xf32>
    %1765 = arith.addf %1747, %1764 : vector<8x256xf32>
    %c383 = arith.constant 383 : index
    %1766 = memref.load %arg2[%c383] : memref<400xf32, #tpu.memory_space<smem>>
    %1767 = vector.broadcast %1766 : f32 to vector<8x256xf32>
    %1768 = arith.mulf %1753, %1767 : vector<8x256xf32>
    %1769 = arith.addf %1751, %1768 : vector<8x256xf32>
    %c24_150 = arith.constant 24 : index
    %c0_151 = arith.constant 0 : index
    %c0_152 = arith.constant 0 : index
    %1770 = vector.load %arg6[%c24_150, %c0_151, %c0_152] : memref<25x8x256xf32, #tpu.memory_space<vmem>>, vector<1x8x256xf32>
    %1771 = vector.shape_cast %1770 : vector<1x8x256xf32> to vector<8x256xf32>
    %c222_i32 = arith.constant 222 : i32
    %1772 = tpu.dynamic_rotate %1 by %c222_i32 dim 1 : vector<8x256xf32>, i32 -> vector<8x256xf32>
    %1773 = arith.mulf %1772, %1771 : vector<8x256xf32>
    %c384 = arith.constant 384 : index
    %1774 = memref.load %arg2[%c384] : memref<400xf32, #tpu.memory_space<smem>>
    %1775 = vector.broadcast %1774 : f32 to vector<8x256xf32>
    %1776 = arith.mulf %1773, %1775 : vector<8x256xf32>
    %1777 = arith.addf %1757, %1776 : vector<8x256xf32>
    %c388 = arith.constant 388 : index
    %1778 = memref.load %arg2[%c388] : memref<400xf32, #tpu.memory_space<smem>>
    %1779 = vector.broadcast %1778 : f32 to vector<8x256xf32>
    %1780 = arith.mulf %1773, %1779 : vector<8x256xf32>
    %1781 = arith.addf %1761, %1780 : vector<8x256xf32>
    %c392 = arith.constant 392 : index
    %1782 = memref.load %arg2[%c392] : memref<400xf32, #tpu.memory_space<smem>>
    %1783 = vector.broadcast %1782 : f32 to vector<8x256xf32>
    %1784 = arith.mulf %1773, %1783 : vector<8x256xf32>
    %1785 = arith.addf %1765, %1784 : vector<8x256xf32>
    %c396 = arith.constant 396 : index
    %1786 = memref.load %arg2[%c396] : memref<400xf32, #tpu.memory_space<smem>>
    %1787 = vector.broadcast %1786 : f32 to vector<8x256xf32>
    %1788 = arith.mulf %1773, %1787 : vector<8x256xf32>
    %1789 = arith.addf %1769, %1788 : vector<8x256xf32>
    %c222_i32_153 = arith.constant 222 : i32
    %1790 = tpu.dynamic_rotate %3 by %c222_i32_153 dim 1 : vector<8x256xf32>, i32 -> vector<8x256xf32>
    %1791 = arith.mulf %1790, %1771 : vector<8x256xf32>
    %c385 = arith.constant 385 : index
    %1792 = memref.load %arg2[%c385] : memref<400xf32, #tpu.memory_space<smem>>
    %1793 = vector.broadcast %1792 : f32 to vector<8x256xf32>
    %1794 = arith.mulf %1791, %1793 : vector<8x256xf32>
    %1795 = arith.addf %1777, %1794 : vector<8x256xf32>
    %c389 = arith.constant 389 : index
    %1796 = memref.load %arg2[%c389] : memref<400xf32, #tpu.memory_space<smem>>
    %1797 = vector.broadcast %1796 : f32 to vector<8x256xf32>
    %1798 = arith.mulf %1791, %1797 : vector<8x256xf32>
    %1799 = arith.addf %1781, %1798 : vector<8x256xf32>
    %c393 = arith.constant 393 : index
    %1800 = memref.load %arg2[%c393] : memref<400xf32, #tpu.memory_space<smem>>
    %1801 = vector.broadcast %1800 : f32 to vector<8x256xf32>
    %1802 = arith.mulf %1791, %1801 : vector<8x256xf32>
    %1803 = arith.addf %1785, %1802 : vector<8x256xf32>
    %c397 = arith.constant 397 : index
    %1804 = memref.load %arg2[%c397] : memref<400xf32, #tpu.memory_space<smem>>
    %1805 = vector.broadcast %1804 : f32 to vector<8x256xf32>
    %1806 = arith.mulf %1791, %1805 : vector<8x256xf32>
    %1807 = arith.addf %1789, %1806 : vector<8x256xf32>
    %c222_i32_154 = arith.constant 222 : i32
    %1808 = tpu.dynamic_rotate %5 by %c222_i32_154 dim 1 : vector<8x256xf32>, i32 -> vector<8x256xf32>
    %1809 = arith.mulf %1808, %1771 : vector<8x256xf32>
    %c386 = arith.constant 386 : index
    %1810 = memref.load %arg2[%c386] : memref<400xf32, #tpu.memory_space<smem>>
    %1811 = vector.broadcast %1810 : f32 to vector<8x256xf32>
    %1812 = arith.mulf %1809, %1811 : vector<8x256xf32>
    %1813 = arith.addf %1795, %1812 : vector<8x256xf32>
    %c390 = arith.constant 390 : index
    %1814 = memref.load %arg2[%c390] : memref<400xf32, #tpu.memory_space<smem>>
    %1815 = vector.broadcast %1814 : f32 to vector<8x256xf32>
    %1816 = arith.mulf %1809, %1815 : vector<8x256xf32>
    %1817 = arith.addf %1799, %1816 : vector<8x256xf32>
    %c394 = arith.constant 394 : index
    %1818 = memref.load %arg2[%c394] : memref<400xf32, #tpu.memory_space<smem>>
    %1819 = vector.broadcast %1818 : f32 to vector<8x256xf32>
    %1820 = arith.mulf %1809, %1819 : vector<8x256xf32>
    %1821 = arith.addf %1803, %1820 : vector<8x256xf32>
    %c398 = arith.constant 398 : index
    %1822 = memref.load %arg2[%c398] : memref<400xf32, #tpu.memory_space<smem>>
    %1823 = vector.broadcast %1822 : f32 to vector<8x256xf32>
    %1824 = arith.mulf %1809, %1823 : vector<8x256xf32>
    %1825 = arith.addf %1807, %1824 : vector<8x256xf32>
    %c222_i32_155 = arith.constant 222 : i32
    %1826 = tpu.dynamic_rotate %7 by %c222_i32_155 dim 1 : vector<8x256xf32>, i32 -> vector<8x256xf32>
    %1827 = arith.mulf %1826, %1771 : vector<8x256xf32>
    %c387 = arith.constant 387 : index
    %1828 = memref.load %arg2[%c387] : memref<400xf32, #tpu.memory_space<smem>>
    %1829 = vector.broadcast %1828 : f32 to vector<8x256xf32>
    %1830 = arith.mulf %1827, %1829 : vector<8x256xf32>
    %1831 = arith.addf %1813, %1830 : vector<8x256xf32>
    %c391 = arith.constant 391 : index
    %1832 = memref.load %arg2[%c391] : memref<400xf32, #tpu.memory_space<smem>>
    %1833 = vector.broadcast %1832 : f32 to vector<8x256xf32>
    %1834 = arith.mulf %1827, %1833 : vector<8x256xf32>
    %1835 = arith.addf %1817, %1834 : vector<8x256xf32>
    %c395 = arith.constant 395 : index
    %1836 = memref.load %arg2[%c395] : memref<400xf32, #tpu.memory_space<smem>>
    %1837 = vector.broadcast %1836 : f32 to vector<8x256xf32>
    %1838 = arith.mulf %1827, %1837 : vector<8x256xf32>
    %1839 = arith.addf %1821, %1838 : vector<8x256xf32>
    %c399 = arith.constant 399 : index
    %1840 = memref.load %arg2[%c399] : memref<400xf32, #tpu.memory_space<smem>>
    %1841 = vector.broadcast %1840 : f32 to vector<8x256xf32>
    %1842 = arith.mulf %1827, %1841 : vector<8x256xf32>
    %1843 = arith.addf %1825, %1842 : vector<8x256xf32>
    %c0_156 = arith.constant 0 : index
    %1844 = memref.load %arg3[%c0_156] : memref<4xf32, #tpu.memory_space<smem>>
    %1845 = vector.broadcast %1844 : f32 to vector<8x256xf32>
    %1846 = arith.addf %1831, %1845 : vector<8x256xf32>
    %cst = arith.constant 0.000000e+00 : f32
    %1847 = vector.broadcast %cst : f32 to vector<8x256xf32>
    %1848 = arith.maximumf %1846, %1847 : vector<8x256xf32>
    %c1_157 = arith.constant 1 : index
    %1849 = memref.load %arg3[%c1_157] : memref<4xf32, #tpu.memory_space<smem>>
    %1850 = vector.broadcast %1849 : f32 to vector<8x256xf32>
    %1851 = arith.addf %1835, %1850 : vector<8x256xf32>
    %cst_158 = arith.constant 0.000000e+00 : f32
    %1852 = vector.broadcast %cst_158 : f32 to vector<8x256xf32>
    %1853 = arith.maximumf %1851, %1852 : vector<8x256xf32>
    %c2_159 = arith.constant 2 : index
    %1854 = memref.load %arg3[%c2_159] : memref<4xf32, #tpu.memory_space<smem>>
    %1855 = vector.broadcast %1854 : f32 to vector<8x256xf32>
    %1856 = arith.addf %1839, %1855 : vector<8x256xf32>
    %cst_160 = arith.constant 0.000000e+00 : f32
    %1857 = vector.broadcast %cst_160 : f32 to vector<8x256xf32>
    %1858 = arith.maximumf %1856, %1857 : vector<8x256xf32>
    %c3_161 = arith.constant 3 : index
    %1859 = memref.load %arg3[%c3_161] : memref<4xf32, #tpu.memory_space<smem>>
    %1860 = vector.broadcast %1859 : f32 to vector<8x256xf32>
    %1861 = arith.addf %1843, %1860 : vector<8x256xf32>
    %cst_162 = arith.constant 0.000000e+00 : f32
    %1862 = vector.broadcast %cst_162 : f32 to vector<8x256xf32>
    %1863 = arith.maximumf %1861, %1862 : vector<8x256xf32>
    %c0_163 = arith.constant 0 : index
    %1864 = memref.load %arg4[%c0_163] : memref<192xf32, #tpu.memory_space<smem>>
    %1865 = vector.broadcast %1864 : f32 to vector<8x256xf32>
    %1866 = arith.mulf %1848, %1865 : vector<8x256xf32>
    %c4_164 = arith.constant 4 : index
    %1867 = memref.load %arg4[%c4_164] : memref<192xf32, #tpu.memory_space<smem>>
    %1868 = vector.broadcast %1867 : f32 to vector<8x256xf32>
    %1869 = arith.mulf %1848, %1868 : vector<8x256xf32>
    %c8_165 = arith.constant 8 : index
    %1870 = memref.load %arg4[%c8_165] : memref<192xf32, #tpu.memory_space<smem>>
    %1871 = vector.broadcast %1870 : f32 to vector<8x256xf32>
    %1872 = arith.mulf %1848, %1871 : vector<8x256xf32>
    %c12_166 = arith.constant 12 : index
    %1873 = memref.load %arg4[%c12_166] : memref<192xf32, #tpu.memory_space<smem>>
    %1874 = vector.broadcast %1873 : f32 to vector<8x256xf32>
    %1875 = arith.mulf %1848, %1874 : vector<8x256xf32>
    %c16_167 = arith.constant 16 : index
    %1876 = memref.load %arg4[%c16_167] : memref<192xf32, #tpu.memory_space<smem>>
    %1877 = vector.broadcast %1876 : f32 to vector<8x256xf32>
    %1878 = arith.mulf %1848, %1877 : vector<8x256xf32>
    %c20_168 = arith.constant 20 : index
    %1879 = memref.load %arg4[%c20_168] : memref<192xf32, #tpu.memory_space<smem>>
    %1880 = vector.broadcast %1879 : f32 to vector<8x256xf32>
    %1881 = arith.mulf %1848, %1880 : vector<8x256xf32>
    %c24_169 = arith.constant 24 : index
    %1882 = memref.load %arg4[%c24_169] : memref<192xf32, #tpu.memory_space<smem>>
    %1883 = vector.broadcast %1882 : f32 to vector<8x256xf32>
    %1884 = arith.mulf %1848, %1883 : vector<8x256xf32>
    %c28_170 = arith.constant 28 : index
    %1885 = memref.load %arg4[%c28_170] : memref<192xf32, #tpu.memory_space<smem>>
    %1886 = vector.broadcast %1885 : f32 to vector<8x256xf32>
    %1887 = arith.mulf %1848, %1886 : vector<8x256xf32>
    %c32_171 = arith.constant 32 : index
    %1888 = memref.load %arg4[%c32_171] : memref<192xf32, #tpu.memory_space<smem>>
    %1889 = vector.broadcast %1888 : f32 to vector<8x256xf32>
    %1890 = arith.mulf %1848, %1889 : vector<8x256xf32>
    %c36_172 = arith.constant 36 : index
    %1891 = memref.load %arg4[%c36_172] : memref<192xf32, #tpu.memory_space<smem>>
    %1892 = vector.broadcast %1891 : f32 to vector<8x256xf32>
    %1893 = arith.mulf %1848, %1892 : vector<8x256xf32>
    %c40_173 = arith.constant 40 : index
    %1894 = memref.load %arg4[%c40_173] : memref<192xf32, #tpu.memory_space<smem>>
    %1895 = vector.broadcast %1894 : f32 to vector<8x256xf32>
    %1896 = arith.mulf %1848, %1895 : vector<8x256xf32>
    %c44_174 = arith.constant 44 : index
    %1897 = memref.load %arg4[%c44_174] : memref<192xf32, #tpu.memory_space<smem>>
    %1898 = vector.broadcast %1897 : f32 to vector<8x256xf32>
    %1899 = arith.mulf %1848, %1898 : vector<8x256xf32>
    %c1_175 = arith.constant 1 : index
    %1900 = memref.load %arg4[%c1_175] : memref<192xf32, #tpu.memory_space<smem>>
    %1901 = vector.broadcast %1900 : f32 to vector<8x256xf32>
    %1902 = arith.mulf %1853, %1901 : vector<8x256xf32>
    %1903 = arith.addf %1866, %1902 : vector<8x256xf32>
    %c5_176 = arith.constant 5 : index
    %1904 = memref.load %arg4[%c5_176] : memref<192xf32, #tpu.memory_space<smem>>
    %1905 = vector.broadcast %1904 : f32 to vector<8x256xf32>
    %1906 = arith.mulf %1853, %1905 : vector<8x256xf32>
    %1907 = arith.addf %1869, %1906 : vector<8x256xf32>
    %c9_177 = arith.constant 9 : index
    %1908 = memref.load %arg4[%c9_177] : memref<192xf32, #tpu.memory_space<smem>>
    %1909 = vector.broadcast %1908 : f32 to vector<8x256xf32>
    %1910 = arith.mulf %1853, %1909 : vector<8x256xf32>
    %1911 = arith.addf %1872, %1910 : vector<8x256xf32>
    %c13_178 = arith.constant 13 : index
    %1912 = memref.load %arg4[%c13_178] : memref<192xf32, #tpu.memory_space<smem>>
    %1913 = vector.broadcast %1912 : f32 to vector<8x256xf32>
    %1914 = arith.mulf %1853, %1913 : vector<8x256xf32>
    %1915 = arith.addf %1875, %1914 : vector<8x256xf32>
    %c17_179 = arith.constant 17 : index
    %1916 = memref.load %arg4[%c17_179] : memref<192xf32, #tpu.memory_space<smem>>
    %1917 = vector.broadcast %1916 : f32 to vector<8x256xf32>
    %1918 = arith.mulf %1853, %1917 : vector<8x256xf32>
    %1919 = arith.addf %1878, %1918 : vector<8x256xf32>
    %c21_180 = arith.constant 21 : index
    %1920 = memref.load %arg4[%c21_180] : memref<192xf32, #tpu.memory_space<smem>>
    %1921 = vector.broadcast %1920 : f32 to vector<8x256xf32>
    %1922 = arith.mulf %1853, %1921 : vector<8x256xf32>
    %1923 = arith.addf %1881, %1922 : vector<8x256xf32>
    %c25_181 = arith.constant 25 : index
    %1924 = memref.load %arg4[%c25_181] : memref<192xf32, #tpu.memory_space<smem>>
    %1925 = vector.broadcast %1924 : f32 to vector<8x256xf32>
    %1926 = arith.mulf %1853, %1925 : vector<8x256xf32>
    %1927 = arith.addf %1884, %1926 : vector<8x256xf32>
    %c29_182 = arith.constant 29 : index
    %1928 = memref.load %arg4[%c29_182] : memref<192xf32, #tpu.memory_space<smem>>
    %1929 = vector.broadcast %1928 : f32 to vector<8x256xf32>
    %1930 = arith.mulf %1853, %1929 : vector<8x256xf32>
    %1931 = arith.addf %1887, %1930 : vector<8x256xf32>
    %c33_183 = arith.constant 33 : index
    %1932 = memref.load %arg4[%c33_183] : memref<192xf32, #tpu.memory_space<smem>>
    %1933 = vector.broadcast %1932 : f32 to vector<8x256xf32>
    %1934 = arith.mulf %1853, %1933 : vector<8x256xf32>
    %1935 = arith.addf %1890, %1934 : vector<8x256xf32>
    %c37_184 = arith.constant 37 : index
    %1936 = memref.load %arg4[%c37_184] : memref<192xf32, #tpu.memory_space<smem>>
    %1937 = vector.broadcast %1936 : f32 to vector<8x256xf32>
    %1938 = arith.mulf %1853, %1937 : vector<8x256xf32>
    %1939 = arith.addf %1893, %1938 : vector<8x256xf32>
    %c41_185 = arith.constant 41 : index
    %1940 = memref.load %arg4[%c41_185] : memref<192xf32, #tpu.memory_space<smem>>
    %1941 = vector.broadcast %1940 : f32 to vector<8x256xf32>
    %1942 = arith.mulf %1853, %1941 : vector<8x256xf32>
    %1943 = arith.addf %1896, %1942 : vector<8x256xf32>
    %c45_186 = arith.constant 45 : index
    %1944 = memref.load %arg4[%c45_186] : memref<192xf32, #tpu.memory_space<smem>>
    %1945 = vector.broadcast %1944 : f32 to vector<8x256xf32>
    %1946 = arith.mulf %1853, %1945 : vector<8x256xf32>
    %1947 = arith.addf %1899, %1946 : vector<8x256xf32>
    %c2_187 = arith.constant 2 : index
    %1948 = memref.load %arg4[%c2_187] : memref<192xf32, #tpu.memory_space<smem>>
    %1949 = vector.broadcast %1948 : f32 to vector<8x256xf32>
    %1950 = arith.mulf %1858, %1949 : vector<8x256xf32>
    %1951 = arith.addf %1903, %1950 : vector<8x256xf32>
    %c6_188 = arith.constant 6 : index
    %1952 = memref.load %arg4[%c6_188] : memref<192xf32, #tpu.memory_space<smem>>
    %1953 = vector.broadcast %1952 : f32 to vector<8x256xf32>
    %1954 = arith.mulf %1858, %1953 : vector<8x256xf32>
    %1955 = arith.addf %1907, %1954 : vector<8x256xf32>
    %c10_189 = arith.constant 10 : index
    %1956 = memref.load %arg4[%c10_189] : memref<192xf32, #tpu.memory_space<smem>>
    %1957 = vector.broadcast %1956 : f32 to vector<8x256xf32>
    %1958 = arith.mulf %1858, %1957 : vector<8x256xf32>
    %1959 = arith.addf %1911, %1958 : vector<8x256xf32>
    %c14_190 = arith.constant 14 : index
    %1960 = memref.load %arg4[%c14_190] : memref<192xf32, #tpu.memory_space<smem>>
    %1961 = vector.broadcast %1960 : f32 to vector<8x256xf32>
    %1962 = arith.mulf %1858, %1961 : vector<8x256xf32>
    %1963 = arith.addf %1915, %1962 : vector<8x256xf32>
    %c18_191 = arith.constant 18 : index
    %1964 = memref.load %arg4[%c18_191] : memref<192xf32, #tpu.memory_space<smem>>
    %1965 = vector.broadcast %1964 : f32 to vector<8x256xf32>
    %1966 = arith.mulf %1858, %1965 : vector<8x256xf32>
    %1967 = arith.addf %1919, %1966 : vector<8x256xf32>
    %c22_192 = arith.constant 22 : index
    %1968 = memref.load %arg4[%c22_192] : memref<192xf32, #tpu.memory_space<smem>>
    %1969 = vector.broadcast %1968 : f32 to vector<8x256xf32>
    %1970 = arith.mulf %1858, %1969 : vector<8x256xf32>
    %1971 = arith.addf %1923, %1970 : vector<8x256xf32>
    %c26_193 = arith.constant 26 : index
    %1972 = memref.load %arg4[%c26_193] : memref<192xf32, #tpu.memory_space<smem>>
    %1973 = vector.broadcast %1972 : f32 to vector<8x256xf32>
    %1974 = arith.mulf %1858, %1973 : vector<8x256xf32>
    %1975 = arith.addf %1927, %1974 : vector<8x256xf32>
    %c30_194 = arith.constant 30 : index
    %1976 = memref.load %arg4[%c30_194] : memref<192xf32, #tpu.memory_space<smem>>
    %1977 = vector.broadcast %1976 : f32 to vector<8x256xf32>
    %1978 = arith.mulf %1858, %1977 : vector<8x256xf32>
    %1979 = arith.addf %1931, %1978 : vector<8x256xf32>
    %c34_195 = arith.constant 34 : index
    %1980 = memref.load %arg4[%c34_195] : memref<192xf32, #tpu.memory_space<smem>>
    %1981 = vector.broadcast %1980 : f32 to vector<8x256xf32>
    %1982 = arith.mulf %1858, %1981 : vector<8x256xf32>
    %1983 = arith.addf %1935, %1982 : vector<8x256xf32>
    %c38_196 = arith.constant 38 : index
    %1984 = memref.load %arg4[%c38_196] : memref<192xf32, #tpu.memory_space<smem>>
    %1985 = vector.broadcast %1984 : f32 to vector<8x256xf32>
    %1986 = arith.mulf %1858, %1985 : vector<8x256xf32>
    %1987 = arith.addf %1939, %1986 : vector<8x256xf32>
    %c42_197 = arith.constant 42 : index
    %1988 = memref.load %arg4[%c42_197] : memref<192xf32, #tpu.memory_space<smem>>
    %1989 = vector.broadcast %1988 : f32 to vector<8x256xf32>
    %1990 = arith.mulf %1858, %1989 : vector<8x256xf32>
    %1991 = arith.addf %1943, %1990 : vector<8x256xf32>
    %c46_198 = arith.constant 46 : index
    %1992 = memref.load %arg4[%c46_198] : memref<192xf32, #tpu.memory_space<smem>>
    %1993 = vector.broadcast %1992 : f32 to vector<8x256xf32>
    %1994 = arith.mulf %1858, %1993 : vector<8x256xf32>
    %1995 = arith.addf %1947, %1994 : vector<8x256xf32>
    %c3_199 = arith.constant 3 : index
    %1996 = memref.load %arg4[%c3_199] : memref<192xf32, #tpu.memory_space<smem>>
    %1997 = vector.broadcast %1996 : f32 to vector<8x256xf32>
    %1998 = arith.mulf %1863, %1997 : vector<8x256xf32>
    %1999 = arith.addf %1951, %1998 : vector<8x256xf32>
    %c7_200 = arith.constant 7 : index
    %2000 = memref.load %arg4[%c7_200] : memref<192xf32, #tpu.memory_space<smem>>
    %2001 = vector.broadcast %2000 : f32 to vector<8x256xf32>
    %2002 = arith.mulf %1863, %2001 : vector<8x256xf32>
    %2003 = arith.addf %1955, %2002 : vector<8x256xf32>
    %c11_201 = arith.constant 11 : index
    %2004 = memref.load %arg4[%c11_201] : memref<192xf32, #tpu.memory_space<smem>>
    %2005 = vector.broadcast %2004 : f32 to vector<8x256xf32>
    %2006 = arith.mulf %1863, %2005 : vector<8x256xf32>
    %2007 = arith.addf %1959, %2006 : vector<8x256xf32>
    %c15_202 = arith.constant 15 : index
    %2008 = memref.load %arg4[%c15_202] : memref<192xf32, #tpu.memory_space<smem>>
    %2009 = vector.broadcast %2008 : f32 to vector<8x256xf32>
    %2010 = arith.mulf %1863, %2009 : vector<8x256xf32>
    %2011 = arith.addf %1963, %2010 : vector<8x256xf32>
    %c19_203 = arith.constant 19 : index
    %2012 = memref.load %arg4[%c19_203] : memref<192xf32, #tpu.memory_space<smem>>
    %2013 = vector.broadcast %2012 : f32 to vector<8x256xf32>
    %2014 = arith.mulf %1863, %2013 : vector<8x256xf32>
    %2015 = arith.addf %1967, %2014 : vector<8x256xf32>
    %c23_204 = arith.constant 23 : index
    %2016 = memref.load %arg4[%c23_204] : memref<192xf32, #tpu.memory_space<smem>>
    %2017 = vector.broadcast %2016 : f32 to vector<8x256xf32>
    %2018 = arith.mulf %1863, %2017 : vector<8x256xf32>
    %2019 = arith.addf %1971, %2018 : vector<8x256xf32>
    %c27_205 = arith.constant 27 : index
    %2020 = memref.load %arg4[%c27_205] : memref<192xf32, #tpu.memory_space<smem>>
    %2021 = vector.broadcast %2020 : f32 to vector<8x256xf32>
    %2022 = arith.mulf %1863, %2021 : vector<8x256xf32>
    %2023 = arith.addf %1975, %2022 : vector<8x256xf32>
    %c31_206 = arith.constant 31 : index
    %2024 = memref.load %arg4[%c31_206] : memref<192xf32, #tpu.memory_space<smem>>
    %2025 = vector.broadcast %2024 : f32 to vector<8x256xf32>
    %2026 = arith.mulf %1863, %2025 : vector<8x256xf32>
    %2027 = arith.addf %1979, %2026 : vector<8x256xf32>
    %c35_207 = arith.constant 35 : index
    %2028 = memref.load %arg4[%c35_207] : memref<192xf32, #tpu.memory_space<smem>>
    %2029 = vector.broadcast %2028 : f32 to vector<8x256xf32>
    %2030 = arith.mulf %1863, %2029 : vector<8x256xf32>
    %2031 = arith.addf %1983, %2030 : vector<8x256xf32>
    %c39_208 = arith.constant 39 : index
    %2032 = memref.load %arg4[%c39_208] : memref<192xf32, #tpu.memory_space<smem>>
    %2033 = vector.broadcast %2032 : f32 to vector<8x256xf32>
    %2034 = arith.mulf %1863, %2033 : vector<8x256xf32>
    %2035 = arith.addf %1987, %2034 : vector<8x256xf32>
    %c43_209 = arith.constant 43 : index
    %2036 = memref.load %arg4[%c43_209] : memref<192xf32, #tpu.memory_space<smem>>
    %2037 = vector.broadcast %2036 : f32 to vector<8x256xf32>
    %2038 = arith.mulf %1863, %2037 : vector<8x256xf32>
    %2039 = arith.addf %1991, %2038 : vector<8x256xf32>
    %c47_210 = arith.constant 47 : index
    %2040 = memref.load %arg4[%c47_210] : memref<192xf32, #tpu.memory_space<smem>>
    %2041 = vector.broadcast %2040 : f32 to vector<8x256xf32>
    %2042 = arith.mulf %1863, %2041 : vector<8x256xf32>
    %2043 = arith.addf %1995, %2042 : vector<8x256xf32>
    %c1_211 = arith.constant 1 : index
    %c0_212 = arith.constant 0 : index
    %c0_213 = arith.constant 0 : index
    %2044 = vector.load %arg7[%c1_211, %c0_212, %c0_213] : memref<4x8x256xf32, #tpu.memory_space<vmem>>, vector<1x8x256xf32>
    %2045 = vector.shape_cast %2044 : vector<1x8x256xf32> to vector<8x256xf32>
    %c255_i32_214 = arith.constant 255 : i32
    %2046 = tpu.dynamic_rotate %1848 by %c255_i32_214 dim 1 : vector<8x256xf32>, i32 -> vector<8x256xf32>
    %2047 = arith.mulf %2046, %2045 : vector<8x256xf32>
    %c60_215 = arith.constant 60 : index
    %2048 = memref.load %arg4[%c60_215] : memref<192xf32, #tpu.memory_space<smem>>
    %2049 = vector.broadcast %2048 : f32 to vector<8x256xf32>
    %2050 = arith.mulf %2047, %2049 : vector<8x256xf32>
    %2051 = arith.addf %2011, %2050 : vector<8x256xf32>
    %c64_216 = arith.constant 64 : index
    %2052 = memref.load %arg4[%c64_216] : memref<192xf32, #tpu.memory_space<smem>>
    %2053 = vector.broadcast %2052 : f32 to vector<8x256xf32>
    %2054 = arith.mulf %2047, %2053 : vector<8x256xf32>
    %2055 = arith.addf %2015, %2054 : vector<8x256xf32>
    %c68_217 = arith.constant 68 : index
    %2056 = memref.load %arg4[%c68_217] : memref<192xf32, #tpu.memory_space<smem>>
    %2057 = vector.broadcast %2056 : f32 to vector<8x256xf32>
    %2058 = arith.mulf %2047, %2057 : vector<8x256xf32>
    %2059 = arith.addf %2019, %2058 : vector<8x256xf32>
    %c84_218 = arith.constant 84 : index
    %2060 = memref.load %arg4[%c84_218] : memref<192xf32, #tpu.memory_space<smem>>
    %2061 = vector.broadcast %2060 : f32 to vector<8x256xf32>
    %2062 = arith.mulf %2047, %2061 : vector<8x256xf32>
    %2063 = arith.addf %2035, %2062 : vector<8x256xf32>
    %c88_219 = arith.constant 88 : index
    %2064 = memref.load %arg4[%c88_219] : memref<192xf32, #tpu.memory_space<smem>>
    %2065 = vector.broadcast %2064 : f32 to vector<8x256xf32>
    %2066 = arith.mulf %2047, %2065 : vector<8x256xf32>
    %2067 = arith.addf %2039, %2066 : vector<8x256xf32>
    %c92_220 = arith.constant 92 : index
    %2068 = memref.load %arg4[%c92_220] : memref<192xf32, #tpu.memory_space<smem>>
    %2069 = vector.broadcast %2068 : f32 to vector<8x256xf32>
    %2070 = arith.mulf %2047, %2069 : vector<8x256xf32>
    %2071 = arith.addf %2043, %2070 : vector<8x256xf32>
    %c255_i32_221 = arith.constant 255 : i32
    %2072 = tpu.dynamic_rotate %1853 by %c255_i32_221 dim 1 : vector<8x256xf32>, i32 -> vector<8x256xf32>
    %2073 = arith.mulf %2072, %2045 : vector<8x256xf32>
    %c61_222 = arith.constant 61 : index
    %2074 = memref.load %arg4[%c61_222] : memref<192xf32, #tpu.memory_space<smem>>
    %2075 = vector.broadcast %2074 : f32 to vector<8x256xf32>
    %2076 = arith.mulf %2073, %2075 : vector<8x256xf32>
    %2077 = arith.addf %2051, %2076 : vector<8x256xf32>
    %c65_223 = arith.constant 65 : index
    %2078 = memref.load %arg4[%c65_223] : memref<192xf32, #tpu.memory_space<smem>>
    %2079 = vector.broadcast %2078 : f32 to vector<8x256xf32>
    %2080 = arith.mulf %2073, %2079 : vector<8x256xf32>
    %2081 = arith.addf %2055, %2080 : vector<8x256xf32>
    %c69_224 = arith.constant 69 : index
    %2082 = memref.load %arg4[%c69_224] : memref<192xf32, #tpu.memory_space<smem>>
    %2083 = vector.broadcast %2082 : f32 to vector<8x256xf32>
    %2084 = arith.mulf %2073, %2083 : vector<8x256xf32>
    %2085 = arith.addf %2059, %2084 : vector<8x256xf32>
    %c85_225 = arith.constant 85 : index
    %2086 = memref.load %arg4[%c85_225] : memref<192xf32, #tpu.memory_space<smem>>
    %2087 = vector.broadcast %2086 : f32 to vector<8x256xf32>
    %2088 = arith.mulf %2073, %2087 : vector<8x256xf32>
    %2089 = arith.addf %2063, %2088 : vector<8x256xf32>
    %c89_226 = arith.constant 89 : index
    %2090 = memref.load %arg4[%c89_226] : memref<192xf32, #tpu.memory_space<smem>>
    %2091 = vector.broadcast %2090 : f32 to vector<8x256xf32>
    %2092 = arith.mulf %2073, %2091 : vector<8x256xf32>
    %2093 = arith.addf %2067, %2092 : vector<8x256xf32>
    %c93_227 = arith.constant 93 : index
    %2094 = memref.load %arg4[%c93_227] : memref<192xf32, #tpu.memory_space<smem>>
    %2095 = vector.broadcast %2094 : f32 to vector<8x256xf32>
    %2096 = arith.mulf %2073, %2095 : vector<8x256xf32>
    %2097 = arith.addf %2071, %2096 : vector<8x256xf32>
    %c255_i32_228 = arith.constant 255 : i32
    %2098 = tpu.dynamic_rotate %1858 by %c255_i32_228 dim 1 : vector<8x256xf32>, i32 -> vector<8x256xf32>
    %2099 = arith.mulf %2098, %2045 : vector<8x256xf32>
    %c62_229 = arith.constant 62 : index
    %2100 = memref.load %arg4[%c62_229] : memref<192xf32, #tpu.memory_space<smem>>
    %2101 = vector.broadcast %2100 : f32 to vector<8x256xf32>
    %2102 = arith.mulf %2099, %2101 : vector<8x256xf32>
    %2103 = arith.addf %2077, %2102 : vector<8x256xf32>
    %c66_230 = arith.constant 66 : index
    %2104 = memref.load %arg4[%c66_230] : memref<192xf32, #tpu.memory_space<smem>>
    %2105 = vector.broadcast %2104 : f32 to vector<8x256xf32>
    %2106 = arith.mulf %2099, %2105 : vector<8x256xf32>
    %2107 = arith.addf %2081, %2106 : vector<8x256xf32>
    %c70_231 = arith.constant 70 : index
    %2108 = memref.load %arg4[%c70_231] : memref<192xf32, #tpu.memory_space<smem>>
    %2109 = vector.broadcast %2108 : f32 to vector<8x256xf32>
    %2110 = arith.mulf %2099, %2109 : vector<8x256xf32>
    %2111 = arith.addf %2085, %2110 : vector<8x256xf32>
    %c86_232 = arith.constant 86 : index
    %2112 = memref.load %arg4[%c86_232] : memref<192xf32, #tpu.memory_space<smem>>
    %2113 = vector.broadcast %2112 : f32 to vector<8x256xf32>
    %2114 = arith.mulf %2099, %2113 : vector<8x256xf32>
    %2115 = arith.addf %2089, %2114 : vector<8x256xf32>
    %c90_233 = arith.constant 90 : index
    %2116 = memref.load %arg4[%c90_233] : memref<192xf32, #tpu.memory_space<smem>>
    %2117 = vector.broadcast %2116 : f32 to vector<8x256xf32>
    %2118 = arith.mulf %2099, %2117 : vector<8x256xf32>
    %2119 = arith.addf %2093, %2118 : vector<8x256xf32>
    %c94_234 = arith.constant 94 : index
    %2120 = memref.load %arg4[%c94_234] : memref<192xf32, #tpu.memory_space<smem>>
    %2121 = vector.broadcast %2120 : f32 to vector<8x256xf32>
    %2122 = arith.mulf %2099, %2121 : vector<8x256xf32>
    %2123 = arith.addf %2097, %2122 : vector<8x256xf32>
    %c255_i32_235 = arith.constant 255 : i32
    %2124 = tpu.dynamic_rotate %1863 by %c255_i32_235 dim 1 : vector<8x256xf32>, i32 -> vector<8x256xf32>
    %2125 = arith.mulf %2124, %2045 : vector<8x256xf32>
    %c63_236 = arith.constant 63 : index
    %2126 = memref.load %arg4[%c63_236] : memref<192xf32, #tpu.memory_space<smem>>
    %2127 = vector.broadcast %2126 : f32 to vector<8x256xf32>
    %2128 = arith.mulf %2125, %2127 : vector<8x256xf32>
    %2129 = arith.addf %2103, %2128 : vector<8x256xf32>
    %c67_237 = arith.constant 67 : index
    %2130 = memref.load %arg4[%c67_237] : memref<192xf32, #tpu.memory_space<smem>>
    %2131 = vector.broadcast %2130 : f32 to vector<8x256xf32>
    %2132 = arith.mulf %2125, %2131 : vector<8x256xf32>
    %2133 = arith.addf %2107, %2132 : vector<8x256xf32>
    %c71_238 = arith.constant 71 : index
    %2134 = memref.load %arg4[%c71_238] : memref<192xf32, #tpu.memory_space<smem>>
    %2135 = vector.broadcast %2134 : f32 to vector<8x256xf32>
    %2136 = arith.mulf %2125, %2135 : vector<8x256xf32>
    %2137 = arith.addf %2111, %2136 : vector<8x256xf32>
    %c87_239 = arith.constant 87 : index
    %2138 = memref.load %arg4[%c87_239] : memref<192xf32, #tpu.memory_space<smem>>
    %2139 = vector.broadcast %2138 : f32 to vector<8x256xf32>
    %2140 = arith.mulf %2125, %2139 : vector<8x256xf32>
    %2141 = arith.addf %2115, %2140 : vector<8x256xf32>
    %c91_240 = arith.constant 91 : index
    %2142 = memref.load %arg4[%c91_240] : memref<192xf32, #tpu.memory_space<smem>>
    %2143 = vector.broadcast %2142 : f32 to vector<8x256xf32>
    %2144 = arith.mulf %2125, %2143 : vector<8x256xf32>
    %2145 = arith.addf %2119, %2144 : vector<8x256xf32>
    %c95_241 = arith.constant 95 : index
    %2146 = memref.load %arg4[%c95_241] : memref<192xf32, #tpu.memory_space<smem>>
    %2147 = vector.broadcast %2146 : f32 to vector<8x256xf32>
    %2148 = arith.mulf %2125, %2147 : vector<8x256xf32>
    %2149 = arith.addf %2123, %2148 : vector<8x256xf32>
    %c2_242 = arith.constant 2 : index
    %c0_243 = arith.constant 0 : index
    %c0_244 = arith.constant 0 : index
    %2150 = vector.load %arg7[%c2_242, %c0_243, %c0_244] : memref<4x8x256xf32, #tpu.memory_space<vmem>>, vector<1x8x256xf32>
    %2151 = vector.shape_cast %2150 : vector<1x8x256xf32> to vector<8x256xf32>
    %c240_i32_245 = arith.constant 240 : i32
    %2152 = tpu.dynamic_rotate %1848 by %c240_i32_245 dim 1 : vector<8x256xf32>, i32 -> vector<8x256xf32>
    %2153 = arith.mulf %2152, %2151 : vector<8x256xf32>
    %c120_246 = arith.constant 120 : index
    %2154 = memref.load %arg4[%c120_246] : memref<192xf32, #tpu.memory_space<smem>>
    %2155 = vector.broadcast %2154 : f32 to vector<8x256xf32>
    %2156 = arith.mulf %2153, %2155 : vector<8x256xf32>
    %2157 = arith.addf %2023, %2156 : vector<8x256xf32>
    %c124_247 = arith.constant 124 : index
    %2158 = memref.load %arg4[%c124_247] : memref<192xf32, #tpu.memory_space<smem>>
    %2159 = vector.broadcast %2158 : f32 to vector<8x256xf32>
    %2160 = arith.mulf %2153, %2159 : vector<8x256xf32>
    %2161 = arith.addf %2027, %2160 : vector<8x256xf32>
    %c128_248 = arith.constant 128 : index
    %2162 = memref.load %arg4[%c128_248] : memref<192xf32, #tpu.memory_space<smem>>
    %2163 = vector.broadcast %2162 : f32 to vector<8x256xf32>
    %2164 = arith.mulf %2153, %2163 : vector<8x256xf32>
    %2165 = arith.addf %2031, %2164 : vector<8x256xf32>
    %c132_249 = arith.constant 132 : index
    %2166 = memref.load %arg4[%c132_249] : memref<192xf32, #tpu.memory_space<smem>>
    %2167 = vector.broadcast %2166 : f32 to vector<8x256xf32>
    %2168 = arith.mulf %2153, %2167 : vector<8x256xf32>
    %2169 = arith.addf %2141, %2168 : vector<8x256xf32>
    %c136_250 = arith.constant 136 : index
    %2170 = memref.load %arg4[%c136_250] : memref<192xf32, #tpu.memory_space<smem>>
    %2171 = vector.broadcast %2170 : f32 to vector<8x256xf32>
    %2172 = arith.mulf %2153, %2171 : vector<8x256xf32>
    %2173 = arith.addf %2145, %2172 : vector<8x256xf32>
    %c140_251 = arith.constant 140 : index
    %2174 = memref.load %arg4[%c140_251] : memref<192xf32, #tpu.memory_space<smem>>
    %2175 = vector.broadcast %2174 : f32 to vector<8x256xf32>
    %2176 = arith.mulf %2153, %2175 : vector<8x256xf32>
    %2177 = arith.addf %2149, %2176 : vector<8x256xf32>
    %c240_i32_252 = arith.constant 240 : i32
    %2178 = tpu.dynamic_rotate %1853 by %c240_i32_252 dim 1 : vector<8x256xf32>, i32 -> vector<8x256xf32>
    %2179 = arith.mulf %2178, %2151 : vector<8x256xf32>
    %c121_253 = arith.constant 121 : index
    %2180 = memref.load %arg4[%c121_253] : memref<192xf32, #tpu.memory_space<smem>>
    %2181 = vector.broadcast %2180 : f32 to vector<8x256xf32>
    %2182 = arith.mulf %2179, %2181 : vector<8x256xf32>
    %2183 = arith.addf %2157, %2182 : vector<8x256xf32>
    %c125_254 = arith.constant 125 : index
    %2184 = memref.load %arg4[%c125_254] : memref<192xf32, #tpu.memory_space<smem>>
    %2185 = vector.broadcast %2184 : f32 to vector<8x256xf32>
    %2186 = arith.mulf %2179, %2185 : vector<8x256xf32>
    %2187 = arith.addf %2161, %2186 : vector<8x256xf32>
    %c129_255 = arith.constant 129 : index
    %2188 = memref.load %arg4[%c129_255] : memref<192xf32, #tpu.memory_space<smem>>
    %2189 = vector.broadcast %2188 : f32 to vector<8x256xf32>
    %2190 = arith.mulf %2179, %2189 : vector<8x256xf32>
    %2191 = arith.addf %2165, %2190 : vector<8x256xf32>
    %c133_256 = arith.constant 133 : index
    %2192 = memref.load %arg4[%c133_256] : memref<192xf32, #tpu.memory_space<smem>>
    %2193 = vector.broadcast %2192 : f32 to vector<8x256xf32>
    %2194 = arith.mulf %2179, %2193 : vector<8x256xf32>
    %2195 = arith.addf %2169, %2194 : vector<8x256xf32>
    %c137_257 = arith.constant 137 : index
    %2196 = memref.load %arg4[%c137_257] : memref<192xf32, #tpu.memory_space<smem>>
    %2197 = vector.broadcast %2196 : f32 to vector<8x256xf32>
    %2198 = arith.mulf %2179, %2197 : vector<8x256xf32>
    %2199 = arith.addf %2173, %2198 : vector<8x256xf32>
    %c141_258 = arith.constant 141 : index
    %2200 = memref.load %arg4[%c141_258] : memref<192xf32, #tpu.memory_space<smem>>
    %2201 = vector.broadcast %2200 : f32 to vector<8x256xf32>
    %2202 = arith.mulf %2179, %2201 : vector<8x256xf32>
    %2203 = arith.addf %2177, %2202 : vector<8x256xf32>
    %c240_i32_259 = arith.constant 240 : i32
    %2204 = tpu.dynamic_rotate %1858 by %c240_i32_259 dim 1 : vector<8x256xf32>, i32 -> vector<8x256xf32>
    %2205 = arith.mulf %2204, %2151 : vector<8x256xf32>
    %c122_260 = arith.constant 122 : index
    %2206 = memref.load %arg4[%c122_260] : memref<192xf32, #tpu.memory_space<smem>>
    %2207 = vector.broadcast %2206 : f32 to vector<8x256xf32>
    %2208 = arith.mulf %2205, %2207 : vector<8x256xf32>
    %2209 = arith.addf %2183, %2208 : vector<8x256xf32>
    %c126_261 = arith.constant 126 : index
    %2210 = memref.load %arg4[%c126_261] : memref<192xf32, #tpu.memory_space<smem>>
    %2211 = vector.broadcast %2210 : f32 to vector<8x256xf32>
    %2212 = arith.mulf %2205, %2211 : vector<8x256xf32>
    %2213 = arith.addf %2187, %2212 : vector<8x256xf32>
    %c130_262 = arith.constant 130 : index
    %2214 = memref.load %arg4[%c130_262] : memref<192xf32, #tpu.memory_space<smem>>
    %2215 = vector.broadcast %2214 : f32 to vector<8x256xf32>
    %2216 = arith.mulf %2205, %2215 : vector<8x256xf32>
    %2217 = arith.addf %2191, %2216 : vector<8x256xf32>
    %c134_263 = arith.constant 134 : index
    %2218 = memref.load %arg4[%c134_263] : memref<192xf32, #tpu.memory_space<smem>>
    %2219 = vector.broadcast %2218 : f32 to vector<8x256xf32>
    %2220 = arith.mulf %2205, %2219 : vector<8x256xf32>
    %2221 = arith.addf %2195, %2220 : vector<8x256xf32>
    %c138_264 = arith.constant 138 : index
    %2222 = memref.load %arg4[%c138_264] : memref<192xf32, #tpu.memory_space<smem>>
    %2223 = vector.broadcast %2222 : f32 to vector<8x256xf32>
    %2224 = arith.mulf %2205, %2223 : vector<8x256xf32>
    %2225 = arith.addf %2199, %2224 : vector<8x256xf32>
    %c142_265 = arith.constant 142 : index
    %2226 = memref.load %arg4[%c142_265] : memref<192xf32, #tpu.memory_space<smem>>
    %2227 = vector.broadcast %2226 : f32 to vector<8x256xf32>
    %2228 = arith.mulf %2205, %2227 : vector<8x256xf32>
    %2229 = arith.addf %2203, %2228 : vector<8x256xf32>
    %c240_i32_266 = arith.constant 240 : i32
    %2230 = tpu.dynamic_rotate %1863 by %c240_i32_266 dim 1 : vector<8x256xf32>, i32 -> vector<8x256xf32>
    %2231 = arith.mulf %2230, %2151 : vector<8x256xf32>
    %c123_267 = arith.constant 123 : index
    %2232 = memref.load %arg4[%c123_267] : memref<192xf32, #tpu.memory_space<smem>>
    %2233 = vector.broadcast %2232 : f32 to vector<8x256xf32>
    %2234 = arith.mulf %2231, %2233 : vector<8x256xf32>
    %2235 = arith.addf %2209, %2234 : vector<8x256xf32>
    %c127_268 = arith.constant 127 : index
    %2236 = memref.load %arg4[%c127_268] : memref<192xf32, #tpu.memory_space<smem>>
    %2237 = vector.broadcast %2236 : f32 to vector<8x256xf32>
    %2238 = arith.mulf %2231, %2237 : vector<8x256xf32>
    %2239 = arith.addf %2213, %2238 : vector<8x256xf32>
    %c131_269 = arith.constant 131 : index
    %2240 = memref.load %arg4[%c131_269] : memref<192xf32, #tpu.memory_space<smem>>
    %2241 = vector.broadcast %2240 : f32 to vector<8x256xf32>
    %2242 = arith.mulf %2231, %2241 : vector<8x256xf32>
    %2243 = arith.addf %2217, %2242 : vector<8x256xf32>
    %c135_270 = arith.constant 135 : index
    %2244 = memref.load %arg4[%c135_270] : memref<192xf32, #tpu.memory_space<smem>>
    %2245 = vector.broadcast %2244 : f32 to vector<8x256xf32>
    %2246 = arith.mulf %2231, %2245 : vector<8x256xf32>
    %2247 = arith.addf %2221, %2246 : vector<8x256xf32>
    %c139_271 = arith.constant 139 : index
    %2248 = memref.load %arg4[%c139_271] : memref<192xf32, #tpu.memory_space<smem>>
    %2249 = vector.broadcast %2248 : f32 to vector<8x256xf32>
    %2250 = arith.mulf %2231, %2249 : vector<8x256xf32>
    %2251 = arith.addf %2225, %2250 : vector<8x256xf32>
    %c143_272 = arith.constant 143 : index
    %2252 = memref.load %arg4[%c143_272] : memref<192xf32, #tpu.memory_space<smem>>
    %2253 = vector.broadcast %2252 : f32 to vector<8x256xf32>
    %2254 = arith.mulf %2231, %2253 : vector<8x256xf32>
    %2255 = arith.addf %2229, %2254 : vector<8x256xf32>
    %c3_273 = arith.constant 3 : index
    %c0_274 = arith.constant 0 : index
    %c0_275 = arith.constant 0 : index
    %2256 = vector.load %arg7[%c3_273, %c0_274, %c0_275] : memref<4x8x256xf32, #tpu.memory_space<vmem>>, vector<1x8x256xf32>
    %2257 = vector.shape_cast %2256 : vector<1x8x256xf32> to vector<8x256xf32>
    %c239_i32_276 = arith.constant 239 : i32
    %2258 = tpu.dynamic_rotate %1848 by %c239_i32_276 dim 1 : vector<8x256xf32>, i32 -> vector<8x256xf32>
    %2259 = arith.mulf %2258, %2257 : vector<8x256xf32>
    %c180_277 = arith.constant 180 : index
    %2260 = memref.load %arg4[%c180_277] : memref<192xf32, #tpu.memory_space<smem>>
    %2261 = vector.broadcast %2260 : f32 to vector<8x256xf32>
    %2262 = arith.mulf %2259, %2261 : vector<8x256xf32>
    %2263 = arith.addf %2247, %2262 : vector<8x256xf32>
    %c184_278 = arith.constant 184 : index
    %2264 = memref.load %arg4[%c184_278] : memref<192xf32, #tpu.memory_space<smem>>
    %2265 = vector.broadcast %2264 : f32 to vector<8x256xf32>
    %2266 = arith.mulf %2259, %2265 : vector<8x256xf32>
    %2267 = arith.addf %2251, %2266 : vector<8x256xf32>
    %c188_279 = arith.constant 188 : index
    %2268 = memref.load %arg4[%c188_279] : memref<192xf32, #tpu.memory_space<smem>>
    %2269 = vector.broadcast %2268 : f32 to vector<8x256xf32>
    %2270 = arith.mulf %2259, %2269 : vector<8x256xf32>
    %2271 = arith.addf %2255, %2270 : vector<8x256xf32>
    %c239_i32_280 = arith.constant 239 : i32
    %2272 = tpu.dynamic_rotate %1853 by %c239_i32_280 dim 1 : vector<8x256xf32>, i32 -> vector<8x256xf32>
    %2273 = arith.mulf %2272, %2257 : vector<8x256xf32>
    %c181_281 = arith.constant 181 : index
    %2274 = memref.load %arg4[%c181_281] : memref<192xf32, #tpu.memory_space<smem>>
    %2275 = vector.broadcast %2274 : f32 to vector<8x256xf32>
    %2276 = arith.mulf %2273, %2275 : vector<8x256xf32>
    %2277 = arith.addf %2263, %2276 : vector<8x256xf32>
    %c185_282 = arith.constant 185 : index
    %2278 = memref.load %arg4[%c185_282] : memref<192xf32, #tpu.memory_space<smem>>
    %2279 = vector.broadcast %2278 : f32 to vector<8x256xf32>
    %2280 = arith.mulf %2273, %2279 : vector<8x256xf32>
    %2281 = arith.addf %2267, %2280 : vector<8x256xf32>
    %c189_283 = arith.constant 189 : index
    %2282 = memref.load %arg4[%c189_283] : memref<192xf32, #tpu.memory_space<smem>>
    %2283 = vector.broadcast %2282 : f32 to vector<8x256xf32>
    %2284 = arith.mulf %2273, %2283 : vector<8x256xf32>
    %2285 = arith.addf %2271, %2284 : vector<8x256xf32>
    %c239_i32_284 = arith.constant 239 : i32
    %2286 = tpu.dynamic_rotate %1858 by %c239_i32_284 dim 1 : vector<8x256xf32>, i32 -> vector<8x256xf32>
    %2287 = arith.mulf %2286, %2257 : vector<8x256xf32>
    %c182_285 = arith.constant 182 : index
    %2288 = memref.load %arg4[%c182_285] : memref<192xf32, #tpu.memory_space<smem>>
    %2289 = vector.broadcast %2288 : f32 to vector<8x256xf32>
    %2290 = arith.mulf %2287, %2289 : vector<8x256xf32>
    %2291 = arith.addf %2277, %2290 : vector<8x256xf32>
    %c186_286 = arith.constant 186 : index
    %2292 = memref.load %arg4[%c186_286] : memref<192xf32, #tpu.memory_space<smem>>
    %2293 = vector.broadcast %2292 : f32 to vector<8x256xf32>
    %2294 = arith.mulf %2287, %2293 : vector<8x256xf32>
    %2295 = arith.addf %2281, %2294 : vector<8x256xf32>
    %c190_287 = arith.constant 190 : index
    %2296 = memref.load %arg4[%c190_287] : memref<192xf32, #tpu.memory_space<smem>>
    %2297 = vector.broadcast %2296 : f32 to vector<8x256xf32>
    %2298 = arith.mulf %2287, %2297 : vector<8x256xf32>
    %2299 = arith.addf %2285, %2298 : vector<8x256xf32>
    %c239_i32_288 = arith.constant 239 : i32
    %2300 = tpu.dynamic_rotate %1863 by %c239_i32_288 dim 1 : vector<8x256xf32>, i32 -> vector<8x256xf32>
    %2301 = arith.mulf %2300, %2257 : vector<8x256xf32>
    %c183_289 = arith.constant 183 : index
    %2302 = memref.load %arg4[%c183_289] : memref<192xf32, #tpu.memory_space<smem>>
    %2303 = vector.broadcast %2302 : f32 to vector<8x256xf32>
    %2304 = arith.mulf %2301, %2303 : vector<8x256xf32>
    %2305 = arith.addf %2291, %2304 : vector<8x256xf32>
    %c187_290 = arith.constant 187 : index
    %2306 = memref.load %arg4[%c187_290] : memref<192xf32, #tpu.memory_space<smem>>
    %2307 = vector.broadcast %2306 : f32 to vector<8x256xf32>
    %2308 = arith.mulf %2301, %2307 : vector<8x256xf32>
    %2309 = arith.addf %2295, %2308 : vector<8x256xf32>
    %c191_291 = arith.constant 191 : index
    %2310 = memref.load %arg4[%c191_291] : memref<192xf32, #tpu.memory_space<smem>>
    %2311 = vector.broadcast %2310 : f32 to vector<8x256xf32>
    %2312 = arith.mulf %2301, %2311 : vector<8x256xf32>
    %2313 = arith.addf %2299, %2312 : vector<8x256xf32>
    %c0_292 = arith.constant 0 : index
    %2314 = memref.load %arg5[%c0_292] : memref<3xf32, #tpu.memory_space<smem>>
    %2315 = vector.broadcast %2314 : f32 to vector<8x256xf32>
    %2316 = arith.addf %1999, %2315 : vector<8x256xf32>
    %cst_293 = arith.constant 0.000000e+00 : f32
    %2317 = vector.broadcast %cst_293 : f32 to vector<8x256xf32>
    %2318 = arith.maximumf %2316, %2317 : vector<8x256xf32>
    %c0_294 = arith.constant 0 : index
    %c0_295 = arith.constant 0 : index
    %c0_296 = arith.constant 0 : index
    %2319 = vector.load %arg8[%c0_294, %c0_295, %c0_296] : memref<12x8x256xf32, #tpu.memory_space<vmem>>, vector<1x8x256xf32>
    %2320 = vector.shape_cast %2319 : vector<1x8x256xf32> to vector<8x256xf32>
    %2321 = vector.shape_cast %2318 : vector<8x256xf32> to vector<1x8x256xf32>
    tpu.vector_store %arg8[%c0_294, %c0_295, %c0_296], %2321 {strides = array<i32>} : memref<12x8x256xf32, #tpu.memory_space<vmem>>, vector<1x8x256xf32>,
    %c1_297 = arith.constant 1 : index
    %2322 = memref.load %arg5[%c1_297] : memref<3xf32, #tpu.memory_space<smem>>
    %2323 = vector.broadcast %2322 : f32 to vector<8x256xf32>
    %2324 = arith.addf %2003, %2323 : vector<8x256xf32>
    %cst_298 = arith.constant 0.000000e+00 : f32
    %2325 = vector.broadcast %cst_298 : f32 to vector<8x256xf32>
    %2326 = arith.maximumf %2324, %2325 : vector<8x256xf32>
    %c1_299 = arith.constant 1 : index
    %c0_300 = arith.constant 0 : index
    %c0_301 = arith.constant 0 : index
    %2327 = vector.load %arg8[%c1_299, %c0_300, %c0_301] : memref<12x8x256xf32, #tpu.memory_space<vmem>>, vector<1x8x256xf32>
    %2328 = vector.shape_cast %2327 : vector<1x8x256xf32> to vector<8x256xf32>
    %2329 = vector.shape_cast %2326 : vector<8x256xf32> to vector<1x8x256xf32>
    tpu.vector_store %arg8[%c1_299, %c0_300, %c0_301], %2329 {strides = array<i32>} : memref<12x8x256xf32, #tpu.memory_space<vmem>>, vector<1x8x256xf32>,
    %c2_302 = arith.constant 2 : index
    %2330 = memref.load %arg5[%c2_302] : memref<3xf32, #tpu.memory_space<smem>>
    %2331 = vector.broadcast %2330 : f32 to vector<8x256xf32>
    %2332 = arith.addf %2007, %2331 : vector<8x256xf32>
    %cst_303 = arith.constant 0.000000e+00 : f32
    %2333 = vector.broadcast %cst_303 : f32 to vector<8x256xf32>
    %2334 = arith.maximumf %2332, %2333 : vector<8x256xf32>
    %c2_304 = arith.constant 2 : index
    %c0_305 = arith.constant 0 : index
    %c0_306 = arith.constant 0 : index
    %2335 = vector.load %arg8[%c2_304, %c0_305, %c0_306] : memref<12x8x256xf32, #tpu.memory_space<vmem>>, vector<1x8x256xf32>
    %2336 = vector.shape_cast %2335 : vector<1x8x256xf32> to vector<8x256xf32>
    %2337 = vector.shape_cast %2334 : vector<8x256xf32> to vector<1x8x256xf32>
    tpu.vector_store %arg8[%c2_304, %c0_305, %c0_306], %2337 {strides = array<i32>} : memref<12x8x256xf32, #tpu.memory_space<vmem>>, vector<1x8x256xf32>,
    %c0_307 = arith.constant 0 : index
    %2338 = memref.load %arg5[%c0_307] : memref<3xf32, #tpu.memory_space<smem>>
    %2339 = vector.broadcast %2338 : f32 to vector<8x256xf32>
    %2340 = arith.addf %2129, %2339 : vector<8x256xf32>
    %cst_308 = arith.constant 0.000000e+00 : f32
    %2341 = vector.broadcast %cst_308 : f32 to vector<8x256xf32>
    %2342 = arith.maximumf %2340, %2341 : vector<8x256xf32>
    %c3_309 = arith.constant 3 : index
    %c0_310 = arith.constant 0 : index
    %c0_311 = arith.constant 0 : index
    %2343 = vector.load %arg8[%c3_309, %c0_310, %c0_311] : memref<12x8x256xf32, #tpu.memory_space<vmem>>, vector<1x8x256xf32>
    %2344 = vector.shape_cast %2343 : vector<1x8x256xf32> to vector<8x256xf32>
    %2345 = vector.shape_cast %2342 : vector<8x256xf32> to vector<1x8x256xf32>
    tpu.vector_store %arg8[%c3_309, %c0_310, %c0_311], %2345 {strides = array<i32>} : memref<12x8x256xf32, #tpu.memory_space<vmem>>, vector<1x8x256xf32>,
    %c1_312 = arith.constant 1 : index
    %2346 = memref.load %arg5[%c1_312] : memref<3xf32, #tpu.memory_space<smem>>
    %2347 = vector.broadcast %2346 : f32 to vector<8x256xf32>
    %2348 = arith.addf %2133, %2347 : vector<8x256xf32>
    %cst_313 = arith.constant 0.000000e+00 : f32
    %2349 = vector.broadcast %cst_313 : f32 to vector<8x256xf32>
    %2350 = arith.maximumf %2348, %2349 : vector<8x256xf32>
    %c4_314 = arith.constant 4 : index
    %c0_315 = arith.constant 0 : index
    %c0_316 = arith.constant 0 : index
    %2351 = vector.load %arg8[%c4_314, %c0_315, %c0_316] : memref<12x8x256xf32, #tpu.memory_space<vmem>>, vector<1x8x256xf32>
    %2352 = vector.shape_cast %2351 : vector<1x8x256xf32> to vector<8x256xf32>
    %2353 = vector.shape_cast %2350 : vector<8x256xf32> to vector<1x8x256xf32>
    tpu.vector_store %arg8[%c4_314, %c0_315, %c0_316], %2353 {strides = array<i32>} : memref<12x8x256xf32, #tpu.memory_space<vmem>>, vector<1x8x256xf32>,
    %c2_317 = arith.constant 2 : index
    %2354 = memref.load %arg5[%c2_317] : memref<3xf32, #tpu.memory_space<smem>>
    %2355 = vector.broadcast %2354 : f32 to vector<8x256xf32>
    %2356 = arith.addf %2137, %2355 : vector<8x256xf32>
    %cst_318 = arith.constant 0.000000e+00 : f32
    %2357 = vector.broadcast %cst_318 : f32 to vector<8x256xf32>
    %2358 = arith.maximumf %2356, %2357 : vector<8x256xf32>
    %c5_319 = arith.constant 5 : index
    %c0_320 = arith.constant 0 : index
    %c0_321 = arith.constant 0 : index
    %2359 = vector.load %arg8[%c5_319, %c0_320, %c0_321] : memref<12x8x256xf32, #tpu.memory_space<vmem>>, vector<1x8x256xf32>
    %2360 = vector.shape_cast %2359 : vector<1x8x256xf32> to vector<8x256xf32>
    %2361 = vector.shape_cast %2358 : vector<8x256xf32> to vector<1x8x256xf32>
    tpu.vector_store %arg8[%c5_319, %c0_320, %c0_321], %2361 {strides = array<i32>} : memref<12x8x256xf32, #tpu.memory_space<vmem>>, vector<1x8x256xf32>,
    %c0_322 = arith.constant 0 : index
    %2362 = memref.load %arg5[%c0_322] : memref<3xf32, #tpu.memory_space<smem>>
    %2363 = vector.broadcast %2362 : f32 to vector<8x256xf32>
    %2364 = arith.addf %2235, %2363 : vector<8x256xf32>
    %cst_323 = arith.constant 0.000000e+00 : f32
    %2365 = vector.broadcast %cst_323 : f32 to vector<8x256xf32>
    %2366 = arith.maximumf %2364, %2365 : vector<8x256xf32>
    %c6_324 = arith.constant 6 : index
    %c0_325 = arith.constant 0 : index
    %c0_326 = arith.constant 0 : index
    %2367 = vector.load %arg8[%c6_324, %c0_325, %c0_326] : memref<12x8x256xf32, #tpu.memory_space<vmem>>, vector<1x8x256xf32>
    %2368 = vector.shape_cast %2367 : vector<1x8x256xf32> to vector<8x256xf32>
    %2369 = vector.shape_cast %2366 : vector<8x256xf32> to vector<1x8x256xf32>
    tpu.vector_store %arg8[%c6_324, %c0_325, %c0_326], %2369 {strides = array<i32>} : memref<12x8x256xf32, #tpu.memory_space<vmem>>, vector<1x8x256xf32>,
    %c1_327 = arith.constant 1 : index
    %2370 = memref.load %arg5[%c1_327] : memref<3xf32, #tpu.memory_space<smem>>
    %2371 = vector.broadcast %2370 : f32 to vector<8x256xf32>
    %2372 = arith.addf %2239, %2371 : vector<8x256xf32>
    %cst_328 = arith.constant 0.000000e+00 : f32
    %2373 = vector.broadcast %cst_328 : f32 to vector<8x256xf32>
    %2374 = arith.maximumf %2372, %2373 : vector<8x256xf32>
    %c7_329 = arith.constant 7 : index
    %c0_330 = arith.constant 0 : index
    %c0_331 = arith.constant 0 : index
    %2375 = vector.load %arg8[%c7_329, %c0_330, %c0_331] : memref<12x8x256xf32, #tpu.memory_space<vmem>>, vector<1x8x256xf32>
    %2376 = vector.shape_cast %2375 : vector<1x8x256xf32> to vector<8x256xf32>
    %2377 = vector.shape_cast %2374 : vector<8x256xf32> to vector<1x8x256xf32>
    tpu.vector_store %arg8[%c7_329, %c0_330, %c0_331], %2377 {strides = array<i32>} : memref<12x8x256xf32, #tpu.memory_space<vmem>>, vector<1x8x256xf32>,
    %c2_332 = arith.constant 2 : index
    %2378 = memref.load %arg5[%c2_332] : memref<3xf32, #tpu.memory_space<smem>>
    %2379 = vector.broadcast %2378 : f32 to vector<8x256xf32>
    %2380 = arith.addf %2243, %2379 : vector<8x256xf32>
    %cst_333 = arith.constant 0.000000e+00 : f32
    %2381 = vector.broadcast %cst_333 : f32 to vector<8x256xf32>
    %2382 = arith.maximumf %2380, %2381 : vector<8x256xf32>
    %c8_334 = arith.constant 8 : index
    %c0_335 = arith.constant 0 : index
    %c0_336 = arith.constant 0 : index
    %2383 = vector.load %arg8[%c8_334, %c0_335, %c0_336] : memref<12x8x256xf32, #tpu.memory_space<vmem>>, vector<1x8x256xf32>
    %2384 = vector.shape_cast %2383 : vector<1x8x256xf32> to vector<8x256xf32>
    %2385 = vector.shape_cast %2382 : vector<8x256xf32> to vector<1x8x256xf32>
    tpu.vector_store %arg8[%c8_334, %c0_335, %c0_336], %2385 {strides = array<i32>} : memref<12x8x256xf32, #tpu.memory_space<vmem>>, vector<1x8x256xf32>,
    %c0_337 = arith.constant 0 : index
    %2386 = memref.load %arg5[%c0_337] : memref<3xf32, #tpu.memory_space<smem>>
    %2387 = vector.broadcast %2386 : f32 to vector<8x256xf32>
    %2388 = arith.addf %2305, %2387 : vector<8x256xf32>
    %cst_338 = arith.constant 0.000000e+00 : f32
    %2389 = vector.broadcast %cst_338 : f32 to vector<8x256xf32>
    %2390 = arith.maximumf %2388, %2389 : vector<8x256xf32>
    %c9_339 = arith.constant 9 : index
    %c0_340 = arith.constant 0 : index
    %c0_341 = arith.constant 0 : index
    %2391 = vector.load %arg8[%c9_339, %c0_340, %c0_341] : memref<12x8x256xf32, #tpu.memory_space<vmem>>, vector<1x8x256xf32>
    %2392 = vector.shape_cast %2391 : vector<1x8x256xf32> to vector<8x256xf32>
    %2393 = vector.shape_cast %2390 : vector<8x256xf32> to vector<1x8x256xf32>
    tpu.vector_store %arg8[%c9_339, %c0_340, %c0_341], %2393 {strides = array<i32>} : memref<12x8x256xf32, #tpu.memory_space<vmem>>, vector<1x8x256xf32>,
    %c1_342 = arith.constant 1 : index
    %2394 = memref.load %arg5[%c1_342] : memref<3xf32, #tpu.memory_space<smem>>
    %2395 = vector.broadcast %2394 : f32 to vector<8x256xf32>
    %2396 = arith.addf %2309, %2395 : vector<8x256xf32>
    %cst_343 = arith.constant 0.000000e+00 : f32
    %2397 = vector.broadcast %cst_343 : f32 to vector<8x256xf32>
    %2398 = arith.maximumf %2396, %2397 : vector<8x256xf32>
    %c10_344 = arith.constant 10 : index
    %c0_345 = arith.constant 0 : index
    %c0_346 = arith.constant 0 : index
    %2399 = vector.load %arg8[%c10_344, %c0_345, %c0_346] : memref<12x8x256xf32, #tpu.memory_space<vmem>>, vector<1x8x256xf32>
    %2400 = vector.shape_cast %2399 : vector<1x8x256xf32> to vector<8x256xf32>
    %2401 = vector.shape_cast %2398 : vector<8x256xf32> to vector<1x8x256xf32>
    tpu.vector_store %arg8[%c10_344, %c0_345, %c0_346], %2401 {strides = array<i32>} : memref<12x8x256xf32, #tpu.memory_space<vmem>>, vector<1x8x256xf32>,
    %c2_347 = arith.constant 2 : index
    %2402 = memref.load %arg5[%c2_347] : memref<3xf32, #tpu.memory_space<smem>>
    %2403 = vector.broadcast %2402 : f32 to vector<8x256xf32>
    %2404 = arith.addf %2313, %2403 : vector<8x256xf32>
    %cst_348 = arith.constant 0.000000e+00 : f32
    %2405 = vector.broadcast %cst_348 : f32 to vector<8x256xf32>
    %2406 = arith.maximumf %2404, %2405 : vector<8x256xf32>
    %c11_349 = arith.constant 11 : index
    %c0_350 = arith.constant 0 : index
    %c0_351 = arith.constant 0 : index
    %2407 = vector.load %arg8[%c11_349, %c0_350, %c0_351] : memref<12x8x256xf32, #tpu.memory_space<vmem>>, vector<1x8x256xf32>
    %2408 = vector.shape_cast %2407 : vector<1x8x256xf32> to vector<8x256xf32>
    %2409 = vector.shape_cast %2406 : vector<8x256xf32> to vector<1x8x256xf32>
    tpu.vector_store %arg8[%c11_349, %c0_350, %c0_351], %2409 {strides = array<i32>} : memref<12x8x256xf32, #tpu.memory_space<vmem>>, vector<1x8x256xf32>,
    return
  }
  func.func @transform_0(%arg0: i32) -> (i32, i32, i32) {
    %c0_i32 = arith.constant 0 : i32
    %c0_i32_0 = arith.constant 0 : i32
    %c0_i32_1 = arith.constant 0 : i32
    return %c0_i32, %arg0, %c0_i32_0 : i32, i32, i32
  }
  func.func @transform_1(%arg0: i32) -> i32 {
    %c0_i32 = arith.constant 0 : i32
    %c0_i32_0 = arith.constant 0 : i32
    return %c0_i32 : i32
  }
  func.func @transform_2(%arg0: i32) -> i32 {
    %c0_i32 = arith.constant 0 : i32
    %c0_i32_0 = arith.constant 0 : i32
    return %c0_i32 : i32
  }
  func.func @transform_3(%arg0: i32) -> i32 {
    %c0_i32 = arith.constant 0 : i32
    %c0_i32_0 = arith.constant 0 : i32
    return %c0_i32 : i32
  }
  func.func @transform_4(%arg0: i32) -> i32 {
    %c0_i32 = arith.constant 0 : i32
    %c0_i32_0 = arith.constant 0 : i32
    return %c0_i32 : i32
  }
  func.func @transform_5(%arg0: i32) -> (i32, i32, i32) {
    %c0_i32 = arith.constant 0 : i32
    %c0_i32_0 = arith.constant 0 : i32
    %c0_i32_1 = arith.constant 0 : i32
    %c0_i32_2 = arith.constant 0 : i32
    return %c0_i32, %c0_i32_0, %c0_i32_1 : i32, i32, i32
  }
  func.func @transform_6(%arg0: i32) -> (i32, i32, i32) {
    %c0_i32 = arith.constant 0 : i32
    %c0_i32_0 = arith.constant 0 : i32
    %c0_i32_1 = arith.constant 0 : i32
    %c0_i32_2 = arith.constant 0 : i32
    return %c0_i32, %c0_i32_0, %c0_i32_1 : i32, i32, i32
  }
  func.func @transform_7(%arg0: i32) -> (i32, i32, i32) {
    %c0_i32 = arith.constant 0 : i32
    %c0_i32_0 = arith.constant 0 : i32
    %c0_i32_1 = arith.constant 0 : i32
    return %c0_i32, %arg0, %c0_i32_0 : i32, i32, i32
  }
}

</mosaic_0001>

<bundles_post_ra>
// kernel: _upsample_forward_impl.1
= control target key start
LH: loop header
LB: loop body
LE: loop exit
PB: predicated region body
PF: predicated region fallthrough
CT: control target
= control target key end

     0   :  { %s9348_s0 = inlined_call_operand.vmem [shape: f32[4,8,256], index: 0, kind: input, shape index: {}]   ;;  %s9349_s1 = inlined_call_operand.vmem [shape: f32[400], index: 1, kind: input, shape index: {}]   ;;  %s9350_s2 = inlined_call_operand.hbm [shape: f32[4], index: 2, kind: input, shape index: {}]   ;;  %s9351_s3 = inlined_call_operand.vmem [shape: f32[192], index: 3, kind: input, shape index: {}]   ;;  %s9352_s4 = inlined_call_operand.hbm [shape: f32[3], index: 4, kind: input, shape index: {}]   ;;  %s9353_s5 = inlined_call_operand.hbm [shape: f32[25,8,256], index: 5, kind: input, shape index: {}]   ;;  %s9354_s6 = inlined_call_operand.hbm [shape: f32[4,8,256], index: 6, kind: input, shape index: {}]   ;;  %s9355_s7 = inlined_call_operand.vmem [shape: f32[12,8,256], index: 7, kind: output, shape index: {}]  }
   0x1   :  { %9584 = sst [smem:[#allocation106_spill]] %s9348_s0 }
   0x2   :  { %9585 = sst [smem:[#allocation107_spill]] %s9355_s7 }
   0x3   :  { %12 = vsyncpa [#allocation5], 0 }
   0x4   :  { %13 = vsyncpa [#allocation4], 0 }
   0x5   :  { %14 = vsyncpa [#allocation8], 0 }
   0x6   :  { %15 = vsyncpa [#allocation10], 0 }
   0x7   :  { %16 = vsyncpa [#allocation3], 0  ;;  %s26_s26 = sshll.u32 %s9349_s1, 4  ;;  %s27_s26 = int_to_ptr.vmem [resolvable:$true] %s26_s26 }
   0x8   :  { %17 = vsyncpa [#allocation13], 0  ;;  %s4836_s27 = scalar_lea.vmem %s27_s26, 64  ;;  %p4841_p1 = scmp.lt.s32.totalorder %s27_s26, %s27_s26 }
   0x9   :  { %p4837_p0 = scmp.ne.s32.totalorder %s27_s26, %s4836_s27  ;;  %p4842_p2 = scmp.lt.s32.totalorder %s4836_s27, %s4836_s27 }
   0xb   :  { %p4843_p3 = por %p4842_p2, %p4841_p1 }
   0xd   :  { %p4844_p4 = pnand %p4843_p3, %p4837_p0 }
   0xf   :  { %4847 = shalt.err (!%p4844_p4)
}
  0x10   :  { %s4936_s28 = smov [#allocation2]   ;;  %s4848_s8 = scalar_lea.hbm %s9350_s2, 16 }
  0x11   :  { %29 = dma.vmem_to_smem %s27_s26, 64, %s4936_s28, [#allocation5]  }
  0x12   :  { %p4849_p5 = scmp.ne.s32.totalorder %s9350_s2, %s4848_s8  ;;  %p4852_p6 = scmp.lt.u32.totalorder %s4848_s8, %s9350_s2 }
  0x14   :  { %p4854_p7 = pnand %p4852_p6, %p4849_p5 }
  0x16   :  { %4857 = shalt.err (!%p4854_p7)
}
  0x17   :  { %s4937_s12 = smov [#allocation6]   ;;  %s44_s17 = sshll.u32 %s9351_s3, 4  ;;  %s45_s17 = int_to_ptr.vmem [resolvable:$true] %s44_s17 }
  0x18   :  { %37 = dma.hbm_to_smem %s9350_s2, 16, %s4937_s12, [#allocation4]  }
  0x19   :  { %s4858_s18 = scalar_lea.vmem %s45_s17, 32  ;;  %p4863_p9 = scmp.lt.s32.totalorder %s45_s17, %s45_s17 }
  0x1a   :  { %p4859_p8 = scmp.ne.s32.totalorder %s45_s17, %s4858_s18  ;;  %p4864_p10 = scmp.lt.s32.totalorder %s4858_s18, %s4858_s18 }
  0x1c   :  { %p4865_p11 = por %p4864_p10, %p4863_p9 }
  0x1e   :  { %p4866_p12 = pnand %p4865_p11, %p4859_p8 }
  0x20   :  { %4869 = shalt.err (!%p4866_p12)
}
  0x21   :  { %s4938_s19 = smov [#allocation7]   ;;  %s4870_s22 = scalar_lea.hbm %s9352_s4, 16 }
  0x22   :  { %47 = dma.vmem_to_smem %s45_s17, 32, %s4938_s19, [#allocation8]  }
  0x23   :  { %p4871_p13 = scmp.ne.s32.totalorder %s9352_s4, %s4870_s22  ;;  %p4874_p0 = scmp.lt.u32.totalorder %s4870_s22, %s9352_s4 }
  0x25   :  { %p4876_p1 = pnand %p4874_p0, %p4871_p13 }
  0x27   :  { %4879 = shalt.err (!%p4876_p1)
}
  0x28   :  { %s4939_s25 = smov [#allocation9]   ;;  %s4940_s28 = smov [#allocation11]  }
  0x29   :  { %55 = dma.hbm_to_smem %s9352_s4, 16, %s4939_s25, [#allocation10]  }
  0x2a   :  { %s61_s29 = sshll.u32 %s4940_s28, 4  ;;  %s4880_s9 = scalar_lea.hbm %s9353_s5, 6400  ;;  %s62_s29 = int_to_ptr.vmem [resolvable:$true] %s61_s29 }
  0x2b   :  { %p4881_p2 = scmp.ne.s32.totalorder %s9353_s5, %s4880_s9  ;;  %p4884_p3 = scmp.lt.u32.totalorder %s4880_s9, %s9353_s5 }
  0x2d   :  { %p4886_p4 = pnand %p4884_p3, %p4881_p2 }
  0x2f   :  { %4889 = shalt.err (!%p4886_p4)
}
  0x30   :  { %s4890_s13 = scalar_lea.vmem %s62_s29, 6400  ;;  %p4895_p6 = scmp.lt.s32.totalorder %s62_s29, %s62_s29 }
  0x31   :  { %p4891_p5 = scmp.ne.s32.totalorder %s62_s29, %s4890_s13  ;;  %p4896_p7 = scmp.lt.s32.totalorder %s4890_s13, %s4890_s13 }
  0x33   :  { %p4897_p8 = por %p4896_p7, %p4895_p6 }
  0x35   :  { %p4898_p9 = pnand %p4897_p8, %p4891_p5 }
  0x37   :  { %4901 = shalt.err (!%p4898_p9)
}
  0x38   :  { %s4941_s4 = smov 256   ;;  %s9356_s14 = smov 16  }
  0x39   :  { %67 = dma.hbm_to_vmem [thread:$0]  %s9353_s5, 6400, %s62_s29, [#allocation3], %s4941_s4, %s4941_s4, %s9356_s14  }
  0x3a   :  { %s4943_s17 = smov [#allocation12]   ;;  %s4902_s21 = scalar_lea.hbm %s9354_s6, 1024 }
  0x3b   :  { %s73_s18 = sshll.u32 %s4943_s17, 4  ;;  %p4903_p10 = scmp.ne.s32.totalorder %s9354_s6, %s4902_s21  ;;  %s74_s18 = int_to_ptr.vmem [resolvable:$true] %s73_s18 }
  0x3c   :  { %p4906_p11 = scmp.lt.u32.totalorder %s4902_s21, %s9354_s6 }
  0x3e   :  { %p4908_p12 = pnand %p4906_p11, %p4903_p10 }
  0x40   :  { %4911 = shalt.err (!%p4908_p12)
}
  0x41   :  { %s4912_s3 = scalar_lea.vmem %s74_s18, 1024  ;;  %p4917_p0 = scmp.lt.s32.totalorder %s74_s18, %s74_s18 }
  0x42   :  { %p4913_p13 = scmp.ne.s32.totalorder %s74_s18, %s4912_s3  ;;  %p4918_p1 = scmp.lt.s32.totalorder %s4912_s3, %s4912_s3 }
  0x44   :  { %p4919_p2 = por %p4918_p1, %p4917_p0 }
  0x46   :  { %p4920_p3 = pnand %p4919_p2, %p4913_p13 }
  0x48   :  { %4923 = shalt.err (!%p4920_p3)
}
  0x49   :  { %79 = dma.hbm_to_vmem [thread:$0]  %s9354_s6, 1024, %s74_s18, [#allocation13], %s4941_s4, %s4941_s4, %s9356_s14  }
  0x4a   :  { %4924 = dma.done.wait [#allocation5], 64  }
  0x4b   :  { %4925 = vsyncadd [#allocation5], 4294967232 }
  0x4c   :  { %4926 = dma.done.wait [#allocation4], 16  }
  0x4d   :  { %4927 = vsyncadd [#allocation4], 4294967280 }
  0x4e   :  { %4928 = dma.done.wait [#allocation8], 32  }
  0x4f   :  { %4929 = vsyncadd [#allocation8], 4294967264 }
  0x50   :  { %4930 = dma.done.wait [#allocation10], 16  }
  0x51   :  { %4931 = vsyncadd [#allocation10], 4294967280 }
  0x52   :  { %4932 = dma.done.wait [#allocation3], 6400  }
  0x53   :  { %4933 = vsyncadd [#allocation3], 4294960896 }
  0x54   :  { %4934 = dma.done.wait [#allocation13], 1024  }
  0x55   :  { %4935 = vsyncadd [#allocation13], 4294966272 }
  0x56   :  { %98 = sfence }
  0x57   :  { %v5066_v0 = vld [vmem:[%s9348_s0 + $0x10] sm:$0xff]  ;;  %v5071_v1 = vld [vmem:[%s9348_s0] sm:$0xff]  ;;  %s4944_s29 = smov 34   ;;  %v5078_v2 = vld [vmem:[%s9348_s0 + $0x18] sm:$0xff]  ;;  %s4945_s18 = smov 33   ;;  %v116_v56 = vlaneseq }
  0x58   :  { %139 = vrot.lane.b32.xlu1 %v5066_v0, %s4944_s29  ;;  %112 = vrot.lane.b32.xlu0 %v5071_v1, %s4944_s29  ;;  %v5083_v3 = vld [vmem:[%s9348_s0 + $0x8] sm:$0xff]  ;;  %v5095_v5 = vld [vmem:[%s9348_s0 + $0x20] sm:$0xff]  ;;  %s4946_s19 = smov 32   ;;  %s4947_s20 = smov 31  }
  0x59   :  { %v5090_v4 = vld [vmem:[%s9348_s0 + $0x28] sm:$0xff]  ;;  %v5102_v6 = vld [vmem:[%s9348_s0 + $0x38] sm:$0xff]  ;;  %v5107_v7 = vld [vmem:[%s9348_s0 + $0x30] sm:$0xff]  ;;  %s5135_s21 = sld [smem:[#allocation2 + $0x1]]  ;;  %s5137_s22 = sld [smem:[#allocation2 + $0x5]]  ;;  %v5464_v55 = vand.u32 127, %v116_v56 }
  0x5a   :  { %s5139_s23 = sld [smem:[#allocation2 + $0x9]]  ;;  %s5141_s2 = sld [smem:[#allocation2 + $0xd]]  ;;  %v5495_v63 = vld [vmem:[#allocation11] sm:$0xff]  ;;  %v5497_v59 = vld [vmem:[#allocation11 + $0x8] sm:$0xff] }
  0x5b   :  { %s5143_s24 = sld [smem:[#allocation2]]  ;;  %s5145_s3 = sld [smem:[#allocation2 + $0x4]]  ;;  %vm118_vm0 = vcmp.lt.s32.totalorder %v5464_v55, 34  ;;  %vm242_vm1 = vcmp.lt.s32.totalorder %v5464_v55, 33  ;;  %vm374_vm2 = vcmp.lt.s32.totalorder %v5464_v55, 32  ;;  %vm506_vm3 = vcmp.lt.s32.totalorder %v5464_v55, 31 }
  0x5c   :  { %141 = vrot.lane.b32.xlu1 %v5078_v2, %s4944_s29  ;;  %114 = vrot.lane.b32.xlu0 %v5083_v3, %s4944_s29  ;;  %s4948_s5 = smov 30   ;;  %s5151_s25 = sld [smem:[#allocation2 + $0x8]]  ;;  %vm638_vm4 = vcmp.lt.s32.totalorder %v5464_v55, 30  ;;  %vm770_vm5 = vcmp.lt.s32.totalorder %v5464_v55, 18  ;;  %vm902_vm6 = vcmp.lt.s32.totalorder %v5464_v55, 17  ;;  %vm1034_vm7 = vcmp.lt.s32.totalorder %v5464_v55, 16 }
  0x5d   :  { %s5153_s26 = sld [smem:[#allocation2 + $0xc]]  ;;  %s5155_s27 = sld [smem:[#allocation2 + $0x2]]  ;;  %vm1166_vm8 = vcmp.lt.s32.totalorder %v5464_v55, 15  ;;  %vm1298_vm9 = vcmp.lt.s32.totalorder %v5464_v55, 14  ;;  %vm1430_vm10 = vcmp.lt.s32.totalorder %v5464_v55, 2  ;;  %vm1562_vm11 = vcmp.lt.s32.totalorder %v5464_v55, 1 }
  0x5e   :  { %s5157_s28 = sld [smem:[#allocation2 + $0x6]]  ;;  %s5159_s6 = sld [smem:[#allocation2 + $0xa]]  ;;  %vm1790_vm12 = vcmp.lt.s32.totalorder %v5464_v55, 127  ;;  %vm1922_vm13 = vcmp.lt.s32.totalorder %v5464_v55, 126  ;;  %vm2054_vm14 = vcmp.lt.s32.totalorder %v5464_v55, 114  ;;  %vm2186_vm15 = vcmp.lt.s32.totalorder %v5464_v55, 113 }
  0x5f   :  { %9586 = sst [smem:[#allocation20_spill]] %s5135_s21  ;;  %s5163_s30 = sld [smem:[#allocation2 + $0x3]]  ;;  %v148_v8 = vstv %s5135_s21  ;;  %v154_v9 = vstv %s5137_s22 }
  0x60   :  { %173 = vrot.lane.b32.xlu1 %v5090_v4, %s4944_s29  ;;  %171 = vrot.lane.b32.xlu0 %v5095_v5, %s4944_s29  ;;  %9587 = sst [smem:[#allocation21_spill]] %s5137_s22  ;;  %s5165_s8 = sld [smem:[#allocation2 + $0x7]]  ;;  %v160_v10 = vstv %s5139_s23  ;;  %v166_v11 = vstv %s5141_s2 }
  0x61   :  { %9588 = sst [smem:[#allocation22_spill]] %s5139_s23  ;;  %s5171_s9 = sld [smem:[#allocation2 + $0xb]]  ;;  %v124_v12 = vstv %s5143_s24  ;;  %v128_v13 = vstv %s5145_s3 }
  0x62   :  { %9589 = sst [smem:[#allocation23_spill]] %s5141_s2  ;;  %s5173_s10 = sld [smem:[#allocation2 + $0xf]]  ;;  %v132_v14 = vstv %s5151_s25 }
  0x63   :  { %9590 = sst [smem:[#allocation24_spill]] %s5143_s24  ;;  %s5175_s1 = sld [smem:[#allocation2 + $0x10]]  ;;  %v136_v15 = vstv %s5153_s26  ;;  %v180_v16 = vstv %s5155_s27 }
  0x64   :  { %205 = vrot.lane.b32.xlu1 %v5102_v6, %s4944_s29  ;;  %203 = vrot.lane.b32.xlu0 %v5107_v7, %s4944_s29  ;;  %9591 = sst [smem:[#allocation25_spill]] %s5145_s3  ;;  %s5161_s29 = sld [smem:[#allocation2 + $0xe]]  ;;  %v186_v17 = vstv %s5157_s28  ;;  %v192_v18 = vstv %s5159_s6 }
  0x65   :  { %9592 = sst [smem:[#allocation26_spill]] %s5151_s25  ;;  %s5177_s11 = sld [smem:[#allocation2 + $0x14]]  ;;  %v212_v20 = vstv %s5163_s30 }
  0x66   :  { %9593 = sst [smem:[#allocation27_spill]] %s5153_s26  ;;  %s5179_s12 = sld [smem:[#allocation2 + $0x18]]  ;;  %v218_v21 = vstv %s5165_s8 }
  0x67   :  { %9594 = sst [smem:[#allocation28_spill]] %s5155_s27  ;;  %s5181_s13 = sld [smem:[#allocation2 + $0x1c]]  ;;  %v224_v22 = vstv %s5171_s9 }
  0x68   :  { %240 = vrot.lane.b32.xlu1 %v5083_v3, %s4945_s18  ;;  %238 = vrot.lane.b32.xlu0 %v5071_v1, %s4945_s18  ;;  %9595 = sst [smem:[#allocation29_spill]] %s5157_s28  ;;  %s5185_s15 = sld [smem:[#allocation2 + $0x15]]  ;;  %v230_v23 = vstv %s5173_s10 }
  0x69   :  { %9596 = sst [smem:[#allocation30_spill]] %s5159_s6  ;;  %s5183_s4 = sld [smem:[#allocation2 + $0x11]]  ;;  %v248_v24 = vstv %s5175_s1 }
  0x6a   :  { %9597 = sst [smem:[#allocation31_spill]] %s5161_s29  ;;  %s5191_s16 = sld [smem:[#allocation2 + $0x19]]  ;;  %v198_v19 = vstv %s5161_s29 }
  0x6b   :  { %9598 = sst [smem:[#allocation32_spill]] %s5163_s30  ;;  %s5193_s17 = sld [smem:[#allocation2 + $0x1d]]  ;;  %v254_v25 = vstv %s5177_s11 }
  0x6c   :  { %273 = vrot.lane.b32.xlu1 %v5078_v2, %s4945_s18  ;;  %271 = vrot.lane.b32.xlu0 %v5066_v0, %s4945_s18  ;;  %9599 = sst [smem:[#allocation33_spill]] %s5165_s8  ;;  %s5201_s14 = sld [smem:[#allocation2 + $0x1e]]  ;;  %v260_v26 = vstv %s5179_s12 }
  0x6d   :  { %9600 = sst [smem:[#allocation34_spill]] %s5171_s9  ;;  %s5203_s7 = sld [smem:[#allocation2 + $0x13]]  ;;  %v266_v27 = vstv %s5181_s13 }
  0x6e   :  { %9601 = sst [smem:[#allocation35_spill]] %s5173_s10  ;;  %s5300_s3 = sld [smem:[#allocation2 + $0x3b]] }
  0x6f   :  { %9602 = sst [smem:[#allocation36_spill]] %s5175_s1  ;;  %s5205_s0 = sld [smem:[#allocation2 + $0x17]]  ;;  %v280_v28 = vstv %s5183_s4 }
  0x70   :  { %305 = vrot.lane.b32.xlu1 %v5090_v4, %s4945_s18  ;;  %303 = vrot.lane.b32.xlu0 %v5095_v5, %s4945_s18  ;;  %9603 = sst [smem:[#allocation37_spill]] %s5177_s11  ;;  %s5292_s21 = sld [smem:[#allocation2 + $0x37]] }
  0x71   :  { %9604 = sst [smem:[#allocation38_spill]] %s5179_s12  ;;  %s5302_s25 = sld [smem:[#allocation2 + $0x3f]] }
  0x72   :  { %9605 = sst [smem:[#allocation39_spill]] %s5181_s13  ;;  %s5308_s24 = sld [smem:[#allocation2 + $0x40]] }
  0x73   :  { %9606 = sst [smem:[#allocation40_spill]] %s5183_s4  ;;  %s5316_s26 = sld [smem:[#allocation2 + $0x48]] }
  0x74   :  { %337 = vrot.lane.b32.xlu1 %v5102_v6, %s4945_s18  ;;  %335 = vrot.lane.b32.xlu0 %v5107_v7, %s4945_s18  ;;  %9607 = sst [smem:[#allocation41_spill]] %s5185_s15  ;;  %s5195_s18 = sld [smem:[#allocation2 + $0x12]] }
  0x75   :  { %9608 = sst [smem:[#allocation42_spill]] %s5191_s16  ;;  %s5211_s16 = sld [smem:[#allocation2 + $0x1b]] }
  0x76   :  { %9609 = sst [smem:[#allocation43_spill]] %s5193_s17  ;;  %s9384_s15 = smov 18  }
  0x77   :  { %9613 = sst [smem:[#allocation47_spill]] %s5201_s14  ;;  %s5213_s17 = sld [smem:[#allocation2 + $0x1f]] }
  0x78   :  { %372 = vrot.lane.b32.xlu1 %v5083_v3, %s4946_s19  ;;  %370 = vrot.lane.b32.xlu0 %v5071_v1, %s4946_s19  ;;  %9614 = sst [smem:[#allocation48_spill]] %s5203_s7  ;;  %s5223_s7 = sld [smem:[#allocation2 + $0x21]] }
  0x79   :  { %9615 = sst [smem:[#allocation49_spill]] %s5205_s0  ;;  %s5221_s14 = sld [smem:[#allocation2 + $0x2c]] }
  0x7a   :  { %9610 = sst [smem:[#allocation44_spill]] %s5195_s18  ;;  %s5225_s0 = sld [smem:[#allocation2 + $0x25]] }
  0x7b   :  { %9616 = sst [smem:[#allocation50_spill]] %s5211_s16  ;;  %s5215_s18 = sld [smem:[#allocation2 + $0x20]] }
  0x7c   :  { %405 = vrot.lane.b32.xlu1 %v5078_v2, %s4946_s19  ;;  %403 = vrot.lane.b32.xlu0 %v5066_v0, %s4946_s19  ;;  %9648 = sst [smem:[#allocation81_spill]] %s5292_s21  ;;  %s5310_s2 = sld [smem:[#allocation2 + $0x44]] }
  0x7d   :  { %9617 = sst [smem:[#allocation51_spill]] %s5213_s17  ;;  %s9653_s23 = sld [smem:[#allocation41_spill]] }
  0x7e   :  { %9622 = sst [smem:[#allocation56_spill]] %s5223_s7  ;;  %s5241_s7 = sld [smem:[#allocation2 + $0x2e]] }
  0x7f   :  { %9621 = sst [smem:[#allocation55_spill]] %s5221_s14  ;;  %s5239_s14 = sld [smem:[#allocation2 + $0x2a]] }
  0x80   :  { %437 = vrot.lane.b32.xlu1 %v5090_v4, %s4946_s19  ;;  %435 = vrot.lane.b32.xlu0 %v5095_v5, %s4946_s19  ;;  %9623 = sst [smem:[#allocation57_spill]] %s5225_s0  ;;  %s5243_s0 = sld [smem:[#allocation2 + $0x23]] }
  0x81   :  { %9618 = sst [smem:[#allocation52_spill]] %s5215_s18  ;;  %s5233_s18 = sld [smem:[#allocation2 + $0x2d]] }
  0x82   :  { %s5245_s17 = sld [smem:[#allocation2 + $0x27]]  ;;  %9649 = sst [smem:[#allocation82_spill]] %s5300_s3 }
  0x83   :  { %9650 = sst [smem:[#allocation83_spill]] %s5302_s25  ;;  %s9657_s22 = sld [smem:[#allocation44_spill]]  ;;  %v286_v29 = vstv %s9653_s23 }
  0x84   :  { %469 = vrot.lane.b32.xlu1 %v5102_v6, %s4946_s19  ;;  %467 = vrot.lane.b32.xlu0 %v5107_v7, %s4946_s19  ;;  %s5197_s19 = sld [smem:[#allocation2 + $0x16]]  ;;  %9629 = sst [smem:[#allocation63_spill]] %s5241_s7 }
  0x85   :  { %9628 = sst [smem:[#allocation62_spill]] %s5239_s14  ;;  %s5255_s14 = sld [smem:[#allocation2 + $0x30]] }
  0x86   :  { %9630 = sst [smem:[#allocation64_spill]] %s5243_s0  ;;  %s5259_s0 = sld [smem:[#allocation2 + $0x38]] }
  0x87   :  { %9625 = sst [smem:[#allocation59_spill]] %s5233_s18  ;;  %s5251_s18 = sld [smem:[#allocation2 + $0x2b]] }
  0x88   :  { %504 = vrot.lane.b32.xlu1 %v5083_v3, %s4947_s20  ;;  %502 = vrot.lane.b32.xlu0 %v5071_v1, %s4947_s20  ;;  %9631 = sst [smem:[#allocation65_spill]] %s5245_s17  ;;  %s5257_s7 = sld [smem:[#allocation2 + $0x34]] }
  0x89   :  { %s5261_s17 = sld [smem:[#allocation2 + $0x3c]]  ;;  %9651 = sst [smem:[#allocation84_spill]] %s5308_s24  ;;  %v312_v32 = vstv %s9657_s22 }
  0x8a   :  { %9611 = sst [smem:[#allocation45_spill]] %s5197_s19  ;;  %s5217_s19 = sld [smem:[#allocation2 + $0x24]] }
  0x8b   :  { %9634 = sst [smem:[#allocation68_spill]] %s5255_s14  ;;  %s5271_s14 = sld [smem:[#allocation2 + $0x39]] }
  0x8c   :  { %537 = vrot.lane.b32.xlu1 %v5078_v2, %s4947_s20  ;;  %535 = vrot.lane.b32.xlu0 %v5066_v0, %s4947_s20  ;;  %9636 = sst [smem:[#allocation70_spill]] %s5259_s0  ;;  %s9655_s27 = sld [smem:[#allocation43_spill]] }
  0x8d   :  { %9632 = sst [smem:[#allocation66_spill]] %s5251_s18  ;;  %s9640_s18 = smov 18  }
  0x8e   :  { %9635 = sst [smem:[#allocation69_spill]] %s5257_s7  ;;  %s5273_s7 = sld [smem:[#allocation2 + $0x3d]] }
  0x8f   :  { %9637 = sst [smem:[#allocation71_spill]] %s5261_s17  ;;  %s5275_s0 = sld [smem:[#allocation2 + $0x32]] }
  0x90   :  { %569 = vrot.lane.b32.xlu1 %v5090_v4, %s4947_s20  ;;  %567 = vrot.lane.b32.xlu0 %v5095_v5, %s4947_s20  ;;  %9619 = sst [smem:[#allocation53_spill]] %s5217_s19  ;;  %s5235_s19 = sld [smem:[#allocation2 + $0x22]] }
  0x91   :  { %9641 = sst [smem:[#allocation74_spill]] %s5271_s14  ;;  %s5318_s25 = sld [smem:[#allocation2 + $0x4c]] }
  0x92   :  { %s5277_s17 = sld [smem:[#allocation2 + $0x36]]  ;;  %9652 = sst [smem:[#allocation85_spill]] %s5310_s2  ;;  %v298_v31 = vstv %s9655_s27 }
  0x93   :  { %9656 = sst [smem:[#allocation86_spill]] %s5316_s26  ;;  %s9659_s28 = sld [smem:[#allocation45_spill]] }
  0x94   :  { %601 = vrot.lane.b32.xlu1 %v5102_v6, %s4947_s20  ;;  %599 = vrot.lane.b32.xlu0 %v5107_v7, %s4947_s20  ;;  %s5199_s20 = sld [smem:[#allocation2 + $0x1a]]  ;;  %9642 = sst [smem:[#allocation75_spill]] %s5273_s7 }
  0x95   :  { %9643 = sst [smem:[#allocation76_spill]] %s5275_s0  ;;  %s5290_s0 = sld [smem:[#allocation2 + $0x33]] }
  0x96   :  { %9626 = sst [smem:[#allocation60_spill]] %s5235_s19  ;;  %s5263_s19 = sld [smem:[#allocation2 + $0x31]] }
  0x97   :  { %9658 = sst [smem:[#allocation87_spill]] %s5318_s25  ;;  %s5324_s6 = sld [smem:[#allocation2 + $0x41]] }
  0x98   :  { %636 = vrot.lane.b32.xlu1 %v5083_v3, %s4948_s5  ;;  %634 = vrot.lane.b32.xlu0 %v5071_v1, %s4948_s5  ;;  %9644 = sst [smem:[#allocation77_spill]] %s5277_s17  ;;  %s9661_s30 = sld [smem:[#allocation47_spill]] }
  0x99   :  { %s9663_s8 = sld [smem:[#allocation48_spill]]  ;;  %s5326_s2 = sld [smem:[#allocation2 + $0x45]]  ;;  %v318_v33 = vstv %s9659_s28 }
  0x9a   :  { %9612 = sst [smem:[#allocation46_spill]] %s5199_s20  ;;  %s5219_s20 = sld [smem:[#allocation2 + $0x28]] }
  0x9b   :  { %9647 = sst [smem:[#allocation80_spill]] %s5290_s0  ;;  %s9660_s29 = sld [smem:[#allocation46_spill]] }
  0x9c   :  { %669 = vrot.lane.b32.xlu1 %v5078_v2, %s4948_s5  ;;  %667 = vrot.lane.b32.xlu0 %v5066_v0, %s4948_s5  ;;  %9638 = sst [smem:[#allocation72_spill]] %s5263_s19  ;;  %s5284_s19 = sld [smem:[#allocation2 + $0x3e]] }
  0x9d   :  { %9662 = sst [smem:[#allocation88_spill]] %s5324_s6  ;;  %s9442_s1 = smov 17  }
  0x9e   :  { %s5334_s4 = sld [smem:[#allocation2 + $0x49]]  ;;  %s5336_s9 = sld [smem:[#allocation2 + $0x4d]]  ;;  %v330_v35 = vstv %s9661_s30 }
  0x9f   :  { %9664 = sst [smem:[#allocation89_spill]] %s5326_s2  ;;  %s5342_s2 = sld [smem:[#allocation2 + $0x42]]  ;;  %v344_v36 = vstv %s9663_s8 }
  0xa0   :  { %701 = vrot.lane.b32.xlu1 %v5090_v4, %s4948_s5  ;;  %699 = vrot.lane.b32.xlu0 %v5095_v5, %s4948_s5  ;;  %9620 = sst [smem:[#allocation54_spill]] %s5219_s20  ;;  %s5237_s20 = sld [smem:[#allocation2 + $0x26]] }
  0xa1   :  { %v324_v34 = vstv %s9660_s29  ;;  %s5344_s26 = sld [smem:[#allocation2 + $0x46]]  ;;  %s5350_s23 = sld [smem:[#allocation2 + $0x4a]] }
  0xa2   :  { %9646 = sst [smem:[#allocation79_spill]] %s5284_s19  ;;  %s5360_s8 = sld [smem:[#allocation2 + $0x47]] }
  0xa3   :  { %s5358_s27 = sld [smem:[#allocation2 + $0x43]]  ;;  %s9686_s10 = smov 17  }
  0xa4   :  { %733 = vrot.lane.b32.xlu1 %v5102_v6, %s4948_s5  ;;  %731 = vrot.lane.b32.xlu0 %v5107_v7, %s4948_s5  ;;  %s5231_s5 = sld [smem:[#allocation2 + $0x29]]  ;;  %9668 = sst [smem:[#allocation90_spill]] %s5334_s4 }
  0xa5   :  { %9670 = sst [smem:[#allocation91_spill]] %s5336_s9  ;;  %s5352_s4 = sld [smem:[#allocation2 + $0x4e]] }
  0xa6   :  { %9627 = sst [smem:[#allocation61_spill]] %s5237_s20  ;;  %s5253_s20 = sld [smem:[#allocation2 + $0x2f]] }
  0xa7   :  { %9672 = sst [smem:[#allocation92_spill]] %s5342_s2  ;;  %s5368_s12 = sld [smem:[#allocation2 + $0x4b]] }
  0xa8   :  { %768 = vrot.lane.b32.xlu1 %v5083_v3, %s9384_s15  ;;  %766 = vrot.lane.b32.xlu0 %v5071_v1, %s9384_s15  ;;  %9674 = sst [smem:[#allocation93_spill]] %s5344_s26  ;;  %s5370_s6 = sld [smem:[#allocation2 + $0x4f]] }
  0xa9   :  { %9677 = sst [smem:[#allocation94_spill]] %s5350_s23  ;;  %s5378_s23 = sld [smem:[#allocation2 + $0x54]] }
  0xaa   :  { %9624 = sst [smem:[#allocation58_spill]] %s5231_s5  ;;  %s5386_s2 = sld [smem:[#allocation2 + $0x5c]] }
  0xab   :  { %9679 = sst [smem:[#allocation95_spill]] %s5352_s4  ;;  %s5392_s9 = sld [smem:[#allocation2 + $0x51]] }
  0xac   :  { %801 = vrot.lane.b32.xlu1 %v5078_v2, %s9384_s15  ;;  %799 = vrot.lane.b32.xlu0 %v5066_v0, %s9384_s15  ;;  %9633 = sst [smem:[#allocation67_spill]] %s5253_s20  ;;  %s5265_s15 = sld [smem:[#allocation2 + $0x35]] }
  0xad   :  { %9683 = sst [smem:[#allocation96_spill]] %s5358_s27  ;;  %s5394_s28 = sld [smem:[#allocation2 + $0x55]] }
  0xae   :  { %9685 = sst [smem:[#allocation97_spill]] %s5360_s8  ;;  %s5376_s8 = sld [smem:[#allocation2 + $0x50]] }
  0xaf   :  { %9690 = sst [smem:[#allocation98_spill]] %s5368_s12  ;;  %s5384_s12 = sld [smem:[#allocation2 + $0x58]] }
  0xb0   :  { %833 = vrot.lane.b32.xlu1 %v5090_v4, %s9640_s18  ;;  %831 = vrot.lane.b32.xlu0 %v5095_v5, %s9640_s18  ;;  %9691 = sst [smem:[#allocation99_spill]] %s5370_s6  ;;  %s5402_s20 = sld [smem:[#allocation2 + $0x59]] }
  0xb1   :  { %s5404_s11 = sld [smem:[#allocation2 + $0x5d]]  ;;  %s5410_s13 = sld [smem:[#allocation2 + $0x52]] }
  0xb2   :  { %9639 = sst [smem:[#allocation73_spill]] %s5265_s15  ;;  %s5282_s15 = sld [smem:[#allocation2 + $0x3a]] }
  0xb3   :  { %s5412_s4 = sld [smem:[#allocation2 + $0x56]]  ;;  %s5418_s27 = sld [smem:[#allocation2 + $0x5a]] }
  0xb4   :  { %865 = vrot.lane.b32.xlu1 %v5102_v6, %s9640_s18  ;;  %863 = vrot.lane.b32.xlu0 %v5107_v7, %s9640_s18  ;;  %s9654_s18 = sld [smem:[#allocation42_spill]]  ;;  %s9701_s30 = sld [smem:[#allocation86_spill]] }
  0xb5   :  { %s5420_s29 = sld [smem:[#allocation2 + $0x5e]]  ;;  %s9705_s14 = sld [smem:[#allocation89_spill]] }
  0xb6   :  { %s5426_s25 = sld [smem:[#allocation2 + $0x53]]  ;;  %s9707_s7 = sld [smem:[#allocation90_spill]] }
  0xb7   :  { %s5428_s5 = sld [smem:[#allocation2 + $0x57]]  ;;  %s5436_s3 = sld [smem:[#allocation2 + $0x5b]] }
  0xb8   :  { %9645 = sst [smem:[#allocation78_spill]] %s5282_s15  ;;  %900 = vrot.lane.b32.xlu1 %v5083_v3, %s9442_s1  ;;  %898 = vrot.lane.b32.xlu0 %v5071_v1, %s9442_s1  ;;  %s9703_s1 = sld [smem:[#allocation87_spill]] }
  0xb9   :  { %s5438_s22 = sld [smem:[#allocation2 + $0x5f]]  ;;  %s5452_s16 = sld [smem:[#allocation2 + $0x68]] }
  0xba   :  { %v292_v30 = vstv %s9654_s18  ;;  %s9721_s24 = sld [smem:[#allocation99_spill]]  ;;  %s5454_s26 = sld [smem:[#allocation2 + $0x6c]] }
  0xbb   :  { %9702 = sst [smem:[#allocation86_spill]] %s5420_s29  ;;  %s9724_s6 = smov 16  }
  0xbc   :  { %933 = vrot.lane.b32.xlu1 %v5078_v2, %s9686_s10  ;;  %931 = vrot.lane.b32.xlu0 %v5066_v0, %s9686_s10  ;;  %9706 = sst [smem:[#allocation87_spill]] %s5426_s25  ;;  %s5444_s25 = sld [smem:[#allocation2 + $0x60]] }
  0xbd   :  { %9708 = sst [smem:[#allocation89_spill]] %s5428_s5  ;;  %s5468_s19 = sld [smem:[#allocation2 + $0x61]] }
  0xbe   :  { %9713 = sst [smem:[#allocation90_spill]] %s5436_s3  ;;  %s9717_s5 = sld [smem:[#allocation97_spill]] }
  0xbf   :  { %9715 = sst [smem:[#allocation100_spill]] %s5438_s22  ;;  %s5470_s18 = sld [smem:[#allocation2 + $0x65]] }
  0xc0   :  { %965 = vrot.lane.b32.xlu1 %v5090_v4, %s9686_s10  ;;  %963 = vrot.lane.b32.xlu0 %v5095_v5, %s9686_s10  ;;  %9722 = sst [smem:[#allocation99_spill]] %s5452_s16  ;;  %s9727_s0 = sld [smem:[#allocation86_spill]] }
  0xc1   :  { %9723 = sst [smem:[#allocation102_spill]] %s5454_s26  ;;  %s5476_s21 = sld [smem:[#allocation2 + $0x69]] }
  0xc2   :  { %9718 = sst [smem:[#allocation97_spill]] %s5444_s25  ;;  %s5528_s3 = sld [smem:[#allocation2 + $0x66]] }
  0xc3   :  { %9725 = sst [smem:[#allocation103_spill]] %s5468_s19  ;;  %s5478_s15 = sld [smem:[#allocation2 + $0x6d]] }
  0xc4   :  { %997 = vrot.lane.b32.xlu1 %v5102_v6, %s9686_s10  ;;  %995 = vrot.lane.b32.xlu0 %v5107_v7, %s9686_s10  ;;  %s5446_s10 = sld [smem:[#allocation2 + $0x64]]  ;;  %s4951_s22 = smov 15  }
  0xc5   :  { %9726 = sst [smem:[#allocation104_spill]] %s5470_s18  ;;  %s5540_s18 = sld [smem:[#allocation2 + $0x6e]] }
  0xc6   :  { %s5613_s25 = sld [smem:[#allocation2 + $0x67]]  ;;  %s9764_s26 = sld [smem:[#allocation49_spill]] }
  0xc7   :  { %9728 = sst [smem:[#allocation86_spill]] %s5476_s21  ;;  %s5611_s21 = sld [smem:[#allocation2 + $0x63]] }
  0xc8   :  { %1032 = vrot.lane.b32.xlu1 %v5083_v3, %s9724_s6  ;;  %1030 = vrot.lane.b32.xlu0 %v5071_v1, %s9724_s6  ;;  %s9765_s29 = sld [smem:[#allocation50_spill]]  ;;  %s9766_s16 = sld [smem:[#allocation51_spill]] }
  0xc9   :  { %9730 = sst [smem:[#allocation105_spill]] %s5478_s15  ;;  %s5538_s15 = sld [smem:[#allocation2 + $0x6a]] }
  0xca   :  { %9720 = sst [smem:[#allocation101_spill]] %s5446_s10  ;;  %v140_v56 = vpop.permute.xlu1 %139  ;;  %v113_v62 = vpop.permute.xlu0 %112  ;;  %s5526_s10 = sld [smem:[#allocation2 + $0x62]] }
  0xcb   :  { %9740 = sst [smem:[#allocation20_spill]] %s5540_s18  ;;  %s4953_s19 = smov 2  }
  0xcc   :  { %1065 = vrot.lane.b32.xlu1 %v5078_v2, %s9724_s6  ;;  %1063 = vrot.lane.b32.xlu0 %v5066_v0, %s9724_s6  ;;  %9750 = sst [smem:[#allocation22_spill]] %s5613_s25  ;;  %s9773_s17 = sld [smem:[#allocation52_spill]] }
  0xcd   :  { %9749 = sst [smem:[#allocation21_spill]] %s5611_s21 }
  0xce   :  { %v142_v52 = vpop.permute.xlu1 %141  ;;  %v115_v51 = vpop.permute.xlu0 %114 }
  0xcf   :  { %v143_v54 = vsel %vm118_vm0, %v140_v56, %v142_v52  ;;  %v144_v61 = vsel %vm118_vm0, %v142_v52, %v140_v56  ;;  %v119_v57 = vsel %vm118_vm0, %v113_v62, %v115_v51  ;;  %v120_v50 = vsel %vm118_vm0, %v115_v51, %v113_v62 }
  0xd0   :  { %v145_v49 = vmul.f32 %v144_v61, %v5495_v63  ;;  %v146_v47 = vmul.f32 %v143_v54, %v5497_v59  ;;  %v121_v48 = vmul.f32 %v120_v50, %v5495_v63  ;;  %v122_v53 = vmul.f32 %v119_v57, %v5497_v59  ;;  %1097 = vrot.lane.b32.xlu1 %v5090_v4, %s9724_s6 }
  0xd1   :  { %1095 = vrot.lane.b32.xlu0 %v5095_v5, %s9724_s6 }
  0xd2   :  { %v149_v50 = vmul.f32 %v148_v8, %v145_v49  ;;  %v150_v54 = vmul.f32 %v148_v8, %v146_v47  ;;  %v155_v57 = vmul.f32 %v154_v9, %v145_v49  ;;  %v156_v62 = vmul.f32 %v154_v9, %v146_v47  ;;  %v174_v56 = vpop.permute.xlu1 %173  ;;  %v172_v61 = vpop.permute.xlu0 %171 }
  0xd3   :  { %v161_v51 = vmul.f32 %v160_v10, %v145_v49  ;;  %v162_v52 = vmul.f32 %v160_v10, %v146_v47  ;;  %v167_v8 = vmul.f32 %v166_v11, %v145_v49  ;;  %v168_v58 = vmul.f32 %v166_v11, %v146_v47 }
  0xd4   :  { %v125_v60 = vmul.f32 %v124_v12, %v121_v48  ;;  %v126_v9 = vmul.f32 %v124_v12, %v122_v53  ;;  %v129_v46 = vmul.f32 %v128_v13, %v121_v48  ;;  %v130_v45 = vmul.f32 %v128_v13, %v122_v53  ;;  %1129 = vrot.lane.b32.xlu1 %v5102_v6, %s9724_s6 }
  0xd5   :  { %v133_v44 = vmul.f32 %v132_v14, %v121_v48  ;;  %v134_v43 = vmul.f32 %v132_v14, %v122_v53  ;;  %v137_v10 = vmul.f32 %v136_v15, %v121_v48  ;;  %v138_v49 = vmul.f32 %v136_v15, %v122_v53  ;;  %1127 = vrot.lane.b32.xlu0 %v5107_v7, %s9724_s6  ;;  %s4952_s6 = smov 14  }
  0xd6   :  { %v151_v11 = vadd.f32 %v149_v50, %v125_v60  ;;  %v152_v12 = vadd.f32 %v150_v54, %v126_v9  ;;  %v157_v47 = vadd.f32 %v155_v57, %v129_v46  ;;  %v158_v42 = vadd.f32 %v156_v62, %v130_v45  ;;  %v206_v41 = vpop.permute.xlu1 %205  ;;  %v204_v13 = vpop.permute.xlu0 %203 }
  0xd7   :  { %v163_v40 = vadd.f32 %v161_v51, %v133_v44  ;;  %v164_v39 = vadd.f32 %v162_v52, %v134_v43  ;;  %v169_v38 = vadd.f32 %v167_v8, %v137_v10  ;;  %v170_v37 = vadd.f32 %v168_v58, %v138_v49 }
  0xd8   :  { %v175_v14 = vsel %vm118_vm0, %v172_v61, %v174_v56  ;;  %v176_v15 = vsel %vm118_vm0, %v174_v56, %v172_v61  ;;  %v207_v46 = vsel %vm118_vm0, %v204_v13, %v206_v41  ;;  %v208_v44 = vsel %vm118_vm0, %v206_v41, %v204_v13  ;;  %1164 = vrot.lane.b32.xlu1 %v5083_v3, %s4951_s22 }
  0xd9   :  { %v177_v43 = vmul.f32 %v176_v15, %v5495_v63  ;;  %v178_v45 = vmul.f32 %v175_v14, %v5497_v59  ;;  %v209_v48 = vmul.f32 %v208_v44, %v5495_v63  ;;  %v210_v41 = vmul.f32 %v207_v46, %v5497_v59  ;;  %1162 = vrot.lane.b32.xlu0 %v5071_v1, %s4951_s22 }
  0xda   :  { %v241_v53 = vpop.permute.xlu1 %240  ;;  %v239_v58 = vpop.permute.xlu0 %238  ;;  %v972_v60 = vstv %s5526_s10  ;;  %v978_v52 = vstv %s5528_s3  ;;  %v984_v51 = vstv %s5538_s15  ;;  %v990_v61 = vstv %s5540_s18  ;;  %s9813_s18 = sld [smem:[#allocation67_spill]]  ;;  %s6398_s3 = sld [smem:[#allocation2 + $0x75]] }
  0xdb   :  { %v181_v50 = vmul.f32 %v180_v16, %v177_v43  ;;  %v182_v54 = vmul.f32 %v180_v16, %v178_v45  ;;  %v187_v57 = vmul.f32 %v186_v17, %v177_v43  ;;  %v188_v63 = vmul.f32 %v186_v17, %v178_v45  ;;  %s6400_s15 = sld [smem:[#allocation2 + $0x79]]  ;;  %s6687_s10 = sld [smem:[#allocation2 + $0x96]] }
  0xdc   :  { %v193_v62 = vmul.f32 %v192_v18, %v177_v43  ;;  %v194_v59 = vmul.f32 %v192_v18, %v178_v45  ;;  %v199_v56 = vmul.f32 %v198_v19, %v177_v43  ;;  %v200_v8 = vmul.f32 %v198_v19, %v178_v45  ;;  %1197 = vrot.lane.b32.xlu1 %v5078_v2, %s4951_s22 }
  0xdd   :  { %v183_v9 = vadd.f32 %v181_v50, %v151_v11  ;;  %v184_v16 = vadd.f32 %v182_v54, %v152_v12  ;;  %v189_v10 = vadd.f32 %v187_v57, %v157_v47  ;;  %v190_v17 = vadd.f32 %v188_v63, %v158_v42  ;;  %1195 = vrot.lane.b32.xlu0 %v5066_v0, %s4951_s22  ;;  %v5635_v50 = vld [vmem:[#allocation11 + $0x18] sm:$0xff] }
  0xde   :  { %v195_v18 = vadd.f32 %v193_v62, %v163_v40  ;;  %v196_v19 = vadd.f32 %v194_v59, %v164_v39  ;;  %v201_v49 = vadd.f32 %v199_v56, %v169_v38  ;;  %v202_v13 = vadd.f32 %v200_v8, %v170_v37  ;;  %v274_v11 = vpop.permute.xlu1 %273  ;;  %v272_v14 = vpop.permute.xlu0 %271 }
  0xdf   :  { %v213_v12 = vmul.f32 %v212_v20, %v209_v48  ;;  %v214_v47 = vmul.f32 %v212_v20, %v210_v41  ;;  %v219_v42 = vmul.f32 %v218_v21, %v209_v48  ;;  %v220_v15 = vmul.f32 %v218_v21, %v210_v41  ;;  %v5633_v20 = vld [vmem:[#allocation11 + $0x10] sm:$0xff] }
  0xe0   :  { %v225_v46 = vmul.f32 %v224_v22, %v209_v48  ;;  %v226_v44 = vmul.f32 %v224_v22, %v210_v41  ;;  %v231_v43 = vmul.f32 %v230_v23, %v209_v48  ;;  %v232_v39 = vmul.f32 %v230_v23, %v210_v41  ;;  %1229 = vrot.lane.b32.xlu1 %v5090_v4, %s4951_s22 }
  0xe1   :  { %v215_v37 = vadd.f32 %v213_v12, %v183_v9  ;;  %v216_v38 = vadd.f32 %v214_v47, %v184_v16  ;;  %v221_v40 = vadd.f32 %v219_v42, %v189_v10  ;;  %v222_v45 = vadd.f32 %v220_v15, %v190_v17  ;;  %1227 = vrot.lane.b32.xlu0 %v5095_v5, %s4951_s22 }
  0xe2   :  { %v227_v21 = vadd.f32 %v225_v46, %v195_v18  ;;  %v228_v22 = vadd.f32 %v226_v44, %v196_v19  ;;  %v233_v54 = vadd.f32 %v231_v43, %v201_v49  ;;  %v234_v48 = vadd.f32 %v232_v39, %v202_v13  ;;  %v306_v23 = vpop.permute.xlu1 %305  ;;  %v304_v41 = vpop.permute.xlu0 %303 }
  0xe3   :  { %v243_v57 = vsel %vm242_vm1, %v239_v58, %v241_v53  ;;  %v244_v63 = vsel %vm242_vm1, %v241_v53, %v239_v58  ;;  %v275_v62 = vsel %vm242_vm1, %v272_v14, %v274_v11  ;;  %v276_v59 = vsel %vm242_vm1, %v274_v11, %v272_v14 }
  0xe4   :  { %v245_v56 = vmul.f32 %v244_v63, %v5633_v20  ;;  %v246_v8 = vmul.f32 %v243_v57, %v5635_v50  ;;  %v277_v9 = vmul.f32 %v276_v59, %v5633_v20  ;;  %v278_v16 = vmul.f32 %v275_v62, %v5635_v50  ;;  %1261 = vrot.lane.b32.xlu1 %v5102_v6, %s4951_s22 }
  0xe5   :  { %v307_v53 = vsel %vm242_vm1, %v304_v41, %v306_v23  ;;  %v308_v58 = vsel %vm242_vm1, %v306_v23, %v304_v41  ;;  %1259 = vrot.lane.b32.xlu0 %v5107_v7, %s4951_s22  ;;  %v1004_v10 = vstv %s5611_s21  ;;  %v1010_v17 = vstv %s5613_s25  ;;  %s9774_s22 = sld [smem:[#allocation53_spill]]  ;;  %s9777_s25 = sld [smem:[#allocation106_spill]] }
  0xe6   :  { %v249_v18 = vmul.f32 %v248_v24, %v245_v56  ;;  %v250_v19 = vmul.f32 %v248_v24, %v246_v8  ;;  %v255_v49 = vmul.f32 %v254_v25, %v245_v56  ;;  %v256_v13 = vmul.f32 %v254_v25, %v246_v8  ;;  %v338_v11 = vpop.permute.xlu1 %337  ;;  %v336_v14 = vpop.permute.xlu0 %335  ;;  %s9784_s21 = sld [smem:[#allocation56_spill]] }
  0xe7   :  { %v261_v12 = vmul.f32 %v260_v26, %v245_v56  ;;  %v262_v47 = vmul.f32 %v260_v26, %v246_v8  ;;  %v267_v42 = vmul.f32 %v266_v27, %v245_v56  ;;  %v268_v15 = vmul.f32 %v266_v27, %v246_v8 }
  0xe8   :  { %v251_v46 = vadd.f32 %v249_v18, %v215_v37  ;;  %v252_v24 = vadd.f32 %v250_v19, %v216_v38  ;;  %v257_v44 = vadd.f32 %v255_v49, %v221_v40  ;;  %v258_v25 = vadd.f32 %v256_v13, %v222_v45  ;;  %1296 = vrot.lane.b32.xlu1 %v5083_v3, %s4952_s6 }
  0xe9   :  { %v263_v43 = vadd.f32 %v261_v12, %v227_v21  ;;  %v264_v26 = vadd.f32 %v262_v47, %v228_v22  ;;  %v269_v39 = vadd.f32 %v267_v42, %v233_v54  ;;  %v270_v23 = vadd.f32 %v268_v15, %v234_v48  ;;  %1294 = vrot.lane.b32.xlu0 %v5071_v1, %s4952_s6 }
  0xea   :  { %v281_v27 = vmul.f32 %v280_v28, %v277_v9  ;;  %v282_v37 = vmul.f32 %v280_v28, %v278_v16  ;;  %v287_v38 = vmul.f32 %v286_v29, %v277_v9  ;;  %v288_v40 = vmul.f32 %v286_v29, %v278_v16  ;;  %v373_v45 = vpop.permute.xlu1 %372  ;;  %v371_v41 = vpop.permute.xlu0 %370 }
  0xeb   :  { %v293_v57 = vmul.f32 %v292_v30, %v277_v9  ;;  %v294_v21 = vmul.f32 %v292_v30, %v278_v16  ;;  %v299_v22 = vmul.f32 %v298_v31, %v277_v9  ;;  %v300_v54 = vmul.f32 %v298_v31, %v278_v16 }
  0xec   :  { %v283_v48 = vadd.f32 %v281_v27, %v251_v46  ;;  %v284_v1 = vadd.f32 %v282_v37, %v252_v24  ;;  %v289_v63 = vadd.f32 %v287_v38, %v257_v44  ;;  %v290_v62 = vadd.f32 %v288_v40, %v258_v25  ;;  %1329 = vrot.lane.b32.xlu1 %v5078_v2, %s4952_s6 }
  0xed   :  { %v295_v28 = vadd.f32 %v293_v57, %v263_v43  ;;  %v296_v29 = vadd.f32 %v294_v21, %v264_v26  ;;  %v301_v59 = vadd.f32 %v299_v22, %v269_v39  ;;  %v302_v56 = vadd.f32 %v300_v54, %v270_v23  ;;  %1327 = vrot.lane.b32.xlu0 %v5066_v0, %s4952_s6  ;;  %v5752_v21 = vld [vmem:[#allocation11 + $0x20] sm:$0xff]  ;;  %v5754_v22 = vld [vmem:[#allocation11 + $0x28] sm:$0xff] }
  0xee   :  { %v309_v30 = vmul.f32 %v308_v58, %v5633_v20  ;;  %v310_v31 = vmul.f32 %v307_v53, %v5635_v50  ;;  %v339_v2 = vsel %vm242_vm1, %v336_v14, %v338_v11  ;;  %v340_v8 = vsel %vm242_vm1, %v338_v11, %v336_v14  ;;  %v406_v9 = vpop.permute.xlu1 %405  ;;  %v404_v16 = vpop.permute.xlu0 %403 }
  0xef   :  { %v341_v18 = vmul.f32 %v340_v8, %v5633_v20  ;;  %v342_v0 = vmul.f32 %v339_v2, %v5635_v50  ;;  %v375_v58 = vsel %vm374_vm2, %v371_v41, %v373_v45  ;;  %v376_v53 = vsel %vm374_vm2, %v373_v45, %v371_v41 }
  0xf0   :  { %v313_v19 = vmul.f32 %v312_v32, %v309_v30  ;;  %v314_v49 = vmul.f32 %v312_v32, %v310_v31  ;;  %v319_v13 = vmul.f32 %v318_v33, %v309_v30  ;;  %v320_v11 = vmul.f32 %v318_v33, %v310_v31  ;;  %1361 = vrot.lane.b32.xlu1 %v5090_v4, %s4952_s6 }
  0xf1   :  { %v325_v20 = vmul.f32 %v324_v34, %v309_v30  ;;  %v326_v50 = vmul.f32 %v324_v34, %v310_v31  ;;  %v331_v14 = vmul.f32 %v330_v35, %v309_v30  ;;  %v332_v12 = vmul.f32 %v330_v35, %v310_v31  ;;  %1359 = vrot.lane.b32.xlu0 %v5095_v5, %s4952_s6 }
  0xf2   :  { %v315_v32 = vadd.f32 %v313_v19, %v283_v48  ;;  %v316_v33 = vadd.f32 %v314_v49, %v284_v1  ;;  %v321_v4 = vadd.f32 %v319_v13, %v289_v63  ;;  %v322_v47 = vadd.f32 %v320_v11, %v290_v62  ;;  %v438_v42 = vpop.permute.xlu1 %437  ;;  %v436_v15 = vpop.permute.xlu0 %435 }
  0xf3   :  { %v327_v34 = vadd.f32 %v325_v20, %v295_v28  ;;  %v328_v46 = vadd.f32 %v326_v50, %v296_v29  ;;  %v333_v24 = vadd.f32 %v331_v14, %v301_v59  ;;  %v334_v44 = vadd.f32 %v332_v12, %v302_v56 }
  0xf4   :  { %v345_v25 = vmul.f32 %v344_v36, %v341_v18  ;;  %v346_v35 = vmul.f32 %v344_v36, %v342_v0  ;;  %v9767_v43 = vstv %s9764_s26  ;;  %1393 = vrot.lane.b32.xlu1 %v5102_v6, %s4952_s6  ;;  %v9769_v23 = vstv %s9765_s29  ;;  %s9776_s26 = sld [smem:[#allocation55_spill]]  ;;  %s9787_s29 = sld [smem:[#allocation57_spill]] }
  0xf5   :  { %v351_v5 = vmul.f32 %v9767_v43, %v341_v18  ;;  %v9768_v26 = vmov %v9767_v43  ;;  %v357_v27 = vmul.f32 %v9769_v23, %v341_v18  ;;  %v9770_v37 = vmov %v9769_v23  ;;  %1391 = vrot.lane.b32.xlu0 %v5107_v7, %s4952_s6  ;;  %s9775_s6 = sld [smem:[#allocation54_spill]] }
  0xf6   :  { %v352_v39 = vmul.f32 %v9768_v26, %v342_v0  ;;  %v358_v38 = vmul.f32 %v9770_v37, %v342_v0  ;;  %v9771_v40 = vstv %s9766_s16  ;;  %v347_v36 = vadd.f32 %v345_v25, %v315_v32  ;;  %v5758_v6 = vpop.permute.xlu1 %469  ;;  %v5760_v63 = vpop.permute.xlu0 %467  ;;  %v5803_v25 = vld [vmem:[%s9777_s25 + $0x18] sm:$0xff]  ;;  %s9825_s16 = sld [smem:[#allocation71_spill]] }
  0xf7   :  { %v363_v45 = vmul.f32 %v9771_v40, %v341_v18  ;;  %v9772_v41 = vmov %v9771_v40  ;;  %v348_v54 = vadd.f32 %v346_v35, %v316_v33  ;;  %v353_v48 = vadd.f32 %v351_v5, %v321_v4 }
  0xf8   :  { %v364_v57 = vmul.f32 %v9772_v41, %v342_v0  ;;  %v354_v1 = vadd.f32 %v352_v39, %v322_v47  ;;  %v359_v62 = vadd.f32 %v357_v27, %v327_v34  ;;  %v360_v28 = vadd.f32 %v358_v38, %v328_v46  ;;  %1428 = vrot.lane.b32.xlu1 %v5083_v3, %s4953_s19  ;;  %v5810_v39 = vld [vmem:[%s9777_s25 + $0x10] sm:$0xff] }
  0xf9   :  { %v365_v29 = vadd.f32 %v363_v45, %v333_v24  ;;  %v377_v56 = vmul.f32 %v376_v53, %v5752_v21  ;;  %v378_v7 = vmul.f32 %v375_v58, %v5754_v22  ;;  %v407_v30 = vsel %vm374_vm2, %v404_v16, %v406_v9 }
  0xfa   :  { %v366_v59 = vadd.f32 %v364_v57, %v334_v44  ;;  %v408_v31 = vsel %vm374_vm2, %v406_v9, %v404_v16  ;;  %v410_v8 = vmul.f32 %v407_v30, %v5754_v22  ;;  %v439_v18 = vsel %vm374_vm2, %v436_v15, %v438_v42  ;;  %v5780_v16 = vld [vmem:[%s9777_s25] sm:$0xff]  ;;  %v505_v20 = vpop.permute.xlu1 %504  ;;  %v503_v50 = vpop.permute.xlu0 %502 }
  0xfb   :  { %v409_v2 = vmul.f32 %v408_v31, %v5752_v21  ;;  %v440_v9 = vsel %vm374_vm2, %v438_v42, %v436_v15  ;;  %1426 = vrot.lane.b32.xlu0 %v5780_v16, %s4953_s19  ;;  %v9778_v3 = vstv %s9773_s17  ;;  %v9780_v19 = vstv %s9774_s22  ;;  %s9788_s17 = sld [smem:[#allocation58_spill]]  ;;  %s9808_s22 = sld [smem:[#allocation64_spill]] }
  0xfc   :  { %v381_v0 = vmul.f32 %v9778_v3, %v377_v56  ;;  %v9779_v58 = vmov %v9778_v3  ;;  %v387_v49 = vmul.f32 %v9780_v19, %v377_v56  ;;  %v9781_v13 = vmov %v9780_v19  ;;  %1461 = vrot.lane.b32.xlu1 %v5803_v25, %s4953_s19 }
  0xfd   :  { %v382_v53 = vmul.f32 %v9779_v58, %v378_v7  ;;  %v388_v11 = vmul.f32 %v9781_v13, %v378_v7  ;;  %v9782_v14 = vstv %s9775_s6  ;;  %v9785_v4 = vstv %s9776_s26  ;;  %s9789_s6 = sld [smem:[#allocation59_spill]]  ;;  %v5837_v58 = vld [vmem:[%s9777_s25 + $0x28] sm:$0xff]  ;;  %s9801_s26 = sld [smem:[#allocation63_spill]] }
  0xfe   :  { %v393_v12 = vmul.f32 %v9782_v14, %v377_v56  ;;  %v9783_v32 = vmov %v9782_v14  ;;  %v399_v47 = vmul.f32 %v9785_v4, %v377_v56  ;;  %v9786_v42 = vmov %v9785_v4 }
  0xff   :  { %v394_v33 = vmul.f32 %v9783_v32, %v378_v7  ;;  %v400_v15 = vmul.f32 %v9786_v42, %v378_v7  ;;  %v383_v34 = vadd.f32 %v381_v0, %v347_v36  ;;  %v384_v46 = vadd.f32 %v382_v53, %v348_v54  ;;  %1459 = vrot.lane.b32.xlu0 %v5810_v39, %s4953_s19  ;;  %v5822_v36 = vpop.permute.xlu1 %537  ;;  %v5824_v54 = vpop.permute.xlu0 %535 }
 0x100   :  { %v389_v24 = vadd.f32 %v387_v49, %v353_v48  ;;  %v390_v44 = vadd.f32 %v388_v11, %v354_v1  ;;  %v395_v35 = vadd.f32 %v393_v12, %v359_v62  ;;  %v401_v5 = vadd.f32 %v399_v47, %v365_v29  ;;  %1493 = vrot.lane.b32.xlu1 %v5837_v58, %s4953_s19 }
 0x101   :  { %v396_v43 = vadd.f32 %v394_v33, %v360_v28  ;;  %v402_v26 = vadd.f32 %v400_v15, %v366_v59  ;;  %v9790_v23 = vstv %s9784_s21  ;;  %v9792_v40 = vstv %s9787_s29  ;;  %s9798_s29 = sld [smem:[#allocation60_spill]]  ;;  %s4954_s21 = smov 1  }
 0x102   :  { %v413_v27 = vmul.f32 %v9790_v23, %v409_v2  ;;  %v9791_v37 = vmov %v9790_v23  ;;  %v419_v45 = vmul.f32 %v9792_v40, %v409_v2  ;;  %v9793_v41 = vmov %v9792_v40 }
 0x103   :  { %v414_v38 = vmul.f32 %v9791_v37, %v410_v8  ;;  %v420_v57 = vmul.f32 %v9793_v41, %v410_v8  ;;  %v9794_v48 = vstv %s9788_s17  ;;  %v9796_v29 = vstv %s9789_s6  ;;  %s9799_s17 = sld [smem:[#allocation61_spill]]  ;;  %s9800_s6 = sld [smem:[#allocation62_spill]]  ;;  %v570_v32 = vpop.permute.xlu1 %569  ;;  %v568_v33 = vpop.permute.xlu0 %567 }
 0x104   :  { %v425_v1 = vmul.f32 %v9794_v48, %v409_v2  ;;  %v9795_v62 = vmov %v9794_v48  ;;  %v431_v59 = vmul.f32 %v9796_v29, %v409_v2  ;;  %v9797_v56 = vmov %v9796_v29 }
 0x105   :  { %v426_v28 = vmul.f32 %v9795_v62, %v410_v8  ;;  %v432_v7 = vmul.f32 %v9797_v56, %v410_v8  ;;  %v415_v30 = vadd.f32 %v413_v27, %v383_v34  ;;  %v416_v31 = vadd.f32 %v414_v38, %v384_v46  ;;  %v5844_v8 = vld [vmem:[%s9777_s25 + $0x20] sm:$0xff]  ;;  %v5890_v27 = vld [vmem:[%s9777_s25 + $0x30] sm:$0xff] }
 0x106   :  { %v421_v3 = vadd.f32 %v419_v45, %v389_v24  ;;  %v422_v0 = vadd.f32 %v420_v57, %v390_v44  ;;  %v427_v53 = vadd.f32 %v425_v1, %v395_v35  ;;  %v433_v49 = vadd.f32 %v431_v59, %v401_v5  ;;  %1491 = vrot.lane.b32.xlu0 %v5844_v8, %s4953_s19 }
 0x107   :  { %v428_v19 = vadd.f32 %v426_v28, %v396_v43  ;;  %v434_v2 = vadd.f32 %v432_v7, %v402_v26  ;;  %v441_v13 = vmul.f32 %v440_v9, %v5752_v21  ;;  %v442_v11 = vmul.f32 %v439_v18, %v5754_v22  ;;  %v5894_v41 = vpop.permute.xlu1 %601  ;;  %v5896_v57 = vpop.permute.xlu0 %599 }
 0x108   :  { %v471_v14 = vsel %vm374_vm2, %v5760_v63, %v5758_v6  ;;  %v472_v12 = vsel %vm374_vm2, %v5758_v6, %v5760_v63  ;;  %v507_v18 = vsel %vm506_vm3, %v503_v50, %v505_v20  ;;  %v508_v47 = vsel %vm506_vm3, %v505_v20, %v503_v50 }
 0x109   :  { %v473_v9 = vmul.f32 %v472_v12, %v5752_v21  ;;  %v474_v4 = vmul.f32 %v471_v14, %v5754_v22  ;;  %v9802_v42 = vstv %s9798_s29  ;;  %v9804_v24 = vstv %s9799_s17  ;;  %v5875_v21 = vld [vmem:[%s9777_s25 + $0x38] sm:$0xff]  ;;  %s9811_s29 = sld [smem:[#allocation65_spill]]  ;;  %s9824_s17 = sld [smem:[#allocation70_spill]] }
 0x10a   :  { %v445_v15 = vmul.f32 %v9802_v42, %v441_v13  ;;  %v9803_v34 = vmov %v9802_v42  ;;  %v451_v44 = vmul.f32 %v9804_v24, %v441_v13  ;;  %v9805_v6 = vmov %v9804_v24  ;;  %1525 = vrot.lane.b32.xlu1 %v5875_v21, %s4953_s19  ;;  %1523 = vrot.lane.b32.xlu0 %v5890_v27, %s4953_s19  ;;  %s9836_s19 = sld [smem:[#allocation74_spill]] }
 0x10b   :  { %v446_v46 = vmul.f32 %v9803_v34, %v442_v11  ;;  %v452_v63 = vmul.f32 %v9805_v6, %v442_v11  ;;  %v9806_v22 = vstv %s9800_s6  ;;  %v9809_v50 = vstv %s9801_s26  ;;  %s9812_s6 = sld [smem:[#allocation66_spill]]  ;;  %v5923_v34 = vld [vmem:[#allocation11 + $0x38] sm:$0xff]  ;;  %s9837_s26 = sld [smem:[#allocation75_spill]] }
 0x10c   :  { %v457_v35 = vmul.f32 %v9806_v22, %v441_v13  ;;  %v9807_v43 = vmov %v9806_v22  ;;  %v463_v5 = vmul.f32 %v9809_v50, %v441_v13  ;;  %v9810_v26 = vmov %v9809_v50  ;;  %v5929_v22 = vpop.permute.xlu0 %634 }
 0x10d   :  { %v458_v20 = vmul.f32 %v9807_v43, %v442_v11  ;;  %v464_v23 = vmul.f32 %v9810_v26, %v442_v11  ;;  %v447_v37 = vadd.f32 %v445_v15, %v415_v30  ;;  %v448_v38 = vadd.f32 %v446_v46, %v416_v31  ;;  %v5921_v15 = vld [vmem:[#allocation11 + $0x30] sm:$0xff] }
 0x10e   :  { %v453_v40 = vadd.f32 %v451_v44, %v421_v3  ;;  %v454_v45 = vadd.f32 %v452_v63, %v422_v0  ;;  %v459_v48 = vadd.f32 %v457_v35, %v427_v53  ;;  %v465_v62 = vadd.f32 %v463_v5, %v433_v49  ;;  %v5909_v0 = vld [vmem:[%s9777_s25 + $0x8] sm:$0xff]  ;;  %1558 = vrot.lane.b32.xlu0 %v5780_v16, %s4954_s21  ;;  %v5927_v63 = vpop.permute.xlu1 %636 }
 0x10f   :  { %v460_v1 = vadd.f32 %v458_v20, %v428_v19  ;;  %v466_v28 = vadd.f32 %v464_v23, %v434_v2  ;;  %v9814_v29 = vstv %s9808_s22  ;;  %v9816_v30 = vstv %s9811_s29  ;;  %1560 = vrot.lane.b32.xlu1 %v5909_v0, %s4954_s21  ;;  %s9822_s22 = sld [smem:[#allocation68_spill]]  ;;  %s9823_s29 = sld [smem:[#allocation69_spill]] }
 0x110   :  { %v477_v59 = vmul.f32 %v9814_v29, %v473_v9  ;;  %v9815_v56 = vmov %v9814_v29  ;;  %v483_v31 = vmul.f32 %v9816_v30, %v473_v9  ;;  %v9817_v13 = vmov %v9816_v30 }
 0x111   :  { %v478_v7 = vmul.f32 %v9815_v56, %v474_v4  ;;  %v484_v3 = vmul.f32 %v9817_v13, %v474_v4  ;;  %v9818_v53 = vstv %s9812_s6  ;;  %v9820_v11 = vstv %s9813_s18  ;;  %s9832_s6 = sld [smem:[#allocation72_spill]]  ;;  %s9835_s18 = sld [smem:[#allocation73_spill]] }
 0x112   :  { %v489_v19 = vmul.f32 %v9818_v53, %v473_v9  ;;  %v9819_v49 = vmov %v9818_v53  ;;  %v495_v14 = vmul.f32 %v9820_v11, %v473_v9  ;;  %v9821_v12 = vmov %v9820_v11  ;;  %1591 = vrot.lane.b32.xlu0 %v5810_v39, %s4954_s21 }
 0x113   :  { %v490_v2 = vmul.f32 %v9819_v49, %v474_v4  ;;  %v496_v42 = vmul.f32 %v9821_v12, %v474_v4  ;;  %v479_v46 = vadd.f32 %v477_v59, %v447_v37  ;;  %v480_v24 = vadd.f32 %v478_v7, %v448_v38  ;;  %1593 = vrot.lane.b32.xlu1 %v5803_v25, %s4954_s21  ;;  %v5970_v49 = vpop.permute.xlu0 %667 }
 0x114   :  { %v485_v44 = vadd.f32 %v483_v31, %v453_v40  ;;  %v486_v6 = vadd.f32 %v484_v3, %v454_v45  ;;  %v491_v35 = vadd.f32 %v489_v19, %v459_v48  ;;  %v497_v4 = vadd.f32 %v495_v14, %v465_v62  ;;  %v5968_v19 = vpop.permute.xlu1 %669 }
 0x115   :  { %v492_v9 = vadd.f32 %v490_v2, %v460_v1  ;;  %v498_v43 = vadd.f32 %v496_v42, %v466_v28  ;;  %v509_v20 = vmul.f32 %v508_v47, %v5921_v15  ;;  %v510_v50 = vmul.f32 %v507_v18, %v5923_v34 }
 0x116   :  { %v539_v5 = vsel %vm506_vm3, %v5824_v54, %v5822_v36  ;;  %v540_v26 = vsel %vm506_vm3, %v5822_v36, %v5824_v54  ;;  %v571_v23 = vsel %vm506_vm3, %v568_v33, %v570_v32  ;;  %v572_v37 = vsel %vm506_vm3, %v570_v32, %v568_v33  ;;  %1623 = vrot.lane.b32.xlu0 %v5844_v8, %s4954_s21 }
 0x117   :  { %v541_v47 = vmul.f32 %v540_v26, %v5921_v15  ;;  %v542_v18 = vmul.f32 %v539_v5, %v5923_v34  ;;  %v9826_v38 = vstv %s9822_s22  ;;  %v9828_v45 = vstv %s9823_s29  ;;  %1625 = vrot.lane.b32.xlu1 %v5837_v58, %s4954_s21  ;;  %s9846_s22 = sld [smem:[#allocation76_spill]]  ;;  %s9847_s29 = sld [smem:[#allocation77_spill]] }
 0x118   :  { %v513_v36 = vmul.f32 %v9826_v38, %v509_v20  ;;  %v9827_v54 = vmov %v9826_v38  ;;  %v519_v48 = vmul.f32 %v9828_v45, %v509_v20  ;;  %v9829_v1 = vmov %v9828_v45 }
 0x119   :  { %v514_v40 = vmul.f32 %v9827_v54, %v510_v50  ;;  %v520_v62 = vmul.f32 %v9829_v1, %v510_v50  ;;  %v9830_v28 = vstv %s9824_s17  ;;  %v9833_v7 = vstv %s9825_s16  ;;  %s9848_s17 = sld [smem:[#allocation78_spill]]  ;;  %s9849_s16 = sld [smem:[#allocation79_spill]] }
 0x11a   :  { %v525_v29 = vmul.f32 %v9830_v28, %v509_v20  ;;  %v9831_v59 = vmov %v9830_v28  ;;  %v531_v30 = vmul.f32 %v9833_v7, %v509_v20  ;;  %v9834_v32 = vmov %v9833_v7  ;;  %1655 = vrot.lane.b32.xlu0 %v5890_v27, %s4954_s21 }
 0x11b   :  { %v526_v56 = vmul.f32 %v9831_v59, %v510_v50  ;;  %v532_v33 = vmul.f32 %v9834_v32, %v510_v50  ;;  %v515_v31 = vadd.f32 %v513_v36, %v479_v46  ;;  %v516_v13 = vadd.f32 %v514_v40, %v480_v24  ;;  %1657 = vrot.lane.b32.xlu1 %v5875_v21, %s4954_s21  ;;  %v700_v32 = vpop.permute.xlu0 %699  ;;  %s9854_s21 = sld [smem:[#allocation80_spill]] }
 0x11c   :  { %v521_v3 = vadd.f32 %v519_v48, %v485_v44  ;;  %v522_v53 = vadd.f32 %v520_v62, %v486_v6  ;;  %v527_v2 = vadd.f32 %v525_v29, %v491_v35  ;;  %v533_v14 = vadd.f32 %v531_v30, %v497_v4  ;;  %v702_v30 = vpop.permute.xlu1 %701 }
 0x11d   :  { %v528_v11 = vadd.f32 %v526_v56, %v492_v9  ;;  %v534_v12 = vadd.f32 %v532_v33, %v498_v43  ;;  %v9838_v42 = vstv %s9832_s6  ;;  %v9840_v6 = vstv %s9835_s18  ;;  %s4955_s6 = smov 127   ;;  %s9856_s18 = sld [smem:[#allocation81_spill]] }
 0x11e   :  { %v545_v46 = vmul.f32 %v9838_v42, %v541_v47  ;;  %v9839_v24 = vmov %v9838_v42  ;;  %v551_v20 = vmul.f32 %v9840_v6, %v541_v47  ;;  %v9841_v50 = vmov %v9840_v6  ;;  %1786 = vrot.lane.b32.xlu0 %v5780_v16, %s4955_s6 }
 0x11f   :  { %v546_v44 = vmul.f32 %v9839_v24, %v542_v18  ;;  %v552_v5 = vmul.f32 %v9841_v50, %v542_v18  ;;  %v9842_v26 = vstv %s9836_s19  ;;  %v9844_v40 = vstv %s9837_s26  ;;  %1788 = vrot.lane.b32.xlu1 %v5909_v0, %s4955_s6  ;;  %s9860_s19 = sld [smem:[#allocation82_spill]]  ;;  %s9861_s26 = sld [smem:[#allocation83_spill]] }
 0x120   :  { %v557_v38 = vmul.f32 %v9842_v26, %v541_v47  ;;  %v9843_v36 = vmov %v9842_v26  ;;  %v563_v35 = vmul.f32 %v9844_v40, %v541_v47  ;;  %v9845_v9 = vmov %v9844_v40 }
 0x121   :  { %v558_v54 = vmul.f32 %v9843_v36, %v542_v18  ;;  %v564_v4 = vmul.f32 %v9845_v9, %v542_v18  ;;  %v547_v43 = vadd.f32 %v545_v46, %v515_v31  ;;  %v548_v45 = vadd.f32 %v546_v44, %v516_v13 }
 0x122   :  { %v553_v48 = vadd.f32 %v551_v20, %v521_v3  ;;  %v554_v1 = vadd.f32 %v552_v5, %v522_v53  ;;  %v559_v62 = vadd.f32 %v557_v38, %v527_v2  ;;  %v565_v29 = vadd.f32 %v563_v35, %v533_v14  ;;  %1819 = vrot.lane.b32.xlu0 %v5810_v39, %s4955_s6 }
 0x123   :  { %v560_v28 = vadd.f32 %v558_v54, %v528_v11  ;;  %v566_v59 = vadd.f32 %v564_v4, %v534_v12  ;;  %v573_v47 = vmul.f32 %v572_v37, %v5921_v15  ;;  %v574_v18 = vmul.f32 %v571_v23, %v5923_v34  ;;  %1821 = vrot.lane.b32.xlu1 %v5803_v25, %s4955_s6 }
 0x124   :  { %v603_v56 = vsel %vm506_vm3, %v5896_v57, %v5894_v41  ;;  %v604_v7 = vsel %vm506_vm3, %v5894_v41, %v5896_v57  ;;  %v639_v23 = vsel %vm638_vm4, %v5929_v22, %v5927_v63  ;;  %v640_v31 = vsel %vm638_vm4, %v5927_v63, %v5929_v22 }
 0x125   :  { %v605_v37 = vmul.f32 %v604_v7, %v5921_v15  ;;  %v606_v33 = vmul.f32 %v603_v56, %v5923_v34  ;;  %v9850_v13 = vstv %s9846_s22  ;;  %v9852_v53 = vstv %s9847_s29  ;;  %v6044_v7 = vpop.permute.xlu1 %733  ;;  %s9870_s22 = sld [smem:[#allocation84_spill]]  ;;  %s9871_s29 = sld [smem:[#allocation85_spill]] }
 0x126   :  { %v577_v3 = vmul.f32 %v9850_v13, %v573_v47  ;;  %v9851_v41 = vmov %v9850_v13  ;;  %v583_v2 = vmul.f32 %v9852_v53, %v573_v47  ;;  %v9853_v11 = vmov %v9852_v53  ;;  %1851 = vrot.lane.b32.xlu0 %v5844_v8, %s4955_s6 }
 0x127   :  { %v578_v57 = vmul.f32 %v9851_v41, %v574_v18  ;;  %v584_v15 = vmul.f32 %v9853_v11, %v574_v18  ;;  %v9855_v34 = vstv %s9848_s17  ;;  %v9858_v22 = vstv %s9849_s16  ;;  %v6060_v41 = vld [vmem:[#allocation11 + $0x48] sm:$0xff]  ;;  %1853 = vrot.lane.b32.xlu1 %v5837_v58, %s4955_s6  ;;  %s9876_s17 = sld [smem:[#allocation88_spill]]  ;;  %s9881_s16 = sld [smem:[#allocation91_spill]] }
 0x128   :  { %v589_v14 = vmul.f32 %v9855_v34, %v573_v47  ;;  %v9857_v12 = vmov %v9855_v34  ;;  %v595_v42 = vmul.f32 %v9858_v22, %v573_v47  ;;  %v9859_v46 = vmov %v9858_v22 }
 0x129   :  { %v590_v63 = vmul.f32 %v9857_v12, %v574_v18  ;;  %v596_v24 = vmul.f32 %v9859_v46, %v574_v18  ;;  %v579_v44 = vadd.f32 %v577_v3, %v547_v43  ;;  %v580_v6 = vadd.f32 %v578_v57, %v548_v45  ;;  %v6046_v43 = vpop.permute.xlu0 %731  ;;  %v6058_v3 = vld [vmem:[#allocation11 + $0x40] sm:$0xff] }
 0x12a   :  { %v585_v20 = vadd.f32 %v583_v2, %v553_v48  ;;  %v586_v50 = vadd.f32 %v584_v15, %v554_v1  ;;  %v591_v5 = vadd.f32 %v589_v14, %v559_v62  ;;  %v597_v38 = vadd.f32 %v595_v42, %v565_v29  ;;  %1883 = vrot.lane.b32.xlu0 %v5890_v27, %s4955_s6 }
 0x12b   :  { %v592_v26 = vadd.f32 %v590_v63, %v560_v28  ;;  %v598_v36 = vadd.f32 %v596_v24, %v566_v59  ;;  %v9862_v54 = vstv %s9854_s21  ;;  %v9864_v4 = vstv %s9856_s18  ;;  %1885 = vrot.lane.b32.xlu1 %v5875_v21, %s4955_s6  ;;  %s9893_s21 = sld [smem:[#allocation95_spill]]  ;;  %s9899_s18 = sld [smem:[#allocation96_spill]] }
 0x12c   :  { %v609_v40 = vmul.f32 %v9862_v54, %v605_v37  ;;  %v9863_v35 = vmov %v9862_v54  ;;  %v615_v47 = vmul.f32 %v9864_v4, %v605_v37  ;;  %v9865_v18 = vmov %v9864_v4 }
 0x12d   :  { %v610_v9 = vmul.f32 %v9863_v35, %v606_v33  ;;  %v616_v56 = vmul.f32 %v9865_v18, %v606_v33  ;;  %v9866_v45 = vstv %s9860_s19  ;;  %v9868_v28 = vstv %s9861_s26  ;;  %s9903_s19 = sld [smem:[#allocation98_spill]]  ;;  %s9962_s26 = sld [smem:[#allocation86_spill]] }
 0x12e   :  { %v621_v48 = vmul.f32 %v9866_v45, %v605_v37  ;;  %v9867_v1 = vmov %v9866_v45  ;;  %v627_v29 = vmul.f32 %v9868_v28, %v605_v37  ;;  %v9869_v59 = vmov %v9868_v28 }
 0x12f   :  { %v622_v62 = vmul.f32 %v9867_v1, %v606_v33  ;;  %v628_v13 = vmul.f32 %v9869_v59, %v606_v33  ;;  %v611_v57 = vadd.f32 %v609_v40, %v579_v44  ;;  %v612_v53 = vadd.f32 %v610_v9, %v580_v6 }
 0x130   :  { %v617_v2 = vadd.f32 %v615_v47, %v585_v20  ;;  %v618_v11 = vadd.f32 %v616_v56, %v586_v50  ;;  %v623_v15 = vadd.f32 %v621_v48, %v591_v5  ;;  %v629_v14 = vadd.f32 %v627_v29, %v597_v38  ;;  %v767_v38 = vpop.permute.xlu0 %766 }
 0x131   :  { %v624_v34 = vadd.f32 %v622_v62, %v592_v26  ;;  %v630_v37 = vadd.f32 %v628_v13, %v598_v36  ;;  %v641_v33 = vmul.f32 %v640_v31, %v6058_v3  ;;  %v642_v12 = vmul.f32 %v639_v23, %v6060_v41  ;;  %v769_v26 = vpop.permute.xlu1 %768 }
 0x132   :  { %v671_v63 = vsel %vm638_vm4, %v5970_v49, %v5968_v19  ;;  %v672_v22 = vsel %vm638_vm4, %v5968_v19, %v5970_v49  ;;  %v703_v42 = vsel %vm638_vm4, %v700_v32, %v702_v30  ;;  %v704_v46 = vsel %vm638_vm4, %v702_v30, %v700_v32 }
 0x133   :  { %v673_v23 = vmul.f32 %v672_v22, %v6058_v3  ;;  %v674_v31 = vmul.f32 %v671_v63, %v6060_v41  ;;  %v9872_v19 = vstv %s9870_s22  ;;  %v9874_v6 = vstv %s9871_s29  ;;  %s6334_s22 = sld [smem:[#allocation2 + $0x70]]  ;;  %s9963_s29 = sld [smem:[#allocation105_spill]] }
 0x134   :  { %v645_v49 = vmul.f32 %v9872_v19, %v641_v33  ;;  %v9873_v24 = vmov %v9872_v19  ;;  %v651_v20 = vmul.f32 %v9874_v6, %v641_v33  ;;  %v9875_v50 = vmov %v9874_v6 }
 0x135   :  { %v646_v44 = vmul.f32 %v9873_v24, %v642_v12  ;;  %v652_v5 = vmul.f32 %v9875_v50, %v642_v12  ;;  %v9877_v36 = vstv %s9701_s30  ;;  %v9879_v32 = vstv %s9703_s1  ;;  %v800_v50 = vpop.permute.xlu0 %799  ;;  %s9890_s30 = sld [smem:[#allocation92_spill]]  ;;  %s4956_s1 = smov 126  }
 0x136   :  { %v657_v54 = vmul.f32 %v9877_v36, %v641_v33  ;;  %v9878_v40 = vmov %v9877_v36  ;;  %v663_v35 = vmul.f32 %v9879_v32, %v641_v33  ;;  %v9880_v9 = vmov %v9879_v32  ;;  %1920 = vrot.lane.b32.xlu1 %v5909_v0, %s4956_s1  ;;  %1918 = vrot.lane.b32.xlu0 %v5780_v16, %s4956_s1 }
 0x137   :  { %v658_v30 = vmul.f32 %v9878_v40, %v642_v12  ;;  %v664_v4 = vmul.f32 %v9880_v9, %v642_v12  ;;  %v647_v47 = vadd.f32 %v645_v49, %v611_v57  ;;  %v648_v18 = vadd.f32 %v646_v44, %v612_v53 }
 0x138   :  { %v653_v56 = vadd.f32 %v651_v20, %v617_v2  ;;  %v654_v45 = vadd.f32 %v652_v5, %v618_v11  ;;  %v659_v48 = vadd.f32 %v657_v54, %v623_v15  ;;  %v665_v62 = vadd.f32 %v663_v35, %v629_v14  ;;  %v802_v20 = vpop.permute.xlu1 %801 }
 0x139   :  { %v660_v1 = vadd.f32 %v658_v30, %v624_v34  ;;  %v666_v28 = vadd.f32 %v664_v4, %v630_v37  ;;  %v9882_v29 = vstv %s9876_s17  ;;  %v9884_v57 = vstv %s9705_s14  ;;  %s9891_s14 = sld [smem:[#allocation93_spill]]  ;;  %s6356_s17 = sld [smem:[#allocation2 + $0x74]] }
 0x13a   :  { %v677_v59 = vmul.f32 %v9882_v29, %v673_v23  ;;  %v9883_v13 = vmov %v9882_v29  ;;  %v683_v12 = vmul.f32 %v9884_v57, %v673_v23  ;;  %v9885_v53 = vmov %v9884_v57  ;;  %1953 = vrot.lane.b32.xlu1 %v5803_v25, %s4956_s1  ;;  %1951 = vrot.lane.b32.xlu0 %v5810_v39, %s4956_s1 }
 0x13b   :  { %v678_v33 = vmul.f32 %v9883_v13, %v674_v31  ;;  %v684_v63 = vmul.f32 %v9885_v53, %v674_v31  ;;  %v9886_v2 = vstv %s9707_s7  ;;  %v9888_v49 = vstv %s9881_s16  ;;  %s9892_s7 = sld [smem:[#allocation94_spill]]  ;;  %v832_v53 = vpop.permute.xlu0 %831  ;;  %s6358_s16 = sld [smem:[#allocation2 + $0x78]] }
 0x13c   :  { %v689_v11 = vmul.f32 %v9886_v2, %v673_v23  ;;  %v9887_v22 = vmov %v9886_v2  ;;  %v695_v15 = vmul.f32 %v9888_v49, %v673_v23  ;;  %v9889_v34 = vmov %v9888_v49 }
 0x13d   :  { %v690_v19 = vmul.f32 %v9887_v22, %v674_v31  ;;  %v696_v14 = vmul.f32 %v9889_v34, %v674_v31  ;;  %v679_v37 = vadd.f32 %v677_v59, %v647_v47  ;;  %v680_v24 = vadd.f32 %v678_v33, %v648_v18 }
 0x13e   :  { %v685_v44 = vadd.f32 %v683_v12, %v653_v56  ;;  %v686_v6 = vadd.f32 %v684_v63, %v654_v45  ;;  %v691_v5 = vadd.f32 %v689_v11, %v659_v48  ;;  %v697_v54 = vadd.f32 %v695_v15, %v665_v62  ;;  %v834_v12 = vpop.permute.xlu1 %833  ;;  %1985 = vrot.lane.b32.xlu1 %v5837_v58, %s4956_s1 }
 0x13f   :  { %v692_v36 = vadd.f32 %v690_v19, %v660_v1  ;;  %v698_v23 = vadd.f32 %v696_v14, %v666_v28  ;;  %v705_v31 = vmul.f32 %v704_v46, %v6058_v3  ;;  %v706_v40 = vmul.f32 %v703_v42, %v6060_v41  ;;  %1983 = vrot.lane.b32.xlu0 %v5844_v8, %s4956_s1 }
 0x140   :  { %v735_v30 = vsel %vm638_vm4, %v6046_v43, %v6044_v7  ;;  %v736_v32 = vsel %vm638_vm4, %v6044_v7, %v6046_v43  ;;  %v771_v46 = vsel %vm770_vm5, %v767_v38, %v769_v26  ;;  %v772_v42 = vsel %vm770_vm5, %v769_v26, %v767_v38 }
 0x141   :  { %v737_v35 = vmul.f32 %v736_v32, %v6058_v3  ;;  %v738_v9 = vmul.f32 %v735_v30, %v6060_v41  ;;  %v9894_v4 = vstv %s9890_s30  ;;  %v9896_v45 = vstv %s9891_s14  ;;  %s6362_s30 = sld [smem:[#allocation2 + $0x7c]]  ;;  %s6537_s14 = sld [smem:[#allocation2 + $0x8d]] }
 0x142   :  { %v709_v47 = vmul.f32 %v9894_v4, %v705_v31  ;;  %v9895_v18 = vmov %v9894_v4  ;;  %v715_v48 = vmul.f32 %v9896_v45, %v705_v31  ;;  %v9897_v1 = vmov %v9896_v45  ;;  %v6181_v4 = vld [vmem:[#allocation11 + $0x58] sm:$0xff]  ;;  %2017 = vrot.lane.b32.xlu1 %v5875_v21, %s4956_s1 }
 0x143   :  { %v710_v56 = vmul.f32 %v9895_v18, %v706_v40  ;;  %v716_v62 = vmul.f32 %v9897_v1, %v706_v40  ;;  %v9898_v7 = vstv %s9892_s7  ;;  %v9901_v28 = vstv %s9893_s21  ;;  %2015 = vrot.lane.b32.xlu0 %v5890_v27, %s4956_s1  ;;  %s6364_s1 = sld [smem:[#allocation2 + $0x71]]  ;;  %s6402_s21 = sld [smem:[#allocation2 + $0x7d]] }
 0x144   :  { %v721_v43 = vmul.f32 %v9898_v7, %v705_v31  ;;  %v9900_v3 = vmov %v9898_v7  ;;  %v727_v26 = vmul.f32 %v9901_v28, %v705_v31  ;;  %v9902_v38 = vmov %v9901_v28  ;;  %v864_v28 = vpop.permute.xlu0 %863  ;;  %s6691_s7 = sld [smem:[#allocation2 + $0x9a]] }
 0x145   :  { %v722_v41 = vmul.f32 %v9900_v3, %v706_v40  ;;  %v728_v29 = vmul.f32 %v9902_v38, %v706_v40  ;;  %v711_v59 = vadd.f32 %v709_v47, %v679_v37  ;;  %v712_v13 = vadd.f32 %v710_v56, %v680_v24 }
 0x146   :  { %v717_v33 = vadd.f32 %v715_v48, %v685_v44  ;;  %v718_v57 = vadd.f32 %v716_v62, %v686_v6  ;;  %v723_v63 = vadd.f32 %v721_v43, %v691_v5  ;;  %v729_v11 = vadd.f32 %v727_v26, %v697_v54 }
 0x147   :  { %v724_v2 = vadd.f32 %v722_v41, %v692_v36  ;;  %v730_v22 = vadd.f32 %v728_v29, %v698_v23  ;;  %v9904_v19 = vstv %s9899_s18  ;;  %v9906_v14 = vstv %s9717_s5  ;;  %v6179_v23 = vld [vmem:[#allocation11 + $0x50] sm:$0xff]  ;;  %v866_v41 = vpop.permute.xlu1 %865  ;;  %s9960_s5 = sld [smem:[#allocation104_spill]]  ;;  %s6404_s18 = sld [smem:[#allocation2 + $0x72]] }
 0x148   :  { %v741_v49 = vmul.f32 %v9904_v19, %v737_v35  ;;  %v9905_v15 = vmov %v9904_v19  ;;  %v747_v31 = vmul.f32 %v9906_v14, %v737_v35  ;;  %v9907_v40 = vmov %v9906_v14 }
 0x149   :  { %v742_v34 = vmul.f32 %v9905_v15, %v738_v9  ;;  %v748_v37 = vmul.f32 %v9907_v40, %v738_v9  ;;  %v9908_v24 = vstv %s9903_s19  ;;  %v9910_v32 = vstv %s9721_s24  ;;  %s9934_s24 = sld [smem:[#allocation89_spill]]  ;;  %s4959_s19 = smov 112  }
 0x14a   :  { %v753_v44 = vmul.f32 %v9908_v24, %v737_v35  ;;  %v9909_v6 = vmov %v9908_v24  ;;  %v759_v5 = vmul.f32 %v9910_v32, %v737_v35  ;;  %v9911_v36 = vmov %v9910_v32 }
 0x14b   :  { %v754_v30 = vmul.f32 %v9909_v6, %v738_v9  ;;  %v760_v54 = vmul.f32 %v9911_v36, %v738_v9  ;;  %v743_v47 = vadd.f32 %v741_v49, %v711_v59  ;;  %v744_v18 = vadd.f32 %v742_v34, %v712_v13 }
 0x14c   :  { %v749_v56 = vadd.f32 %v747_v31, %v717_v33  ;;  %v750_v45 = vadd.f32 %v748_v37, %v718_v57  ;;  %v755_v48 = vadd.f32 %v753_v44, %v723_v63  ;;  %v761_v62 = vadd.f32 %v759_v5, %v729_v11 }
 0x14d   :  { %v756_v1 = vadd.f32 %v754_v30, %v724_v2  ;;  %v762_v7 = vadd.f32 %v760_v54, %v730_v22  ;;  %v773_v35 = vmul.f32 %v772_v42, %v6179_v23  ;;  %v774_v9 = vmul.f32 %v771_v46, %v6181_v4 }
 0x14e   :  { %v803_v43 = vsel %vm770_vm5, %v800_v50, %v802_v20  ;;  %v804_v3 = vsel %vm770_vm5, %v802_v20, %v800_v50  ;;  %v835_v26 = vsel %vm770_vm5, %v832_v53, %v834_v12  ;;  %v836_v38 = vsel %vm770_vm5, %v834_v12, %v832_v53 }
 0x14f   :  { %v805_v42 = vmul.f32 %v804_v3, %v6179_v23  ;;  %v806_v46 = vmul.f32 %v803_v43, %v6181_v4  ;;  %v9912_v20 = vstv %s5376_s8  ;;  %v9914_v13 = vstv %s5378_s23  ;;  %s4957_s23 = smov 114   ;;  %s9939_s8 = sld [smem:[#allocation100_spill]] }
 0x150   :  { %v777_v50 = vmul.f32 %v9912_v20, %v773_v35  ;;  %v9913_v29 = vmov %v9912_v20  ;;  %v783_v33 = vmul.f32 %v9914_v13, %v773_v35  ;;  %v9915_v57 = vmov %v9914_v13  ;;  %2052 = vrot.lane.b32.xlu1 %v5909_v0, %s4957_s23  ;;  %2050 = vrot.lane.b32.xlu0 %v5780_v16, %s4957_s23 }
 0x151   :  { %v778_v59 = vmul.f32 %v9913_v29, %v774_v9  ;;  %v784_v63 = vmul.f32 %v9915_v57, %v774_v9  ;;  %v9916_v2 = vstv %s5384_s12  ;;  %v9918_v49 = vstv %s5386_s2  ;;  %s9932_s2 = sld [smem:[#allocation87_spill]]  ;;  %s4958_s12 = smov 113  }
 0x152   :  { %v789_v11 = vmul.f32 %v9916_v2, %v773_v35  ;;  %v9917_v22 = vmov %v9916_v2  ;;  %v795_v12 = vmul.f32 %v9918_v49, %v773_v35  ;;  %v9919_v53 = vmov %v9918_v49  ;;  %v899_v35 = vpop.permute.xlu0 %898 }
 0x153   :  { %v790_v19 = vmul.f32 %v9917_v22, %v774_v9  ;;  %v796_v15 = vmul.f32 %v9919_v53, %v774_v9  ;;  %v779_v34 = vadd.f32 %v777_v50, %v743_v47  ;;  %v780_v14 = vadd.f32 %v778_v59, %v744_v18 }
 0x154   :  { %v785_v31 = vadd.f32 %v783_v33, %v749_v56  ;;  %v786_v40 = vadd.f32 %v784_v63, %v750_v45  ;;  %v791_v37 = vadd.f32 %v789_v11, %v755_v48  ;;  %v797_v44 = vadd.f32 %v795_v12, %v761_v62  ;;  %v901_v45 = vpop.permute.xlu1 %900  ;;  %2085 = vrot.lane.b32.xlu1 %v5803_v25, %s4957_s23 }
 0x155   :  { %v792_v24 = vadd.f32 %v790_v19, %v756_v1  ;;  %v798_v6 = vadd.f32 %v796_v15, %v762_v7  ;;  %v9920_v30 = vstv %s5392_s9  ;;  %v9922_v54 = vstv %s5394_s28  ;;  %2083 = vrot.lane.b32.xlu0 %v5810_v39, %s4957_s23  ;;  %s9938_s28 = sld [smem:[#allocation90_spill]]  ;;  %s9950_s9 = sld [smem:[#allocation99_spill]] }
 0x156   :  { %v809_v32 = vmul.f32 %v9920_v30, %v805_v42  ;;  %v9921_v5 = vmov %v9920_v30  ;;  %v815_v47 = vmul.f32 %v9922_v54, %v805_v42  ;;  %v9923_v18 = vmov %v9922_v54 }
 0x157   :  { %v810_v36 = vmul.f32 %v9921_v5, %v806_v46  ;;  %v816_v56 = vmul.f32 %v9923_v18, %v806_v46  ;;  %v9924_v9 = vstv %s5402_s20  ;;  %v9926_v1 = vstv %s5404_s11  ;;  %s9951_s11 = sld [smem:[#allocation102_spill]]  ;;  %s9957_s20 = sld [smem:[#allocation103_spill]] }
 0x158   :  { %v821_v43 = vmul.f32 %v9924_v9, %v805_v42  ;;  %v9925_v3 = vmov %v9924_v9  ;;  %v827_v62 = vmul.f32 %v9926_v1, %v805_v42  ;;  %v9927_v7 = vmov %v9926_v1  ;;  %2117 = vrot.lane.b32.xlu1 %v5837_v58, %s4957_s23 }
 0x159   :  { %v822_v48 = vmul.f32 %v9925_v3, %v806_v46  ;;  %v828_v20 = vmul.f32 %v9927_v7, %v806_v46  ;;  %v811_v50 = vadd.f32 %v809_v32, %v779_v34  ;;  %v812_v29 = vadd.f32 %v810_v36, %v780_v14  ;;  %2115 = vrot.lane.b32.xlu0 %v5844_v8, %s4957_s23 }
 0x15a   :  { %v817_v59 = vadd.f32 %v815_v47, %v785_v31  ;;  %v818_v13 = vadd.f32 %v816_v56, %v786_v40  ;;  %v823_v33 = vadd.f32 %v821_v43, %v791_v37  ;;  %v829_v63 = vadd.f32 %v827_v62, %v797_v44 }
 0x15b   :  { %v824_v57 = vadd.f32 %v822_v48, %v792_v24  ;;  %v830_v2 = vadd.f32 %v828_v20, %v798_v6  ;;  %v837_v42 = vmul.f32 %v836_v38, %v6179_v23  ;;  %v838_v46 = vmul.f32 %v835_v26, %v6181_v4  ;;  %v934_v24 = vpop.permute.xlu1 %933 }
 0x15c   :  { %v867_v11 = vsel %vm770_vm5, %v864_v28, %v866_v41  ;;  %v868_v22 = vsel %vm770_vm5, %v866_v41, %v864_v28  ;;  %v903_v12 = vsel %vm902_vm6, %v899_v35, %v901_v45  ;;  %v904_v38 = vsel %vm902_vm6, %v901_v45, %v899_v35  ;;  %v932_v41 = vpop.permute.xlu0 %931  ;;  %2149 = vrot.lane.b32.xlu1 %v5875_v21, %s4957_s23 }
 0x15d   :  { %v869_v19 = vmul.f32 %v868_v22, %v6179_v23  ;;  %v870_v49 = vmul.f32 %v867_v11, %v6181_v4  ;;  %v9928_v53 = vstv %s5410_s13  ;;  %v9930_v14 = vstv %s5412_s4  ;;  %v6294_v11 = vld [vmem:[#allocation11 + $0x68] sm:$0xff]  ;;  %2147 = vrot.lane.b32.xlu0 %v5890_v27, %s4957_s23  ;;  %s6322_s13 = sld [smem:[#allocation2 + $0x6b]]  ;;  %s6324_s4 = sld [smem:[#allocation2 + $0x6f]] }
 0x15e   :  { %v841_v26 = vmul.f32 %v9928_v53, %v837_v42  ;;  %v9929_v15 = vmov %v9928_v53  ;;  %v847_v31 = vmul.f32 %v9930_v14, %v837_v42  ;;  %v9931_v40 = vmov %v9930_v14  ;;  %s6432_s23 = sld [smem:[#allocation2 + $0x76]] }
 0x15f   :  { %v842_v34 = vmul.f32 %v9929_v15, %v838_v46  ;;  %v848_v37 = vmul.f32 %v9931_v40, %v838_v46  ;;  %v9933_v23 = vstv %s5418_s27  ;;  %v9936_v6 = vstv %s9727_s0  ;;  %s9948_s0 = sld [smem:[#allocation97_spill]]  ;;  %s9949_s27 = sld [smem:[#allocation101_spill]] }
 0x160   :  { %v853_v4 = vmul.f32 %v9933_v23, %v837_v42  ;;  %v9935_v28 = vmov %v9933_v23  ;;  %v859_v30 = vmul.f32 %v9936_v6, %v837_v42  ;;  %v9937_v32 = vmov %v9936_v6  ;;  %v964_v14 = vpop.permute.xlu0 %963  ;;  %2184 = vrot.lane.b32.xlu1 %v5909_v0, %s4958_s12 }
 0x161   :  { %v854_v44 = vmul.f32 %v9935_v28, %v838_v46  ;;  %v860_v5 = vmul.f32 %v9937_v32, %v838_v46  ;;  %v843_v36 = vadd.f32 %v841_v26, %v811_v50  ;;  %v844_v54 = vadd.f32 %v842_v34, %v812_v29  ;;  %v966_v34 = vpop.permute.xlu1 %965  ;;  %2182 = vrot.lane.b32.xlu0 %v5780_v16, %s4958_s12 }
 0x162   :  { %v849_v47 = vadd.f32 %v847_v31, %v817_v59  ;;  %v850_v18 = vadd.f32 %v848_v37, %v818_v13  ;;  %v855_v56 = vadd.f32 %v853_v4, %v823_v33  ;;  %v861_v35 = vadd.f32 %v859_v30, %v829_v63 }
 0x163   :  { %v856_v45 = vadd.f32 %v854_v44, %v824_v57  ;;  %v862_v9 = vadd.f32 %v860_v5, %v830_v2  ;;  %v9940_v43 = vstv %s9932_s2  ;;  %v9942_v62 = vstv %s9934_s24  ;;  %v6292_v2 = vld [vmem:[#allocation11 + $0x60] sm:$0xff]  ;;  %s6434_s2 = sld [smem:[#allocation2 + $0x7a]]  ;;  %s6438_s24 = sld [smem:[#allocation2 + $0x7e]] }
 0x164   :  { %v873_v3 = vmul.f32 %v9940_v43, %v869_v19  ;;  %v9941_v48 = vmov %v9940_v43  ;;  %v879_v7 = vmul.f32 %v9942_v62, %v869_v19  ;;  %v9943_v20 = vmov %v9942_v62  ;;  %2217 = vrot.lane.b32.xlu1 %v5803_v25, %s4958_s12 }
 0x165   :  { %v874_v1 = vmul.f32 %v9941_v48, %v870_v49  ;;  %v880_v42 = vmul.f32 %v9943_v20, %v870_v49  ;;  %v9944_v50 = vstv %s9938_s28  ;;  %v9946_v13 = vstv %s9939_s8  ;;  %2215 = vrot.lane.b32.xlu0 %v5810_v39, %s4958_s12  ;;  %s6440_s28 = sld [smem:[#allocation2 + $0x73]]  ;;  %s6462_s8 = sld [smem:[#allocation2 + $0x77]] }
 0x166   :  { %v885_v46 = vmul.f32 %v9944_v50, %v869_v19  ;;  %v9945_v29 = vmov %v9944_v50  ;;  %v891_v33 = vmul.f32 %v9946_v13, %v869_v19  ;;  %v9947_v57 = vmov %v9946_v13 }
 0x167   :  { %v886_v59 = vmul.f32 %v9945_v29, %v870_v49  ;;  %v892_v63 = vmul.f32 %v9947_v57, %v870_v49  ;;  %v875_v22 = vadd.f32 %v873_v3, %v843_v36  ;;  %v876_v53 = vadd.f32 %v874_v1, %v844_v54 }
 0x168   :  { %v881_v26 = vadd.f32 %v879_v7, %v849_v47  ;;  %v882_v15 = vadd.f32 %v880_v42, %v850_v18  ;;  %v887_v31 = vadd.f32 %v885_v46, %v855_v56  ;;  %v893_v19 = vadd.f32 %v891_v33, %v861_v35  ;;  %2249 = vrot.lane.b32.xlu1 %v5837_v58, %s4958_s12 }
 0x169   :  { %v888_v40 = vadd.f32 %v886_v59, %v856_v45  ;;  %v894_v49 = vadd.f32 %v892_v63, %v862_v9  ;;  %v905_v37 = vmul.f32 %v904_v38, %v6292_v2  ;;  %v906_v23 = vmul.f32 %v903_v12, %v6294_v11  ;;  %2247 = vrot.lane.b32.xlu0 %v5844_v8, %s4958_s12 }
 0x16a   :  { %v935_v4 = vsel %vm902_vm6, %v932_v41, %v934_v24  ;;  %v936_v28 = vsel %vm902_vm6, %v934_v24, %v932_v41  ;;  %v967_v12 = vsel %vm902_vm6, %v964_v14, %v966_v34  ;;  %v968_v6 = vsel %vm902_vm6, %v966_v34, %v964_v14 }
 0x16b   :  { %v937_v44 = vmul.f32 %v936_v28, %v6292_v2  ;;  %v938_v38 = vmul.f32 %v935_v4, %v6294_v11  ;;  %v9952_v24 = vstv %s9948_s0  ;;  %v9954_v5 = vstv %s9949_s27  ;;  %s6464_s0 = sld [smem:[#allocation2 + $0x7b]]  ;;  %s6466_s27 = sld [smem:[#allocation2 + $0x7f]] }
 0x16c   :  { %v909_v41 = vmul.f32 %v9952_v24, %v905_v37  ;;  %v9953_v30 = vmov %v9952_v24  ;;  %v915_v36 = vmul.f32 %v9954_v5, %v905_v37  ;;  %v9955_v54 = vmov %v9954_v5  ;;  %2281 = vrot.lane.b32.xlu1 %v5875_v21, %s4958_s12 }
 0x16d   :  { %v910_v32 = vmul.f32 %v9953_v30, %v906_v23  ;;  %v916_v47 = vmul.f32 %v9955_v54, %v906_v23  ;;  %v9956_v18 = vstv %s9950_s9  ;;  %v9959_v9 = vstv %s9951_s11  ;;  %v996_v30 = vpop.permute.xlu0 %995  ;;  %2279 = vrot.lane.b32.xlu0 %v5890_v27, %s4958_s12  ;;  %s6486_s9 = sld [smem:[#allocation2 + $0x80]]  ;;  %s6488_s11 = sld [smem:[#allocation2 + $0x84]] }
 0x16e   :  { %v921_v56 = vmul.f32 %v9956_v18, %v905_v37  ;;  %v9958_v45 = vmov %v9956_v18  ;;  %v927_v43 = vmul.f32 %v9959_v9, %v905_v37  ;;  %v9961_v3 = vmov %v9959_v9  ;;  %s4960_s12 = smov 111  }
 0x16f   :  { %v922_v35 = vmul.f32 %v9958_v45, %v906_v23  ;;  %v928_v48 = vmul.f32 %v9961_v3, %v906_v23  ;;  %v911_v1 = vadd.f32 %v909_v41, %v875_v22  ;;  %v912_v62 = vadd.f32 %v910_v32, %v876_v53  ;;  %v998_v41 = vpop.permute.xlu1 %997 }
 0x170   :  { %v917_v7 = vadd.f32 %v915_v36, %v881_v26  ;;  %v918_v20 = vadd.f32 %v916_v47, %v882_v15  ;;  %v923_v42 = vadd.f32 %v921_v56, %v887_v31  ;;  %v929_v46 = vadd.f32 %v927_v43, %v893_v19  ;;  %2316 = vrot.lane.b32.xlu1 %v5909_v0, %s4959_s19 }
 0x171   :  { %v924_v50 = vadd.f32 %v922_v35, %v888_v40  ;;  %v930_v29 = vadd.f32 %v928_v48, %v894_v49  ;;  %v9964_v59 = vstv %s9957_s20  ;;  %v9966_v63 = vstv %s9960_s5  ;;  %2314 = vrot.lane.b32.xlu0 %v5780_v16, %s4959_s19  ;;  %s6616_s20 = sld [smem:[#allocation2 + $0x8b]]  ;;  %s6618_s5 = sld [smem:[#allocation2 + $0x8f]] }
 0x172   :  { %v941_v13 = vmul.f32 %v9964_v59, %v937_v44  ;;  %v9965_v33 = vmov %v9964_v59  ;;  %v947_v22 = vmul.f32 %v9966_v63, %v937_v44  ;;  %v9967_v53 = vmov %v9966_v63 }
 0x173   :  { %v942_v57 = vmul.f32 %v9965_v33, %v938_v38  ;;  %v948_v34 = vmul.f32 %v9967_v53, %v938_v38  ;;  %v9968_v26 = vstv %s9962_s26  ;;  %v9970_v23 = vstv %s9963_s29  ;;  %s6634_s26 = sld [smem:[#allocation2 + $0x90]] }
 0x174   :  { %v953_v15 = vmul.f32 %v9968_v26, %v937_v44  ;;  %v9969_v14 = vmov %v9968_v26  ;;  %v959_v31 = vmul.f32 %v9970_v23, %v937_v44  ;;  %v9971_v40 = vmov %v9970_v23  ;;  %2349 = vrot.lane.b32.xlu1 %v5803_v25, %s4959_s19  ;;  %s6640_s29 = sld [smem:[#allocation2 + $0x98]] }
 0x175   :  { %v954_v37 = vmul.f32 %v9969_v14, %v938_v38  ;;  %v960_v19 = vmul.f32 %v9971_v40, %v938_v38  ;;  %v943_v49 = vadd.f32 %v941_v13, %v911_v1  ;;  %v944_v4 = vadd.f32 %v942_v57, %v912_v62  ;;  %v6428_v40 = vld [vmem:[#allocation11 + $0x70] sm:$0xff]  ;;  %2347 = vrot.lane.b32.xlu0 %v5810_v39, %s4959_s19 }
 0x176   :  { %v949_v28 = vadd.f32 %v947_v22, %v917_v7  ;;  %v950_v24 = vadd.f32 %v948_v34, %v918_v20  ;;  %v955_v44 = vadd.f32 %v953_v15, %v923_v42  ;;  %v961_v32 = vadd.f32 %v959_v31, %v929_v46  ;;  %v1033_v42 = vpop.permute.xlu1 %1032 }
 0x177   :  { %v956_v38 = vadd.f32 %v954_v37, %v924_v50  ;;  %v962_v5 = vadd.f32 %v960_v19, %v930_v29  ;;  %v969_v36 = vmul.f32 %v968_v6, %v6292_v2  ;;  %v970_v54 = vmul.f32 %v967_v12, %v6294_v11  ;;  %v1031_v50 = vpop.permute.xlu0 %1030  ;;  %v6430_v19 = vld [vmem:[#allocation11 + $0x78] sm:$0xff] }
 0x178   :  { %v1016_v47 = vstv %s6322_s13  ;;  %v1022_v18 = vstv %s6324_s4  ;;  %v999_v56 = vsel %vm902_vm6, %v996_v30, %v998_v41  ;;  %v1000_v45 = vsel %vm902_vm6, %v998_v41, %v996_v30  ;;  %2381 = vrot.lane.b32.xlu1 %v5837_v58, %s4959_s19  ;;  %s6492_s13 = sld [smem:[#allocation2 + $0x88]]  ;;  %s6494_s4 = sld [smem:[#allocation2 + $0x8c]] }
 0x179   :  { %v1040_v35 = vstv %s6334_s22  ;;  %v973_v9 = vmul.f32 %v972_v60, %v969_v36  ;;  %v974_v43 = vmul.f32 %v972_v60, %v970_v54  ;;  %v979_v6 = vmul.f32 %v978_v52, %v969_v36  ;;  %2379 = vrot.lane.b32.xlu0 %v5844_v8, %s4959_s19  ;;  %s6636_s22 = sld [smem:[#allocation2 + $0x94]] }
 0x17a   :  { %v980_v3 = vmul.f32 %v978_v52, %v970_v54  ;;  %v985_v12 = vmul.f32 %v984_v51, %v969_v36  ;;  %v986_v48 = vmul.f32 %v984_v51, %v970_v54  ;;  %v991_v1 = vmul.f32 %v990_v61, %v969_v36 }
 0x17b   :  { %v992_v62 = vmul.f32 %v990_v61, %v970_v54  ;;  %v975_v7 = vadd.f32 %v973_v9, %v943_v49  ;;  %v976_v60 = vadd.f32 %v974_v43, %v944_v4  ;;  %v981_v20 = vadd.f32 %v979_v6, %v949_v28 }
 0x17c   :  { %v982_v52 = vadd.f32 %v980_v3, %v950_v24  ;;  %v987_v51 = vadd.f32 %v985_v12, %v955_v44  ;;  %v988_v46 = vadd.f32 %v986_v48, %v956_v38  ;;  %v993_v61 = vadd.f32 %v991_v1, %v961_v32  ;;  %v1066_v24 = vpop.permute.xlu1 %1065  ;;  %2413 = vrot.lane.b32.xlu1 %v5875_v21, %s4959_s19 }
 0x17d   :  { %v994_v29 = vadd.f32 %v992_v62, %v962_v5  ;;  %v1001_v59 = vmul.f32 %v1000_v45, %v6292_v2  ;;  %v1002_v13 = vmul.f32 %v999_v56, %v6294_v11  ;;  %v1046_v33 = vstv %s6356_s17  ;;  %2411 = vrot.lane.b32.xlu0 %v5890_v27, %s4959_s19  ;;  %s6642_s17 = sld [smem:[#allocation2 + $0x9c]] }
 0x17e   :  { %v1052_v57 = vstv %s6358_s16  ;;  %v1058_v63 = vstv %s6362_s30  ;;  %v1035_v22 = vsel %vm1034_vm7, %v1031_v50, %v1033_v42  ;;  %v1036_v53 = vsel %vm1034_vm7, %v1033_v42, %v1031_v50  ;;  %s6531_s16 = sld [smem:[#allocation2 + $0x81]]  ;;  %s6533_s30 = sld [smem:[#allocation2 + $0x85]] }
 0x17f   :  { %v1072_v34 = vstv %s6364_s1  ;;  %v1005_v2 = vmul.f32 %v1004_v10, %v1001_v59  ;;  %v1006_v11 = vmul.f32 %v1004_v10, %v1002_v13  ;;  %v1011_v26 = vmul.f32 %v1010_v17, %v1001_v59  ;;  %v1064_v10 = vpop.permute.xlu0 %1063  ;;  %s6535_s1 = sld [smem:[#allocation2 + $0x89]] }
 0x180   :  { %v1012_v15 = vmul.f32 %v1010_v17, %v1002_v13  ;;  %v1017_v14 = vmul.f32 %v1016_v47, %v1001_v59  ;;  %v1018_v37 = vmul.f32 %v1016_v47, %v1002_v13  ;;  %v1023_v23 = vmul.f32 %v1022_v18, %v1001_v59  ;;  %2448 = vrot.lane.b32.xlu1 %v5909_v0, %s4960_s12 }
 0x181   :  { %v1024_v31 = vmul.f32 %v1022_v18, %v1002_v13  ;;  %v1007_v49 = vadd.f32 %v1005_v2, %v975_v7  ;;  %v1008_v4 = vadd.f32 %v1006_v11, %v976_v60  ;;  %v1013_v28 = vadd.f32 %v1011_v26, %v981_v20 }
 0x182   :  { %v1014_v16 = vadd.f32 %v1012_v15, %v982_v52  ;;  %v1019_v17 = vadd.f32 %v1017_v14, %v987_v51  ;;  %v1020_v41 = vadd.f32 %v1018_v37, %v988_v46  ;;  %v1025_v30 = vadd.f32 %v1023_v23, %v993_v61 }
 0x183   :  { %v1026_v44 = vadd.f32 %v1024_v31, %v994_v29  ;;  %v1037_v38 = vmul.f32 %v1036_v53, %v6428_v40  ;;  %v1038_v32 = vmul.f32 %v1035_v22, %v6430_v19  ;;  %v1078_v5 = vstv %s6398_s3  ;;  %v1096_v60 = vpop.permute.xlu0 %1095  ;;  %s4962_s3 = smov 98  }
 0x184   :  { %v1084_v36 = vstv %s6400_s15  ;;  %v1090_v25 = vstv %s6402_s21  ;;  %v1067_v54 = vsel %vm1034_vm7, %v1064_v10, %v1066_v24  ;;  %v1068_v47 = vsel %vm1034_vm7, %v1066_v24, %v1064_v10  ;;  %s6571_s21 = sld [smem:[#allocation2 + $0x82]] }
 0x185   :  { %v1104_v18 = vstv %s6404_s18  ;;  %v1041_v56 = vmul.f32 %v1040_v35, %v1037_v38  ;;  %v1042_v45 = vmul.f32 %v1040_v35, %v1038_v32  ;;  %v1047_v9 = vmul.f32 %v1046_v33, %v1037_v38  ;;  %v1098_v35 = vpop.permute.xlu1 %1097  ;;  %s6573_s18 = sld [smem:[#allocation2 + $0x86]]  ;;  %s6685_s15 = sld [smem:[#allocation2 + $0x92]] }
 0x186   :  { %v1048_v39 = vmul.f32 %v1046_v33, %v1038_v32  ;;  %v1053_v43 = vmul.f32 %v1052_v57, %v1037_v38  ;;  %v1054_v6 = vmul.f32 %v1052_v57, %v1038_v32  ;;  %v1059_v3 = vmul.f32 %v1058_v63, %v1037_v38 }
 0x187   :  { %v1060_v12 = vmul.f32 %v1058_v63, %v1038_v32  ;;  %v1043_v48 = vadd.f32 %v1041_v56, %v1007_v49  ;;  %v1044_v1 = vadd.f32 %v1042_v45, %v1008_v4  ;;  %v1049_v62 = vadd.f32 %v1047_v9, %v1013_v28  ;;  %v1128_v31 = vpop.permute.xlu0 %1127  ;;  %v6499_v28 = vld [vmem:[%s9777_s25] sm:$0xff]  ;;  %v6527_v45 = vld [vmem:[%s9777_s25 + $0x10] sm:$0xff] }
 0x188   :  { %v1050_v7 = vadd.f32 %v1048_v39, %v1014_v16  ;;  %v1055_v58 = vadd.f32 %v1053_v43, %v1019_v17  ;;  %v1056_v20 = vadd.f32 %v1054_v6, %v1020_v41  ;;  %v1061_v52 = vadd.f32 %v1059_v3, %v1025_v30  ;;  %2446 = vrot.lane.b32.xlu0 %v6499_v28, %s4960_s12 }
 0x189   :  { %v1062_v8 = vadd.f32 %v1060_v12, %v1026_v44  ;;  %v1069_v42 = vmul.f32 %v1068_v47, %v6428_v40  ;;  %v1070_v50 = vmul.f32 %v1067_v54, %v6430_v19  ;;  %v1110_v51 = vstv %s6432_s23  ;;  %v1130_v23 = vpop.permute.xlu1 %1129  ;;  %s6575_s23 = sld [smem:[#allocation2 + $0x8a]] }
 0x18a   :  { %v1116_v46 = vstv %s6434_s2  ;;  %v1122_v61 = vstv %s6438_s24  ;;  %v1099_v29 = vsel %vm1034_vm7, %v1096_v60, %v1098_v35  ;;  %v1100_v59 = vsel %vm1034_vm7, %v1098_v35, %v1096_v60  ;;  %s6715_s2 = sld [smem:[#allocation2 + $0x9b]]  ;;  %s6717_s24 = sld [smem:[#allocation2 + $0x9f]] }
 0x18b   :  { %v1136_v13 = vstv %s6440_s28  ;;  %v1073_v33 = vmul.f32 %v1072_v34, %v1069_v42  ;;  %v1074_v57 = vmul.f32 %v1072_v34, %v1070_v50  ;;  %v1079_v63 = vmul.f32 %v1078_v5, %v1069_v42  ;;  %v1163_v3 = vpop.permute.xlu0 %1162  ;;  %s6584_s28 = sld [smem:[#allocation2 + $0x8e]] }
 0x18c   :  { %v1080_v22 = vmul.f32 %v1078_v5, %v1070_v50  ;;  %v1085_v53 = vmul.f32 %v1084_v36, %v1069_v42  ;;  %v1086_v2 = vmul.f32 %v1084_v36, %v1070_v50  ;;  %v1091_v21 = vmul.f32 %v1090_v25, %v1069_v42  ;;  %v6520_v36 = vld [vmem:[%s9777_s25 + $0x18] sm:$0xff]  ;;  %2479 = vrot.lane.b32.xlu0 %v6527_v45, %s4960_s12 }
 0x18d   :  { %v1092_v11 = vmul.f32 %v1090_v25, %v1070_v50  ;;  %v1075_v26 = vadd.f32 %v1073_v33, %v1043_v48  ;;  %v1076_v15 = vadd.f32 %v1074_v57, %v1044_v1  ;;  %v1081_v14 = vadd.f32 %v1079_v63, %v1049_v62  ;;  %2481 = vrot.lane.b32.xlu1 %v6520_v36, %s4960_s12  ;;  %v1165_v6 = vpop.permute.xlu1 %1164  ;;  %v6567_v63 = vld [vmem:[#allocation11 + $0x80] sm:$0xff] }
 0x18e   :  { %v1082_v37 = vadd.f32 %v1080_v22, %v1050_v7  ;;  %v1087_v27 = vadd.f32 %v1085_v53, %v1055_v58  ;;  %v1088_v34 = vadd.f32 %v1086_v2, %v1056_v20  ;;  %v1093_v49 = vadd.f32 %v1091_v21, %v1061_v52  ;;  %v6546_v20 = vld [vmem:[%s9777_s25 + $0x28] sm:$0xff] }
 0x18f   :  { %v1094_v4 = vadd.f32 %v1092_v11, %v1062_v8  ;;  %v1101_v0 = vmul.f32 %v1100_v59, %v6428_v40  ;;  %v1102_v16 = vmul.f32 %v1099_v29, %v6430_v19  ;;  %v1142_v24 = vstv %s6462_s8  ;;  %v6569_v22 = vld [vmem:[#allocation11 + $0x88] sm:$0xff]  ;;  %s6735_s8 = sld [smem:[#allocation2 + $0xa4]] }
 0x190   :  { %v1148_v10 = vstv %s6464_s0  ;;  %v1154_v17 = vstv %s6466_s27  ;;  %v1131_v41 = vsel %vm1034_vm7, %v1128_v31, %v1130_v23  ;;  %v1132_v30 = vsel %vm1034_vm7, %v1130_v23, %v1128_v31  ;;  %s4963_s0 = smov 97   ;;  %s6739_s27 = sld [smem:[#allocation2 + $0xa8]] }
 0x191   :  { %v1105_v44 = vmul.f32 %v1104_v18, %v1101_v0  ;;  %v1106_v38 = vmul.f32 %v1104_v18, %v1102_v16  ;;  %v1111_v32 = vmul.f32 %v1110_v51, %v1101_v0  ;;  %v1112_v5 = vmul.f32 %v1110_v51, %v1102_v16  ;;  %2513 = vrot.lane.b32.xlu1 %v6546_v20, %s4960_s12 }
 0x192   :  { %v1117_v25 = vmul.f32 %v1116_v46, %v1101_v0  ;;  %v1118_v54 = vmul.f32 %v1116_v46, %v1102_v16  ;;  %v1123_v47 = vmul.f32 %v1122_v61, %v1101_v0  ;;  %v1124_v56 = vmul.f32 %v1122_v61, %v1102_v16 }
 0x193   :  { %v1107_v18 = vadd.f32 %v1105_v44, %v1075_v26  ;;  %v1108_v9 = vadd.f32 %v1106_v38, %v1076_v15  ;;  %v1113_v39 = vadd.f32 %v1111_v32, %v1081_v14  ;;  %v1114_v43 = vadd.f32 %v1112_v5, %v1082_v37  ;;  %v1198_v26 = vpop.permute.xlu1 %1197  ;;  %v6580_v15 = vld [vmem:[%s9777_s25 + $0x38] sm:$0xff]  ;;  %v6606_v32 = vld [vmem:[%s9777_s25 + $0x8] sm:$0xff] }
 0x194   :  { %v1119_v12 = vadd.f32 %v1117_v25, %v1087_v27  ;;  %v1120_v48 = vadd.f32 %v1118_v54, %v1088_v34  ;;  %v1125_v1 = vadd.f32 %v1123_v47, %v1093_v49  ;;  %v1126_v62 = vadd.f32 %v1124_v56, %v1094_v4  ;;  %v6589_v27 = vld [vmem:[%s9777_s25 + $0x30] sm:$0xff] }
 0x195   :  { %v1133_v7 = vmul.f32 %v1132_v30, %v6428_v40  ;;  %v1134_v35 = vmul.f32 %v1131_v41, %v6430_v19  ;;  %v1172_v60 = vstv %s6486_s9  ;;  %v1178_v58 = vstv %s6488_s11  ;;  %v6559_v19 = vld [vmem:[%s9777_s25 + $0x20] sm:$0xff]  ;;  %2545 = vrot.lane.b32.xlu1 %v6580_v15, %s4960_s12  ;;  %s4961_s11 = smov 110   ;;  %s6741_s9 = sld [smem:[#allocation2 + $0xac]] }
 0x196   :  { %v1184_v52 = vstv %s6492_s13  ;;  %v1190_v8 = vstv %s6494_s4  ;;  %v1167_v42 = vsel %vm1166_vm8, %v1163_v3, %v1165_v6  ;;  %v1168_v40 = vsel %vm1166_vm8, %v1165_v6, %v1163_v3  ;;  %2511 = vrot.lane.b32.xlu0 %v6559_v19, %s4960_s12  ;;  %s6612_s13 = sld [smem:[#allocation2 + $0x83]]  ;;  %s6614_s4 = sld [smem:[#allocation2 + $0x87]] }
 0x197   :  { %v1137_v50 = vmul.f32 %v1136_v13, %v1133_v7  ;;  %v1138_v51 = vmul.f32 %v1136_v13, %v1134_v35  ;;  %v1143_v46 = vmul.f32 %v1142_v24, %v1133_v7  ;;  %v1144_v61 = vmul.f32 %v1142_v24, %v1134_v35  ;;  %v1196_v13 = vpop.permute.xlu0 %1195 }
 0x198   :  { %v1149_v29 = vmul.f32 %v1148_v10, %v1133_v7  ;;  %v1150_v59 = vmul.f32 %v1148_v10, %v1134_v35  ;;  %v1155_v33 = vmul.f32 %v1154_v17, %v1133_v7  ;;  %v1156_v57 = vmul.f32 %v1154_v17, %v1134_v35 }
 0x199   :  { %v1139_v53 = vadd.f32 %v1137_v50, %v1107_v18  ;;  %v1140_v2 = vadd.f32 %v1138_v51, %v1108_v9  ;;  %v1145_v21 = vadd.f32 %v1143_v46, %v1113_v39  ;;  %v1146_v11 = vadd.f32 %v1144_v61, %v1114_v43  ;;  %2580 = vrot.lane.b32.xlu1 %v6606_v32, %s4961_s11  ;;  %v1230_v43 = vpop.permute.xlu1 %1229 }
 0x19a   :  { %v1151_v14 = vadd.f32 %v1149_v29, %v1119_v12  ;;  %v1152_v37 = vadd.f32 %v1150_v59, %v1120_v48  ;;  %v1157_v23 = vadd.f32 %v1155_v33, %v1125_v1  ;;  %v1158_v31 = vadd.f32 %v1156_v57, %v1126_v62  ;;  %2543 = vrot.lane.b32.xlu0 %v6589_v27, %s4960_s12 }
 0x19b   :  { %v1169_v34 = vmul.f32 %v1168_v40, %v6567_v63  ;;  %v1170_v49 = vmul.f32 %v1167_v42, %v6569_v22  ;;  %v1204_v4 = vstv %s6531_s16  ;;  %v1210_v0 = vstv %s6533_s30  ;;  %v1228_v6 = vpop.permute.xlu0 %1227  ;;  %s6660_s16 = sld [smem:[#allocation2 + $0x91]]  ;;  %s6662_s30 = sld [smem:[#allocation2 + $0x95]] }
 0x19c   :  { %v1216_v16 = vstv %s6535_s1  ;;  %v1222_v24 = vstv %s6537_s14  ;;  %v1199_v10 = vsel %vm1166_vm8, %v1196_v13, %v1198_v26  ;;  %v1200_v17 = vsel %vm1166_vm8, %v1198_v26, %v1196_v13  ;;  %s6664_s1 = sld [smem:[#allocation2 + $0x99]]  ;;  %s6666_s14 = sld [smem:[#allocation2 + $0x9d]] }
 0x19d   :  { %v1173_v41 = vmul.f32 %v1172_v60, %v1169_v34  ;;  %v1174_v30 = vmul.f32 %v1172_v60, %v1170_v49  ;;  %v1179_v44 = vmul.f32 %v1178_v58, %v1169_v34  ;;  %v1180_v38 = vmul.f32 %v1178_v58, %v1170_v49  ;;  %2613 = vrot.lane.b32.xlu1 %v6520_v36, %s4961_s11 }
 0x19e   :  { %v1185_v5 = vmul.f32 %v1184_v52, %v1169_v34  ;;  %v1186_v25 = vmul.f32 %v1184_v52, %v1170_v49  ;;  %v1191_v54 = vmul.f32 %v1190_v8, %v1169_v34  ;;  %v1192_v47 = vmul.f32 %v1190_v8, %v1170_v49  ;;  %2578 = vrot.lane.b32.xlu0 %v6499_v28, %s4961_s11 }
 0x19f   :  { %v1175_v56 = vadd.f32 %v1173_v41, %v1139_v53  ;;  %v1176_v18 = vadd.f32 %v1174_v30, %v1140_v2  ;;  %v1181_v9 = vadd.f32 %v1179_v44, %v1145_v21  ;;  %v1182_v39 = vadd.f32 %v1180_v38, %v1146_v11  ;;  %v1262_v11 = vpop.permute.xlu1 %1261  ;;  %v1260_v26 = vpop.permute.xlu0 %1259 }
 0x1a0   :  { %v1187_v3 = vadd.f32 %v1185_v5, %v1151_v14  ;;  %v1188_v12 = vadd.f32 %v1186_v25, %v1152_v37  ;;  %v1193_v48 = vadd.f32 %v1191_v54, %v1157_v23  ;;  %v1194_v1 = vadd.f32 %v1192_v47, %v1158_v31 }
 0x1a1   :  { %v1201_v62 = vmul.f32 %v1200_v17, %v6567_v63  ;;  %v1202_v7 = vmul.f32 %v1199_v10, %v6569_v22  ;;  %v1236_v35 = vstv %s6571_s21  ;;  %v1242_v60 = vstv %s6573_s18  ;;  %2645 = vrot.lane.b32.xlu1 %v6546_v20, %s4961_s11  ;;  %s6693_s21 = sld [smem:[#allocation2 + $0x9e]]  ;;  %s6711_s18 = sld [smem:[#allocation2 + $0x93]] }
 0x1a2   :  { %v1248_v58 = vstv %s6575_s23  ;;  %v1254_v52 = vstv %s6584_s28  ;;  %v1231_v8 = vsel %vm1166_vm8, %v1228_v6, %v1230_v43  ;;  %v1232_v42 = vsel %vm1166_vm8, %v1230_v43, %v1228_v6  ;;  %2611 = vrot.lane.b32.xlu0 %v6527_v45, %s4961_s11  ;;  %s6713_s23 = sld [smem:[#allocation2 + $0x97]]  ;;  %s6733_s28 = sld [smem:[#allocation2 + $0xa0]] }
 0x1a3   :  { %v1205_v40 = vmul.f32 %v1204_v4, %v1201_v62  ;;  %v1206_v50 = vmul.f32 %v1204_v4, %v1202_v7  ;;  %v1211_v51 = vmul.f32 %v1210_v0, %v1201_v62  ;;  %v1212_v46 = vmul.f32 %v1210_v0, %v1202_v7  ;;  %v1295_v43 = vpop.permute.xlu0 %1294 }
 0x1a4   :  { %v1217_v61 = vmul.f32 %v1216_v16, %v1201_v62  ;;  %v1218_v29 = vmul.f32 %v1216_v16, %v1202_v7  ;;  %v1223_v59 = vmul.f32 %v1222_v24, %v1201_v62  ;;  %v1224_v33 = vmul.f32 %v1222_v24, %v1202_v7 }
 0x1a5   :  { %v1207_v57 = vadd.f32 %v1205_v40, %v1175_v56  ;;  %v1208_v53 = vadd.f32 %v1206_v50, %v1176_v18  ;;  %v1213_v2 = vadd.f32 %v1211_v51, %v1181_v9  ;;  %v1214_v21 = vadd.f32 %v1212_v46, %v1182_v39  ;;  %2677 = vrot.lane.b32.xlu1 %v6580_v15, %s4961_s11  ;;  %v1297_v39 = vpop.permute.xlu1 %1296 }
 0x1a6   :  { %v1219_v13 = vadd.f32 %v1217_v61, %v1187_v3  ;;  %v1220_v14 = vadd.f32 %v1218_v29, %v1188_v12  ;;  %v1225_v37 = vadd.f32 %v1223_v59, %v1193_v48  ;;  %v1226_v23 = vadd.f32 %v1224_v33, %v1194_v1  ;;  %2643 = vrot.lane.b32.xlu0 %v6559_v19, %s4961_s11  ;;  %v6681_v61 = vld [vmem:[#allocation11 + $0x98] sm:$0xff] }
 0x1a7   :  { %v1233_v31 = vmul.f32 %v1232_v42, %v6567_v63  ;;  %v1234_v34 = vmul.f32 %v1231_v8, %v6569_v22  ;;  %v1268_v49 = vstv %s6612_s13  ;;  %v1274_v4 = vstv %s6614_s4  ;;  %s6761_s13 = sld [smem:[#allocation2 + $0xa5]]  ;;  %s6763_s4 = sld [smem:[#allocation2 + $0xa9]] }
 0x1a8   :  { %v1280_v0 = vstv %s6616_s20  ;;  %v1286_v16 = vstv %s6618_s5  ;;  %v1263_v24 = vsel %vm1166_vm8, %v1260_v26, %v1262_v11  ;;  %v1264_v10 = vsel %vm1166_vm8, %v1262_v11, %v1260_v26  ;;  %s6765_s20 = sld [smem:[#allocation2 + $0xad]]  ;;  %s6772_s5 = sld [smem:[#allocation2 + $0xa2]] }
 0x1a9   :  { %v1237_v17 = vmul.f32 %v1236_v35, %v1233_v31  ;;  %v1238_v41 = vmul.f32 %v1236_v35, %v1234_v34  ;;  %v1243_v30 = vmul.f32 %v1242_v60, %v1233_v31  ;;  %v1244_v44 = vmul.f32 %v1242_v60, %v1234_v34  ;;  %2712 = vrot.lane.b32.xlu1 %v6606_v32, %s4962_s3 }
 0x1aa   :  { %v1249_v38 = vmul.f32 %v1248_v58, %v1233_v31  ;;  %v1250_v5 = vmul.f32 %v1248_v58, %v1234_v34  ;;  %v1255_v25 = vmul.f32 %v1254_v52, %v1233_v31  ;;  %v1256_v54 = vmul.f32 %v1254_v52, %v1234_v34  ;;  %2675 = vrot.lane.b32.xlu0 %v6589_v27, %s4961_s11  ;;  %s6759_s11 = sld [smem:[#allocation2 + $0xa1]] }
 0x1ab   :  { %v1239_v47 = vadd.f32 %v1237_v17, %v1207_v57  ;;  %v1240_v56 = vadd.f32 %v1238_v41, %v1208_v53  ;;  %v1245_v18 = vadd.f32 %v1243_v30, %v1213_v2  ;;  %v1246_v9 = vadd.f32 %v1244_v44, %v1214_v21  ;;  %v6683_v53 = vld [vmem:[#allocation11 + $0x90] sm:$0xff]  ;;  %v1330_v2 = vpop.permute.xlu1 %1329  ;;  %v1328_v21 = vpop.permute.xlu0 %1327 }
 0x1ac   :  { %v1251_v6 = vadd.f32 %v1249_v38, %v1219_v13  ;;  %v1252_v3 = vadd.f32 %v1250_v5, %v1220_v14  ;;  %v1257_v12 = vadd.f32 %v1255_v25, %v1225_v37  ;;  %v1258_v48 = vadd.f32 %v1256_v54, %v1226_v23 }
 0x1ad   :  { %v1265_v1 = vmul.f32 %v1264_v10, %v6567_v63  ;;  %v1266_v62 = vmul.f32 %v1263_v24, %v6569_v22  ;;  %v1304_v7 = vstv %s6634_s26  ;;  %v1310_v35 = vstv %s6636_s22  ;;  %2745 = vrot.lane.b32.xlu1 %v6520_v36, %s4962_s3  ;;  %s6774_s26 = sld [smem:[#allocation2 + $0xa6]]  ;;  %s6788_s22 = sld [smem:[#allocation2 + $0xaa]] }
 0x1ae   :  { %v1316_v60 = vstv %s6640_s29  ;;  %v1322_v58 = vstv %s6642_s17  ;;  %v1299_v52 = vsel %vm1298_vm9, %v1295_v43, %v1297_v39  ;;  %2710 = vrot.lane.b32.xlu0 %v6499_v28, %s4962_s3  ;;  %v1300_v37 = vsel %vm1298_vm9, %v1297_v39, %v1295_v43  ;;  %s6792_s29 = sld [smem:[#allocation2 + $0xae]]  ;;  %s6802_s17 = sld [smem:[#allocation2 + $0xa3]] }
 0x1af   :  { %v1269_v8 = vmul.f32 %v1268_v49, %v1265_v1  ;;  %v1270_v63 = vmul.f32 %v1268_v49, %v1266_v62  ;;  %v1275_v42 = vmul.f32 %v1274_v4, %v1265_v1  ;;  %v1276_v22 = vmul.f32 %v1274_v4, %v1266_v62 }
 0x1b0   :  { %v1281_v40 = vmul.f32 %v1280_v0, %v1265_v1  ;;  %v1282_v50 = vmul.f32 %v1280_v0, %v1266_v62  ;;  %v1287_v51 = vmul.f32 %v1286_v16, %v1265_v1  ;;  %v1288_v46 = vmul.f32 %v1286_v16, %v1266_v62 }
 0x1b1   :  { %v1271_v29 = vadd.f32 %v1269_v8, %v1239_v47  ;;  %v1272_v59 = vadd.f32 %v1270_v63, %v1240_v56  ;;  %v1277_v33 = vadd.f32 %v1275_v42, %v1245_v18  ;;  %v1278_v57 = vadd.f32 %v1276_v22, %v1246_v9  ;;  %2777 = vrot.lane.b32.xlu1 %v6546_v20, %s4962_s3  ;;  %v1362_v18 = vpop.permute.xlu1 %1361  ;;  %v1360_v9 = vpop.permute.xlu0 %1359 }
 0x1b2   :  { %v1283_v11 = vadd.f32 %v1281_v40, %v1251_v6  ;;  %v1284_v26 = vadd.f32 %v1282_v50, %v1252_v3  ;;  %v1289_v13 = vadd.f32 %v1287_v51, %v1257_v12  ;;  %v1290_v14 = vadd.f32 %v1288_v46, %v1258_v48  ;;  %2743 = vrot.lane.b32.xlu0 %v6527_v45, %s4962_s3 }
 0x1b3   :  { %v1302_v23 = vmul.f32 %v1299_v52, %v6681_v61  ;;  %v1336_v31 = vstv %s6660_s16  ;;  %v1342_v34 = vstv %s6662_s30  ;;  %v1301_v49 = vmul.f32 %v1300_v37, %v6683_v53  ;;  %s6804_s16 = sld [smem:[#allocation2 + $0xa7]]  ;;  %s4964_s30 = smov 96  }
 0x1b4   :  { %v1348_v4 = vstv %s6664_s1  ;;  %v1354_v0 = vstv %s6666_s14  ;;  %v1331_v16 = vsel %vm1298_vm9, %v1328_v21, %v1330_v2  ;;  %v1332_v12 = vsel %vm1298_vm9, %v1330_v2, %v1328_v21  ;;  %s6820_s1 = sld [smem:[#allocation2 + $0xab]]  ;;  %s6822_s14 = sld [smem:[#allocation2 + $0xaf]] }
 0x1b5   :  { %v1306_v24 = vmul.f32 %v1304_v7, %v1302_v23  ;;  %v1312_v10 = vmul.f32 %v1310_v35, %v1302_v23  ;;  %v1318_v17 = vmul.f32 %v1316_v60, %v1302_v23  ;;  %v1324_v41 = vmul.f32 %v1322_v58, %v1302_v23  ;;  %2809 = vrot.lane.b32.xlu1 %v6580_v15, %s4962_s3  ;;  %v1392_v2 = vpop.permute.xlu0 %1391 }
 0x1b6   :  { %v1305_v30 = vmul.f32 %v1304_v7, %v1301_v49  ;;  %v1311_v44 = vmul.f32 %v1310_v35, %v1301_v49  ;;  %v1317_v38 = vmul.f32 %v1316_v60, %v1301_v49  ;;  %v1323_v5 = vmul.f32 %v1322_v58, %v1301_v49  ;;  %2775 = vrot.lane.b32.xlu0 %v6559_v19, %s4962_s3 }
 0x1b7   :  { %v1308_v25 = vadd.f32 %v1306_v24, %v1272_v59  ;;  %v1314_v54 = vadd.f32 %v1312_v10, %v1278_v57  ;;  %v1320_v47 = vadd.f32 %v1318_v17, %v1284_v26  ;;  %v1326_v56 = vadd.f32 %v1324_v41, %v1290_v14  ;;  %v1394_v57 = vpop.permute.xlu1 %1393 }
 0x1b8   :  { %v1307_v39 = vadd.f32 %v1305_v30, %v1271_v29  ;;  %v1313_v43 = vadd.f32 %v1311_v44, %v1277_v33  ;;  %v1319_v6 = vadd.f32 %v1317_v38, %v1283_v11  ;;  %v1325_v3 = vadd.f32 %v1323_v5, %v1289_v13 }
 0x1b9   :  { %v1334_v48 = vmul.f32 %v1331_v16, %v6681_v61  ;;  %v1368_v1 = vstv %s6685_s15  ;;  %v1374_v62 = vstv %s6687_s10  ;;  %v1333_v7 = vmul.f32 %v1332_v12, %v6683_v53  ;;  %2844 = vrot.lane.b32.xlu1 %v6606_v32, %s4963_s0  ;;  %s6842_s15 = sld [smem:[#allocation2 + $0xb4]]  ;;  %s6844_s10 = sld [smem:[#allocation2 + $0xb8]] }
 0x1ba   :  { %v1380_v35 = vstv %s6691_s7  ;;  %v1386_v60 = vstv %s6693_s21  ;;  %v1363_v58 = vsel %vm1298_vm9, %v1360_v9, %v1362_v18  ;;  %2807 = vrot.lane.b32.xlu0 %v6589_v27, %s4962_s3  ;;  %v1364_v14 = vsel %vm1298_vm9, %v1362_v18, %v1360_v9  ;;  %s6824_s3 = sld [smem:[#allocation2 + $0xb0]]  ;;  %s6848_s7 = sld [smem:[#allocation2 + $0xbc]] }
 0x1bb   :  { %v1338_v52 = vmul.f32 %v1336_v31, %v1334_v48  ;;  %v1344_v8 = vmul.f32 %v1342_v34, %v1334_v48  ;;  %v1350_v63 = vmul.f32 %v1348_v4, %v1334_v48  ;;  %v1356_v42 = vmul.f32 %v1354_v0, %v1334_v48  ;;  %s6850_s21 = sld [smem:[#allocation2 + $0xb1]] }
 0x1bc   :  { %v1337_v22 = vmul.f32 %v1336_v31, %v1333_v7  ;;  %v1343_v40 = vmul.f32 %v1342_v34, %v1333_v7  ;;  %v1349_v50 = vmul.f32 %v1348_v4, %v1333_v7  ;;  %v1355_v51 = vmul.f32 %v1354_v0, %v1333_v7 }
 0x1bd   :  { %v1340_v46 = vadd.f32 %v1338_v52, %v1308_v25  ;;  %v1346_v29 = vadd.f32 %v1344_v8, %v1314_v54  ;;  %v1352_v59 = vadd.f32 %v1350_v63, %v1320_v47  ;;  %v1358_v33 = vadd.f32 %v1356_v42, %v1326_v56  ;;  %2877 = vrot.lane.b32.xlu1 %v6520_v36, %s4963_s0 }
 0x1be   :  { %v1339_v21 = vadd.f32 %v1337_v22, %v1307_v39  ;;  %v1345_v11 = vadd.f32 %v1343_v40, %v1313_v43  ;;  %v1351_v26 = vadd.f32 %v1349_v50, %v1319_v6  ;;  %v1357_v13 = vadd.f32 %v1355_v51, %v1325_v3  ;;  %2842 = vrot.lane.b32.xlu0 %v6499_v28, %s4963_s0  ;;  %v1429_v43 = vpop.permute.xlu1 %1428  ;;  %v1427_v6 = vpop.permute.xlu0 %1426 }
 0x1bf   :  { %v1366_v37 = vmul.f32 %v1363_v58, %v6681_v61  ;;  %v1400_v23 = vstv %s6711_s18  ;;  %v1406_v31 = vstv %s6713_s23  ;;  %v1365_v34 = vmul.f32 %v1364_v14, %v6683_v53  ;;  %s6874_s18 = sld [smem:[#allocation2 + $0xb5]]  ;;  %s6876_s23 = sld [smem:[#allocation2 + $0xb9]] }
 0x1c0   :  { %v1412_v49 = vstv %s6715_s2  ;;  %v1418_v4 = vstv %s6717_s24  ;;  %v1395_v0 = vsel %vm1298_vm9, %v1392_v2, %v1394_v57  ;;  %v1396_v3 = vsel %vm1298_vm9, %v1394_v57, %v1392_v2  ;;  %s6878_s2 = sld [smem:[#allocation2 + $0xbd]]  ;;  %s6880_s24 = sld [smem:[#allocation2 + $0xb2]] }
 0x1c1   :  { %v1370_v16 = vmul.f32 %v1368_v1, %v1366_v37  ;;  %v1376_v24 = vmul.f32 %v1374_v62, %v1366_v37  ;;  %v1382_v10 = vmul.f32 %v1380_v35, %v1366_v37  ;;  %v1388_v17 = vmul.f32 %v1386_v60, %v1366_v37  ;;  %2909 = vrot.lane.b32.xlu1 %v6546_v20, %s4963_s0 }
 0x1c2   :  { %v1369_v41 = vmul.f32 %v1368_v1, %v1365_v34  ;;  %v1375_v30 = vmul.f32 %v1374_v62, %v1365_v34  ;;  %v1381_v44 = vmul.f32 %v1380_v35, %v1365_v34  ;;  %v1387_v38 = vmul.f32 %v1386_v60, %v1365_v34  ;;  %2875 = vrot.lane.b32.xlu0 %v6527_v45, %s4963_s0 }
 0x1c3   :  { %v1372_v5 = vadd.f32 %v1370_v16, %v1340_v46  ;;  %v1378_v25 = vadd.f32 %v1376_v24, %v1346_v29  ;;  %v1384_v54 = vadd.f32 %v1382_v10, %v1352_v59  ;;  %v1390_v47 = vadd.f32 %v1388_v17, %v1358_v33  ;;  %v6786_v29 = vld [vmem:[#allocation11 + $0xa8] sm:$0xff] }
 0x1c4   :  { %v1371_v56 = vadd.f32 %v1369_v41, %v1339_v21  ;;  %v1377_v18 = vadd.f32 %v1375_v30, %v1345_v11  ;;  %v1383_v9 = vadd.f32 %v1381_v44, %v1351_v26  ;;  %v1389_v39 = vadd.f32 %v1387_v38, %v1357_v13  ;;  %v1462_v21 = vpop.permute.xlu1 %1461  ;;  %v1460_v11 = vpop.permute.xlu0 %1459 }
 0x1c5   :  { %v1398_v12 = vmul.f32 %v1395_v0, %v6681_v61  ;;  %v1436_v48 = vstv %s6733_s28  ;;  %v1397_v1 = vmul.f32 %v1396_v3, %v6683_v53  ;;  %v1442_v62 = vstv %s6735_s8  ;;  %v6784_v53 = vld [vmem:[#allocation11 + $0xa0] sm:$0xff]  ;;  %2941 = vrot.lane.b32.xlu1 %v6580_v15, %s4963_s0  ;;  %s4965_s28 = smov 95   ;;  %s6910_s8 = sld [smem:[#allocation2 + $0xb6]] }
 0x1c6   :  { %v1448_v7 = vstv %s6739_s27  ;;  %v1454_v35 = vstv %s6741_s9  ;;  %2907 = vrot.lane.b32.xlu0 %v6559_v19, %s4963_s0  ;;  %v1431_v26 = vsel %vm1430_vm10, %v1427_v6, %v1429_v43  ;;  %v1432_v13 = vsel %vm1430_vm10, %v1429_v43, %v1427_v6  ;;  %s6916_s27 = sld [smem:[#allocation2 + $0xbe]]  ;;  %s6918_s9 = sld [smem:[#allocation2 + $0xb3]] }
 0x1c7   :  { %v1402_v60 = vmul.f32 %v1400_v23, %v1398_v12  ;;  %v1408_v61 = vmul.f32 %v1406_v31, %v1398_v12  ;;  %v1414_v58 = vmul.f32 %v1412_v49, %v1398_v12  ;;  %v1420_v52 = vmul.f32 %v1418_v4, %v1398_v12 }
 0x1c8   :  { %v1401_v8 = vmul.f32 %v1400_v23, %v1397_v1  ;;  %v1407_v63 = vmul.f32 %v1406_v31, %v1397_v1  ;;  %v1413_v42 = vmul.f32 %v1412_v49, %v1397_v1  ;;  %v1419_v22 = vmul.f32 %v1418_v4, %v1397_v1 }
 0x1c9   :  { %v1404_v40 = vadd.f32 %v1402_v60, %v1372_v5  ;;  %v1410_v50 = vadd.f32 %v1408_v61, %v1378_v25  ;;  %v1416_v51 = vadd.f32 %v1414_v58, %v1384_v54  ;;  %v1422_v46 = vadd.f32 %v1420_v52, %v1390_v47  ;;  %2976 = vrot.lane.b32.xlu1 %v6606_v32, %s4964_s30 }
 0x1ca   :  { %v1403_v59 = vadd.f32 %v1401_v8, %v1371_v56  ;;  %v1409_v33 = vadd.f32 %v1407_v63, %v1377_v18  ;;  %v1415_v57 = vadd.f32 %v1413_v42, %v1383_v9  ;;  %v1421_v2 = vadd.f32 %v1419_v22, %v1389_v39  ;;  %2939 = vrot.lane.b32.xlu0 %v6589_v27, %s4963_s0  ;;  %v1494_v9 = vpop.permute.xlu1 %1493  ;;  %v1492_v39 = vpop.permute.xlu0 %1491  ;;  %s6912_s0 = sld [smem:[#allocation2 + $0xba]] }
 0x1cb   :  { %v1468_v14 = vstv %s6759_s11  ;;  %v1474_v37 = vstv %s6761_s13  ;;  %v1433_v23 = vmul.f32 %v1432_v13, %v6784_v53  ;;  %v1434_v31 = vmul.f32 %v1431_v26, %v6786_v29  ;;  %s6938_s11 = sld [smem:[#allocation2 + $0xb7]]  ;;  %s6940_s13 = sld [smem:[#allocation2 + $0xbb]] }
 0x1cc   :  { %v1480_v34 = vstv %s6763_s4  ;;  %v1486_v49 = vstv %s6765_s20  ;;  %v1463_v4 = vsel %vm1430_vm10, %v1460_v11, %v1462_v21  ;;  %v1464_v0 = vsel %vm1430_vm10, %v1462_v21, %v1460_v11  ;;  %s6942_s4 = sld [smem:[#allocation2 + $0xbf]]  ;;  %s6944_s20 = sld [smem:[#allocation2 + $0xc0]] }
 0x1cd   :  { %v1500_v16 = vstv %s6772_s5  ;;  %v1506_v24 = vstv %s6774_s26  ;;  %v1437_v10 = vmul.f32 %v1436_v48, %v1433_v23  ;;  %v1438_v17 = vmul.f32 %v1436_v48, %v1434_v31  ;;  %3009 = vrot.lane.b32.xlu1 %v6520_v36, %s4964_s30  ;;  %s6946_s5 = sld [smem:[#allocation2 + $0xc4]]  ;;  %s6948_s26 = sld [smem:[#allocation2 + $0xc8]] }
 0x1ce   :  { %v1443_v41 = vmul.f32 %v1442_v62, %v1433_v23  ;;  %v1444_v30 = vmul.f32 %v1442_v62, %v1434_v31  ;;  %2974 = vrot.lane.b32.xlu0 %v6499_v28, %s4964_s30  ;;  %v1449_v44 = vmul.f32 %v1448_v7, %v1433_v23  ;;  %v1450_v38 = vmul.f32 %v1448_v7, %v1434_v31  ;;  %v1524_v21 = vpop.permute.xlu0 %1523 }
 0x1cf   :  { %v1455_v5 = vmul.f32 %v1454_v35, %v1433_v23  ;;  %v1456_v25 = vmul.f32 %v1454_v35, %v1434_v31  ;;  %v1439_v54 = vadd.f32 %v1437_v10, %v1403_v59  ;;  %v1440_v47 = vadd.f32 %v1438_v17, %v1404_v40 }
 0x1d0   :  { %v1445_v56 = vadd.f32 %v1443_v41, %v1409_v33  ;;  %v1446_v18 = vadd.f32 %v1444_v30, %v1410_v50  ;;  %v1451_v43 = vadd.f32 %v1449_v44, %v1415_v57  ;;  %v1452_v6 = vadd.f32 %v1450_v38, %v1416_v51 }
 0x1d1   :  { %v1457_v3 = vadd.f32 %v1455_v5, %v1421_v2  ;;  %v1458_v12 = vadd.f32 %v1456_v25, %v1422_v46  ;;  %v1465_v48 = vmul.f32 %v1464_v0, %v6784_v53  ;;  %v1466_v1 = vmul.f32 %v1463_v4, %v6786_v29  ;;  %3041 = vrot.lane.b32.xlu1 %v6546_v20, %s4964_s30  ;;  %v1526_v2 = vpop.permute.xlu1 %1525 }
 0x1d2   :  { %v1512_v62 = vstv %s6788_s22  ;;  %v1518_v7 = vstv %s6792_s29  ;;  %3007 = vrot.lane.b32.xlu0 %v6527_v45, %s4964_s30  ;;  %v1495_v35 = vsel %vm1430_vm10, %v1492_v39, %v1494_v9  ;;  %v1496_v60 = vsel %vm1430_vm10, %v1494_v9, %v1492_v39  ;;  %v1559_v39 = vpop.permute.xlu0 %1558  ;;  %s4966_s22 = smov 94   ;;  %s6970_s29 = sld [smem:[#allocation2 + $0xcc]] }
 0x1d3   :  { %v1532_v61 = vstv %s6802_s17  ;;  %v1538_v58 = vstv %s6804_s16  ;;  %v1469_v52 = vmul.f32 %v1468_v14, %v1465_v48  ;;  %v1470_v8 = vmul.f32 %v1468_v14, %v1466_v1  ;;  %s6972_s17 = sld [smem:[#allocation2 + $0xc1]] }
 0x1d4   :  { %v1475_v63 = vmul.f32 %v1474_v37, %v1465_v48  ;;  %v1476_v42 = vmul.f32 %v1474_v37, %v1466_v1  ;;  %v1481_v22 = vmul.f32 %v1480_v34, %v1465_v48  ;;  %v1482_v40 = vmul.f32 %v1480_v34, %v1466_v1  ;;  %s7289_s16 = sld [smem:[#allocation2 + $0xe1]] }
 0x1d5   :  { %v1487_v50 = vmul.f32 %v1486_v49, %v1465_v48  ;;  %v1488_v51 = vmul.f32 %v1486_v49, %v1466_v1  ;;  %v1471_v46 = vadd.f32 %v1469_v52, %v1439_v54  ;;  %v1472_v59 = vadd.f32 %v1470_v8, %v1440_v47  ;;  %3073 = vrot.lane.b32.xlu1 %v6580_v15, %s4964_s30  ;;  %v1561_v9 = vpop.permute.xlu1 %1560 }
 0x1d6   :  { %v1477_v33 = vadd.f32 %v1475_v63, %v1445_v56  ;;  %v1478_v57 = vadd.f32 %v1476_v42, %v1446_v18  ;;  %3039 = vrot.lane.b32.xlu0 %v6559_v19, %s4964_s30  ;;  %v1483_v11 = vadd.f32 %v1481_v22, %v1451_v43  ;;  %v1484_v26 = vadd.f32 %v1482_v40, %v1452_v6  ;;  %v6904_v40 = vld [vmem:[#allocation11 + $0xb0] sm:$0xff] }
 0x1d7   :  { %v1489_v13 = vadd.f32 %v1487_v50, %v1457_v3  ;;  %v1490_v14 = vadd.f32 %v1488_v51, %v1458_v12  ;;  %v1497_v37 = vmul.f32 %v1496_v60, %v6784_v53  ;;  %v1498_v23 = vmul.f32 %v1495_v35, %v6786_v29  ;;  %v6906_v50 = vld [vmem:[#allocation11 + $0xb8] sm:$0xff] }
 0x1d8   :  { %v1544_v31 = vstv %s6820_s1  ;;  %v1550_v34 = vstv %s6822_s14  ;;  %v1527_v49 = vsel %vm1430_vm10, %v1524_v21, %v1526_v2  ;;  %v1528_v4 = vsel %vm1430_vm10, %v1526_v2, %v1524_v21  ;;  %s6981_s1 = sld [smem:[#allocation2 + $0xc5]]  ;;  %s6983_s14 = sld [smem:[#allocation2 + $0xc9]] }
 0x1d9   :  { %v1568_v0 = vstv %s6824_s3  ;;  %v1501_v10 = vmul.f32 %v1500_v16, %v1497_v37  ;;  %v1502_v17 = vmul.f32 %v1500_v16, %v1498_v23  ;;  %v1507_v41 = vmul.f32 %v1506_v24, %v1497_v37  ;;  %3108 = vrot.lane.b32.xlu1 %v6606_v32, %s4965_s28  ;;  %s6993_s3 = sld [smem:[#allocation2 + $0xcd]] }
 0x1da   :  { %v1508_v30 = vmul.f32 %v1506_v24, %v1498_v23  ;;  %3071 = vrot.lane.b32.xlu0 %v6589_v27, %s4964_s30  ;;  %v1513_v44 = vmul.f32 %v1512_v62, %v1497_v37  ;;  %v1514_v38 = vmul.f32 %v1512_v62, %v1498_v23  ;;  %v1519_v5 = vmul.f32 %v1518_v7, %v1497_v37  ;;  %s7291_s30 = sld [smem:[#allocation2 + $0xe5]] }
 0x1db   :  { %v1520_v25 = vmul.f32 %v1518_v7, %v1498_v23  ;;  %v1503_v54 = vadd.f32 %v1501_v10, %v1471_v46  ;;  %v1504_v47 = vadd.f32 %v1502_v17, %v1472_v59  ;;  %v1509_v56 = vadd.f32 %v1507_v41, %v1477_v33  ;;  %v1594_v33 = vpop.permute.xlu1 %1593 }
 0x1dc   :  { %v1510_v18 = vadd.f32 %v1508_v30, %v1478_v57  ;;  %v1515_v16 = vadd.f32 %v1513_v44, %v1483_v11  ;;  %v1516_v24 = vadd.f32 %v1514_v38, %v1484_v26  ;;  %v1521_v43 = vadd.f32 %v1519_v5, %v1489_v13 }
 0x1dd   :  { %v1522_v6 = vadd.f32 %v1520_v25, %v1490_v14  ;;  %v1529_v3 = vmul.f32 %v1528_v4, %v6784_v53  ;;  %v1530_v12 = vmul.f32 %v1527_v49, %v6786_v29  ;;  %v1574_v48 = vstv %s6842_s15  ;;  %3141 = vrot.lane.b32.xlu1 %v6520_v36, %s4965_s28  ;;  %s6995_s15 = sld [smem:[#allocation2 + $0xc2]] }
 0x1de   :  { %v1580_v1 = vstv %s6844_s10  ;;  %3106 = vrot.lane.b32.xlu0 %v6499_v28, %s4965_s28  ;;  %v1586_v62 = vstv %s6848_s7  ;;  %v1563_v7 = vsel %vm1562_vm11, %v1559_v39, %v1561_v9  ;;  %v1564_v35 = vsel %vm1562_vm11, %v1561_v9, %v1559_v39  ;;  %s7001_s10 = sld [smem:[#allocation2 + $0xc6]]  ;;  %s7003_s7 = sld [smem:[#allocation2 + $0xca]] }
 0x1df   :  { %v1600_v60 = vstv %s6850_s21  ;;  %v1533_v52 = vmul.f32 %v1532_v61, %v1529_v3  ;;  %v1534_v8 = vmul.f32 %v1532_v61, %v1530_v12  ;;  %v1539_v53 = vmul.f32 %v1538_v58, %v1529_v3  ;;  %s7300_s21 = sld [smem:[#allocation2 + $0xe9]] }
 0x1e0   :  { %v1540_v29 = vmul.f32 %v1538_v58, %v1530_v12  ;;  %v1545_v63 = vmul.f32 %v1544_v31, %v1529_v3  ;;  %v1546_v42 = vmul.f32 %v1544_v31, %v1530_v12  ;;  %v1551_v22 = vmul.f32 %v1550_v34, %v1529_v3  ;;  %v1592_v58 = vpop.permute.xlu0 %1591 }
 0x1e1   :  { %v1552_v28 = vmul.f32 %v1550_v34, %v1530_v12  ;;  %v1535_v51 = vadd.f32 %v1533_v52, %v1503_v54  ;;  %v1536_v46 = vadd.f32 %v1534_v8, %v1504_v47  ;;  %v1541_v59 = vadd.f32 %v1539_v53, %v1509_v56  ;;  %3173 = vrot.lane.b32.xlu1 %v6546_v20, %s4965_s28 }
 0x1e2   :  { %v1542_v61 = vadd.f32 %v1540_v29, %v1510_v18  ;;  %3139 = vrot.lane.b32.xlu0 %v6527_v45, %s4965_s28  ;;  %v1547_v57 = vadd.f32 %v1545_v63, %v1515_v16  ;;  %v1548_v36 = vadd.f32 %v1546_v42, %v1516_v24  ;;  %v1553_v2 = vadd.f32 %v1551_v22, %v1521_v43 }
 0x1e3   :  { %v1554_v21 = vadd.f32 %v1552_v28, %v1522_v6  ;;  %v1565_v11 = vmul.f32 %v1564_v35, %v6904_v40  ;;  %v1566_v26 = vmul.f32 %v1563_v7, %v6906_v50  ;;  %v1606_v13 = vstv %s6874_s18  ;;  %s7302_s18 = sld [smem:[#allocation2 + $0xed]] }
 0x1e4   :  { %v1612_v14 = vstv %s6876_s23  ;;  %v1618_v37 = vstv %s6878_s2  ;;  %v1595_v45 = vsel %vm1562_vm11, %v1592_v58, %v1594_v33  ;;  %v1596_v23 = vsel %vm1562_vm11, %v1594_v33, %v1592_v58  ;;  %v1624_v54 = vpop.permute.xlu0 %1623  ;;  %s7009_s23 = sld [smem:[#allocation2 + $0xce]]  ;;  %s7011_s2 = sld [smem:[#allocation2 + $0xc3]] }
 0x1e5   :  { %v1632_v31 = vstv %s6880_s24  ;;  %v1569_v34 = vmul.f32 %v1568_v0, %v1565_v11  ;;  %v1570_v49 = vmul.f32 %v1568_v0, %v1566_v26  ;;  %v1575_v4 = vmul.f32 %v1574_v48, %v1565_v11  ;;  %v1626_v0 = vpop.permute.xlu1 %1625  ;;  %3205 = vrot.lane.b32.xlu1 %v6580_v15, %s4965_s28  ;;  %s7259_s24 = sld [smem:[#allocation2 + $0xdf]] }
 0x1e6   :  { %v1576_v10 = vmul.f32 %v1574_v48, %v1566_v26  ;;  %3171 = vrot.lane.b32.xlu0 %v6559_v19, %s4965_s28  ;;  %v1581_v17 = vmul.f32 %v1580_v1, %v1565_v11  ;;  %v1582_v41 = vmul.f32 %v1580_v1, %v1566_v26  ;;  %v1587_v30 = vmul.f32 %v1586_v62, %v1565_v11 }
 0x1e7   :  { %v1588_v44 = vmul.f32 %v1586_v62, %v1566_v26  ;;  %v1571_v38 = vadd.f32 %v1569_v34, %v1535_v51  ;;  %v1572_v5 = vadd.f32 %v1570_v49, %v1536_v46  ;;  %v1577_v20 = vadd.f32 %v1575_v4, %v1541_v59 }
 0x1e8   :  { %v1578_v25 = vadd.f32 %v1576_v10, %v1542_v61  ;;  %v1583_v19 = vadd.f32 %v1581_v17, %v1547_v57  ;;  %v1584_v47 = vadd.f32 %v1582_v41, %v1548_v36  ;;  %v1589_v56 = vadd.f32 %v1587_v30, %v1553_v2 }
 0x1e9   :  { %v1590_v18 = vadd.f32 %v1588_v44, %v1554_v21  ;;  %v1597_v9 = vmul.f32 %v1596_v23, %v6904_v40  ;;  %v1598_v39 = vmul.f32 %v1595_v45, %v6906_v50  ;;  %v1638_v16 = vstv %s6910_s8  ;;  %3240 = vrot.lane.b32.xlu1 %v6606_v32, %s4966_s22  ;;  %s7033_s8 = sld [smem:[#allocation2 + $0xc7]] }
 0x1ea   :  { %v1644_v24 = vstv %s6912_s0  ;;  %3203 = vrot.lane.b32.xlu0 %v6589_v27, %s4965_s28  ;;  %v1650_v43 = vstv %s6916_s27  ;;  %v1627_v6 = vsel %vm1562_vm11, %v1624_v54, %v1626_v0  ;;  %v1628_v3 = vsel %vm1562_vm11, %v1626_v0, %v1624_v54  ;;  %s7051_s0 = sld [smem:[#allocation2 + $0xcb]]  ;;  %s7053_s27 = sld [smem:[#allocation2 + $0xcf]]  ;;  %v4832_v54 = vld [vmem:[%s9777_s25 + $0x28] sm:$0xff] }
 0x1eb   :  { %v1664_v12 = vstv %s6918_s9  ;;  %v1601_v48 = vmul.f32 %v1600_v60, %v1597_v9  ;;  %v1602_v15 = vmul.f32 %v1600_v60, %v1598_v39  ;;  %v1607_v1 = vmul.f32 %v1606_v13, %v1597_v9  ;;  %v6977_v60 = vld [vmem:[%s9777_s25] sm:$0xff]  ;;  %s7183_s9 = sld [smem:[#allocation2 + $0xd4]]  ;;  %s7271_s28 = sld [smem:[#allocation2 + $0xe0]] }
 0x1ec   :  { %v1608_v62 = vmul.f32 %v1606_v13, %v1598_v39  ;;  %v1613_v7 = vmul.f32 %v1612_v14, %v1597_v9  ;;  %v1614_v35 = vmul.f32 %v1612_v14, %v1598_v39  ;;  %v1619_v52 = vmul.f32 %v1618_v37, %v1597_v9  ;;  %v4830_v14 = vld [vmem:[%s9777_s25 + $0x18] sm:$0xff]  ;;  %v4833_v9 = vld [vmem:[%s9777_s25 + $0x20] sm:$0xff] }
 0x1ed   :  { %v1620_v8 = vmul.f32 %v1618_v37, %v1598_v39  ;;  %v1603_v27 = vadd.f32 %v1601_v48, %v1571_v38  ;;  %v1604_v53 = vadd.f32 %v1602_v15, %v1572_v5  ;;  %v1609_v29 = vadd.f32 %v1607_v1, %v1577_v20  ;;  %3273 = vrot.lane.b32.xlu1 %v4830_v14, %s4966_s22 }
 0x1ee   :  { %v1610_v63 = vadd.f32 %v1608_v62, %v1578_v25  ;;  %3238 = vrot.lane.b32.xlu0 %v6977_v60, %s4966_s22  ;;  %v1615_v42 = vadd.f32 %v1613_v7, %v1583_v19  ;;  %v1616_v22 = vadd.f32 %v1614_v35, %v1584_v47  ;;  %v1621_v28 = vadd.f32 %v1619_v52, %v1589_v56  ;;  %v4834_v35 = vld [vmem:[%s9777_s25 + $0x38] sm:$0xff]  ;;  %v1658_v52 = vpop.permute.xlu1 %1657 }
 0x1ef   :  { %v1622_v51 = vadd.f32 %v1620_v8, %v1590_v18  ;;  %v1629_v46 = vmul.f32 %v1628_v3, %v6904_v40  ;;  %v1630_v59 = vmul.f32 %v1627_v6, %v6906_v50  ;;  %v1670_v61 = vstv %s6938_s11  ;;  %s7186_s11 = sld [smem:[#allocation2 + $0xd8]] }
 0x1f0   :  { %v1676_v33 = vstv %s6940_s13  ;;  %v1682_v58 = vstv %s6942_s4  ;;  %v1688_v57 = vstv %s6944_s20  ;;  %v1694_v36 = vstv %s6946_s5  ;;  %s7188_s13 = sld [smem:[#allocation2 + $0xdc]]  ;;  %s7193_s4 = sld [smem:[#allocation2 + $0xd1]] }
 0x1f1   :  { %v1700_v2 = vstv %s6948_s26  ;;  %v1633_v21 = vmul.f32 %v1632_v31, %v1629_v46  ;;  %v1634_v11 = vmul.f32 %v1632_v31, %v1630_v59  ;;  %v1639_v26 = vmul.f32 %v1638_v16, %v1629_v46  ;;  %v4831_v31 = vld [vmem:[%s9777_s25 + $0x10] sm:$0xff]  ;;  %3305 = vrot.lane.b32.xlu1 %v4832_v54, %s4966_s22  ;;  %s7195_s20 = sld [smem:[#allocation2 + $0xd5]]  ;;  %s7201_s5 = sld [smem:[#allocation2 + $0xd9]] }
 0x1f2   :  { %v1640_v13 = vmul.f32 %v1638_v16, %v1630_v59  ;;  %v1645_v37 = vmul.f32 %v1644_v24, %v1629_v46  ;;  %v1646_v45 = vmul.f32 %v1644_v24, %v1630_v59  ;;  %v1651_v23 = vmul.f32 %v1650_v43, %v1629_v46  ;;  %3271 = vrot.lane.b32.xlu0 %v4831_v31, %s4966_s22  ;;  %v4835_v46 = vld [vmem:[%s9777_s25 + $0x30] sm:$0xff]  ;;  %s7181_s25 = sld [smem:[#allocation2 + $0xd0]]  ;;  %s7203_s26 = sld [smem:[#allocation2 + $0xdd]] }
 0x1f3   :  { %v1652_v34 = vmul.f32 %v1650_v43, %v1630_v59  ;;  %v7017_v49 = vadd.f32 %v1633_v21, %v1603_v27  ;;  %v7019_v4 = vadd.f32 %v1634_v11, %v1604_v53  ;;  %v7021_v10 = vadd.f32 %v1639_v26, %v1609_v29 }
 0x1f4   :  { %v7023_v17 = vadd.f32 %v1640_v13, %v1610_v63  ;;  %v7025_v41 = vadd.f32 %v1645_v37, %v1615_v42  ;;  %v7027_v30 = vadd.f32 %v1646_v45, %v1616_v22  ;;  %v7029_v44 = vadd.f32 %v1651_v23, %v1621_v28  ;;  %v1656_v63 = vpop.permute.xlu0 %1655 }
 0x1f5   :  { %v7031_v38 = vadd.f32 %v1652_v34, %v1622_v51  ;;  %v7038_v5 = vmul.f32 %v6606_v32, %v1688_v57  ;;  %v7043_v20 = vmul.f32 %v6606_v32, %v1694_v36  ;;  %v7048_v25 = vmul.f32 %v6606_v32, %v1700_v2  ;;  %3337 = vrot.lane.b32.xlu1 %v4834_v35, %s4966_s22 }
 0x1f6   :  { %v1706_v0 = vstv %s6970_s29  ;;  %v1712_v47 = vstv %s6972_s17  ;;  %v1718_v56 = vstv %s6981_s1  ;;  %v1724_v18 = vstv %s6983_s14  ;;  %s7229_s29 = sld [smem:[#allocation2 + $0xd6]]  ;;  %s7310_s17 = sld [smem:[#allocation2 + $0xe2]] }
 0x1f7   :  { %v7062_v19 = vmul.f32 %v6606_v32, %v1706_v0  ;;  %3303 = vrot.lane.b32.xlu0 %v4833_v9, %s4966_s22  ;;  %v7071_v39 = vmul.f32 %v4831_v31, %v1712_v47  ;;  %v7073_v16 = vmul.f32 %v4830_v14, %v1712_v47  ;;  %v7075_v24 = vmul.f32 %v4831_v31, %v1718_v56  ;;  %s7312_s1 = sld [smem:[#allocation2 + $0xe6]]  ;;  %s7322_s14 = sld [smem:[#allocation2 + $0xea]] }
 0x1f8   :  { %v7077_v32 = vmul.f32 %v4830_v14, %v1718_v56  ;;  %v7079_v43 = vmul.f32 %v4831_v31, %v1724_v18  ;;  %v7081_v6 = vmul.f32 %v4830_v14, %v1724_v18  ;;  %v1730_v3 = vstv %s6993_s3  ;;  %s7324_s3 = sld [smem:[#allocation2 + $0xee]] }
 0x1f9   :  { %v1736_v48 = vstv %s6995_s15  ;;  %v7085_v15 = vmul.f32 %v4831_v31, %v1730_v3  ;;  %v7087_v1 = vmul.f32 %v4830_v14, %v1730_v3  ;;  %v1742_v8 = vstv %s7001_s10  ;;  %s7237_s15 = sld [smem:[#allocation2 + $0xda]]  ;;  %s7239_s10 = sld [smem:[#allocation2 + $0xde]] }
 0x1fa   :  { %v7089_v62 = vmul.f32 %v4833_v9, %v1736_v48  ;;  %v7091_v7 = vmul.f32 %v4832_v54, %v1736_v48  ;;  %v1748_v27 = vstv %s7003_s7  ;;  %v1754_v53 = vstv %s7009_s23  ;;  %s7253_s7 = sld [smem:[#allocation2 + $0xd3]]  ;;  %s7255_s23 = sld [smem:[#allocation2 + $0xd7]] }
 0x1fb   :  { %v1760_v29 = vstv %s7011_s2  ;;  %v7101_v42 = vmul.f32 %v4833_v9, %v1742_v8  ;;  %v7103_v22 = vmul.f32 %v4832_v54, %v1742_v8  ;;  %v7105_v28 = vmul.f32 %v4833_v9, %v1748_v27  ;;  %3335 = vrot.lane.b32.xlu0 %v4835_v46, %s4966_s22  ;;  %s7227_s22 = sld [smem:[#allocation2 + $0xd2]]  ;;  %s7257_s2 = sld [smem:[#allocation2 + $0xdb]] }
 0x1fc   :  { %v7107_v51 = vmul.f32 %v4832_v54, %v1748_v27  ;;  %v7113_v59 = vmul.f32 %v4833_v9, %v1754_v53  ;;  %v7115_v21 = vmul.f32 %v4832_v54, %v1754_v53  ;;  %v7117_v11 = vmul.f32 %v4835_v46, %v1760_v29 }
 0x1fd   :  { %v7119_v26 = vmul.f32 %v4834_v35, %v1760_v29  ;;  %v1766_v13 = vstv %s7033_s8  ;;  %v1772_v14 = vstv %s7051_s0  ;;  %v1778_v37 = vstv %s7053_s27  ;;  %s7273_s8 = sld [smem:[#allocation2 + $0xe4]]  ;;  %s7285_s0 = sld [smem:[#allocation2 + $0xe8]] }
 0x1fe   :  { %v1659_v45 = vsel %vm1562_vm11, %v1656_v63, %v1658_v52  ;;  %v7126_v23 = vmul.f32 %v4835_v46, %v1766_v13  ;;  %v7128_v34 = vmul.f32 %v4834_v35, %v1766_v13  ;;  %v7130_v31 = vmul.f32 %v4835_v46, %v1772_v14  ;;  %s7287_s27 = sld [smem:[#allocation2 + $0xec]] }
 0x1ff   :  { %v7132_v54 = vmul.f32 %v4834_v35, %v1772_v14  ;;  %v7134_v47 = vmul.f32 %v4835_v46, %v1778_v37  ;;  %v7136_v56 = vmul.f32 %v4834_v35, %v1778_v37  ;;  %v1660_v18 = vsel %vm1562_vm11, %v1658_v52, %v1656_v63 }
 0x200   :  { %v1662_v9 = vmul.f32 %v1659_v45, %v6906_v50  ;;  %v1661_v3 = vmul.f32 %v1660_v18, %v6904_v40  ;;  %v1689_v48 = vmul.f32 %v6977_v60, %v1688_v57  ;;  %v1695_v8 = vmul.f32 %v6977_v60, %v1694_v36 }
 0x201   :  { %v1701_v27 = vmul.f32 %v6977_v60, %v1700_v2  ;;  %vm2318_vm0 = vcmp.lt.s32.totalorder %v5464_v55, 112  ;;  %vm2450_vm1 = vcmp.lt.s32.totalorder %v5464_v55, 111  ;;  %vm2582_vm2 = vcmp.lt.s32.totalorder %v5464_v55, 110 }
 0x202   :  { %v1666_v53 = vmul.f32 %v1664_v12, %v1662_v9  ;;  %v1672_v35 = vmul.f32 %v1670_v61, %v1662_v9  ;;  %v1678_v29 = vmul.f32 %v1676_v33, %v1662_v9  ;;  %v1684_v52 = vmul.f32 %v1682_v58, %v1662_v9 }
 0x203   :  { %v1665_v40 = vmul.f32 %v1664_v12, %v1661_v3  ;;  %v1671_v50 = vmul.f32 %v1670_v61, %v1661_v3  ;;  %v1677_v57 = vmul.f32 %v1676_v33, %v1661_v3  ;;  %v1683_v36 = vmul.f32 %v1682_v58, %v1661_v3 }
 0x204   :  { %v1668_v63 = vadd.f32 %v1666_v53, %v7019_v4  ;;  %v1674_v2 = vadd.f32 %v1672_v35, %v7023_v17  ;;  %v1680_v46 = vadd.f32 %v1678_v29, %v7027_v30  ;;  %v1686_v13 = vadd.f32 %v1684_v52, %v7031_v38 }
 0x205   :  { %v1667_v14 = vadd.f32 %v1665_v40, %v7017_v49  ;;  %v1673_v37 = vadd.f32 %v1671_v50, %v7021_v10  ;;  %v1679_v12 = vadd.f32 %v1677_v57, %v7025_v41  ;;  %v1685_v61 = vadd.f32 %v1683_v36, %v7029_v44 }
 0x206   :  { %v1692_v33 = vadd.f32 %v7038_v5, %v1668_v63  ;;  %v1698_v58 = vadd.f32 %v7043_v20, %v1674_v2  ;;  %v1704_v4 = vadd.f32 %v7048_v25, %v1680_v46  ;;  %v1707_v17 = vmul.f32 %v6977_v60, %v1706_v0  ;;  %v1789_v20 = vpop.permute.xlu1 %1788  ;;  %v1787_v25 = vpop.permute.xlu0 %1786 }
 0x207   :  { %v1691_v49 = vadd.f32 %v1689_v48, %v1667_v14  ;;  %v1697_v30 = vadd.f32 %v1695_v8, %v1673_v37  ;;  %v1703_v10 = vadd.f32 %v1701_v27, %v1679_v12  ;;  %v1710_v41 = vadd.f32 %v7062_v19, %v1686_v13 }
 0x208   :  { %v1709_v44 = vadd.f32 %v1707_v17, %v1685_v61  ;;  %v1716_v38 = vadd.f32 %v7073_v16, %v1692_v33  ;;  %v1722_v5 = vadd.f32 %v7077_v32, %v1698_v58  ;;  %v1728_v60 = vadd.f32 %v7081_v6, %v1704_v4 }
 0x209   :  { %v1715_v0 = vadd.f32 %v7071_v39, %v1691_v49  ;;  %v1721_v19 = vadd.f32 %v7075_v24, %v1697_v30  ;;  %v1727_v45 = vadd.f32 %v7079_v43, %v1703_v10  ;;  %v1734_v18 = vadd.f32 %v7087_v1, %v1710_v41 }
 0x20a   :  { %v1733_v16 = vadd.f32 %v7085_v15, %v1709_v44  ;;  %v1740_v32 = vadd.f32 %v7091_v7, %v1716_v38  ;;  %v1746_v6 = vadd.f32 %v7103_v22, %v1722_v5  ;;  %v1752_v9 = vadd.f32 %v7107_v51, %v1728_v60  ;;  %v7219_v51 = vld [vmem:[#allocation11 + $0xd0] sm:$0xff] }
 0x20b   :  { %v1739_v39 = vadd.f32 %v7089_v62, %v1715_v0  ;;  %v1745_v24 = vadd.f32 %v7101_v42, %v1721_v19  ;;  %v1751_v43 = vadd.f32 %v7105_v28, %v1727_v45  ;;  %v1758_v1 = vadd.f32 %v7115_v21, %v1734_v18  ;;  %v7221_v42 = vld [vmem:[#allocation11 + $0xd8] sm:$0xff] }
 0x20c   :  { %v1757_v3 = vadd.f32 %v7113_v59, %v1733_v16  ;;  %v1764_v48 = vadd.f32 %v7119_v26, %v1740_v32  ;;  %v1770_v22 = vadd.f32 %v7128_v34, %v1746_v6  ;;  %v1776_v62 = vadd.f32 %v7132_v54, %v1752_v9  ;;  %v1820_v26 = vpop.permute.xlu0 %1819 }
 0x20d   :  { %v1763_v15 = vadd.f32 %v7117_v11, %v1739_v39  ;;  %v1769_v7 = vadd.f32 %v7126_v23, %v1745_v24  ;;  %v1775_v28 = vadd.f32 %v7130_v31, %v1751_v43  ;;  %v1782_v21 = vadd.f32 %v7136_v56, %v1758_v1  ;;  %v1822_v11 = vpop.permute.xlu1 %1821 }
 0x20e   :  { %v1781_v59 = vadd.f32 %v7134_v47, %v1757_v3  ;;  %v1796_v23 = vstv %s7181_s25  ;;  %v1802_v34 = vstv %s7183_s9  ;;  %v1791_v31 = vsel %vm1790_vm12, %v1787_v25, %v1789_v20  ;;  %s7328_s25 = sld [smem:[#allocation2 + $0xe3]]  ;;  %s7330_s9 = sld [smem:[#allocation2 + $0xe7]] }
 0x20f   :  { %v1792_v54 = vsel %vm1790_vm12, %v1789_v20, %v1787_v25  ;;  %v1808_v47 = vstv %s7186_s11  ;;  %v1814_v56 = vstv %s7188_s13  ;;  %v1793_v8 = vmul.f32 %v1791_v31, %v7219_v51  ;;  %s7340_s11 = sld [smem:[#allocation2 + $0xeb]]  ;;  %s7342_s13 = sld [smem:[#allocation2 + $0xef]] }
 0x210   :  { %v1794_v27 = vmul.f32 %v1792_v54, %v7221_v42  ;;  %v1828_v53 = vstv %s7193_s4  ;;  %v1834_v35 = vstv %s7195_s20  ;;  %v1840_v29 = vstv %s7201_s5  ;;  %v1852_v58 = vpop.permute.xlu0 %1851  ;;  %s7346_s4 = sld [smem:[#allocation2 + $0xf0]]  ;;  %s7348_s20 = sld [smem:[#allocation2 + $0xf4]] }
 0x211   :  { %v1846_v52 = vstv %s7203_s26  ;;  %v1797_v40 = vmul.f32 %v1796_v23, %v1793_v8  ;;  %v1823_v57 = vsel %vm1790_vm12, %v1820_v26, %v1822_v11  ;;  %v1824_v36 = vsel %vm1790_vm12, %v1822_v11, %v1820_v26  ;;  %v1854_v33 = vpop.permute.xlu1 %1853  ;;  %s7358_s5 = sld [smem:[#allocation2 + $0xf8]]  ;;  %s7360_s26 = sld [smem:[#allocation2 + $0xfc]] }
 0x212   :  { %v1798_v50 = vmul.f32 %v1796_v23, %v1794_v27  ;;  %v1803_v63 = vmul.f32 %v1802_v34, %v1793_v8  ;;  %v1804_v2 = vmul.f32 %v1802_v34, %v1794_v27  ;;  %v1809_v46 = vmul.f32 %v1808_v47, %v1793_v8 }
 0x213   :  { %v1810_v13 = vmul.f32 %v1808_v47, %v1794_v27  ;;  %v1799_v14 = vadd.f32 %v1797_v40, %v1763_v15  ;;  %v1815_v12 = vmul.f32 %v1814_v56, %v1793_v8  ;;  %v1816_v61 = vmul.f32 %v1814_v56, %v1794_v27 }
 0x214   :  { %v1800_v37 = vadd.f32 %v1798_v50, %v1764_v48  ;;  %v1805_v4 = vadd.f32 %v1803_v63, %v1769_v7  ;;  %v1806_v17 = vadd.f32 %v1804_v2, %v1770_v22  ;;  %v1811_v49 = vadd.f32 %v1809_v46, %v1775_v28  ;;  %v1884_v48 = vpop.permute.xlu0 %1883 }
 0x215   :  { %v1812_v30 = vadd.f32 %v1810_v13, %v1776_v62  ;;  %v1817_v10 = vadd.f32 %v1815_v12, %v1781_v59  ;;  %v1818_v41 = vadd.f32 %v1816_v61, %v1782_v21  ;;  %v1825_v44 = vmul.f32 %v1823_v57, %v7219_v51  ;;  %v1886_v3 = vpop.permute.xlu1 %1885 }
 0x216   :  { %v1826_v38 = vmul.f32 %v1824_v36, %v7221_v42  ;;  %v1860_v5 = vstv %s7227_s22  ;;  %v1866_v60 = vstv %s7229_s29  ;;  %v1872_v20 = vstv %s7237_s15  ;;  %s7364_s22 = sld [smem:[#allocation2 + $0xf1]]  ;;  %s7366_s29 = sld [smem:[#allocation2 + $0xf5]] }
 0x217   :  { %v1878_v25 = vstv %s7239_s10  ;;  %v1829_v0 = vmul.f32 %v1828_v53, %v1825_v44  ;;  %v1855_v45 = vsel %vm1790_vm12, %v1852_v58, %v1854_v33  ;;  %v1856_v18 = vsel %vm1790_vm12, %v1854_v33, %v1852_v58  ;;  %s7371_s15 = sld [smem:[#allocation2 + $0xf9]]  ;;  %s7373_s10 = sld [smem:[#allocation2 + $0xfd]] }
 0x218   :  { %v1830_v19 = vmul.f32 %v1828_v53, %v1826_v38  ;;  %v1835_v16 = vmul.f32 %v1834_v35, %v1825_v44  ;;  %v1836_v32 = vmul.f32 %v1834_v35, %v1826_v38  ;;  %v1841_v6 = vmul.f32 %v1840_v29, %v1825_v44  ;;  %v1919_v63 = vpop.permute.xlu0 %1918 }
 0x219   :  { %v1842_v9 = vmul.f32 %v1840_v29, %v1826_v38  ;;  %v1831_v39 = vadd.f32 %v1829_v0, %v1799_v14  ;;  %v1847_v43 = vmul.f32 %v1846_v52, %v1825_v44  ;;  %v1848_v1 = vmul.f32 %v1846_v52, %v1826_v38  ;;  %v1921_v36 = vpop.permute.xlu1 %1920 }
 0x21a   :  { %v1832_v24 = vadd.f32 %v1830_v19, %v1800_v37  ;;  %v1837_v15 = vadd.f32 %v1835_v16, %v1805_v4  ;;  %v1838_v7 = vadd.f32 %v1836_v32, %v1806_v17  ;;  %v1843_v22 = vadd.f32 %v1841_v6, %v1811_v49 }
 0x21b   :  { %v1844_v62 = vadd.f32 %v1842_v9, %v1812_v30  ;;  %v1849_v28 = vadd.f32 %v1847_v43, %v1817_v10  ;;  %v1850_v59 = vadd.f32 %v1848_v1, %v1818_v41  ;;  %v1857_v21 = vmul.f32 %v1855_v45, %v7219_v51 }
 0x21c   :  { %v1858_v11 = vmul.f32 %v1856_v18, %v7221_v42  ;;  %v1892_v26 = vstv %s7253_s7  ;;  %v1898_v23 = vstv %s7255_s23  ;;  %v1904_v34 = vstv %s7257_s2  ;;  %v1952_v18 = vpop.permute.xlu0 %1951  ;;  %s7379_s7 = sld [smem:[#allocation2 + $0xf2]]  ;;  %s7381_s23 = sld [smem:[#allocation2 + $0xf6]] }
 0x21d   :  { %v1910_v31 = vstv %s7259_s24  ;;  %v1861_v54 = vmul.f32 %v1860_v5, %v1857_v21  ;;  %v1887_v56 = vsel %vm1790_vm12, %v1884_v48, %v1886_v3  ;;  %v1888_v8 = vsel %vm1790_vm12, %v1886_v3, %v1884_v48  ;;  %v1954_v45 = vpop.permute.xlu1 %1953  ;;  %s7393_s2 = sld [smem:[#allocation2 + $0xfa]]  ;;  %s7395_s24 = sld [smem:[#allocation2 + $0xfe]] }
 0x21e   :  { %v1862_v47 = vmul.f32 %v1860_v5, %v1858_v11  ;;  %v1867_v27 = vmul.f32 %v1866_v60, %v1857_v21  ;;  %v1868_v53 = vmul.f32 %v1866_v60, %v1858_v11  ;;  %v1873_v35 = vmul.f32 %v1872_v20, %v1857_v21  ;;  %v7304_v5 = vld [vmem:[#allocation11 + $0xe0] sm:$0xff] }
 0x21f   :  { %v1874_v29 = vmul.f32 %v1872_v20, %v1858_v11  ;;  %v1863_v52 = vadd.f32 %v1861_v54, %v1831_v39  ;;  %v1879_v50 = vmul.f32 %v1878_v25, %v1857_v21  ;;  %v1880_v57 = vmul.f32 %v1878_v25, %v1858_v11  ;;  %v7306_v25 = vld [vmem:[#allocation11 + $0xe8] sm:$0xff] }
 0x220   :  { %v1864_v40 = vadd.f32 %v1862_v47, %v1832_v24  ;;  %v1869_v2 = vadd.f32 %v1867_v27, %v1837_v15  ;;  %v1870_v46 = vadd.f32 %v1868_v53, %v1838_v7  ;;  %v1875_v13 = vadd.f32 %v1873_v35, %v1843_v22 }
 0x221   :  { %v1876_v14 = vadd.f32 %v1874_v29, %v1844_v62  ;;  %v1881_v37 = vadd.f32 %v1879_v50, %v1849_v28  ;;  %v1889_v12 = vmul.f32 %v1887_v56, %v7219_v51  ;;  %v1890_v61 = vmul.f32 %v1888_v8, %v7221_v42  ;;  %v1986_v56 = vpop.permute.xlu1 %1985  ;;  %v1984_v8 = vpop.permute.xlu0 %1983 }
 0x222   :  { %v1882_v33 = vadd.f32 %v1880_v57, %v1850_v59  ;;  %v1928_v58 = vstv %s7271_s28  ;;  %v1934_v4 = vstv %s7273_s8  ;;  %v1923_v17 = vsel %vm1922_vm13, %v1919_v63, %v1921_v36  ;;  %s7407_s28 = sld [smem:[#allocation2 + $0xf3]]  ;;  %s7409_s8 = sld [smem:[#allocation2 + $0xf7]] }
 0x223   :  { %v1893_v49 = vmul.f32 %v1892_v26, %v1889_v12  ;;  %v1894_v30 = vmul.f32 %v1892_v26, %v1890_v61  ;;  %v1899_v10 = vmul.f32 %v1898_v23, %v1889_v12  ;;  %v1900_v41 = vmul.f32 %v1898_v23, %v1890_v61 }
 0x224   :  { %v1905_v51 = vmul.f32 %v1904_v34, %v1889_v12  ;;  %v1906_v42 = vmul.f32 %v1904_v34, %v1890_v61  ;;  %v1911_v44 = vmul.f32 %v1910_v31, %v1889_v12  ;;  %v1912_v38 = vmul.f32 %v1910_v31, %v1890_v61 }
 0x225   :  { %v1895_v60 = vadd.f32 %v1893_v49, %v1863_v52  ;;  %v1896_v20 = vadd.f32 %v1894_v30, %v1864_v40  ;;  %v1940_v0 = vstv %s7285_s0  ;;  %v1946_v19 = vstv %s7287_s27  ;;  %s7413_s0 = sld [smem:[#allocation2 + $0xfb]]  ;;  %s7415_s27 = sld [smem:[#allocation2 + $0xff]] }
 0x226   :  { %v1901_v16 = vadd.f32 %v1899_v10, %v1869_v2  ;;  %v1902_v32 = vadd.f32 %v1900_v41, %v1870_v46  ;;  %v1907_v6 = vadd.f32 %v1905_v51, %v1875_v13  ;;  %v1908_v9 = vadd.f32 %v1906_v42, %v1876_v14  ;;  %v2018_v41 = vpop.permute.xlu1 %2017  ;;  %v2016_v51 = vpop.permute.xlu0 %2015 }
 0x227   :  { %v1913_v39 = vadd.f32 %v1911_v44, %v1881_v37  ;;  %v1914_v24 = vadd.f32 %v1912_v38, %v1882_v33  ;;  %v1924_v43 = vsel %vm1922_vm13, %v1921_v36, %v1919_v63  ;;  %v1925_v1 = vmul.f32 %v1923_v17, %v7304_v5 }
 0x228   :  { %v1926_v3 = vmul.f32 %v1924_v43, %v7306_v25  ;;  %v1960_v48 = vstv %s7289_s16  ;;  %v1966_v15 = vstv %s7291_s30  ;;  %v1955_v7 = vsel %vm1922_vm13, %v1952_v18, %v1954_v45  ;;  %s7425_s16 = sld [smem:[#allocation2 + $0x100]]  ;;  %s7429_s30 = sld [smem:[#allocation2 + $0x104]] }
 0x229   :  { %v1929_v22 = vmul.f32 %v1928_v58, %v1925_v1  ;;  %v1935_v62 = vmul.f32 %v1934_v4, %v1925_v1  ;;  %v1941_v28 = vmul.f32 %v1940_v0, %v1925_v1  ;;  %v1947_v59 = vmul.f32 %v1946_v19, %v1925_v1 }
 0x22a   :  { %v1930_v21 = vmul.f32 %v1928_v58, %v1926_v3  ;;  %v1936_v11 = vmul.f32 %v1934_v4, %v1926_v3  ;;  %v1942_v26 = vmul.f32 %v1940_v0, %v1926_v3  ;;  %v1948_v23 = vmul.f32 %v1946_v19, %v1926_v3 }
 0x22b   :  { %v1931_v34 = vadd.f32 %v1929_v22, %v1895_v60  ;;  %v1937_v31 = vadd.f32 %v1935_v62, %v1901_v16  ;;  %v1972_v54 = vstv %s7300_s21  ;;  %v1978_v47 = vstv %s7302_s18  ;;  %s7431_s21 = sld [smem:[#allocation2 + $0x108]]  ;;  %s7441_s18 = sld [smem:[#allocation2 + $0x10c]] }
 0x22c   :  { %v1932_v27 = vadd.f32 %v1930_v21, %v1896_v20  ;;  %v1938_v53 = vadd.f32 %v1936_v11, %v1902_v32  ;;  %v1943_v35 = vadd.f32 %v1941_v28, %v1907_v6  ;;  %v1949_v29 = vadd.f32 %v1947_v59, %v1913_v39 }
 0x22d   :  { %v1944_v52 = vadd.f32 %v1942_v26, %v1908_v9  ;;  %v1950_v40 = vadd.f32 %v1948_v23, %v1914_v24  ;;  %v1956_v50 = vsel %vm1922_vm13, %v1954_v45, %v1952_v18  ;;  %v1957_v57 = vmul.f32 %v1955_v7, %v7304_v5  ;;  %v2053_v23 = vpop.permute.xlu1 %2052 }
 0x22e   :  { %v1958_v36 = vmul.f32 %v1956_v50, %v7306_v25  ;;  %v1992_v63 = vstv %s7310_s17  ;;  %v1998_v2 = vstv %s7312_s1  ;;  %v1987_v46 = vsel %vm1922_vm13, %v1984_v8, %v1986_v56  ;;  %s7443_s17 = sld [smem:[#allocation2 + $0x101]]  ;;  %s7447_s1 = sld [smem:[#allocation2 + $0x105]] }
 0x22f   :  { %v1961_v13 = vmul.f32 %v1960_v48, %v1957_v57  ;;  %v1967_v14 = vmul.f32 %v1966_v15, %v1957_v57  ;;  %v1973_v37 = vmul.f32 %v1972_v54, %v1957_v57  ;;  %v1979_v12 = vmul.f32 %v1978_v47, %v1957_v57 }
 0x230   :  { %v1962_v61 = vmul.f32 %v1960_v48, %v1958_v36  ;;  %v1968_v33 = vmul.f32 %v1966_v15, %v1958_v36  ;;  %v1974_v58 = vmul.f32 %v1972_v54, %v1958_v36  ;;  %v1980_v4 = vmul.f32 %v1978_v47, %v1958_v36 }
 0x231   :  { %v1963_v17 = vadd.f32 %v1961_v13, %v1931_v34  ;;  %v1969_v49 = vadd.f32 %v1967_v14, %v1937_v31  ;;  %v2004_v30 = vstv %s7322_s14  ;;  %v2010_v10 = vstv %s7324_s3  ;;  %v2051_v34 = vpop.permute.xlu0 %2050  ;;  %s7449_s14 = sld [smem:[#allocation2 + $0x109]]  ;;  %s7459_s3 = sld [smem:[#allocation2 + $0x10d]] }
 0x232   :  { %v1964_v42 = vadd.f32 %v1962_v61, %v1932_v27  ;;  %v1970_v44 = vadd.f32 %v1968_v33, %v1938_v53  ;;  %v1975_v38 = vadd.f32 %v1973_v37, %v1943_v35  ;;  %v1981_v60 = vadd.f32 %v1979_v12, %v1949_v29 }
 0x233   :  { %v1976_v20 = vadd.f32 %v1974_v58, %v1944_v52  ;;  %v1982_v0 = vadd.f32 %v1980_v4, %v1950_v40  ;;  %v1988_v19 = vsel %vm1922_vm13, %v1986_v56, %v1984_v8  ;;  %v1989_v45 = vmul.f32 %v1987_v46, %v7304_v5  ;;  %v7385_v46 = vld [vmem:[#allocation11 + $0xf8] sm:$0xff]  ;;  %v2086_v58 = vpop.permute.xlu1 %2085 }
 0x234   :  { %v1990_v18 = vmul.f32 %v1988_v19, %v7306_v25  ;;  %v2024_v16 = vstv %s7328_s25  ;;  %v2030_v32 = vstv %s7330_s9  ;;  %v2019_v6 = vsel %vm1922_vm13, %v2016_v51, %v2018_v41  ;;  %s7461_s25 = sld [smem:[#allocation2 + $0x102]]  ;;  %s7469_s9 = sld [smem:[#allocation2 + $0x106]] }
 0x235   :  { %v1993_v9 = vmul.f32 %v1992_v63, %v1989_v45  ;;  %v1999_v39 = vmul.f32 %v1998_v2, %v1989_v45  ;;  %v2005_v24 = vmul.f32 %v2004_v30, %v1989_v45  ;;  %v2011_v43 = vmul.f32 %v2010_v10, %v1989_v45  ;;  %v2084_v4 = vpop.permute.xlu0 %2083 }
 0x236   :  { %v1994_v1 = vmul.f32 %v1992_v63, %v1990_v18  ;;  %v2000_v3 = vmul.f32 %v1998_v2, %v1990_v18  ;;  %v2006_v48 = vmul.f32 %v2004_v30, %v1990_v18  ;;  %v2012_v15 = vmul.f32 %v2010_v10, %v1990_v18  ;;  %v7383_v2 = vld [vmem:[#allocation11 + $0xf0] sm:$0xff] }
 0x237   :  { %v1995_v7 = vadd.f32 %v1993_v9, %v1963_v17  ;;  %v2001_v22 = vadd.f32 %v1999_v39, %v1969_v49  ;;  %v2036_v62 = vstv %s7340_s11  ;;  %v2042_v28 = vstv %s7342_s13  ;;  %s7471_s11 = sld [smem:[#allocation2 + $0x10a]]  ;;  %s7481_s13 = sld [smem:[#allocation2 + $0x10e]] }
 0x238   :  { %v1996_v59 = vadd.f32 %v1994_v1, %v1964_v42  ;;  %v2002_v21 = vadd.f32 %v2000_v3, %v1970_v44  ;;  %v2007_v11 = vadd.f32 %v2005_v24, %v1975_v38  ;;  %v2013_v26 = vadd.f32 %v2011_v43, %v1981_v60  ;;  %v2118_v1 = vpop.permute.xlu1 %2117 }
 0x239   :  { %v2008_v31 = vadd.f32 %v2006_v48, %v1976_v20  ;;  %v2014_v54 = vadd.f32 %v2012_v15, %v1982_v0  ;;  %v2020_v47 = vsel %vm1922_vm13, %v2018_v41, %v2016_v51  ;;  %v2021_v56 = vmul.f32 %v2019_v6, %v7304_v5  ;;  %v2116_v15 = vpop.permute.xlu0 %2115 }
 0x23a   :  { %v2022_v8 = vmul.f32 %v2020_v47, %v7306_v25  ;;  %v2060_v27 = vstv %s7346_s4  ;;  %v2066_v53 = vstv %s7348_s20  ;;  %v2072_v13 = vstv %s7358_s5  ;;  %s7483_s4 = sld [smem:[#allocation2 + $0x103]]  ;;  %s7487_s20 = sld [smem:[#allocation2 + $0x107]] }
 0x23b   :  { %v2025_v35 = vmul.f32 %v2024_v16, %v2021_v56  ;;  %v2031_v29 = vmul.f32 %v2030_v32, %v2021_v56  ;;  %v2037_v52 = vmul.f32 %v2036_v62, %v2021_v56  ;;  %v2043_v40 = vmul.f32 %v2042_v28, %v2021_v56  ;;  %s7489_s5 = sld [smem:[#allocation2 + $0x10b]] }
 0x23c   :  { %v2026_v50 = vmul.f32 %v2024_v16, %v2022_v8  ;;  %v2032_v57 = vmul.f32 %v2030_v32, %v2022_v8  ;;  %v2038_v36 = vmul.f32 %v2036_v62, %v2022_v8  ;;  %v2044_v5 = vmul.f32 %v2042_v28, %v2022_v8 }
 0x23d   :  { %v2027_v63 = vadd.f32 %v2025_v35, %v1995_v7  ;;  %v2033_v25 = vadd.f32 %v2031_v29, %v2001_v22  ;;  %v2078_v14 = vstv %s7360_s26  ;;  %v2039_v61 = vadd.f32 %v2037_v52, %v2007_v11  ;;  %s7499_s26 = sld [smem:[#allocation2 + $0x10f]] }
 0x23e   :  { %v2028_v37 = vadd.f32 %v2026_v50, %v1996_v59  ;;  %v2034_v12 = vadd.f32 %v2032_v57, %v2002_v21  ;;  %v2045_v33 = vadd.f32 %v2043_v40, %v2013_v26  ;;  %v2040_v17 = vadd.f32 %v2038_v36, %v2008_v31  ;;  %v2150_v57 = vpop.permute.xlu1 %2149 }
 0x23f   :  { %v2046_v49 = vadd.f32 %v2044_v5, %v2014_v54  ;;  %v2055_v30 = vsel %vm2054_vm14, %v2051_v34, %v2053_v23  ;;  %v2056_v10 = vsel %vm2054_vm14, %v2053_v23, %v2051_v34  ;;  %v2092_v42 = vstv %s7364_s22  ;;  %s7503_s22 = sld [smem:[#allocation2 + $0x110]] }
 0x240   :  { %v2057_v41 = vmul.f32 %v2055_v30, %v7383_v2  ;;  %v2058_v51 = vmul.f32 %v2056_v10, %v7385_v46  ;;  %v2098_v44 = vstv %s7366_s29  ;;  %v2104_v38 = vstv %s7371_s15  ;;  %s7505_s29 = sld [smem:[#allocation2 + $0x114]]  ;;  %s7517_s15 = sld [smem:[#allocation2 + $0x118]] }
 0x241   :  { %v2110_v60 = vstv %s7373_s10  ;;  %v2087_v20 = vsel %vm2054_vm14, %v2084_v4, %v2086_v58  ;;  %v2088_v0 = vsel %vm2054_vm14, %v2086_v58, %v2084_v4  ;;  %v2124_v3 = vstv %s7379_s7  ;;  %s7519_s10 = sld [smem:[#allocation2 + $0x11c]]  ;;  %s7521_s7 = sld [smem:[#allocation2 + $0x111]] }
 0x242   :  { %v2061_v19 = vmul.f32 %v2060_v27, %v2057_v41  ;;  %v2062_v45 = vmul.f32 %v2060_v27, %v2058_v51  ;;  %v2067_v18 = vmul.f32 %v2066_v53, %v2057_v41  ;;  %v2068_v16 = vmul.f32 %v2066_v53, %v2058_v51 }
 0x243   :  { %v2073_v32 = vmul.f32 %v2072_v13, %v2057_v41  ;;  %v2074_v6 = vmul.f32 %v2072_v13, %v2058_v51  ;;  %v2079_v9 = vmul.f32 %v2078_v14, %v2057_v41  ;;  %v2080_v39 = vmul.f32 %v2078_v14, %v2058_v51 }
 0x244   :  { %v2063_v24 = vadd.f32 %v2061_v19, %v2027_v63  ;;  %v2064_v43 = vadd.f32 %v2062_v45, %v2028_v37  ;;  %v2130_v48 = vstv %s7381_s23  ;;  %v2069_v7 = vadd.f32 %v2067_v18, %v2033_v25  ;;  %v2148_v63 = vpop.permute.xlu0 %2147  ;;  %v2185_v45 = vpop.permute.xlu1 %2184  ;;  %s7531_s23 = sld [smem:[#allocation2 + $0x115]] }
 0x245   :  { %v2070_v22 = vadd.f32 %v2068_v16, %v2034_v12  ;;  %v2075_v62 = vadd.f32 %v2073_v32, %v2039_v61  ;;  %v2076_v28 = vadd.f32 %v2074_v6, %v2040_v17  ;;  %v2081_v59 = vadd.f32 %v2079_v9, %v2045_v33 }
 0x246   :  { %v2082_v21 = vadd.f32 %v2080_v39, %v2046_v49  ;;  %v2089_v11 = vmul.f32 %v2087_v20, %v7383_v2  ;;  %v2090_v26 = vmul.f32 %v2088_v0, %v7385_v46  ;;  %v2136_v23 = vstv %s7393_s2  ;;  %s7533_s2 = sld [smem:[#allocation2 + $0x119]] }
 0x247   :  { %v2142_v34 = vstv %s7395_s24  ;;  %v2119_v31 = vsel %vm2054_vm14, %v2116_v15, %v2118_v1  ;;  %v2120_v54 = vsel %vm2054_vm14, %v2118_v1, %v2116_v15  ;;  %v2156_v36 = vstv %s7407_s28  ;;  %s7535_s24 = sld [smem:[#allocation2 + $0x11d]]  ;;  %s7541_s28 = sld [smem:[#allocation2 + $0x112]] }
 0x248   :  { %v2093_v47 = vmul.f32 %v2092_v42, %v2089_v11  ;;  %v2094_v56 = vmul.f32 %v2092_v42, %v2090_v26  ;;  %v2099_v8 = vmul.f32 %v2098_v44, %v2089_v11  ;;  %v2100_v27 = vmul.f32 %v2098_v44, %v2090_v26  ;;  %v2183_v16 = vpop.permute.xlu0 %2182 }
 0x249   :  { %v2105_v53 = vmul.f32 %v2104_v38, %v2089_v11  ;;  %v2106_v35 = vmul.f32 %v2104_v38, %v2090_v26  ;;  %v2111_v29 = vmul.f32 %v2110_v60, %v2089_v11  ;;  %v2112_v52 = vmul.f32 %v2110_v60, %v2090_v26 }
 0x24a   :  { %v2095_v40 = vadd.f32 %v2093_v47, %v2063_v24  ;;  %v2096_v50 = vadd.f32 %v2094_v56, %v2064_v43  ;;  %v2162_v5 = vstv %s7409_s8  ;;  %v2101_v25 = vadd.f32 %v2099_v8, %v2069_v7  ;;  %v2218_v56 = vpop.permute.xlu1 %2217  ;;  %s7552_s8 = sld [smem:[#allocation2 + $0x116]] }
 0x24b   :  { %v2102_v13 = vadd.f32 %v2100_v27, %v2070_v22  ;;  %v2107_v14 = vadd.f32 %v2105_v53, %v2075_v62  ;;  %v2108_v37 = vadd.f32 %v2106_v35, %v2076_v28  ;;  %v2113_v12 = vadd.f32 %v2111_v29, %v2081_v59 }
 0x24c   :  { %v2114_v61 = vadd.f32 %v2112_v52, %v2082_v21  ;;  %v2121_v33 = vmul.f32 %v2119_v31, %v7383_v2  ;;  %v2122_v58 = vmul.f32 %v2120_v54, %v7385_v46  ;;  %v2168_v4 = vstv %s7413_s0  ;;  %v2216_v27 = vpop.permute.xlu0 %2215  ;;  %s7554_s0 = sld [smem:[#allocation2 + $0x11a]] }
 0x24d   :  { %v2174_v17 = vstv %s7415_s27  ;;  %v2151_v49 = vsel %vm2054_vm14, %v2148_v63, %v2150_v57  ;;  %v2152_v30 = vsel %vm2054_vm14, %v2150_v57, %v2148_v63  ;;  %v2192_v18 = vstv %s7425_s16  ;;  %s7556_s27 = sld [smem:[#allocation2 + $0x11e]]  ;;  %s7561_s16 = sld [smem:[#allocation2 + $0x113]] }
 0x24e   :  { %v2125_v10 = vmul.f32 %v2124_v3, %v2121_v33  ;;  %v2126_v41 = vmul.f32 %v2124_v3, %v2122_v58  ;;  %v2131_v51 = vmul.f32 %v2130_v48, %v2121_v33  ;;  %v2132_v42 = vmul.f32 %v2130_v48, %v2122_v58 }
 0x24f   :  { %v2137_v44 = vmul.f32 %v2136_v23, %v2121_v33  ;;  %v2138_v38 = vmul.f32 %v2136_v23, %v2122_v58  ;;  %v2143_v60 = vmul.f32 %v2142_v34, %v2121_v33  ;;  %v2144_v20 = vmul.f32 %v2142_v34, %v2122_v58  ;;  %v7463_v23 = vld [vmem:[#allocation11 + $0x100] sm:$0xff]  ;;  %v7465_v34 = vld [vmem:[#allocation11 + $0x108] sm:$0xff] }
 0x250   :  { %v2127_v0 = vadd.f32 %v2125_v10, %v2095_v40  ;;  %v2128_v19 = vadd.f32 %v2126_v41, %v2096_v50  ;;  %v2133_v32 = vadd.f32 %v2131_v51, %v2101_v25  ;;  %v2134_v6 = vadd.f32 %v2132_v42, %v2102_v13  ;;  %v2250_v41 = vpop.permute.xlu1 %2249  ;;  %v2248_v42 = vpop.permute.xlu0 %2247 }
 0x251   :  { %v2139_v9 = vadd.f32 %v2137_v44, %v2107_v14  ;;  %v2140_v39 = vadd.f32 %v2138_v38, %v2108_v37  ;;  %v2145_v24 = vadd.f32 %v2143_v60, %v2113_v12  ;;  %v2146_v43 = vadd.f32 %v2144_v20, %v2114_v61 }
 0x252   :  { %v2153_v1 = vmul.f32 %v2151_v49, %v7383_v2  ;;  %v2154_v3 = vmul.f32 %v2152_v30, %v7385_v46  ;;  %v2198_v48 = vstv %s7429_s30  ;;  %v2204_v15 = vstv %s7431_s21  ;;  %s7570_s30 = sld [smem:[#allocation2 + $0x117]]  ;;  %s7572_s21 = sld [smem:[#allocation2 + $0x11b]] }
 0x253   :  { %v2187_v7 = vsel %vm2186_vm15, %v2183_v16, %v2185_v45  ;;  %v2188_v22 = vsel %vm2186_vm15, %v2185_v45, %v2183_v16  ;;  %v2210_v47 = vstv %s7441_s18  ;;  %v2224_v8 = vstv %s7443_s17  ;;  %s7574_s18 = sld [smem:[#allocation2 + $0x11f]]  ;;  %s7579_s17 = sld [smem:[#allocation2 + $0x120]] }
 0x254   :  { %v2157_v62 = vmul.f32 %v2156_v36, %v2153_v1  ;;  %v2158_v28 = vmul.f32 %v2156_v36, %v2154_v3  ;;  %v2163_v59 = vmul.f32 %v2162_v5, %v2153_v1  ;;  %v2164_v21 = vmul.f32 %v2162_v5, %v2154_v3 }
 0x255   :  { %v2169_v2 = vmul.f32 %v2168_v4, %v2153_v1  ;;  %v2170_v46 = vmul.f32 %v2168_v4, %v2154_v3  ;;  %v2175_v11 = vmul.f32 %v2174_v17, %v2153_v1  ;;  %v2176_v26 = vmul.f32 %v2174_v17, %v2154_v3 }
 0x256   :  { %v2159_v31 = vadd.f32 %v2157_v62, %v2127_v0  ;;  %v2160_v54 = vadd.f32 %v2158_v28, %v2128_v19  ;;  %v2165_v53 = vadd.f32 %v2163_v59, %v2133_v32  ;;  %v2166_v35 = vadd.f32 %v2164_v21, %v2134_v6  ;;  %v2282_v59 = vpop.permute.xlu1 %2281 }
 0x257   :  { %v2171_v29 = vadd.f32 %v2169_v2, %v2139_v9  ;;  %v2172_v52 = vadd.f32 %v2170_v46, %v2140_v39  ;;  %v2177_v40 = vadd.f32 %v2175_v11, %v2145_v24  ;;  %v2178_v50 = vadd.f32 %v2176_v26, %v2146_v43  ;;  %v2280_v2 = vpop.permute.xlu0 %2279 }
 0x258   :  { %v2189_v57 = vmul.f32 %v2187_v7, %v7463_v23  ;;  %v2190_v36 = vmul.f32 %v2188_v22, %v7465_v34  ;;  %v2230_v5 = vstv %s7447_s1  ;;  %v2236_v63 = vstv %s7449_s14  ;;  %s7588_s1 = sld [smem:[#allocation2 + $0x124]]  ;;  %s7590_s14 = sld [smem:[#allocation2 + $0x128]] }
 0x259   :  { %v2219_v25 = vsel %vm2186_vm15, %v2216_v27, %v2218_v56  ;;  %v2220_v13 = vsel %vm2186_vm15, %v2218_v56, %v2216_v27  ;;  %v2242_v10 = vstv %s7459_s3  ;;  %v2256_v51 = vstv %s7461_s25  ;;  %s7592_s3 = sld [smem:[#allocation2 + $0x12c]]  ;;  %s7597_s25 = sld [smem:[#allocation2 + $0x121]] }
 0x25a   :  { %v2193_v14 = vmul.f32 %v2192_v18, %v2189_v57  ;;  %v2194_v37 = vmul.f32 %v2192_v18, %v2190_v36  ;;  %v2199_v12 = vmul.f32 %v2198_v48, %v2189_v57  ;;  %v2200_v61 = vmul.f32 %v2198_v48, %v2190_v36 }
 0x25b   :  { %v2205_v33 = vmul.f32 %v2204_v15, %v2189_v57  ;;  %v2206_v58 = vmul.f32 %v2204_v15, %v2190_v36  ;;  %v2211_v4 = vmul.f32 %v2210_v47, %v2189_v57  ;;  %v2212_v17 = vmul.f32 %v2210_v47, %v2190_v36 }
 0x25c   :  { %v2195_v49 = vadd.f32 %v2193_v14, %v2159_v31  ;;  %v2196_v30 = vadd.f32 %v2194_v37, %v2160_v54  ;;  %v2201_v44 = vadd.f32 %v2199_v12, %v2165_v53  ;;  %v2202_v38 = vadd.f32 %v2200_v61, %v2166_v35  ;;  %v2317_v12 = vpop.permute.xlu1 %2316  ;;  %v2315_v61 = vpop.permute.xlu0 %2314 }
 0x25d   :  { %v2207_v60 = vadd.f32 %v2205_v33, %v2171_v29  ;;  %v2208_v20 = vadd.f32 %v2206_v58, %v2172_v52  ;;  %v2213_v0 = vadd.f32 %v2211_v4, %v2177_v40  ;;  %v2214_v19 = vadd.f32 %v2212_v17, %v2178_v50 }
 0x25e   :  { %v2221_v45 = vmul.f32 %v2219_v25, %v7463_v23  ;;  %v2222_v18 = vmul.f32 %v2220_v13, %v7465_v34  ;;  %v2262_v16 = vstv %s7469_s9  ;;  %v2268_v32 = vstv %s7471_s11  ;;  %s7605_s9 = sld [smem:[#allocation2 + $0x125]]  ;;  %s7607_s11 = sld [smem:[#allocation2 + $0x129]] }
 0x25f   :  { %v2251_v6 = vsel %vm2186_vm15, %v2248_v42, %v2250_v41  ;;  %v2252_v9 = vsel %vm2186_vm15, %v2250_v41, %v2248_v42  ;;  %v2274_v28 = vstv %s7481_s13  ;;  %v2288_v21 = vstv %s7483_s4  ;;  %s7609_s13 = sld [smem:[#allocation2 + $0x12d]]  ;;  %s7618_s4 = sld [smem:[#allocation2 + $0x122]] }
 0x260   :  { %v2225_v39 = vmul.f32 %v2224_v8, %v2221_v45  ;;  %v2226_v24 = vmul.f32 %v2224_v8, %v2222_v18  ;;  %v2231_v43 = vmul.f32 %v2230_v5, %v2221_v45  ;;  %v2232_v1 = vmul.f32 %v2230_v5, %v2222_v18 }
 0x261   :  { %v2237_v3 = vmul.f32 %v2236_v63, %v2221_v45  ;;  %v2238_v48 = vmul.f32 %v2236_v63, %v2222_v18  ;;  %v2243_v15 = vmul.f32 %v2242_v10, %v2221_v45  ;;  %v2244_v7 = vmul.f32 %v2242_v10, %v2222_v18 }
 0x262   :  { %v2227_v22 = vadd.f32 %v2225_v39, %v2195_v49  ;;  %v2228_v62 = vadd.f32 %v2226_v24, %v2196_v30  ;;  %v2233_v46 = vadd.f32 %v2231_v43, %v2201_v44  ;;  %v2234_v11 = vadd.f32 %v2232_v1, %v2202_v38  ;;  %v2350_v43 = vpop.permute.xlu1 %2349  ;;  %v2348_v1 = vpop.permute.xlu0 %2347 }
 0x263   :  { %v2239_v26 = vadd.f32 %v2237_v3, %v2207_v60  ;;  %v2240_v31 = vadd.f32 %v2238_v48, %v2208_v20  ;;  %v2245_v54 = vadd.f32 %v2243_v15, %v2213_v0  ;;  %v2246_v47 = vadd.f32 %v2244_v7, %v2214_v19 }
 0x264   :  { %v2253_v56 = vmul.f32 %v2251_v6, %v7463_v23  ;;  %v2254_v8 = vmul.f32 %v2252_v9, %v7465_v34  ;;  %v2294_v27 = vstv %s7487_s20  ;;  %v2300_v53 = vstv %s7489_s5  ;;  %s7627_s20 = sld [smem:[#allocation2 + $0x126]]  ;;  %s7629_s5 = sld [smem:[#allocation2 + $0x12a]] }
 0x265   :  { %v2283_v35 = vsel %vm2186_vm15, %v2280_v2, %v2282_v59  ;;  %v2284_v29 = vsel %vm2186_vm15, %v2282_v59, %v2280_v2  ;;  %v2306_v37 = vstv %s7499_s26  ;;  %v2330_v42 = vstv %s7505_s29  ;;  %s7631_s26 = sld [smem:[#allocation2 + $0x12e]]  ;;  %s7645_s29 = sld [smem:[#allocation2 + $0x127]] }
 0x266   :  { %v2257_v52 = vmul.f32 %v2256_v51, %v2253_v56  ;;  %v2258_v40 = vmul.f32 %v2256_v51, %v2254_v8  ;;  %v2263_v50 = vmul.f32 %v2262_v16, %v2253_v56  ;;  %v2264_v57 = vmul.f32 %v2262_v16, %v2254_v8  ;;  %v7537_v16 = vld [vmem:[#allocation11 + $0x110] sm:$0xff] }
 0x267   :  { %v2269_v36 = vmul.f32 %v2268_v32, %v2253_v56  ;;  %v2270_v5 = vmul.f32 %v2268_v32, %v2254_v8  ;;  %v2275_v63 = vmul.f32 %v2274_v28, %v2253_v56  ;;  %v2276_v25 = vmul.f32 %v2274_v28, %v2254_v8  ;;  %v7539_v32 = vld [vmem:[#allocation11 + $0x118] sm:$0xff] }
 0x268   :  { %v2259_v13 = vadd.f32 %v2257_v52, %v2227_v22  ;;  %v2260_v14 = vadd.f32 %v2258_v40, %v2228_v62  ;;  %v2265_v33 = vadd.f32 %v2263_v50, %v2233_v46  ;;  %v2266_v58 = vadd.f32 %v2264_v57, %v2234_v11  ;;  %v2382_v40 = vpop.permute.xlu1 %2381  ;;  %v2380_v50 = vpop.permute.xlu0 %2379 }
 0x269   :  { %v2271_v4 = vadd.f32 %v2269_v36, %v2239_v26  ;;  %v2272_v17 = vadd.f32 %v2270_v5, %v2240_v31  ;;  %v2277_v49 = vadd.f32 %v2275_v63, %v2245_v54  ;;  %v2278_v30 = vadd.f32 %v2276_v25, %v2246_v47 }
 0x26a   :  { %v2285_v10 = vmul.f32 %v2283_v35, %v7463_v23  ;;  %v2286_v41 = vmul.f32 %v2284_v29, %v7465_v34  ;;  %v2324_v51 = vstv %s7503_s22  ;;  %v2319_v44 = vsel %vm2318_vm0, %v2315_v61, %v2317_v12  ;;  %s7636_s22 = sld [smem:[#allocation2 + $0x123]] }
 0x26b   :  { %v2320_v38 = vsel %vm2318_vm0, %v2317_v12, %v2315_v61  ;;  %v2336_v22 = vstv %s7517_s15  ;;  %v2342_v62 = vstv %s7519_s10  ;;  %v2321_v28 = vmul.f32 %v2319_v44, %v7537_v16  ;;  %s7647_s15 = sld [smem:[#allocation2 + $0x12b]]  ;;  %s7649_s10 = sld [smem:[#allocation2 + $0x12f]] }
 0x26c   :  { %v2289_v60 = vmul.f32 %v2288_v21, %v2285_v10  ;;  %v2290_v20 = vmul.f32 %v2288_v21, %v2286_v41  ;;  %v2295_v0 = vmul.f32 %v2294_v27, %v2285_v10  ;;  %v2296_v19 = vmul.f32 %v2294_v27, %v2286_v41 }
 0x26d   :  { %v2301_v23 = vmul.f32 %v2300_v53, %v2285_v10  ;;  %v2302_v34 = vmul.f32 %v2300_v53, %v2286_v41  ;;  %v2307_v45 = vmul.f32 %v2306_v37, %v2285_v10  ;;  %v2308_v18 = vmul.f32 %v2306_v37, %v2286_v41 }
 0x26e   :  { %v2291_v6 = vadd.f32 %v2289_v60, %v2259_v13  ;;  %v2292_v9 = vadd.f32 %v2290_v20, %v2260_v14  ;;  %v2297_v39 = vadd.f32 %v2295_v0, %v2265_v33  ;;  %v2298_v24 = vadd.f32 %v2296_v19, %v2266_v58  ;;  %v2414_v0 = vpop.permute.xlu1 %2413  ;;  %v2412_v19 = vpop.permute.xlu0 %2411 }
 0x26f   :  { %v2303_v3 = vadd.f32 %v2301_v23, %v2271_v4  ;;  %v2304_v48 = vadd.f32 %v2302_v34, %v2272_v17  ;;  %v2309_v15 = vadd.f32 %v2307_v45, %v2277_v49  ;;  %v2310_v7 = vadd.f32 %v2308_v18, %v2278_v30 }
 0x270   :  { %v2322_v59 = vmul.f32 %v2320_v38, %v7539_v32  ;;  %v2356_v21 = vstv %s7521_s7  ;;  %v2351_v2 = vsel %vm2318_vm0, %v2348_v1, %v2350_v43  ;;  %v2352_v46 = vsel %vm2318_vm0, %v2350_v43, %v2348_v1  ;;  %s7654_s7 = sld [smem:[#allocation2 + $0x130]] }
 0x271   :  { %v2325_v11 = vmul.f32 %v2324_v51, %v2321_v28  ;;  %v2331_v31 = vmul.f32 %v2330_v42, %v2321_v28  ;;  %v2337_v47 = vmul.f32 %v2336_v22, %v2321_v28  ;;  %v2343_v8 = vmul.f32 %v2342_v62, %v2321_v28 }
 0x272   :  { %v2326_v26 = vmul.f32 %v2324_v51, %v2322_v59  ;;  %v2332_v54 = vmul.f32 %v2330_v42, %v2322_v59  ;;  %v2338_v56 = vmul.f32 %v2336_v22, %v2322_v59  ;;  %v2344_v27 = vmul.f32 %v2342_v62, %v2322_v59 }
 0x273   :  { %v2327_v53 = vadd.f32 %v2325_v11, %v2291_v6  ;;  %v2362_v35 = vstv %s7531_s23  ;;  %v2368_v29 = vstv %s7533_s2  ;;  %v2374_v52 = vstv %s7535_s24  ;;  %s7663_s23 = sld [smem:[#allocation2 + $0x134]]  ;;  %s7665_s2 = sld [smem:[#allocation2 + $0x138]] }
 0x274   :  { %v2328_v57 = vadd.f32 %v2326_v26, %v2292_v9  ;;  %v2333_v36 = vadd.f32 %v2331_v31, %v2297_v39  ;;  %v2334_v5 = vadd.f32 %v2332_v54, %v2298_v24  ;;  %v2339_v63 = vadd.f32 %v2337_v47, %v2303_v3  ;;  %v2449_v54 = vpop.permute.xlu1 %2448  ;;  %v2447_v47 = vpop.permute.xlu0 %2446  ;;  %s7667_s24 = sld [smem:[#allocation2 + $0x13c]] }
 0x275   :  { %v2340_v25 = vadd.f32 %v2338_v56, %v2304_v48  ;;  %v2345_v13 = vadd.f32 %v2343_v8, %v2309_v15  ;;  %v2353_v14 = vmul.f32 %v2351_v2, %v7537_v16  ;;  %v2354_v37 = vmul.f32 %v2352_v46, %v7539_v32 }
 0x276   :  { %v2346_v12 = vadd.f32 %v2344_v27, %v2310_v7  ;;  %v2388_v61 = vstv %s7541_s28  ;;  %v2383_v33 = vsel %vm2318_vm0, %v2380_v50, %v2382_v40  ;;  %v2384_v58 = vsel %vm2318_vm0, %v2382_v40, %v2380_v50  ;;  %s7672_s28 = sld [smem:[#allocation2 + $0x131]] }
 0x277   :  { %v2357_v4 = vmul.f32 %v2356_v21, %v2353_v14  ;;  %v2358_v17 = vmul.f32 %v2356_v21, %v2354_v37  ;;  %v2363_v49 = vmul.f32 %v2362_v35, %v2353_v14  ;;  %v2364_v30 = vmul.f32 %v2362_v35, %v2354_v37 }
 0x278   :  { %v2369_v10 = vmul.f32 %v2368_v29, %v2353_v14  ;;  %v2370_v41 = vmul.f32 %v2368_v29, %v2354_v37  ;;  %v2375_v51 = vmul.f32 %v2374_v52, %v2353_v14  ;;  %v2376_v42 = vmul.f32 %v2374_v52, %v2354_v37 }
 0x279   :  { %v2359_v44 = vadd.f32 %v2357_v4, %v2327_v53  ;;  %v2394_v38 = vstv %s7552_s8  ;;  %v2400_v60 = vstv %s7554_s0  ;;  %v2406_v20 = vstv %s7556_s27  ;;  %s7677_s8 = sld [smem:[#allocation2 + $0x135]]  ;;  %s7679_s0 = sld [smem:[#allocation2 + $0x139]] }
 0x27a   :  { %v2360_v23 = vadd.f32 %v2358_v17, %v2328_v57  ;;  %v2365_v34 = vadd.f32 %v2363_v49, %v2333_v36  ;;  %v2366_v45 = vadd.f32 %v2364_v30, %v2334_v5  ;;  %v2371_v18 = vadd.f32 %v2369_v10, %v2339_v63  ;;  %v2482_v49 = vpop.permute.xlu1 %2481  ;;  %v2480_v30 = vpop.permute.xlu0 %2479  ;;  %s7684_s27 = sld [smem:[#allocation2 + $0x13d]] }
 0x27b   :  { %v2372_v6 = vadd.f32 %v2370_v41, %v2340_v25  ;;  %v2377_v9 = vadd.f32 %v2375_v51, %v2345_v13  ;;  %v2385_v39 = vmul.f32 %v2383_v33, %v7537_v16  ;;  %v2386_v24 = vmul.f32 %v2384_v58, %v7539_v32  ;;  %v7613_v33 = vld [vmem:[#allocation11 + $0x128] sm:$0xff] }
 0x27c   :  { %v2378_v43 = vadd.f32 %v2376_v42, %v2346_v12  ;;  %v2420_v1 = vstv %s7561_s16  ;;  %v2415_v3 = vsel %vm2318_vm0, %v2412_v19, %v2414_v0  ;;  %v2416_v48 = vsel %vm2318_vm0, %v2414_v0, %v2412_v19  ;;  %v7611_v12 = vld [vmem:[#allocation11 + $0x120] sm:$0xff]  ;;  %s7686_s16 = sld [smem:[#allocation2 + $0x132]] }
 0x27d   :  { %v2389_v15 = vmul.f32 %v2388_v61, %v2385_v39  ;;  %v2390_v7 = vmul.f32 %v2388_v61, %v2386_v24  ;;  %v2395_v22 = vmul.f32 %v2394_v38, %v2385_v39  ;;  %v2396_v62 = vmul.f32 %v2394_v38, %v2386_v24 }
 0x27e   :  { %v2401_v28 = vmul.f32 %v2400_v60, %v2385_v39  ;;  %v2402_v59 = vmul.f32 %v2400_v60, %v2386_v24  ;;  %v2407_v21 = vmul.f32 %v2406_v20, %v2385_v39  ;;  %v2408_v2 = vmul.f32 %v2406_v20, %v2386_v24 }
 0x27f   :  { %v2391_v46 = vadd.f32 %v2389_v15, %v2359_v44  ;;  %v2426_v11 = vstv %s7570_s30  ;;  %v2432_v26 = vstv %s7572_s21  ;;  %v2438_v31 = vstv %s7574_s18  ;;  %s7688_s30 = sld [smem:[#allocation2 + $0x136]]  ;;  %s7701_s21 = sld [smem:[#allocation2 + $0x13a]] }
 0x280   :  { %v2392_v56 = vadd.f32 %v2390_v7, %v2360_v23  ;;  %v2397_v8 = vadd.f32 %v2395_v22, %v2365_v34  ;;  %v2398_v27 = vadd.f32 %v2396_v62, %v2366_v45  ;;  %v2403_v53 = vadd.f32 %v2401_v28, %v2371_v18  ;;  %v2514_v22 = vpop.permute.xlu1 %2513  ;;  %v2512_v62 = vpop.permute.xlu0 %2511  ;;  %s7712_s18 = sld [smem:[#allocation2 + $0x13e]] }
 0x281   :  { %v2404_v35 = vadd.f32 %v2402_v59, %v2372_v6  ;;  %v2417_v29 = vmul.f32 %v2415_v3, %v7537_v16  ;;  %v2418_v52 = vmul.f32 %v2416_v48, %v7539_v32  ;;  %v2409_v40 = vadd.f32 %v2407_v21, %v2377_v9 }
 0x282   :  { %v2410_v50 = vadd.f32 %v2408_v2, %v2378_v43  ;;  %v2456_v57 = vstv %s7579_s17  ;;  %v2451_v36 = vsel %vm2450_vm1, %v2447_v47, %v2449_v54  ;;  %v2462_v58 = vstv %s7588_s1  ;;  %s7714_s17 = sld [smem:[#allocation2 + $0x133]]  ;;  %s7716_s1 = sld [smem:[#allocation2 + $0x137]] }
 0x283   :  { %v2421_v5 = vmul.f32 %v2420_v1, %v2417_v29  ;;  %v2422_v63 = vmul.f32 %v2420_v1, %v2418_v52  ;;  %v2427_v25 = vmul.f32 %v2426_v11, %v2417_v29  ;;  %v2428_v13 = vmul.f32 %v2426_v11, %v2418_v52 }
 0x284   :  { %v2433_v16 = vmul.f32 %v2432_v26, %v2417_v29  ;;  %v2434_v32 = vmul.f32 %v2432_v26, %v2418_v52  ;;  %v2439_v14 = vmul.f32 %v2438_v31, %v2417_v29  ;;  %v2440_v37 = vmul.f32 %v2438_v31, %v2418_v52 }
 0x285   :  { %v2423_v61 = vadd.f32 %v2421_v5, %v2391_v46  ;;  %v2468_v4 = vstv %s7590_s14  ;;  %v2474_v17 = vstv %s7592_s3  ;;  %v2424_v10 = vadd.f32 %v2422_v63, %v2392_v56  ;;  %s7721_s14 = sld [smem:[#allocation2 + $0x13b]]  ;;  %s7730_s3 = sld [smem:[#allocation2 + $0x13f]] }
 0x286   :  { %v2429_v41 = vadd.f32 %v2427_v25, %v2397_v8  ;;  %v2430_v51 = vadd.f32 %v2428_v13, %v2398_v27  ;;  %v2435_v42 = vadd.f32 %v2433_v16, %v2403_v53  ;;  %v2436_v44 = vadd.f32 %v2434_v32, %v2404_v35  ;;  %v2546_v13 = vpop.permute.xlu1 %2545  ;;  %v2544_v16 = vpop.permute.xlu0 %2543 }
 0x287   :  { %v2441_v38 = vadd.f32 %v2439_v14, %v2409_v40  ;;  %v2452_v60 = vsel %vm2450_vm1, %v2449_v54, %v2447_v47  ;;  %v2453_v20 = vmul.f32 %v2451_v36, %v7611_v12  ;;  %v2442_v0 = vadd.f32 %v2440_v37, %v2410_v50 }
 0x288   :  { %v2454_v19 = vmul.f32 %v2452_v60, %v7613_v33  ;;  %v2488_v23 = vstv %s7597_s25  ;;  %v2483_v34 = vsel %vm2450_vm1, %v2480_v30, %v2482_v49  ;;  %v2494_v48 = vstv %s7605_s9  ;;  %s7732_s25 = sld [smem:[#allocation2 + $0x140]]  ;;  %s7737_s9 = sld [smem:[#allocation2 + $0x144]] }
 0x289   :  { %v2457_v45 = vmul.f32 %v2456_v57, %v2453_v20  ;;  %v2463_v18 = vmul.f32 %v2462_v58, %v2453_v20  ;;  %v2469_v6 = vmul.f32 %v2468_v4, %v2453_v20  ;;  %v2475_v9 = vmul.f32 %v2474_v17, %v2453_v20 }
 0x28a   :  { %v2458_v39 = vmul.f32 %v2456_v57, %v2454_v19  ;;  %v2464_v24 = vmul.f32 %v2462_v58, %v2454_v19  ;;  %v2470_v43 = vmul.f32 %v2468_v4, %v2454_v19  ;;  %v2476_v1 = vmul.f32 %v2474_v17, %v2454_v19 }
 0x28b   :  { %v2459_v3 = vadd.f32 %v2457_v45, %v2423_v61  ;;  %v2500_v15 = vstv %s7607_s11  ;;  %v2506_v7 = vstv %s7609_s13  ;;  %v2465_v59 = vadd.f32 %v2463_v18, %v2429_v41  ;;  %s7746_s11 = sld [smem:[#allocation2 + $0x148]]  ;;  %s7748_s13 = sld [smem:[#allocation2 + $0x14c]] }
 0x28c   :  { %v2460_v28 = vadd.f32 %v2458_v39, %v2424_v10  ;;  %v2471_v21 = vadd.f32 %v2469_v6, %v2435_v42  ;;  %v2477_v2 = vadd.f32 %v2475_v9, %v2441_v38  ;;  %v2466_v46 = vadd.f32 %v2464_v24, %v2430_v51 }
 0x28d   :  { %v2472_v11 = vadd.f32 %v2470_v43, %v2436_v44  ;;  %v2484_v26 = vsel %vm2450_vm1, %v2482_v49, %v2480_v30  ;;  %v2485_v31 = vmul.f32 %v2483_v34, %v7611_v12  ;;  %v2478_v54 = vadd.f32 %v2476_v1, %v2442_v0  ;;  %v2581_v1 = vpop.permute.xlu1 %2580 }
 0x28e   :  { %v2486_v47 = vmul.f32 %v2484_v26, %v7613_v33  ;;  %v2520_v56 = vstv %s7618_s4  ;;  %v2515_v8 = vsel %vm2450_vm1, %v2512_v62, %v2514_v22  ;;  %v2526_v5 = vstv %s7627_s20  ;;  %s7750_s4 = sld [smem:[#allocation2 + $0x141]]  ;;  %s7755_s20 = sld [smem:[#allocation2 + $0x145]] }
 0x28f   :  { %v2489_v27 = vmul.f32 %v2488_v23, %v2485_v31  ;;  %v2495_v53 = vmul.f32 %v2494_v48, %v2485_v31  ;;  %v2501_v35 = vmul.f32 %v2500_v15, %v2485_v31  ;;  %v2507_v29 = vmul.f32 %v2506_v7, %v2485_v31 }
 0x290   :  { %v2490_v52 = vmul.f32 %v2488_v23, %v2486_v47  ;;  %v2496_v40 = vmul.f32 %v2494_v48, %v2486_v47  ;;  %v2502_v50 = vmul.f32 %v2500_v15, %v2486_v47  ;;  %v2508_v57 = vmul.f32 %v2506_v7, %v2486_v47  ;;  %v7690_v47 = vld [vmem:[#allocation11 + $0x130] sm:$0xff] }
 0x291   :  { %v2491_v36 = vadd.f32 %v2489_v27, %v2459_v3  ;;  %v2532_v63 = vstv %s7629_s5  ;;  %v2538_v25 = vstv %s7631_s26  ;;  %v2497_v14 = vadd.f32 %v2495_v53, %v2465_v59  ;;  %v2579_v3 = vpop.permute.xlu0 %2578  ;;  %s7764_s5 = sld [smem:[#allocation2 + $0x149]]  ;;  %s7766_s26 = sld [smem:[#allocation2 + $0x14d]] }
 0x292   :  { %v2492_v32 = vadd.f32 %v2490_v52, %v2460_v28  ;;  %v2503_v37 = vadd.f32 %v2501_v35, %v2471_v21  ;;  %v2509_v61 = vadd.f32 %v2507_v29, %v2477_v2  ;;  %v2498_v58 = vadd.f32 %v2496_v40, %v2466_v46 }
 0x293   :  { %v2504_v4 = vadd.f32 %v2502_v50, %v2472_v11  ;;  %v2516_v17 = vsel %vm2450_vm1, %v2514_v22, %v2512_v62  ;;  %v2517_v49 = vmul.f32 %v2515_v8, %v7611_v12  ;;  %v2510_v30 = vadd.f32 %v2508_v57, %v2478_v54  ;;  %v2614_v50 = vpop.permute.xlu1 %2613 }
 0x294   :  { %v2518_v10 = vmul.f32 %v2516_v17, %v7613_v33  ;;  %v2552_v41 = vstv %s7636_s22  ;;  %v2547_v51 = vsel %vm2450_vm1, %v2544_v16, %v2546_v13  ;;  %v2558_v45 = vstv %s7645_s29  ;;  %s7768_s22 = sld [smem:[#allocation2 + $0x142]]  ;;  %s7777_s29 = sld [smem:[#allocation2 + $0x146]] }
 0x295   :  { %v2521_v42 = vmul.f32 %v2520_v56, %v2517_v49  ;;  %v2527_v44 = vmul.f32 %v2526_v5, %v2517_v49  ;;  %v2533_v38 = vmul.f32 %v2532_v63, %v2517_v49  ;;  %v2539_v60 = vmul.f32 %v2538_v25, %v2517_v49  ;;  %v2612_v57 = vpop.permute.xlu0 %2611 }
 0x296   :  { %v2522_v20 = vmul.f32 %v2520_v56, %v2518_v10  ;;  %v2528_v0 = vmul.f32 %v2526_v5, %v2518_v10  ;;  %v2534_v19 = vmul.f32 %v2532_v63, %v2518_v10  ;;  %v2540_v23 = vmul.f32 %v2538_v25, %v2518_v10  ;;  %v7692_v56 = vld [vmem:[#allocation11 + $0x138] sm:$0xff] }
 0x297   :  { %v2523_v34 = vadd.f32 %v2521_v42, %v2491_v36  ;;  %v2564_v18 = vstv %s7647_s15  ;;  %v2570_v6 = vstv %s7649_s10  ;;  %v2529_v39 = vadd.f32 %v2527_v44, %v2497_v14  ;;  %s7786_s15 = sld [smem:[#allocation2 + $0x14a]]  ;;  %s7788_s10 = sld [smem:[#allocation2 + $0x14e]] }
 0x298   :  { %v2524_v9 = vadd.f32 %v2522_v20, %v2492_v32  ;;  %v2535_v24 = vadd.f32 %v2533_v38, %v2503_v37  ;;  %v2541_v43 = vadd.f32 %v2539_v60, %v2509_v61  ;;  %v2530_v48 = vadd.f32 %v2528_v0, %v2498_v58  ;;  %v2646_v20 = vpop.permute.xlu1 %2645 }
 0x299   :  { %v2536_v15 = vadd.f32 %v2534_v19, %v2504_v4  ;;  %v2548_v7 = vsel %vm2450_vm1, %v2546_v13, %v2544_v16  ;;  %v2549_v22 = vmul.f32 %v2547_v51, %v7611_v12  ;;  %v2542_v62 = vadd.f32 %v2540_v23, %v2510_v30  ;;  %v2644_v23 = vpop.permute.xlu0 %2643 }
 0x29a   :  { %v2550_v28 = vmul.f32 %v2548_v7, %v7613_v33  ;;  %v2588_v59 = vstv %s7654_s7  ;;  %v2594_v8 = vstv %s7663_s23  ;;  %v2600_v27 = vstv %s7665_s2  ;;  %s7790_s7 = sld [smem:[#allocation2 + $0x143]]  ;;  %s7795_s23 = sld [smem:[#allocation2 + $0x147]] }
 0x29b   :  { %v2553_v21 = vmul.f32 %v2552_v41, %v2549_v22  ;;  %v2559_v2 = vmul.f32 %v2558_v45, %v2549_v22  ;;  %v2565_v46 = vmul.f32 %v2564_v18, %v2549_v22  ;;  %v2571_v11 = vmul.f32 %v2570_v6, %v2549_v22  ;;  %s7804_s2 = sld [smem:[#allocation2 + $0x14b]] }
 0x29c   :  { %v2554_v12 = vmul.f32 %v2552_v41, %v2550_v28  ;;  %v2560_v26 = vmul.f32 %v2558_v45, %v2550_v28  ;;  %v2566_v31 = vmul.f32 %v2564_v18, %v2550_v28  ;;  %v2572_v54 = vmul.f32 %v2570_v6, %v2550_v28 }
 0x29d   :  { %v2555_v33 = vadd.f32 %v2553_v21, %v2523_v34  ;;  %v2606_v53 = vstv %s7667_s24  ;;  %v2561_v29 = vadd.f32 %v2559_v2, %v2529_v39  ;;  %v2567_v52 = vadd.f32 %v2565_v46, %v2535_v24  ;;  %s7806_s24 = sld [smem:[#allocation2 + $0x14f]] }
 0x29e   :  { %v2556_v35 = vadd.f32 %v2554_v12, %v2524_v9  ;;  %v2573_v40 = vadd.f32 %v2571_v11, %v2541_v43  ;;  %v2562_v36 = vadd.f32 %v2560_v26, %v2530_v48  ;;  %v2568_v5 = vadd.f32 %v2566_v31, %v2536_v15  ;;  %v2678_v26 = vpop.permute.xlu1 %2677 }
 0x29f   :  { %v2583_v63 = vsel %vm2582_vm2, %v2579_v3, %v2581_v1  ;;  %v2584_v25 = vsel %vm2582_vm2, %v2581_v1, %v2579_v3  ;;  %v2574_v13 = vadd.f32 %v2572_v54, %v2542_v62  ;;  %v2620_v14 = vstv %s7672_s28  ;;  %s7811_s28 = sld [smem:[#allocation2 + $0x150]] }
 0x2a0   :  { %v2585_v16 = vmul.f32 %v2583_v63, %v7690_v47  ;;  %v2586_v32 = vmul.f32 %v2584_v25, %v7692_v56  ;;  %v2626_v37 = vstv %s7677_s8  ;;  %v2632_v61 = vstv %s7679_s0  ;;  %s7820_s8 = sld [smem:[#allocation2 + $0x154]]  ;;  %s7822_s0 = sld [smem:[#allocation2 + $0x158]] }
 0x2a1   :  { %v2615_v58 = vsel %vm2582_vm2, %v2612_v57, %v2614_v50  ;;  %v2616_v4 = vsel %vm2582_vm2, %v2614_v50, %v2612_v57  ;;  %v2638_v60 = vstv %s7684_s27  ;;  %v2652_v0 = vstv %s7686_s16  ;;  %s7824_s27 = sld [smem:[#allocation2 + $0x15c]]  ;;  %s7829_s16 = sld [smem:[#allocation2 + $0x151]] }
 0x2a2   :  { %v2589_v17 = vmul.f32 %v2588_v59, %v2585_v16  ;;  %v2590_v49 = vmul.f32 %v2588_v59, %v2586_v32  ;;  %v2595_v30 = vmul.f32 %v2594_v8, %v2585_v16  ;;  %v2596_v10 = vmul.f32 %v2594_v8, %v2586_v32 }
 0x2a3   :  { %v2601_v41 = vmul.f32 %v2600_v27, %v2585_v16  ;;  %v2602_v51 = vmul.f32 %v2600_v27, %v2586_v32  ;;  %v2607_v42 = vmul.f32 %v2606_v53, %v2585_v16  ;;  %v2608_v44 = vmul.f32 %v2606_v53, %v2586_v32 }
 0x2a4   :  { %v2591_v38 = vadd.f32 %v2589_v17, %v2555_v33  ;;  %v2658_v19 = vstv %s7688_s30  ;;  %v2592_v34 = vadd.f32 %v2590_v49, %v2556_v35  ;;  %v2597_v45 = vadd.f32 %v2595_v30, %v2561_v29  ;;  %v2676_v33 = vpop.permute.xlu0 %2675  ;;  %v2713_v49 = vpop.permute.xlu1 %2712  ;;  %s7838_s30 = sld [smem:[#allocation2 + $0x155]] }
 0x2a5   :  { %v2598_v18 = vadd.f32 %v2596_v10, %v2562_v36  ;;  %v2603_v6 = vadd.f32 %v2601_v41, %v2567_v52  ;;  %v2604_v9 = vadd.f32 %v2602_v51, %v2568_v5  ;;  %v2609_v39 = vadd.f32 %v2607_v42, %v2573_v40 }
 0x2a6   :  { %v2617_v24 = vmul.f32 %v2615_v58, %v7690_v47  ;;  %v2618_v43 = vmul.f32 %v2616_v4, %v7692_v56  ;;  %v2610_v1 = vadd.f32 %v2608_v44, %v2574_v13  ;;  %v2664_v3 = vstv %s7701_s21  ;;  %s7840_s21 = sld [smem:[#allocation2 + $0x159]] }
 0x2a7   :  { %v2647_v48 = vsel %vm2582_vm2, %v2644_v23, %v2646_v20  ;;  %v2648_v15 = vsel %vm2582_vm2, %v2646_v20, %v2644_v23  ;;  %v2670_v12 = vstv %s7712_s18  ;;  %v2684_v31 = vstv %s7714_s17  ;;  %s7842_s18 = sld [smem:[#allocation2 + $0x15d]]  ;;  %s7851_s17 = sld [smem:[#allocation2 + $0x152]] }
 0x2a8   :  { %v2621_v7 = vmul.f32 %v2620_v14, %v2617_v24  ;;  %v2622_v22 = vmul.f32 %v2620_v14, %v2618_v43  ;;  %v2627_v62 = vmul.f32 %v2626_v37, %v2617_v24  ;;  %v2628_v28 = vmul.f32 %v2626_v37, %v2618_v43  ;;  %v2711_v10 = vpop.permute.xlu0 %2710 }
 0x2a9   :  { %v2633_v59 = vmul.f32 %v2632_v61, %v2617_v24  ;;  %v2634_v21 = vmul.f32 %v2632_v61, %v2618_v43  ;;  %v2639_v2 = vmul.f32 %v2638_v60, %v2617_v24  ;;  %v2640_v46 = vmul.f32 %v2638_v60, %v2618_v43 }
 0x2aa   :  { %v2623_v11 = vadd.f32 %v2621_v7, %v2591_v38  ;;  %v2690_v54 = vstv %s7716_s1  ;;  %v2624_v8 = vadd.f32 %v2622_v22, %v2592_v34  ;;  %v2629_v27 = vadd.f32 %v2627_v62, %v2597_v45  ;;  %v2746_v22 = vpop.permute.xlu1 %2745  ;;  %s7860_s1 = sld [smem:[#allocation2 + $0x156]] }
 0x2ab   :  { %v2630_v53 = vadd.f32 %v2628_v28, %v2598_v18  ;;  %v2635_v35 = vadd.f32 %v2633_v59, %v2603_v6  ;;  %v2636_v29 = vadd.f32 %v2634_v21, %v2604_v9  ;;  %v2641_v52 = vadd.f32 %v2639_v2, %v2609_v39 }
 0x2ac   :  { %v2649_v40 = vmul.f32 %v2647_v48, %v7690_v47  ;;  %v2650_v50 = vmul.f32 %v2648_v15, %v7692_v56  ;;  %v2642_v57 = vadd.f32 %v2640_v46, %v2610_v1  ;;  %v2696_v36 = vstv %s7721_s14  ;;  %v7770_v1 = vld [vmem:[#allocation11 + $0x140] sm:$0xff]  ;;  %v2744_v28 = vpop.permute.xlu0 %2743  ;;  %s7862_s14 = sld [smem:[#allocation2 + $0x15a]] }
 0x2ad   :  { %v2679_v5 = vsel %vm2582_vm2, %v2676_v33, %v2678_v26  ;;  %v2680_v63 = vsel %vm2582_vm2, %v2678_v26, %v2676_v33  ;;  %v2702_v17 = vstv %s7730_s3  ;;  %vm2714_vm3 = vcmp.lt.s32.totalorder %v5464_v55, 98  ;;  %s7864_s3 = sld [smem:[#allocation2 + $0x15e]] }
 0x2ae   :  { %v2653_v25 = vmul.f32 %v2652_v0, %v2649_v40  ;;  %v2654_v13 = vmul.f32 %v2652_v0, %v2650_v50  ;;  %v2659_v16 = vmul.f32 %v2658_v19, %v2649_v40  ;;  %v2660_v32 = vmul.f32 %v2658_v19, %v2650_v50 }
 0x2af   :  { %v2665_v14 = vmul.f32 %v2664_v3, %v2649_v40  ;;  %v2666_v37 = vmul.f32 %v2664_v3, %v2650_v50  ;;  %v2671_v61 = vmul.f32 %v2670_v12, %v2649_v40  ;;  %v2672_v58 = vmul.f32 %v2670_v12, %v2650_v50  ;;  %v7772_v3 = vld [vmem:[#allocation11 + $0x148] sm:$0xff] }
 0x2b0   :  { %v2655_v4 = vadd.f32 %v2653_v25, %v2623_v11  ;;  %v2720_v30 = vstv %s7732_s25  ;;  %v2656_v41 = vadd.f32 %v2654_v13, %v2624_v8  ;;  %v2661_v51 = vadd.f32 %v2659_v16, %v2629_v27  ;;  %v2778_v13 = vpop.permute.xlu1 %2777  ;;  %s7869_s25 = sld [smem:[#allocation2 + $0x153]] }
 0x2b1   :  { %v2662_v42 = vadd.f32 %v2660_v32, %v2630_v53  ;;  %v2667_v44 = vadd.f32 %v2665_v14, %v2635_v35  ;;  %v2668_v38 = vadd.f32 %v2666_v37, %v2636_v29  ;;  %v2673_v60 = vadd.f32 %v2671_v61, %v2641_v52  ;;  %v2776_v32 = vpop.permute.xlu0 %2775 }
 0x2b2   :  { %v2681_v20 = vmul.f32 %v2679_v5, %v7690_v47  ;;  %v2682_v0 = vmul.f32 %v2680_v63, %v7692_v56  ;;  %v2674_v19 = vadd.f32 %v2672_v58, %v2642_v57  ;;  %v2726_v23 = vstv %s7737_s9  ;;  %s7878_s9 = sld [smem:[#allocation2 + $0x157]] }
 0x2b3   :  { %v2715_v34 = vsel %vm2714_vm3, %v2711_v10, %v2713_v49  ;;  %v2716_v45 = vsel %vm2714_vm3, %v2713_v49, %v2711_v10  ;;  %v2732_v15 = vstv %s7746_s11  ;;  %v2738_v7 = vstv %s7748_s13  ;;  %s7880_s11 = sld [smem:[#allocation2 + $0x15b]]  ;;  %s7882_s13 = sld [smem:[#allocation2 + $0x15f]] }
 0x2b4   :  { %v2685_v18 = vmul.f32 %v2684_v31, %v2681_v20  ;;  %v2686_v6 = vmul.f32 %v2684_v31, %v2682_v0  ;;  %v2691_v9 = vmul.f32 %v2690_v54, %v2681_v20  ;;  %v2692_v39 = vmul.f32 %v2690_v54, %v2682_v0 }
 0x2b5   :  { %v2697_v47 = vmul.f32 %v2696_v36, %v2681_v20  ;;  %v2698_v56 = vmul.f32 %v2696_v36, %v2682_v0  ;;  %v2703_v24 = vmul.f32 %v2702_v17, %v2681_v20  ;;  %v2704_v43 = vmul.f32 %v2702_v17, %v2682_v0 }
 0x2b6   :  { %v2687_v48 = vadd.f32 %v2685_v18, %v2655_v4  ;;  %v2752_v62 = vstv %s7750_s4  ;;  %v2688_v59 = vadd.f32 %v2686_v6, %v2656_v41  ;;  %v2693_v21 = vadd.f32 %v2691_v9, %v2661_v51  ;;  %v2810_v9 = vpop.permute.xlu1 %2809  ;;  %s7887_s4 = sld [smem:[#allocation2 + $0x160]] }
 0x2b7   :  { %v2694_v2 = vadd.f32 %v2692_v39, %v2662_v42  ;;  %v2699_v46 = vadd.f32 %v2697_v47, %v2667_v44  ;;  %v2700_v11 = vadd.f32 %v2698_v56, %v2668_v38  ;;  %v2705_v12 = vadd.f32 %v2703_v24, %v2673_v60  ;;  %v2808_v47 = vpop.permute.xlu0 %2807 }
 0x2b8   :  { %v2717_v26 = vmul.f32 %v2715_v34, %v7770_v1  ;;  %v2718_v31 = vmul.f32 %v2716_v45, %v7772_v3  ;;  %v2706_v54 = vadd.f32 %v2704_v43, %v2674_v19  ;;  %v2758_v33 = vstv %s7755_s20  ;;  %s7896_s20 = sld [smem:[#allocation2 + $0x164]] }
 0x2b9   :  { %v2747_v8 = vsel %vm2714_vm3, %v2744_v28, %v2746_v22  ;;  %v2748_v27 = vsel %vm2714_vm3, %v2746_v22, %v2744_v28  ;;  %v2764_v63 = vstv %s7764_s5  ;;  %v2770_v25 = vstv %s7766_s26  ;;  %s7898_s5 = sld [smem:[#allocation2 + $0x168]]  ;;  %s7900_s26 = sld [smem:[#allocation2 + $0x16c]] }
 0x2ba   :  { %v2721_v53 = vmul.f32 %v2720_v30, %v2717_v26  ;;  %v2722_v35 = vmul.f32 %v2720_v30, %v2718_v31  ;;  %v2727_v29 = vmul.f32 %v2726_v23, %v2717_v26  ;;  %v2728_v52 = vmul.f32 %v2726_v23, %v2718_v31 }
 0x2bb   :  { %v2733_v40 = vmul.f32 %v2732_v15, %v2717_v26  ;;  %v2734_v50 = vmul.f32 %v2732_v15, %v2718_v31  ;;  %v2739_v57 = vmul.f32 %v2738_v7, %v2717_v26  ;;  %v2740_v36 = vmul.f32 %v2738_v7, %v2718_v31 }
 0x2bc   :  { %v2723_v5 = vadd.f32 %v2721_v53, %v2687_v48  ;;  %v2784_v16 = vstv %s7768_s22  ;;  %v2724_v14 = vadd.f32 %v2722_v35, %v2688_v59  ;;  %v2729_v37 = vadd.f32 %v2727_v29, %v2693_v21  ;;  %v2845_v29 = vpop.permute.xlu1 %2844  ;;  %s7905_s22 = sld [smem:[#allocation2 + $0x161]] }
 0x2bd   :  { %v2730_v61 = vadd.f32 %v2728_v52, %v2694_v2  ;;  %v2735_v58 = vadd.f32 %v2733_v40, %v2699_v46  ;;  %v2736_v4 = vadd.f32 %v2734_v50, %v2700_v11  ;;  %v2741_v17 = vadd.f32 %v2739_v57, %v2705_v12  ;;  %v2843_v52 = vpop.permute.xlu0 %2842 }
 0x2be   :  { %v2749_v49 = vmul.f32 %v2747_v8, %v7770_v1  ;;  %v2750_v30 = vmul.f32 %v2748_v27, %v7772_v3  ;;  %v2742_v10 = vadd.f32 %v2740_v36, %v2706_v54  ;;  %v2790_v41 = vstv %s7777_s29  ;;  %s7913_s29 = sld [smem:[#allocation2 + $0x165]] }
 0x2bf   :  { %v2779_v51 = vsel %vm2714_vm3, %v2776_v32, %v2778_v13  ;;  %v2780_v42 = vsel %vm2714_vm3, %v2778_v13, %v2776_v32  ;;  %v2796_v18 = vstv %s7786_s15  ;;  %v2802_v6 = vstv %s7788_s10  ;;  %s7915_s15 = sld [smem:[#allocation2 + $0x169]]  ;;  %s7917_s10 = sld [smem:[#allocation2 + $0x16d]] }
 0x2c0   :  { %v2753_v44 = vmul.f32 %v2752_v62, %v2749_v49  ;;  %v2754_v38 = vmul.f32 %v2752_v62, %v2750_v30  ;;  %v2759_v60 = vmul.f32 %v2758_v33, %v2749_v49  ;;  %v2760_v20 = vmul.f32 %v2758_v33, %v2750_v30 }
 0x2c1   :  { %v2765_v0 = vmul.f32 %v2764_v63, %v2749_v49  ;;  %v2766_v19 = vmul.f32 %v2764_v63, %v2750_v30  ;;  %v2771_v23 = vmul.f32 %v2770_v25, %v2749_v49  ;;  %v2772_v34 = vmul.f32 %v2770_v25, %v2750_v30 }
 0x2c2   :  { %v2755_v45 = vadd.f32 %v2753_v44, %v2723_v5  ;;  %v2816_v39 = vstv %s7790_s7  ;;  %v2756_v56 = vadd.f32 %v2754_v38, %v2724_v14  ;;  %v2761_v24 = vadd.f32 %v2759_v60, %v2729_v37  ;;  %v2878_v60 = vpop.permute.xlu1 %2877  ;;  %s7926_s7 = sld [smem:[#allocation2 + $0x162]] }
 0x2c3   :  { %v2762_v43 = vadd.f32 %v2760_v20, %v2730_v61  ;;  %v2767_v48 = vadd.f32 %v2765_v0, %v2735_v58  ;;  %v2768_v15 = vadd.f32 %v2766_v19, %v2736_v4  ;;  %v2773_v7 = vadd.f32 %v2771_v23, %v2741_v17  ;;  %v2876_v20 = vpop.permute.xlu0 %2875 }
 0x2c4   :  { %v2781_v22 = vmul.f32 %v2779_v51, %v7770_v1  ;;  %v2782_v62 = vmul.f32 %v2780_v42, %v7772_v3  ;;  %v2774_v28 = vadd.f32 %v2772_v34, %v2742_v10  ;;  %v2822_v59 = vstv %s7795_s23  ;;  %v7844_v10 = vld [vmem:[#allocation11 + $0x150] sm:$0xff]  ;;  %s7935_s23 = sld [smem:[#allocation2 + $0x166]] }
 0x2c5   :  { %v2811_v21 = vsel %vm2714_vm3, %v2808_v47, %v2810_v9  ;;  %v2812_v2 = vsel %vm2714_vm3, %v2810_v9, %v2808_v47  ;;  %v2828_v53 = vstv %s7804_s2  ;;  %v2834_v35 = vstv %s7806_s24  ;;  %s7937_s2 = sld [smem:[#allocation2 + $0x16a]]  ;;  %s7939_s24 = sld [smem:[#allocation2 + $0x16e]] }
 0x2c6   :  { %v2785_v46 = vmul.f32 %v2784_v16, %v2781_v22  ;;  %v2786_v11 = vmul.f32 %v2784_v16, %v2782_v62  ;;  %v2791_v12 = vmul.f32 %v2790_v41, %v2781_v22  ;;  %v2792_v26 = vmul.f32 %v2790_v41, %v2782_v62  ;;  %v7846_v41 = vld [vmem:[#allocation11 + $0x158] sm:$0xff] }
 0x2c7   :  { %v2797_v31 = vmul.f32 %v2796_v18, %v2781_v22  ;;  %v2798_v54 = vmul.f32 %v2796_v18, %v2782_v62  ;;  %v2803_v33 = vmul.f32 %v2802_v6, %v2781_v22  ;;  %v2804_v8 = vmul.f32 %v2802_v6, %v2782_v62 }
 0x2c8   :  { %v2787_v27 = vadd.f32 %v2785_v46, %v2755_v45  ;;  %vm2846_vm4 = vcmp.lt.s32.totalorder %v5464_v55, 97  ;;  %v2788_v40 = vadd.f32 %v2786_v11, %v2756_v56  ;;  %v2793_v50 = vadd.f32 %v2791_v12, %v2761_v24  ;;  %v2910_v12 = vpop.permute.xlu1 %2909 }
 0x2c9   :  { %v2794_v57 = vadd.f32 %v2792_v26, %v2762_v43  ;;  %v2799_v36 = vadd.f32 %v2797_v31, %v2767_v48  ;;  %v2800_v5 = vadd.f32 %v2798_v54, %v2768_v15  ;;  %v2805_v63 = vadd.f32 %v2803_v33, %v2773_v7  ;;  %v2908_v26 = vpop.permute.xlu0 %2907 }
 0x2ca   :  { %v2813_v25 = vmul.f32 %v2811_v21, %v7770_v1  ;;  %v2814_v13 = vmul.f32 %v2812_v2, %v7772_v3  ;;  %v2806_v16 = vadd.f32 %v2804_v8, %v2774_v28  ;;  %v2852_v32 = vstv %s7811_s28  ;;  %s7944_s28 = sld [smem:[#allocation2 + $0x163]] }
 0x2cb   :  { %v2847_v14 = vsel %vm2846_vm4, %v2843_v52, %v2845_v29  ;;  %v2848_v37 = vsel %vm2846_vm4, %v2845_v29, %v2843_v52  ;;  %v2858_v42 = vstv %s7820_s8  ;;  %v2864_v44 = vstv %s7822_s0  ;;  %s7953_s8 = sld [smem:[#allocation2 + $0x167]]  ;;  %s7955_s0 = sld [smem:[#allocation2 + $0x16b]] }
 0x2cc   :  { %v2817_v61 = vmul.f32 %v2816_v39, %v2813_v25  ;;  %v2818_v58 = vmul.f32 %v2816_v39, %v2814_v13  ;;  %v2823_v4 = vmul.f32 %v2822_v59, %v2813_v25  ;;  %v2824_v17 = vmul.f32 %v2822_v59, %v2814_v13 }
 0x2cd   :  { %v2829_v1 = vmul.f32 %v2828_v53, %v2813_v25  ;;  %v2830_v3 = vmul.f32 %v2828_v53, %v2814_v13  ;;  %v2835_v49 = vmul.f32 %v2834_v35, %v2813_v25  ;;  %v2836_v30 = vmul.f32 %v2834_v35, %v2814_v13 }
 0x2ce   :  { %v2819_v51 = vadd.f32 %v2817_v61, %v2787_v27  ;;  %v2870_v38 = vstv %s7824_s27  ;;  %v2820_v0 = vadd.f32 %v2818_v58, %v2788_v40  ;;  %v2825_v19 = vadd.f32 %v2823_v4, %v2793_v50  ;;  %s7957_s27 = sld [smem:[#allocation2 + $0x16f]] }
 0x2cf   :  { %v2826_v23 = vadd.f32 %v2824_v17, %v2794_v57  ;;  %v2831_v34 = vadd.f32 %v2829_v1, %v2799_v36  ;;  %v2832_v45 = vadd.f32 %v2830_v3, %v2800_v5  ;;  %v2837_v18 = vadd.f32 %v2835_v49, %v2805_v63  ;;  %v2942_v17 = vpop.permute.xlu1 %2941  ;;  %v2940_v1 = vpop.permute.xlu0 %2939 }
 0x2d0   :  { %v2849_v6 = vmul.f32 %v2847_v14, %v7844_v10  ;;  %v2850_v9 = vmul.f32 %v2848_v37, %v7846_v41  ;;  %v2838_v39 = vadd.f32 %v2836_v30, %v2806_v16  ;;  %v2884_v47 = vstv %s7829_s16  ;;  %s7962_s16 = sld [smem:[#allocation2 + $0x170]] }
 0x2d1   :  { %v2879_v56 = vsel %vm2846_vm4, %v2876_v20, %v2878_v60  ;;  %v2880_v24 = vsel %vm2846_vm4, %v2878_v60, %v2876_v20  ;;  %v2890_v2 = vstv %s7838_s30  ;;  %v2896_v46 = vstv %s7840_s21  ;;  %s7971_s30 = sld [smem:[#allocation2 + $0x174]]  ;;  %s7973_s21 = sld [smem:[#allocation2 + $0x178]] }
 0x2d2   :  { %v2853_v43 = vmul.f32 %v2852_v32, %v2849_v6  ;;  %v2854_v48 = vmul.f32 %v2852_v32, %v2850_v9  ;;  %v2859_v15 = vmul.f32 %v2858_v42, %v2849_v6  ;;  %v2860_v7 = vmul.f32 %v2858_v42, %v2850_v9 }
 0x2d3   :  { %v2865_v22 = vmul.f32 %v2864_v44, %v2849_v6  ;;  %v2866_v62 = vmul.f32 %v2864_v44, %v2850_v9  ;;  %v2871_v28 = vmul.f32 %v2870_v38, %v2849_v6  ;;  %v2872_v59 = vmul.f32 %v2870_v38, %v2850_v9 }
 0x2d4   :  { %v2855_v21 = vadd.f32 %v2853_v43, %v2819_v51  ;;  %v2902_v11 = vstv %s7842_s18  ;;  %v2856_v31 = vadd.f32 %v2854_v48, %v2820_v0  ;;  %v2861_v54 = vadd.f32 %v2859_v15, %v2825_v19  ;;  %s7975_s18 = sld [smem:[#allocation2 + $0x17c]] }
 0x2d5   :  { %v2862_v33 = vadd.f32 %v2860_v7, %v2826_v23  ;;  %v2867_v8 = vadd.f32 %v2865_v22, %v2831_v34  ;;  %v2868_v27 = vadd.f32 %v2866_v62, %v2832_v45  ;;  %v2873_v53 = vadd.f32 %v2871_v28, %v2837_v18  ;;  %v2977_v7 = vpop.permute.xlu1 %2976  ;;  %v2975_v22 = vpop.permute.xlu0 %2974 }
 0x2d6   :  { %v2881_v35 = vmul.f32 %v2879_v56, %v7844_v10  ;;  %v2882_v29 = vmul.f32 %v2880_v24, %v7846_v41  ;;  %v2874_v52 = vadd.f32 %v2872_v59, %v2838_v39  ;;  %v2916_v40 = vstv %s7851_s17  ;;  %s7980_s17 = sld [smem:[#allocation2 + $0x171]] }
 0x2d7   :  { %v2911_v50 = vsel %vm2846_vm4, %v2908_v26, %v2910_v12  ;;  %v2912_v57 = vsel %vm2846_vm4, %v2910_v12, %v2908_v26  ;;  %v2922_v61 = vstv %s7860_s1  ;;  %v2928_v58 = vstv %s7862_s14  ;;  %s7985_s1 = sld [smem:[#allocation2 + $0x175]]  ;;  %s7987_s14 = sld [smem:[#allocation2 + $0x179]] }
 0x2d8   :  { %v2885_v36 = vmul.f32 %v2884_v47, %v2881_v35  ;;  %v2886_v5 = vmul.f32 %v2884_v47, %v2882_v29  ;;  %v2891_v63 = vmul.f32 %v2890_v2, %v2881_v35  ;;  %v2892_v25 = vmul.f32 %v2890_v2, %v2882_v29 }
 0x2d9   :  { %v2897_v13 = vmul.f32 %v2896_v46, %v2881_v35  ;;  %v2898_v16 = vmul.f32 %v2896_v46, %v2882_v29  ;;  %v2903_v32 = vmul.f32 %v2902_v11, %v2881_v35  ;;  %v2904_v14 = vmul.f32 %v2902_v11, %v2882_v29 }
 0x2da   :  { %v2887_v37 = vadd.f32 %v2885_v36, %v2855_v21  ;;  %v2934_v4 = vstv %s7864_s3  ;;  %v2888_v3 = vadd.f32 %v2886_v5, %v2856_v31  ;;  %v2893_v49 = vadd.f32 %v2891_v63, %v2861_v54  ;;  %v3010_v63 = vpop.permute.xlu1 %3009  ;;  %s7992_s3 = sld [smem:[#allocation2 + $0x17d]] }
 0x2db   :  { %v2894_v30 = vadd.f32 %v2892_v25, %v2862_v33  ;;  %v2899_v51 = vadd.f32 %v2897_v13, %v2867_v8  ;;  %v2900_v42 = vadd.f32 %v2898_v16, %v2868_v27  ;;  %v2905_v44 = vadd.f32 %v2903_v32, %v2873_v53  ;;  %v3008_v25 = vpop.permute.xlu0 %3007 }
 0x2dc   :  { %v2913_v38 = vmul.f32 %v2911_v50, %v7844_v10  ;;  %v2914_v60 = vmul.f32 %v2912_v57, %v7846_v41  ;;  %v2906_v20 = vadd.f32 %v2904_v14, %v2874_v52  ;;  %v2948_v0 = vstv %s7869_s25  ;;  %v7919_v52 = vld [vmem:[#allocation11 + $0x160] sm:$0xff]  ;;  %v7921_v50 = vld [vmem:[#allocation11 + $0x168] sm:$0xff]  ;;  %s7994_s25 = sld [smem:[#allocation2 + $0x172]] }
 0x2dd   :  { %v2943_v19 = vsel %vm2846_vm4, %v2940_v1, %v2942_v17  ;;  %v2944_v23 = vsel %vm2846_vm4, %v2942_v17, %v2940_v1  ;;  %v2954_v43 = vstv %s7878_s9  ;;  %v2960_v48 = vstv %s7880_s11  ;;  %s7996_s9 = sld [smem:[#allocation2 + $0x176]]  ;;  %s8009_s11 = sld [smem:[#allocation2 + $0x17a]] }
 0x2de   :  { %v2917_v34 = vmul.f32 %v2916_v40, %v2913_v38  ;;  %v2918_v45 = vmul.f32 %v2916_v40, %v2914_v60  ;;  %v2923_v18 = vmul.f32 %v2922_v61, %v2913_v38  ;;  %v2924_v6 = vmul.f32 %v2922_v61, %v2914_v60 }
 0x2df   :  { %v2929_v9 = vmul.f32 %v2928_v58, %v2913_v38  ;;  %v2930_v39 = vmul.f32 %v2928_v58, %v2914_v60  ;;  %v2935_v47 = vmul.f32 %v2934_v4, %v2913_v38  ;;  %v2936_v56 = vmul.f32 %v2934_v4, %v2914_v60 }
 0x2e0   :  { %v2919_v24 = vadd.f32 %v2917_v34, %v2887_v37  ;;  %v2966_v15 = vstv %s7882_s13  ;;  %v2920_v62 = vadd.f32 %v2918_v45, %v2888_v3  ;;  %v2925_v28 = vadd.f32 %v2923_v18, %v2893_v49  ;;  %v3042_v18 = vpop.permute.xlu1 %3041  ;;  %s8020_s13 = sld [smem:[#allocation2 + $0x17e]] }
 0x2e1   :  { %v2926_v59 = vadd.f32 %v2924_v6, %v2894_v30  ;;  %v2931_v21 = vadd.f32 %v2929_v9, %v2899_v51  ;;  %v2932_v2 = vadd.f32 %v2930_v39, %v2900_v42  ;;  %v2945_v46 = vmul.f32 %v2943_v19, %v7844_v10  ;;  %v3040_v6 = vpop.permute.xlu0 %3039 }
 0x2e2   :  { %v2946_v11 = vmul.f32 %v2944_v23, %v7846_v41  ;;  %vm2978_vm5 = vcmp.lt.s32.totalorder %v5464_v55, 96  ;;  %v2937_v12 = vadd.f32 %v2935_v47, %v2905_v44  ;;  %v2938_v26 = vadd.f32 %v2936_v56, %v2906_v20 }
 0x2e3   :  { %v2984_v31 = vstv %s7887_s4  ;;  %v2979_v54 = vsel %vm2978_vm5, %v2975_v22, %v2977_v7  ;;  %v2949_v33 = vmul.f32 %v2948_v0, %v2945_v46  ;;  %v2955_v27 = vmul.f32 %v2954_v43, %v2945_v46  ;;  %s8022_s4 = sld [smem:[#allocation2 + $0x173]] }
 0x2e4   :  { %v2950_v8 = vmul.f32 %v2948_v0, %v2946_v11  ;;  %v2956_v53 = vmul.f32 %v2954_v43, %v2946_v11  ;;  %v2961_v10 = vmul.f32 %v2960_v48, %v2945_v46  ;;  %v2962_v41 = vmul.f32 %v2960_v48, %v2946_v11 }
 0x2e5   :  { %v2967_v35 = vmul.f32 %v2966_v15, %v2945_v46  ;;  %v2968_v29 = vmul.f32 %v2966_v15, %v2946_v11  ;;  %v2951_v40 = vadd.f32 %v2949_v33, %v2919_v24  ;;  %v2990_v57 = vstv %s7896_s20  ;;  %s8024_s20 = sld [smem:[#allocation2 + $0x177]] }
 0x2e6   :  { %v2996_v36 = vstv %s7898_s5  ;;  %v3002_v5 = vstv %s7900_s26  ;;  %v2952_v13 = vadd.f32 %v2950_v8, %v2920_v62  ;;  %v2957_v16 = vadd.f32 %v2955_v27, %v2925_v28  ;;  %s8029_s5 = sld [smem:[#allocation2 + $0x17b]]  ;;  %s8038_s26 = sld [smem:[#allocation2 + $0x17f]] }
 0x2e7   :  { %v2958_v32 = vadd.f32 %v2956_v53, %v2926_v59  ;;  %v2963_v14 = vadd.f32 %v2961_v10, %v2931_v21  ;;  %v2964_v37 = vadd.f32 %v2962_v41, %v2932_v2  ;;  %v2969_v61 = vadd.f32 %v2967_v35, %v2937_v12  ;;  %v3074_v53 = vpop.permute.xlu1 %3073  ;;  %v3072_v10 = vpop.permute.xlu0 %3071 }
 0x2e8   :  { %v2980_v58 = vsel %vm2978_vm5, %v2977_v7, %v2975_v22  ;;  %v2981_v4 = vmul.f32 %v2979_v54, %v7919_v52  ;;  %v2970_v17 = vadd.f32 %v2968_v29, %v2938_v26  ;;  %v3016_v3 = vstv %s7905_s22  ;;  %s8040_s22 = sld [smem:[#allocation2 + $0x180]] }
 0x2e9   :  { %v2982_v1 = vmul.f32 %v2980_v58, %v7921_v50  ;;  %v3011_v49 = vsel %vm2978_vm5, %v3008_v25, %v3010_v63  ;;  %v3022_v23 = vstv %s7913_s29  ;;  %v3028_v34 = vstv %s7915_s15  ;;  %s8045_s29 = sld [smem:[#allocation2 + $0x184]]  ;;  %s8054_s15 = sld [smem:[#allocation2 + $0x188]] }
 0x2ea   :  { %v2985_v30 = vmul.f32 %v2984_v31, %v2981_v4  ;;  %v2991_v51 = vmul.f32 %v2990_v57, %v2981_v4  ;;  %v2997_v42 = vmul.f32 %v2996_v36, %v2981_v4  ;;  %v3003_v44 = vmul.f32 %v3002_v5, %v2981_v4 }
 0x2eb   :  { %v2986_v38 = vmul.f32 %v2984_v31, %v2982_v1  ;;  %v2992_v60 = vmul.f32 %v2990_v57, %v2982_v1  ;;  %v2998_v20 = vmul.f32 %v2996_v36, %v2982_v1  ;;  %v3004_v0 = vmul.f32 %v3002_v5, %v2982_v1 }
 0x2ec   :  { %v2987_v19 = vadd.f32 %v2985_v30, %v2951_v40  ;;  %v3034_v45 = vstv %s7917_s10  ;;  %v2993_v39 = vadd.f32 %v2991_v51, %v2957_v16  ;;  %v2999_v47 = vadd.f32 %v2997_v42, %v2963_v14  ;;  %s8056_s10 = sld [smem:[#allocation2 + $0x18c]] }
 0x2ed   :  { %v2988_v9 = vadd.f32 %v2986_v38, %v2952_v13  ;;  %v3005_v56 = vadd.f32 %v3003_v44, %v2969_v61  ;;  %v2994_v24 = vadd.f32 %v2992_v60, %v2958_v32  ;;  %v3000_v43 = vadd.f32 %v2998_v20, %v2964_v37 }
 0x2ee   :  { %v3012_v48 = vsel %vm2978_vm5, %v3010_v63, %v3008_v25  ;;  %v3013_v15 = vmul.f32 %v3011_v49, %v7919_v52  ;;  %v3006_v7 = vadd.f32 %v3004_v0, %v2970_v17  ;;  %v3048_v62 = vstv %s7926_s7  ;;  %v3109_v0 = vpop.permute.xlu1 %3108  ;;  %s8058_s7 = sld [smem:[#allocation2 + $0x181]] }
 0x2ef   :  { %v3014_v22 = vmul.f32 %v3012_v48, %v7921_v50  ;;  %v3043_v28 = vsel %vm2978_vm5, %v3040_v6, %v3042_v18  ;;  %v3054_v33 = vstv %s7935_s23  ;;  %v3060_v8 = vstv %s7937_s2  ;;  %s8063_s23 = sld [smem:[#allocation2 + $0x185]]  ;;  %s8072_s2 = sld [smem:[#allocation2 + $0x189]] }
 0x2f0   :  { %v3017_v59 = vmul.f32 %v3016_v3, %v3013_v15  ;;  %v3023_v21 = vmul.f32 %v3022_v23, %v3013_v15  ;;  %v3029_v2 = vmul.f32 %v3028_v34, %v3013_v15  ;;  %v3035_v46 = vmul.f32 %v3034_v45, %v3013_v15 }
 0x2f1   :  { %v3018_v11 = vmul.f32 %v3016_v3, %v3014_v22  ;;  %v3024_v12 = vmul.f32 %v3022_v23, %v3014_v22  ;;  %v3030_v26 = vmul.f32 %v3028_v34, %v3014_v22  ;;  %v3036_v31 = vmul.f32 %v3034_v45, %v3014_v22  ;;  %v7998_v22 = vld [vmem:[#allocation11 + $0x170] sm:$0xff] }
 0x2f2   :  { %v3019_v54 = vadd.f32 %v3017_v59, %v2987_v19  ;;  %v3066_v27 = vstv %s7939_s24  ;;  %v3025_v35 = vadd.f32 %v3023_v21, %v2993_v39  ;;  %v3031_v29 = vadd.f32 %v3029_v2, %v2999_v47  ;;  %v3107_v19 = vpop.permute.xlu0 %3106  ;;  %s8074_s24 = sld [smem:[#allocation2 + $0x18d]] }
 0x2f3   :  { %v3020_v41 = vadd.f32 %v3018_v11, %v2988_v9  ;;  %v3037_v40 = vadd.f32 %v3035_v46, %v3005_v56  ;;  %v3026_v57 = vadd.f32 %v3024_v12, %v2994_v24  ;;  %v3032_v36 = vadd.f32 %v3030_v26, %v3000_v43  ;;  %v3142_v26 = vpop.permute.xlu1 %3141 }
 0x2f4   :  { %v3044_v5 = vsel %vm2978_vm5, %v3042_v18, %v3040_v6  ;;  %v3045_v63 = vmul.f32 %v3043_v28, %v7919_v52  ;;  %v3038_v25 = vadd.f32 %v3036_v31, %v3006_v7  ;;  %v3080_v16 = vstv %s7944_s28  ;;  %s8076_s28 = sld [smem:[#allocation2 + $0x182]] }
 0x2f5   :  { %v3046_v13 = vmul.f32 %v3044_v5, %v7921_v50  ;;  %v3075_v32 = vsel %vm2978_vm5, %v3072_v10, %v3074_v53  ;;  %v3086_v30 = vstv %s7953_s8  ;;  %v3092_v51 = vstv %s7955_s0  ;;  %s8085_s8 = sld [smem:[#allocation2 + $0x186]]  ;;  %s8094_s0 = sld [smem:[#allocation2 + $0x18a]] }
 0x2f6   :  { %v3049_v14 = vmul.f32 %v3048_v62, %v3045_v63  ;;  %v3055_v37 = vmul.f32 %v3054_v33, %v3045_v63  ;;  %v3061_v61 = vmul.f32 %v3060_v8, %v3045_v63  ;;  %v3067_v58 = vmul.f32 %v3066_v27, %v3045_v63  ;;  %v3140_v31 = vpop.permute.xlu0 %3139 }
 0x2f7   :  { %v3050_v4 = vmul.f32 %v3048_v62, %v3046_v13  ;;  %v3056_v17 = vmul.f32 %v3054_v33, %v3046_v13  ;;  %v3062_v1 = vmul.f32 %v3060_v8, %v3046_v13  ;;  %v3068_v3 = vmul.f32 %v3066_v27, %v3046_v13  ;;  %v8000_v62 = vld [vmem:[#allocation11 + $0x178] sm:$0xff] }
 0x2f8   :  { %v3051_v49 = vadd.f32 %v3049_v14, %v3019_v54  ;;  %v3098_v42 = vstv %s7957_s27  ;;  %v3057_v38 = vadd.f32 %v3055_v37, %v3025_v35  ;;  %v3063_v60 = vadd.f32 %v3061_v61, %v3031_v29  ;;  %s8096_s27 = sld [smem:[#allocation2 + $0x18e]] }
 0x2f9   :  { %v3052_v44 = vadd.f32 %v3050_v4, %v3020_v41  ;;  %v3069_v20 = vadd.f32 %v3067_v58, %v3037_v40  ;;  %v3058_v23 = vadd.f32 %v3056_v17, %v3026_v57  ;;  %v3064_v34 = vadd.f32 %v3062_v1, %v3032_v36  ;;  %v3174_v4 = vpop.permute.xlu1 %3173 }
 0x2fa   :  { %v3076_v45 = vsel %vm2978_vm5, %v3074_v53, %v3072_v10  ;;  %v3077_v18 = vmul.f32 %v3075_v32, %v7919_v52  ;;  %v3070_v6 = vadd.f32 %v3068_v3, %v3038_v25  ;;  %vm3110_vm6 = vcmp.lt.s32.totalorder %v5464_v55, 95  ;;  %v3172_v3 = vpop.permute.xlu0 %3171 }
 0x2fb   :  { %v3078_v9 = vmul.f32 %v3076_v45, %v7921_v50  ;;  %v3116_v39 = vstv %s7962_s16  ;;  %v3122_v28 = vstv %s7971_s30  ;;  %v3128_v59 = vstv %s7973_s21  ;;  %s8098_s16 = sld [smem:[#allocation2 + $0x183]]  ;;  %s8100_s30 = sld [smem:[#allocation2 + $0x187]] }
 0x2fc   :  { %v3081_v47 = vmul.f32 %v3080_v16, %v3077_v18  ;;  %v3087_v56 = vmul.f32 %v3086_v30, %v3077_v18  ;;  %v3093_v24 = vmul.f32 %v3092_v51, %v3077_v18  ;;  %v3099_v43 = vmul.f32 %v3098_v42, %v3077_v18  ;;  %s8105_s21 = sld [smem:[#allocation2 + $0x18b]] }
 0x2fd   :  { %v3082_v52 = vmul.f32 %v3080_v16, %v3078_v9  ;;  %v3088_v48 = vmul.f32 %v3086_v30, %v3078_v9  ;;  %v3094_v15 = vmul.f32 %v3092_v51, %v3078_v9  ;;  %v3100_v7 = vmul.f32 %v3098_v42, %v3078_v9 }
 0x2fe   :  { %v3083_v50 = vadd.f32 %v3081_v47, %v3051_v49  ;;  %v3134_v21 = vstv %s7975_s18  ;;  %v3089_v46 = vadd.f32 %v3087_v56, %v3057_v38  ;;  %v3095_v11 = vadd.f32 %v3093_v24, %v3063_v60  ;;  %s8107_s18 = sld [smem:[#allocation2 + $0x18f]] }
 0x2ff   :  { %v3084_v2 = vadd.f32 %v3082_v52, %v3052_v44  ;;  %v3101_v12 = vadd.f32 %v3099_v43, %v3069_v20  ;;  %v3090_v54 = vadd.f32 %v3088_v48, %v3058_v23  ;;  %v3096_v33 = vadd.f32 %v3094_v15, %v3064_v34  ;;  %v3206_v48 = vpop.permute.xlu1 %3205 }
 0x300   :  { %v3111_v8 = vsel %vm3110_vm6, %v3107_v19, %v3109_v0  ;;  %v3112_v27 = vsel %vm3110_vm6, %v3109_v0, %v3107_v19  ;;  %v3102_v53 = vadd.f32 %v3100_v7, %v3070_v6  ;;  %v3148_v35 = vstv %s7980_s17  ;;  %s8109_s17 = sld [smem:[#allocation6]] }
 0x301   :  { %v3113_v10 = vmul.f32 %v3111_v8, %v7998_v22  ;;  %v3114_v41 = vmul.f32 %v3112_v27, %v8000_v62  ;;  %v3154_v29 = vstv %s7985_s1  ;;  %v3160_v40 = vstv %s7987_s14  ;;  %s8111_s1 = sld [smem:[#allocation6 + $0x1]]  ;;  %s8115_s14 = sld [smem:[#allocation6 + $0x2]] }
 0x302   :  { %v3143_v57 = vsel %vm3110_vm6, %v3140_v31, %v3142_v26  ;;  %v3144_v36 = vsel %vm3110_vm6, %v3142_v26, %v3140_v31  ;;  %v3166_v58 = vstv %s7992_s3  ;;  %v3180_v17 = vstv %s7994_s25  ;;  %s8117_s3 = sld [smem:[#allocation6 + $0x3]]  ;;  %s8124_s25 = sld [smem:[#allocation7]] }
 0x303   :  { %v3117_v5 = vmul.f32 %v3116_v39, %v3113_v10  ;;  %v3118_v63 = vmul.f32 %v3116_v39, %v3114_v41  ;;  %v3123_v25 = vmul.f32 %v3122_v28, %v3113_v10  ;;  %v3124_v13 = vmul.f32 %v3122_v28, %v3114_v41 }
 0x304   :  { %v3129_v16 = vmul.f32 %v3128_v59, %v3113_v10  ;;  %v3130_v32 = vmul.f32 %v3128_v59, %v3114_v41  ;;  %v3135_v14 = vmul.f32 %v3134_v21, %v3113_v10  ;;  %v3136_v37 = vmul.f32 %v3134_v21, %v3114_v41 }
 0x305   :  { %v3119_v61 = vadd.f32 %v3117_v5, %v3083_v50  ;;  %v3186_v1 = vstv %s7996_s9  ;;  %v3120_v49 = vadd.f32 %v3118_v63, %v3084_v2  ;;  %v3125_v30 = vadd.f32 %v3123_v25, %v3089_v46  ;;  %v3204_v50 = vpop.permute.xlu0 %3203  ;;  %v3241_v63 = vpop.permute.xlu1 %3240  ;;  %s8126_s9 = sld [smem:[#allocation7 + $0x4]] }
 0x306   :  { %v3126_v51 = vadd.f32 %v3124_v13, %v3090_v54  ;;  %v3131_v42 = vadd.f32 %v3129_v16, %v3095_v11  ;;  %v3132_v44 = vadd.f32 %v3130_v32, %v3096_v33  ;;  %v3137_v38 = vadd.f32 %v3135_v14, %v3101_v12 }
 0x307   :  { %v3145_v60 = vmul.f32 %v3143_v57, %v7998_v22  ;;  %v3146_v20 = vmul.f32 %v3144_v36, %v8000_v62  ;;  %v3138_v0 = vadd.f32 %v3136_v37, %v3102_v53  ;;  %v3192_v19 = vstv %s8009_s11  ;;  %s8128_s11 = sld [smem:[#allocation7 + $0x8]] }
 0x308   :  { %v3175_v23 = vsel %vm3110_vm6, %v3172_v3, %v3174_v4  ;;  %v3176_v34 = vsel %vm3110_vm6, %v3174_v4, %v3172_v3  ;;  %v3198_v52 = vstv %s8020_s13  ;;  %v3212_v15 = vstv %s8022_s4  ;;  %s8130_s13 = sld [smem:[#allocation7 + $0x1]]  ;;  %s8132_s4 = sld [smem:[#allocation7 + $0x5]] }
 0x309   :  { %v3149_v45 = vmul.f32 %v3148_v35, %v3145_v60  ;;  %v3150_v18 = vmul.f32 %v3148_v35, %v3146_v20  ;;  %v3155_v6 = vmul.f32 %v3154_v29, %v3145_v60  ;;  %v3156_v9 = vmul.f32 %v3154_v29, %v3146_v20  ;;  %v3239_v13 = vpop.permute.xlu0 %3238 }
 0x30a   :  { %v3161_v39 = vmul.f32 %v3160_v40, %v3145_v60  ;;  %v3162_v47 = vmul.f32 %v3160_v40, %v3146_v20  ;;  %v3167_v56 = vmul.f32 %v3166_v58, %v3145_v60  ;;  %v3168_v24 = vmul.f32 %v3166_v58, %v3146_v20 }
 0x30b   :  { %v3151_v43 = vadd.f32 %v3149_v45, %v3119_v61  ;;  %v3218_v7 = vstv %s8024_s20  ;;  %v3152_v28 = vadd.f32 %v3150_v18, %v3120_v49  ;;  %v3157_v59 = vadd.f32 %v3155_v6, %v3125_v30  ;;  %v3274_v18 = vpop.permute.xlu1 %3273  ;;  %s8134_s20 = sld [smem:[#allocation7 + $0x9]] }
 0x30c   :  { %v3158_v21 = vadd.f32 %v3156_v9, %v3126_v51  ;;  %v3163_v2 = vadd.f32 %v3161_v39, %v3131_v42  ;;  %v3164_v46 = vadd.f32 %v3162_v47, %v3132_v44  ;;  %v3169_v11 = vadd.f32 %v3167_v56, %v3137_v38 }
 0x30d   :  { %v3177_v12 = vmul.f32 %v3175_v23, %v7998_v22  ;;  %v3178_v26 = vmul.f32 %v3176_v34, %v8000_v62  ;;  %v3170_v31 = vadd.f32 %v3168_v24, %v3138_v0  ;;  %v3224_v54 = vstv %s8029_s5  ;;  %v8078_v0 = vld [vmem:[#allocation11 + $0x180] sm:$0xff]  ;;  %v3272_v9 = vpop.permute.xlu0 %3271  ;;  %s8139_s5 = sld [smem:[#allocation7 + $0x2]] }
 0x30e   :  { %v3207_v33 = vsel %vm3110_vm6, %v3204_v50, %v3206_v48  ;;  %v3208_v8 = vsel %vm3110_vm6, %v3206_v48, %v3204_v50  ;;  %v3230_v5 = vstv %s8038_s26  ;;  %vm3242_vm7 = vcmp.lt.s32.totalorder %v5464_v55, 94  ;;  %s8141_s26 = sld [smem:[#allocation7 + $0x6]] }
 0x30f   :  { %v3181_v27 = vmul.f32 %v3180_v17, %v3177_v12  ;;  %v3182_v53 = vmul.f32 %v3180_v17, %v3178_v26  ;;  %v3187_v10 = vmul.f32 %v3186_v1, %v3177_v12  ;;  %v3188_v41 = vmul.f32 %v3186_v1, %v3178_v26 }
 0x310   :  { %v3193_v35 = vmul.f32 %v3192_v19, %v3177_v12  ;;  %v3194_v29 = vmul.f32 %v3192_v19, %v3178_v26  ;;  %v3199_v40 = vmul.f32 %v3198_v52, %v3177_v12  ;;  %v3200_v57 = vmul.f32 %v3198_v52, %v3178_v26  ;;  %v8080_v19 = vld [vmem:[#allocation11 + $0x188] sm:$0xff] }
 0x311   :  { %v3183_v36 = vadd.f32 %v3181_v27, %v3151_v43  ;;  %v3248_v25 = vstv %s8040_s22  ;;  %v3184_v16 = vadd.f32 %v3182_v53, %v3152_v28  ;;  %v3189_v32 = vadd.f32 %v3187_v10, %v3157_v59  ;;  %v3306_v53 = vpop.permute.xlu1 %3305  ;;  %s8143_s22 = sld [smem:[#allocation7 + $0xa]] }
 0x312   :  { %v3190_v14 = vadd.f32 %v3188_v41, %v3158_v21  ;;  %v3195_v37 = vadd.f32 %v3193_v35, %v3163_v2  ;;  %v3196_v61 = vadd.f32 %v3194_v29, %v3164_v46  ;;  %v3201_v58 = vadd.f32 %v3199_v40, %v3169_v11  ;;  %v3304_v41 = vpop.permute.xlu0 %3303 }
 0x313   :  { %v3209_v4 = vmul.f32 %v3207_v33, %v7998_v22  ;;  %v3210_v17 = vmul.f32 %v3208_v8, %v8000_v62  ;;  %v3202_v1 = vadd.f32 %v3200_v57, %v3170_v31  ;;  %v3254_v3 = vstv %s8045_s29  ;;  %s8145_s29 = sld [smem:[#allocation7 + $0x3]] }
 0x314   :  { %v3243_v49 = vsel %vm3242_vm7, %v3239_v13, %v3241_v63  ;;  %v3244_v30 = vsel %vm3242_vm7, %v3241_v63, %v3239_v13  ;;  %v3260_v34 = vstv %s8054_s15  ;;  %v3266_v45 = vstv %s8056_s10  ;;  %s8149_s15 = sld [smem:[#allocation7 + $0x7]]  ;;  %s8151_s10 = sld [smem:[#allocation7 + $0xb]] }
 0x315   :  { %v3213_v51 = vmul.f32 %v3212_v15, %v3209_v4  ;;  %v3214_v42 = vmul.f32 %v3212_v15, %v3210_v17  ;;  %v3219_v44 = vmul.f32 %v3218_v7, %v3209_v4  ;;  %v3220_v38 = vmul.f32 %v3218_v7, %v3210_v17 }
 0x316   :  { %v3225_v22 = vmul.f32 %v3224_v54, %v3209_v4  ;;  %v3226_v62 = vmul.f32 %v3224_v54, %v3210_v17  ;;  %v3231_v60 = vmul.f32 %v3230_v5, %v3209_v4  ;;  %v3232_v20 = vmul.f32 %v3230_v5, %v3210_v17 }
 0x317   :  { %v3215_v23 = vadd.f32 %v3213_v51, %v3183_v36  ;;  %v3280_v6 = vstv %s8058_s7  ;;  %v3216_v39 = vadd.f32 %v3214_v42, %v3184_v16  ;;  %v3221_v47 = vadd.f32 %v3219_v44, %v3189_v32  ;;  %s8156_s7 = sld [smem:[#allocation9]] }
 0x318   :  { %v3222_v56 = vadd.f32 %v3220_v38, %v3190_v14  ;;  %v3227_v24 = vadd.f32 %v3225_v22, %v3195_v37  ;;  %v3228_v43 = vadd.f32 %v3226_v62, %v3196_v61  ;;  %v3233_v52 = vadd.f32 %v3231_v60, %v3201_v58 }
 0x319   :  { %v3245_v48 = vmul.f32 %v3243_v49, %v8078_v0  ;;  %v3246_v15 = vmul.f32 %v3244_v30, %v8080_v19  ;;  %v3234_v7 = vadd.f32 %v3232_v20, %v3202_v1  ;;  %v3286_v50 = vstv %s8063_s23  ;;  %s8158_s23 = sld [smem:[#allocation9 + $0x1]] }
 0x31a   :  { %v3275_v28 = vsel %vm3242_vm7, %v3272_v9, %v3274_v18  ;;  %v3276_v59 = vsel %vm3242_vm7, %v3274_v18, %v3272_v9  ;;  %v3292_v8 = vstv %s8072_s2  ;;  %v3298_v27 = vstv %s8074_s24  ;;  %s8160_s2 = sld [smem:[#allocation9 + $0x2]]  ;;  %s8162_s24 = sld [smem:[#allocation7 + $0xc]] }
 0x31b   :  { %v3249_v21 = vmul.f32 %v3248_v25, %v3245_v48  ;;  %v3250_v2 = vmul.f32 %v3248_v25, %v3246_v15  ;;  %v3255_v46 = vmul.f32 %v3254_v3, %v3245_v48  ;;  %v3256_v11 = vmul.f32 %v3254_v3, %v3246_v15 }
 0x31c   :  { %v3261_v12 = vmul.f32 %v3260_v34, %v3245_v48  ;;  %v3262_v26 = vmul.f32 %v3260_v34, %v3246_v15  ;;  %v3267_v31 = vmul.f32 %v3266_v45, %v3245_v48  ;;  %v3268_v54 = vmul.f32 %v3266_v45, %v3246_v15 }
 0x31d   :  { %v3251_v33 = vadd.f32 %v3249_v21, %v3215_v23  ;;  %v3312_v10 = vstv %s8076_s28  ;;  %v3252_v35 = vadd.f32 %v3250_v2, %v3216_v39  ;;  %v3257_v29 = vadd.f32 %v3255_v46, %v3221_v47  ;;  %s8164_s28 = sld [smem:[#allocation7 + $0x10]] }
 0x31e   :  { %v3258_v40 = vadd.f32 %v3256_v11, %v3222_v56  ;;  %v3263_v57 = vadd.f32 %v3261_v12, %v3227_v24  ;;  %v3264_v36 = vadd.f32 %v3262_v26, %v3228_v43  ;;  %v3269_v5 = vadd.f32 %v3267_v31, %v3233_v52 }
 0x31f   :  { %v3277_v63 = vmul.f32 %v3275_v28, %v8078_v0  ;;  %v3278_v25 = vmul.f32 %v3276_v59, %v8080_v19  ;;  %v3270_v13 = vadd.f32 %v3268_v54, %v3234_v7  ;;  %v3318_v16 = vstv %s8085_s8  ;;  %s8166_s8 = sld [smem:[#allocation7 + $0x14]] }
 0x320   :  { %v3307_v32 = vsel %vm3242_vm7, %v3304_v41, %v3306_v53  ;;  %v3308_v14 = vsel %vm3242_vm7, %v3306_v53, %v3304_v41  ;;  %v3324_v51 = vstv %s8094_s0  ;;  %v3330_v42 = vstv %s8096_s27  ;;  %s8171_s0 = sld [smem:[#allocation7 + $0x24]]  ;;  %s8173_s27 = sld [smem:[#allocation7 + $0x28]] }
 0x321   :  { %v3281_v37 = vmul.f32 %v3280_v6, %v3277_v63  ;;  %v3282_v61 = vmul.f32 %v3280_v6, %v3278_v25  ;;  %v3287_v58 = vmul.f32 %v3286_v50, %v3277_v63  ;;  %v3288_v4 = vmul.f32 %v3286_v50, %v3278_v25 }
 0x322   :  { %v3293_v17 = vmul.f32 %v3292_v8, %v3277_v63  ;;  %v3294_v1 = vmul.f32 %v3292_v8, %v3278_v25  ;;  %v3299_v3 = vmul.f32 %v3298_v27, %v3277_v63  ;;  %v3300_v49 = vmul.f32 %v3298_v27, %v3278_v25  ;;  %v3338_v8 = vpop.permute.xlu1 %3337 }
 0x323   :  { %v3283_v30 = vadd.f32 %v3281_v37, %v3251_v33  ;;  %v3344_v44 = vstv %s8098_s16  ;;  %v3284_v38 = vadd.f32 %v3282_v61, %v3252_v35  ;;  %v3289_v22 = vadd.f32 %v3287_v58, %v3257_v29  ;;  %v3336_v35 = vpop.permute.xlu0 %3335  ;;  %s8252_s16 = sld [smem:[#allocation7 + $0xd]] }
 0x324   :  { %v3290_v62 = vadd.f32 %v3288_v4, %v3258_v40  ;;  %v3295_v60 = vadd.f32 %v3293_v17, %v3263_v57  ;;  %v3296_v20 = vadd.f32 %v3294_v1, %v3264_v36  ;;  %v3301_v23 = vadd.f32 %v3299_v3, %v3269_v5 }
 0x325   :  { %v3309_v34 = vmul.f32 %v3307_v32, %v8078_v0  ;;  %v3310_v45 = vmul.f32 %v3308_v14, %v8080_v19  ;;  %v3302_v18 = vadd.f32 %v3300_v49, %v3270_v13  ;;  %v3350_v6 = vstv %s8100_s30  ;;  %s8254_s30 = sld [smem:[#allocation7 + $0x11]] }
 0x326   :  { %v3356_v9 = vstv %s8105_s21  ;;  %v3362_v39 = vstv %s8107_s18  ;;  %v3368_v28 = vstv %s8109_s17  ;;  %v3374_v59 = vstv %s8111_s1  ;;  %s8284_s21 = sld [smem:[#allocation7 + $0x2c]]  ;;  %s8292_s18 = sld [smem:[#allocation7 + $0x15]] }
 0x327   :  { %v3313_v47 = vmul.f32 %v3312_v10, %v3309_v34  ;;  %v3314_v56 = vmul.f32 %v3312_v10, %v3310_v45  ;;  %v3319_v24 = vmul.f32 %v3318_v16, %v3309_v34  ;;  %v3320_v43 = vmul.f32 %v3318_v16, %v3310_v45  ;;  %s8296_s17 = sld [smem:[#allocation7 + $0x25]]  ;;  %s8298_s1 = sld [smem:[#allocation7 + $0x29]] }
 0x328   :  { %v3325_v52 = vmul.f32 %v3324_v51, %v3309_v34  ;;  %v3326_v48 = vmul.f32 %v3324_v51, %v3310_v45  ;;  %v3331_v15 = vmul.f32 %v3330_v42, %v3309_v34  ;;  %v3332_v7 = vmul.f32 %v3330_v42, %v3310_v45 }
 0x329   :  { %v3315_v50 = vadd.f32 %v3313_v47, %v3283_v30  ;;  %v3380_v21 = vstv %s8115_s14  ;;  %v3316_v2 = vadd.f32 %v3314_v56, %v3284_v38  ;;  %v3321_v46 = vadd.f32 %v3319_v24, %v3289_v22  ;;  %s8312_s14 = sld [smem:[#allocation7 + $0x2d]] }
 0x32a   :  { %v3322_v11 = vadd.f32 %v3320_v43, %v3290_v62  ;;  %v3327_v12 = vadd.f32 %v3325_v52, %v3295_v60  ;;  %v3328_v26 = vadd.f32 %v3326_v48, %v3296_v20  ;;  %v3333_v31 = vadd.f32 %v3331_v15, %v3301_v23 }
 0x32b   :  { %v3334_v54 = vadd.f32 %v3332_v7, %v3302_v18  ;;  %v3386_v33 = vstv %s8117_s3  ;;  %v3392_v27 = vstv %s8124_s25  ;;  %v3396_v53 = vstv %s8126_s9  ;;  %s8316_s3 = sld [smem:[#allocation7 + $0xe]]  ;;  %s8326_s25 = sld [smem:[#allocation7 + $0x12]] }
 0x32c   :  { %v3400_v10 = vstv %s8128_s11  ;;  %v3440_v41 = vstv %s8130_s13  ;;  %v3446_v29 = vstv %s8132_s4  ;;  %v3452_v40 = vstv %s8134_s20  ;;  %s8332_s9 = sld [smem:[#allocation7 + $0x16]]  ;;  %s9975_s20 = sld [smem:[#allocation107_spill]] }
 0x32d   :  { %v3512_v57 = vstv %s8139_s5  ;;  %v3518_v36 = vstv %s8141_s26  ;;  %v3524_v5 = vstv %s8143_s22  ;;  %v3584_v63 = vstv %s8145_s29  ;;  %s8334_s11 = sld [smem:[#allocation7 + $0x26]]  ;;  %s8399_s5 = sld [smem:[#allocation7 + $0x27]] }
 0x32e   :  { %v3590_v25 = vstv %s8149_s15  ;;  %v3596_v13 = vstv %s8151_s10  ;;  %v8189_v16 = vstv %s8156_s7  ;;  %v8192_v32 = vstv %s8158_s23  ;;  %s8364_s10 = sld [smem:[#allocation7 + $0x2a]]  ;;  %s8371_s7 = sld [smem:[#allocation7 + $0x2e]] }
 0x32f   :  { %v3339_v14 = vsel %vm3242_vm7, %v3336_v35, %v3338_v8  ;;  %v3340_v37 = vsel %vm3242_vm7, %v3338_v8, %v3336_v35  ;;  %v8199_v61 = vstv %s8160_s2  ;;  %v3404_v17 = vstv %s8162_s24  ;;  %s8494_s24 = sld [smem:[#allocation7 + $0x1c]]  ;;  %s8591_s26 = sld [smem:[#allocation7 + $0x40]] }
 0x330   :  { %v3341_v58 = vmul.f32 %v3339_v14, %v8078_v0  ;;  %v3342_v4 = vmul.f32 %v3340_v37, %v8080_v19  ;;  %v3408_v1 = vstv %s8164_s28  ;;  %v3412_v3 = vstv %s8166_s8  ;;  %s8499_s28 = sld [smem:[#allocation7 + $0x20]]  ;;  %s8501_s8 = sld [smem:[#allocation7 + $0x19]] }
 0x331   :  { %v3428_v49 = vstv %s8171_s0  ;;  %v3432_v30 = vstv %s8173_s27  ;;  %s8504_s0 = sld [smem:[#allocation7 + $0x1d]]  ;;  %s8506_s27 = sld [smem:[#allocation7 + $0x21]] }
 0x332   :  { %v3345_v51 = vmul.f32 %v3344_v44, %v3341_v58  ;;  %v3346_v42 = vmul.f32 %v3344_v44, %v3342_v4  ;;  %v3351_v38 = vmul.f32 %v3350_v6, %v3341_v58  ;;  %v3352_v22 = vmul.f32 %v3350_v6, %v3342_v4  ;;  %s8595_s22 = sld [smem:[#allocation7 + $0x54]]  ;;  %s8597_s29 = sld [smem:[#allocation7 + $0x58]] }
 0x333   :  { %v3357_v62 = vmul.f32 %v3356_v9, %v3341_v58  ;;  %v3358_v60 = vmul.f32 %v3356_v9, %v3342_v4  ;;  %v3363_v20 = vmul.f32 %v3362_v39, %v3341_v58  ;;  %v3364_v23 = vmul.f32 %v3362_v39, %v3342_v4  ;;  %s8599_s15 = sld [smem:[#allocation7 + $0x5c]]  ;;  %s8605_s23 = sld [smem:[#allocation7 + $0x45]] }
 0x334   :  { %v3347_v34 = vadd.f32 %v3345_v51, %v3315_v50  ;;  %v3348_v45 = vadd.f32 %v3346_v42, %v3316_v2  ;;  %v3353_v0 = vadd.f32 %v3351_v38, %v3321_v46  ;;  %v3354_v18 = vadd.f32 %v3352_v22, %v3322_v11  ;;  %s8607_s2 = sld [smem:[#allocation7 + $0x55]]  ;;  %s8609_s13 = sld [smem:[#allocation7 + $0x59]] }
 0x335   :  { %v3359_v19 = vadd.f32 %v3357_v62, %v3327_v12  ;;  %v3360_v47 = vadd.f32 %v3358_v60, %v3328_v26  ;;  %v3365_v56 = vadd.f32 %v3363_v20, %v3333_v31  ;;  %v3366_v24 = vadd.f32 %v3364_v23, %v3334_v54  ;;  %9977 = sst [smem:[#allocation24_spill]] %s8591_s26  ;;  %s8611_s4 = sld [smem:[#allocation7 + $0x5d]] }
 0x336   :  { %v3369_v43 = vadd.f32 %v3368_v28, %v3347_v34  ;;  %v3370_v52 = vadd.f32 %v3368_v28, %v3348_v45  ;;  %v3375_v48 = vadd.f32 %v3374_v59, %v3353_v0  ;;  %v3376_v15 = vadd.f32 %v3374_v59, %v3354_v18 }
 0x337   :  { %v3381_v7 = vadd.f32 %v3380_v21, %v3359_v19  ;;  %v3382_v44 = vadd.f32 %v3380_v21, %v3360_v47  ;;  %v3387_v8 = vadd.f32 %v3386_v33, %v3365_v56  ;;  %v3388_v6 = vadd.f32 %v3386_v33, %v3366_v24 }
 0x338   :  { %v8212_v35 = vmax.f32 %v3369_v43, 0.0  ;;  %v8214_v9 = vmax.f32 %v3370_v52, 0.0  ;;  %v8216_v39 = vmax.f32 %v3375_v48, 0.0  ;;  %v8218_v50 = vmax.f32 %v3376_v15, 0.0  ;;  %9979 = sst [smem:[#allocation26_spill]] %s8595_s22 }
 0x339   :  { %v8220_v2 = vmax.f32 %v3381_v7, 0.0  ;;  %v8222_v28 = vmax.f32 %v3382_v44, 0.0  ;;  %v8224_v59 = vmax.f32 %v3387_v8, 0.0  ;;  %v8226_v21 = vmax.f32 %v3388_v6, 0.0  ;;  %9980 = sst [smem:[#allocation27_spill]] %s8597_s29 }
 0x33a   :  { %v3393_v46 = vmul.f32 %v3392_v27, %v8212_v35  ;;  %v3394_v11 = vmul.f32 %v3392_v27, %v8214_v9  ;;  %v3397_v12 = vmul.f32 %v3396_v53, %v8212_v35  ;;  %v3398_v26 = vmul.f32 %v3396_v53, %v8214_v9  ;;  %3660 = vrot.lane.b32.xlu1 %v8214_v9, %s4955_s6  ;;  %9981 = sst [smem:[#allocation28_spill]] %s8599_s15 }
 0x33b   :  { %v3401_v31 = vmul.f32 %v3400_v10, %v8212_v35  ;;  %v3402_v54 = vmul.f32 %v3400_v10, %v8214_v9  ;;  %v3441_v33 = vmul.f32 %v3440_v41, %v8216_v39  ;;  %v3442_v14 = vmul.f32 %v3440_v41, %v8218_v50  ;;  %3658 = vrot.lane.b32.xlu0 %v8212_v35, %s4955_s6  ;;  %9984 = sst [smem:[#allocation31_spill]] %s8605_s23 }
 0x33c   :  { %v3447_v27 = vmul.f32 %v3446_v29, %v8216_v39  ;;  %v3448_v53 = vmul.f32 %v3446_v29, %v8218_v50  ;;  %v3453_v37 = vmul.f32 %v3452_v40, %v8216_v39  ;;  %v3454_v10 = vmul.f32 %v3452_v40, %v8218_v50  ;;  %9985 = sst [smem:[#allocation32_spill]] %s8607_s2 }
 0x33d   :  { %v3443_v41 = vadd.f32 %v3441_v33, %v3393_v46  ;;  %v3444_v58 = vadd.f32 %v3442_v14, %v3394_v11  ;;  %v3513_v29 = vmul.f32 %v3512_v57, %v8220_v2  ;;  %v3514_v4 = vmul.f32 %v3512_v57, %v8222_v28  ;;  %9986 = sst [smem:[#allocation33_spill]] %s8609_s13 }
 0x33e   :  { %v3449_v51 = vadd.f32 %v3447_v27, %v3397_v12  ;;  %v3450_v42 = vadd.f32 %v3448_v53, %v3398_v26  ;;  %v3455_v40 = vadd.f32 %v3453_v37, %v3401_v31  ;;  %v3456_v38 = vadd.f32 %v3454_v10, %v3402_v54  ;;  %3704 = vrot.lane.b32.xlu1 %v8218_v50, %s4955_s6  ;;  %9987 = sst [smem:[#allocation34_spill]] %s8611_s4 }
 0x33f   :  { %v3515_v22 = vadd.f32 %v3513_v29, %v3443_v41  ;;  %v3516_v62 = vadd.f32 %v3514_v4, %v3444_v58  ;;  %v3519_v60 = vmul.f32 %v3518_v36, %v8220_v2  ;;  %v3520_v20 = vmul.f32 %v3518_v36, %v8222_v28  ;;  %3702 = vrot.lane.b32.xlu0 %v8216_v39, %s4955_s6 }
 0x340   :  { %v3525_v57 = vmul.f32 %v3524_v5, %v8220_v2  ;;  %v3526_v23 = vmul.f32 %v3524_v5, %v8222_v28  ;;  %v3585_v34 = vmul.f32 %v3584_v63, %v8224_v59  ;;  %v3586_v45 = vmul.f32 %v3584_v63, %v8226_v21 }
 0x341   :  { %v3521_v36 = vadd.f32 %v3519_v60, %v3449_v51  ;;  %v3522_v0 = vadd.f32 %v3520_v20, %v3450_v42  ;;  %v3591_v18 = vmul.f32 %v3590_v25, %v8224_v59  ;;  %v3592_v19 = vmul.f32 %v3590_v25, %v8226_v21 }
 0x342   :  { %v3527_v5 = vadd.f32 %v3525_v57, %v3455_v40  ;;  %v3528_v47 = vadd.f32 %v3526_v23, %v3456_v38  ;;  %v3587_v56 = vadd.f32 %v3585_v34, %v3515_v22  ;;  %v3588_v63 = vadd.f32 %v3586_v45, %v3516_v62  ;;  %3748 = vrot.lane.b32.xlu1 %v8222_v28, %s4955_s6 }
 0x343   :  { %v3593_v24 = vadd.f32 %v3591_v18, %v3521_v36  ;;  %v3594_v43 = vadd.f32 %v3592_v19, %v3522_v0  ;;  %v3597_v25 = vmul.f32 %v3596_v13, %v8224_v59  ;;  %v3598_v52 = vmul.f32 %v3596_v13, %v8226_v21  ;;  %3746 = vrot.lane.b32.xlu0 %v8220_v2, %s4955_s6 }
 0x344   :  { %v4122_v48 = vadd.f32 %v8189_v16, %v3587_v56  ;;  %v4123_v15 = vadd.f32 %v8189_v16, %v3588_v63  ;;  %v3458_v7 = vstv %s8252_s16  ;;  %v3464_v44 = vstv %s8254_s30  ;;  %s8511_s16 = sld [smem:[#allocation7 + $0x1a]]  ;;  %s8513_s30 = sld [smem:[#allocation7 + $0x1e]] }
 0x345   :  { %v3599_v8 = vadd.f32 %v3597_v25, %v3527_v5  ;;  %v3600_v6 = vadd.f32 %v3598_v52, %v3528_v47  ;;  %v4130_v46 = vadd.f32 %v8192_v32, %v3593_v24  ;;  %v4131_v11 = vadd.f32 %v8192_v32, %v3594_v43 }
 0x346   :  { %v4124_v13 = vmax.f32 %v4122_v48, 0.0  ;;  %v4125_v12 = vmax.f32 %v4123_v15, 0.0  ;;  %3792 = vrot.lane.b32.xlu1 %v8226_v21, %s4955_s6  ;;  %v3406_v26 = vmul.f32 %v3404_v17, %v8214_v9  ;;  %v3410_v31 = vmul.f32 %v3408_v1, %v8214_v9 }
 0x347   :  { %v4132_v54 = vmax.f32 %v4130_v46, 0.0  ;;  %v4133_v33 = vmax.f32 %v4131_v11, 0.0  ;;  %v4139_v14 = vadd.f32 %v8199_v61, %v3599_v8  ;;  %v4140_v27 = vadd.f32 %v8199_v61, %v3600_v6  ;;  %3790 = vrot.lane.b32.xlu0 %v8224_v59, %s4955_s6  ;;  %s8593_s6 = sld [smem:[#allocation7 + $0x44]] }
 0x348   :  { %4126 = vst [vmem:[%s9975_s20] sm:$0xff] %v4124_v13  ;;  %4127 = vst [vmem:[%s9975_s20 + $0x8] sm:$0xff] %v4125_v12  ;;  %v3414_v53 = vmul.f32 %v3412_v3, %v8214_v9  ;;  %v3430_v37 = vmul.f32 %v3428_v49, %v8214_v9  ;;  %v3436_v10 = vstv %s8284_s21  ;;  %v3460_v41 = vmul.f32 %v3458_v7, %v8218_v50  ;;  %s8529_s21 = sld [smem:[#allocation7 + $0x22]] }
 0x349   :  { %4753 = vst [vmem:[%s9975_s20 + $0x10] sm:$0xff] %v4132_v54  ;;  %4754 = vst [vmem:[%s9975_s20 + $0x18] sm:$0xff] %v4133_v33  ;;  %v4141_v58 = vmax.f32 %v4139_v14, 0.0  ;;  %v4142_v29 = vmax.f32 %v4140_v27, 0.0  ;;  %v3434_v4 = vmul.f32 %v3432_v30, %v8214_v9  ;;  %v3466_v51 = vmul.f32 %v3464_v44, %v8218_v50 }
 0x34a   :  { %3839 = vrot.lane.b32.xlu1 %v8214_v9, %s4959_s19  ;;  %v3462_v42 = vadd.f32 %v3460_v41, %v3406_v26  ;;  %v3470_v40 = vstv %s8292_s18  ;;  %v3494_v38 = vstv %s8296_s17  ;;  %v3500_v22 = vstv %s8298_s1  ;;  %s8385_s18 = sld [smem:[#allocation7 + $0xf]]  ;;  %s8390_s17 = sld [smem:[#allocation7 + $0x13]] }
 0x34b   :  { %4756 = vst [vmem:[%s9975_s20 + $0x20] sm:$0xff] %v4141_v58  ;;  %4757 = vst [vmem:[%s9975_s20 + $0x28] sm:$0xff] %v4142_v29  ;;  %3837 = vrot.lane.b32.xlu0 %v8212_v35, %s4959_s19  ;;  %v3438_v62 = vmul.f32 %v3436_v10, %v8214_v9  ;;  %v3468_v60 = vadd.f32 %v3466_v51, %v3410_v31  ;;  %v3472_v20 = vmul.f32 %v3470_v40, %v8218_v50  ;;  %s8392_s1 = sld [smem:[#allocation7 + $0x17]]  ;;  %s8649_s20 = sld [smem:[#allocation7 + $0x7a]] }
 0x34c   :  { %v3496_v57 = vmul.f32 %v3494_v38, %v8218_v50  ;;  %v3502_v23 = vmul.f32 %v3500_v22, %v8218_v50  ;;  %v3506_v34 = vstv %s8312_s14  ;;  %v3530_v0 = vstv %s8316_s3  ;;  %s8406_s14 = sld [smem:[#allocation7 + $0x2b]]  ;;  %s8412_s3 = sld [smem:[#allocation7 + $0x2f]] }
 0x34d   :  { %v3474_v45 = vadd.f32 %v3472_v20, %v3414_v53  ;;  %v3508_v36 = vmul.f32 %v3506_v34, %v8218_v50  ;;  %v3532_v5 = vmul.f32 %v3530_v0, %v8222_v28  ;;  %v3536_v56 = vstv %s8326_s25  ;;  %s8531_s25 = sld [smem:[#allocation7 + $0x1b]]  ;;  %9978 = sst [smem:[#allocation25_spill]] %s8593_s6 }
 0x34e   :  { %3883 = vrot.lane.b32.xlu1 %v8218_v50, %s4959_s19  ;;  %v3498_v18 = vadd.f32 %v3496_v57, %v3430_v37  ;;  %v3504_v19 = vadd.f32 %v3502_v23, %v3434_v4  ;;  %v3542_v63 = vstv %s8332_s9  ;;  %v3566_v24 = vstv %s8334_s11  ;;  %s8536_s9 = sld [smem:[#allocation7 + $0x1f]]  ;;  %s8544_s11 = sld [smem:[#allocation7 + $0x23]] }
 0x34f   :  { %3881 = vrot.lane.b32.xlu0 %v8216_v39, %s4959_s19  ;;  %v3510_v47 = vadd.f32 %v3508_v36, %v3438_v62  ;;  %v3534_v43 = vadd.f32 %v3532_v5, %v3462_v42  ;;  %v3538_v25 = vmul.f32 %v3536_v56, %v8222_v28  ;;  %v3544_v52 = vmul.f32 %v3542_v63, %v8222_v28 }
 0x350   :  { %v3568_v48 = vmul.f32 %v3566_v24, %v8222_v28  ;;  %v3572_v15 = vstv %s8364_s10  ;;  %v3578_v46 = vstv %s8371_s7  ;;  %v3459_v11 = vmul.f32 %v3458_v7, %v8216_v39  ;;  %s8601_s10 = sld [smem:[#allocation7 + $0x3d]]  ;;  %s8603_s7 = sld [smem:[#allocation7 + $0x41]] }
 0x351   :  { %v3540_v8 = vadd.f32 %v3538_v25, %v3468_v60  ;;  %v3574_v6 = vmul.f32 %v3572_v15, %v8222_v28  ;;  %v3546_v13 = vadd.f32 %v3544_v52, %v3474_v45  ;;  %v3580_v26 = vmul.f32 %v3578_v46, %v8222_v28  ;;  %10006 = sst [smem:[#allocation53_spill]] %s8649_s20  ;;  %s8665_s20 = sld [smem:[#allocation9 + $0x2]] }
 0x352   :  { %3927 = vrot.lane.b32.xlu1 %v8222_v28, %s4959_s19  ;;  %v3570_v12 = vadd.f32 %v3568_v48, %v3498_v18  ;;  %v3602_v54 = vstv %s8385_s18  ;;  %v3608_v33 = vstv %s8390_s17  ;;  %v3614_v14 = vstv %s8392_s1  ;;  %s8613_s18 = sld [smem:[#allocation7 + $0x3e]]  ;;  %s8615_s17 = sld [smem:[#allocation7 + $0x42]] }
 0x353   :  { %3925 = vrot.lane.b32.xlu0 %v8220_v2, %s4959_s19  ;;  %v3576_v31 = vadd.f32 %v3574_v6, %v3504_v19  ;;  %v3465_v27 = vmul.f32 %v3464_v44, %v8216_v39  ;;  %v3471_v53 = vmul.f32 %v3470_v40, %v8216_v39  ;;  %v3582_v37 = vadd.f32 %v3580_v26, %v3510_v47  ;;  %s8617_s1 = sld [smem:[#allocation7 + $0x46]] }
 0x354   :  { %v3604_v41 = vmul.f32 %v3602_v54, %v8226_v21  ;;  %v3495_v7 = vmul.f32 %v3494_v38, %v8216_v39  ;;  %v3610_v58 = vmul.f32 %v3608_v33, %v8226_v21  ;;  %v3616_v29 = vmul.f32 %v3614_v14, %v8226_v21 }
 0x355   :  { %v3638_v4 = vstv %s8399_s5  ;;  %v3501_v44 = vmul.f32 %v3500_v22, %v8216_v39  ;;  %v3644_v40 = vstv %s8406_s14  ;;  %v3507_v62 = vmul.f32 %v3506_v34, %v8216_v39  ;;  %s8619_s5 = sld [smem:[#allocation7 + $0x56]]  ;;  %s8621_s14 = sld [smem:[#allocation7 + $0x5a]] }
 0x356   :  { %3971 = vrot.lane.b32.xlu1 %v8226_v21, %s4959_s19  ;;  %v8441_v51 = vadd.f32 %v3604_v41, %v3534_v43  ;;  %v3640_v42 = vmul.f32 %v3638_v4, %v8226_v21  ;;  %v8446_v60 = vadd.f32 %v3610_v58, %v3540_v8  ;;  %v8448_v38 = vadd.f32 %v3616_v29, %v3546_v13  ;;  %9982 = sst [smem:[#allocation29_spill]] %s8601_s10 }
 0x357   :  { %3969 = vrot.lane.b32.xlu0 %v8224_v59, %s4959_s19  ;;  %v3646_v20 = vmul.f32 %v3644_v40, %v8226_v21  ;;  %v3531_v57 = vmul.f32 %v3530_v0, %v8220_v2  ;;  %v3537_v22 = vmul.f32 %v3536_v56, %v8220_v2  ;;  %v3650_v45 = vstv %s8412_s3  ;;  %s8492_s19 = sld [smem:[#allocation7 + $0x18]]  ;;  %9983 = sst [smem:[#allocation30_spill]] %s8603_s7 }
 0x358   :  { %v8453_v23 = vadd.f32 %v3640_v42, %v3570_v12  ;;  %v3543_v34 = vmul.f32 %v3542_v63, %v8220_v2  ;;  %v3567_v36 = vmul.f32 %v3566_v24, %v8220_v2  ;;  %v3652_v0 = vmul.f32 %v3650_v45, %v8226_v21  ;;  %9988 = sst [smem:[#allocation35_spill]] %s8613_s18  ;;  %s8623_s3 = sld [smem:[#allocation7 + $0x5e]] }
 0x359   :  { %v8460_v18 = vadd.f32 %v3646_v20, %v3576_v31  ;;  %v3573_v19 = vmul.f32 %v3572_v15, %v8220_v2  ;;  %v3579_v5 = vmul.f32 %v3578_v46, %v8220_v2  ;;  %v3603_v47 = vmul.f32 %v3602_v54, %v8224_v59  ;;  %9989 = sst [smem:[#allocation36_spill]] %s8615_s17 }
 0x35a   :  { %4018 = vrot.lane.b32.xlu1 %v8214_v9, %s4960_s12  ;;  %v3405_v56 = vmul.f32 %v3404_v17, %v8212_v35  ;;  %v8471_v43 = vadd.f32 %v3652_v0, %v3582_v37  ;;  %v3409_v63 = vmul.f32 %v3408_v1, %v8212_v35  ;;  %v3413_v24 = vmul.f32 %v3412_v3, %v8212_v35  ;;  %9990 = sst [smem:[#allocation37_spill]] %s8617_s1 }
 0x35b   :  { %4016 = vrot.lane.b32.xlu0 %v8212_v35, %s4960_s12  ;;  %v3429_v25 = vmul.f32 %v3428_v49, %v8212_v35  ;;  %v3609_v52 = vmul.f32 %v3608_v33, %v8224_v59  ;;  %v3433_v48 = vmul.f32 %v3432_v30, %v8212_v35  ;;  %v3437_v15 = vmul.f32 %v3436_v10, %v8212_v35  ;;  %9991 = sst [smem:[#allocation38_spill]] %s8619_s5 }
 0x35c   :  { %v3461_v17 = vadd.f32 %v3459_v11, %v3405_v56  ;;  %v3615_v1 = vmul.f32 %v3614_v14, %v8224_v59  ;;  %v3467_v8 = vadd.f32 %v3465_v27, %v3409_v63  ;;  %v3473_v6 = vadd.f32 %v3471_v53, %v3413_v24  ;;  %9992 = sst [smem:[#allocation39_spill]] %s8621_s14 }
 0x35d   :  { %v3497_v3 = vadd.f32 %v3495_v7, %v3429_v25  ;;  %v3639_v49 = vmul.f32 %v3638_v4, %v8224_v59  ;;  %v3503_v30 = vadd.f32 %v3501_v44, %v3433_v48  ;;  %v3509_v10 = vadd.f32 %v3507_v62, %v3437_v15  ;;  %10012 = sst [smem:[#allocation59_spill]] %s8665_s20  ;;  %s8680_s20 = sld [smem:[#allocation7 + $0x89]] }
 0x35e   :  { %4044 = vrot.lane.b32.xlu1 %v8218_v50, %s4960_s12  ;;  %v3533_v46 = vadd.f32 %v3531_v57, %v3461_v17  ;;  %v3645_v11 = vmul.f32 %v3644_v40, %v8224_v59  ;;  %v3539_v13 = vadd.f32 %v3537_v22, %v3467_v8  ;;  %v3545_v12 = vadd.f32 %v3543_v34, %v3473_v6  ;;  %9993 = sst [smem:[#allocation40_spill]] %s8623_s3 }
 0x35f   :  { %4042 = vrot.lane.b32.xlu0 %v8216_v39, %s4960_s12  ;;  %v3569_v26 = vadd.f32 %v3567_v36, %v3497_v3  ;;  %v3651_v31 = vmul.f32 %v3650_v45, %v8224_v59  ;;  %v3575_v54 = vadd.f32 %v3573_v19, %v3503_v30  ;;  %v3581_v33 = vadd.f32 %v3579_v5, %v3509_v10 }
 0x360   :  { %v8509_v14 = vadd.f32 %v3603_v47, %v3533_v46  ;;  %v8517_v27 = vadd.f32 %v3609_v52, %v3539_v13  ;;  %v8519_v53 = vadd.f32 %v3615_v1, %v3545_v12  ;;  %v3416_v58 = vstv %s8492_s19  ;;  %s8625_s19 = sld [smem:[#allocation7 + $0x3f]] }
 0x361   :  { %v8521_v37 = vadd.f32 %v3639_v49, %v3569_v26  ;;  %v8525_v41 = vadd.f32 %v3645_v11, %v3575_v54  ;;  %v8527_v7 = vadd.f32 %v3651_v31, %v3581_v33  ;;  %v3418_v29 = vmul.f32 %v3416_v58, %v8214_v9 }
 0x362   :  { %4070 = vrot.lane.b32.xlu1 %v8222_v28, %s4960_s12  ;;  %v3420_v4 = vstv %s8494_s24  ;;  %v3424_v44 = vstv %s8499_s28  ;;  %v3476_v42 = vstv %s8501_s8  ;;  %s8627_s24 = sld [smem:[#allocation7 + $0x43]]  ;;  %s8629_s28 = sld [smem:[#allocation7 + $0x47]] }
 0x363   :  { %4068 = vrot.lane.b32.xlu0 %v8220_v2, %s4960_s12  ;;  %v3422_v40 = vmul.f32 %v3420_v4, %v8214_v9  ;;  %v3426_v62 = vmul.f32 %v3424_v44, %v8214_v9  ;;  %v3478_v20 = vmul.f32 %v3476_v42, %v8218_v50  ;;  %v3482_v57 = vstv %s8504_s0  ;;  %s8631_s8 = sld [smem:[#allocation7 + $0x57]]  ;;  %s8633_s0 = sld [smem:[#allocation7 + $0x5b]] }
 0x364   :  { %v3488_v22 = vstv %s8506_s27  ;;  %v3548_v45 = vstv %s8511_s16  ;;  %v3554_v34 = vstv %s8513_s30  ;;  %v3484_v0 = vmul.f32 %v3482_v57, %v8218_v50  ;;  %s8635_s27 = sld [smem:[#allocation7 + $0x5f]]  ;;  %s8637_s16 = sld [smem:[#allocation7 + $0x78]] }
 0x365   :  { %v3480_v36 = vadd.f32 %v3478_v20, %v3418_v29  ;;  %v3490_v19 = vmul.f32 %v3488_v22, %v8218_v50  ;;  %v3550_v5 = vmul.f32 %v3548_v45, %v8222_v28  ;;  %v3556_v56 = vmul.f32 %v3554_v34, %v8222_v28  ;;  %s8639_s30 = sld [smem:[#allocation7 + $0x7c]] }
 0x366   :  { %4096 = vrot.lane.b32.xlu1 %v8226_v21, %s4960_s12  ;;  %v3486_v47 = vadd.f32 %v3484_v0, %v3422_v40  ;;  %v3560_v63 = vstv %s8529_s21  ;;  %v3620_v9 = vstv %s8531_s25  ;;  %v3626_v17 = vstv %s8536_s9  ;;  %9994 = sst [smem:[#allocation41_spill]] %s8625_s19  ;;  %s8641_s21 = sld [smem:[#allocation7 + $0x80]] }
 0x367   :  { %4094 = vrot.lane.b32.xlu0 %v8224_v59, %s4960_s12  ;;  %v3492_v24 = vadd.f32 %v3490_v19, %v3426_v62  ;;  %v3552_v25 = vadd.f32 %v3550_v5, %v3480_v36  ;;  %v3562_v52 = vmul.f32 %v3560_v63, %v8222_v28  ;;  %v3622_v15 = vmul.f32 %v3620_v9, %v8226_v21  ;;  %s8589_s12 = sld [smem:[#allocation7 + $0x3c]]  ;;  %s8643_s25 = sld [smem:[#allocation7 + $0x79]] }
 0x368   :  { %v3558_v48 = vadd.f32 %v3556_v56, %v3486_v47  ;;  %v3477_v1 = vmul.f32 %v3476_v42, %v8216_v39  ;;  %v3628_v50 = vmul.f32 %v3626_v17, %v8226_v21  ;;  %v3632_v6 = vstv %s8544_s11  ;;  %9995 = sst [smem:[#allocation42_spill]] %s8627_s24  ;;  %s8645_s9 = sld [smem:[#allocation7 + $0x7d]] }
 0x369   :  { %v3564_v8 = vadd.f32 %v3562_v52, %v3492_v24  ;;  %v3483_v3 = vmul.f32 %v3482_v57, %v8216_v39  ;;  %v3489_v49 = vmul.f32 %v3488_v22, %v8216_v39  ;;  %v8567_v30 = vadd.f32 %v3622_v15, %v3552_v25  ;;  %9996 = sst [smem:[#allocation43_spill]] %s8629_s28  ;;  %s8647_s11 = sld [smem:[#allocation7 + $0x81]] }
 0x36a   :  { %v3634_v10 = vmul.f32 %v3632_v6, %v8226_v21  ;;  %v8570_v46 = vadd.f32 %v3628_v50, %v3558_v48  ;;  %v3417_v28 = vmul.f32 %v3416_v58, %v8212_v35  ;;  %v3421_v13 = vmul.f32 %v3420_v4, %v8212_v35  ;;  %9997 = sst [smem:[#allocation44_spill]] %s8631_s8  ;;  %s8728_s28 = sld [smem:[#allocation7 + $0xb9]] }
 0x36b   :  { %v3425_v12 = vmul.f32 %v3424_v44, %v8212_v35  ;;  %v3549_v26 = vmul.f32 %v3548_v45, %v8220_v2  ;;  %v3555_v54 = vmul.f32 %v3554_v34, %v8220_v2  ;;  %v3561_v39 = vmul.f32 %v3560_v63, %v8220_v2  ;;  %9998 = sst [smem:[#allocation45_spill]] %s8633_s0  ;;  %s8651_s0 = sld [smem:[#allocation7 + $0x7e]] }
 0x36c   :  { %v8573_v11 = vadd.f32 %v3634_v10, %v3564_v8  ;;  %v3479_v31 = vadd.f32 %v3477_v1, %v3417_v28  ;;  %v3485_v33 = vadd.f32 %v3483_v3, %v3421_v13  ;;  %v3621_v21 = vmul.f32 %v3620_v9, %v8224_v59  ;;  %9999 = sst [smem:[#allocation46_spill]] %s8635_s27  ;;  %s8657_s27 = sld [smem:[#allocation7 + $0x7f]] }
 0x36d   :  { %v3491_v29 = vadd.f32 %v3489_v49, %v3425_v12  ;;  %v3627_v58 = vmul.f32 %v3626_v17, %v8224_v59  ;;  %v3633_v40 = vmul.f32 %v3632_v6, %v8224_v59  ;;  %9976 = sst [smem:[#allocation23_spill]] %s8589_s12  ;;  %v3667_v2 = vstv %s8589_s12  ;;  %s8688_s12 = sld [smem:[#allocation7 + $0x86]] }
 0x36e   :  { %v3551_v42 = vadd.f32 %v3549_v26, %v3479_v31  ;;  %v3557_v62 = vadd.f32 %v3555_v54, %v3485_v33  ;;  %10000 = sst [smem:[#allocation47_spill]] %s8637_s16  ;;  %s8653_s16 = sld [smem:[#allocation7 + $0x82]]  ;;  %v3673_v59 = vstv %s8591_s26  ;;  %v3679_v57 = vstv %s8593_s6 }
 0x36f   :  { %v3563_v4 = vadd.f32 %v3561_v39, %v3491_v29  ;;  %10001 = sst [smem:[#allocation48_spill]] %s8639_s30  ;;  %s8655_s30 = sld [smem:[#allocation7 + $0x7b]]  ;;  %v3685_v22 = vstv %s8595_s22  ;;  %v3691_v45 = vstv %s8597_s29  ;;  %v3697_v34 = vstv %s8599_s15 }
 0x370   :  { %v8583_v20 = vadd.f32 %v3621_v21, %v3551_v42  ;;  %v8585_v35 = vadd.f32 %v3627_v58, %v3557_v62  ;;  %10002 = sst [smem:[#allocation49_spill]] %s8641_s21  ;;  %s8669_s21 = sld [smem:[#allocation7 + $0x88]]  ;;  %v3711_v36 = vstv %s8601_s10  ;;  %v3717_v0 = vstv %s8603_s7  ;;  %v8750_v58 = vld [vmem:[#allocation12 + $0x10] sm:$0xff] }
 0x371   :  { %v8587_v44 = vadd.f32 %v3633_v40, %v3563_v4  ;;  %10003 = sst [smem:[#allocation50_spill]] %s8643_s25  ;;  %s8659_s25 = sld [smem:[#allocation7 + $0x83]]  ;;  %v3723_v19 = vstv %s8605_s23  ;;  %v3729_v5 = vstv %s8607_s2  ;;  %v3735_v47 = vstv %s8609_s13  ;;  %v8752_v40 = vld [vmem:[#allocation12 + $0x18] sm:$0xff] }
 0x372   :  { %10004 = sst [smem:[#allocation51_spill]] %s8645_s9  ;;  %s8661_s9 = sld [smem:[#allocation9]]  ;;  %v3741_v56 = vstv %s8611_s4  ;;  %v3755_v63 = vstv %s8613_s18  ;;  %v3761_v9 = vstv %s8615_s17  ;;  %v3767_v24 = vstv %s8617_s1 }
 0x373   :  { %10005 = sst [smem:[#allocation52_spill]] %s8647_s11  ;;  %s8663_s11 = sld [smem:[#allocation9 + $0x1]]  ;;  %v3773_v25 = vstv %s8619_s5  ;;  %v3779_v52 = vstv %s8621_s14  ;;  %v3799_v15 = vstv %s8625_s19  ;;  %v3805_v17 = vstv %s8627_s24 }
 0x374   :  { %10007 = sst [smem:[#allocation54_spill]] %s8651_s0  ;;  %s8667_s0 = sld [smem:[#allocation7 + $0x84]] }
 0x375   :  { %10008 = sst [smem:[#allocation55_spill]] %s8653_s16  ;;  %s8690_s6 = sld [smem:[#allocation7 + $0x8a]] }
 0x376   :  { %10009 = sst [smem:[#allocation56_spill]] %s8655_s30  ;;  %s8696_s22 = sld [smem:[#allocation7 + $0x8e]] }
 0x377   :  { %10010 = sst [smem:[#allocation57_spill]] %s8657_s27  ;;  %s8672_s27 = sld [smem:[#allocation7 + $0x8c]] }
 0x378   :  { %10011 = sst [smem:[#allocation58_spill]] %s8659_s25  ;;  %s8674_s25 = sld [smem:[#allocation7 + $0x85]]  ;;  %v8744_v21 = vstv %s8661_s9 }
 0x379   :  { %s8698_s10 = sld [smem:[#allocation7 + $0x87]]  ;;  %s10020_s23 = sld [smem:[#allocation48_spill]]  ;;  %v8755_v62 = vstv %s8663_s11 }
 0x37a   :  { %10013 = sst [smem:[#allocation60_spill]] %s8667_s0  ;;  %s8682_s0 = sld [smem:[#allocation7 + $0x8d]] }
 0x37b   :  { %10014 = sst [smem:[#allocation61_spill]] %s8690_s6  ;;  %s10021_s26 = sld [smem:[#allocation49_spill]] }
 0x37c   :  { %10016 = sst [smem:[#allocation62_spill]] %s8696_s22  ;;  %s8704_s6 = sld [smem:[#allocation7 + $0x8b]] }
 0x37d   :  { %s10023_s2 = sld [smem:[#allocation50_spill]]  ;;  %s8706_s13 = sld [smem:[#allocation7 + $0x8f]] }
 0x37e   :  { %s10024_s4 = sld [smem:[#allocation51_spill]]  ;;  %s8714_s1 = sld [smem:[#allocation7 + $0xb8]] }
 0x37f   :  { %10018 = sst [smem:[#allocation63_spill]] %s8698_s10  ;;  %s8712_s10 = sld [smem:[#allocation7 + $0xb4]] }
 0x380   :  { %s8720_s5 = sld [smem:[#allocation7 + $0xbc]]  ;;  %s8722_s19 = sld [smem:[#allocation7 + $0xb5]] }
 0x381   :  { %s8730_s24 = sld [smem:[#allocation7 + $0xbd]]  ;;  %s10030_s15 = sld [smem:[#allocation59_spill]] }
 0x382   :  { %10022 = sst [smem:[#allocation64_spill]] %s8704_s6  ;;  %s10031_s29 = sld [smem:[#allocation60_spill]] }
 0x383   :  { %s8736_s8 = sld [smem:[#allocation7 + $0xb6]]  ;;  %s8738_s7 = sld [smem:[#allocation7 + $0xba]] }
 0x384   :  { %s8746_s18 = sld [smem:[#allocation7 + $0xbe]]  ;;  %s8748_s22 = sld [smem:[#allocation7 + $0xb7]] }
 0x385   :  { %s10035_s16 = sld [smem:[#allocation61_spill]]  ;;  %s10037_s9 = sld [smem:[#allocation63_spill]] }
 0x386   :  { %s8762_s14 = sld [smem:[#allocation7 + $0xbb]]  ;;  %s8764_s30 = sld [smem:[#allocation7 + $0xbf]] }
 0x387   :  { %v8758_v4 = vstv %s10030_s15  ;;  %s10059_s17 = sld [smem:[#allocation43_spill]]  ;;  %s10060_s15 = sld [smem:[#allocation40_spill]] }
 0x388   :  { %s10063_s6 = sld [smem:[#allocation47_spill]]  ;;  %s10066_s3 = sld [smem:[#allocation44_spill]] }
 0x389   :  { %10032 = sst [smem:[#allocation65_spill]] %s8738_s7  ;;  %s10082_s7 = sld [smem:[#allocation52_spill]] }
 0x38a   :  { %10033 = sst [smem:[#allocation66_spill]] %s8746_s18  ;;  %s10084_s18 = sld [smem:[#allocation54_spill]] }
 0x38b   :  { %10034 = sst [smem:[#allocation67_spill]] %s8748_s22  ;;  %s10073_s22 = sld [smem:[#allocation46_spill]] }
 0x38c   :  { %10038 = sst [smem:[#allocation68_spill]] %s8762_s14  ;;  %s10067_s14 = sld [smem:[#allocation45_spill]] }
 0x38d   :  { %10039 = sst [smem:[#allocation69_spill]] %s8764_s30 }
 0x3ac   :  { %v3661_v42 = vpop.permute.xlu1 %3660 }
 0x3ad   :  { %v3659_v39 = vpop.permute.xlu0 %3658 }
 0x3ae   :  { %v3662_v29 = vsel %vm1790_vm12, %v3659_v39, %v3661_v42  ;;  %v3663_v33 = vsel %vm1790_vm12, %v3661_v42, %v3659_v39 }
 0x3af   :  { %v3664_v54 = vmul.f32 %v3662_v29, %v8750_v58  ;;  %v3665_v31 = vmul.f32 %v3663_v33, %v8752_v40 }
 0x3b0   :  { %v3705_v6 = vpop.permute.xlu1 %3704 }
 0x3b1   :  { %v3668_v29 = vmul.f32 %v3667_v2, %v3664_v54  ;;  %v3669_v33 = vmul.f32 %v3667_v2, %v3665_v31  ;;  %v3703_v13 = vpop.permute.xlu0 %3702  ;;  %v3674_v42 = vmul.f32 %v3673_v59, %v3664_v54  ;;  %v3675_v28 = vmul.f32 %v3673_v59, %v3665_v31 }
 0x3b2   :  { %v3680_v48 = vmul.f32 %v3679_v57, %v3664_v54  ;;  %v3681_v2 = vmul.f32 %v3679_v57, %v3665_v31  ;;  %v3686_v39 = vmul.f32 %v3685_v22, %v3664_v54  ;;  %v3687_v50 = vmul.f32 %v3685_v22, %v3665_v31 }
 0x3b3   :  { %v3670_v49 = vadd.f32 %v3668_v29, %v8509_v14  ;;  %v3671_v10 = vadd.f32 %v3669_v33, %v8441_v51  ;;  %v3692_v3 = vmul.f32 %v3691_v45, %v3664_v54  ;;  %v3693_v8 = vmul.f32 %v3691_v45, %v3665_v31 }
 0x3b4   :  { %v3749_v1 = vpop.permute.xlu1 %3748  ;;  %v3706_v57 = vsel %vm1790_vm12, %v3703_v13, %v3705_v6  ;;  %v3707_v26 = vsel %vm1790_vm12, %v3705_v6, %v3703_v13  ;;  %v3676_v51 = vadd.f32 %v3674_v42, %v8517_v27  ;;  %v3677_v14 = vadd.f32 %v3675_v28, %v8446_v60 }
 0x3b5   :  { %v3747_v59 = vpop.permute.xlu0 %3746  ;;  %v3698_v22 = vmul.f32 %v3697_v34, %v3664_v54  ;;  %v3699_v29 = vmul.f32 %v3697_v34, %v3665_v31  ;;  %v3708_v33 = vmul.f32 %v3706_v57, %v8750_v58  ;;  %v3709_v45 = vmul.f32 %v3707_v26, %v8752_v40 }
 0x3b6   :  { %v3750_v12 = vsel %vm1790_vm12, %v3747_v59, %v3749_v1  ;;  %v3751_v6 = vsel %vm1790_vm12, %v3749_v1, %v3747_v59  ;;  %v3682_v60 = vadd.f32 %v3680_v48, %v8519_v53  ;;  %v3683_v27 = vadd.f32 %v3681_v2, %v8448_v38 }
 0x3b7   :  { %v3688_v34 = vadd.f32 %v3686_v39, %v8521_v37  ;;  %v3689_v28 = vadd.f32 %v3687_v50, %v8453_v23  ;;  %v3694_v13 = vadd.f32 %v3692_v3, %v8525_v41  ;;  %v3695_v26 = vadd.f32 %v3693_v8, %v8460_v18 }
 0x3b8   :  { %v3712_v31 = vmul.f32 %v3711_v36, %v3708_v33  ;;  %v3713_v1 = vmul.f32 %v3711_v36, %v3709_v45  ;;  %v3700_v53 = vadd.f32 %v3698_v22, %v8527_v7  ;;  %v3701_v38 = vadd.f32 %v3699_v29, %v8471_v43  ;;  %v3793_v43 = vpop.permute.xlu1 %3792 }
 0x3b9   :  { %v8845_v23 = vmul.f32 %v3750_v12, %v8750_v58  ;;  %v8848_v37 = vmul.f32 %v3751_v6, %v8752_v40  ;;  %v3718_v18 = vmul.f32 %v3717_v0, %v3708_v33  ;;  %v3719_v41 = vmul.f32 %v3717_v0, %v3709_v45  ;;  %v3791_v48 = vpop.permute.xlu0 %3790 }
 0x3ba   :  { %v3724_v7 = vmul.f32 %v3723_v19, %v3708_v33  ;;  %v3725_v36 = vmul.f32 %v3723_v19, %v3709_v45  ;;  %v3714_v8 = vadd.f32 %v3712_v31, %v3670_v49  ;;  %v3715_v50 = vadd.f32 %v3713_v1, %v3671_v10 }
 0x3bb   :  { %v3730_v3 = vmul.f32 %v3729_v5, %v3708_v33  ;;  %v3731_v12 = vmul.f32 %v3729_v5, %v3709_v45  ;;  %v3736_v54 = vmul.f32 %v3735_v47, %v3708_v33  ;;  %v3737_v39 = vmul.f32 %v3735_v47, %v3709_v45 }
 0x3bc   :  { %v3742_v42 = vmul.f32 %v3741_v56, %v3708_v33  ;;  %v3743_v0 = vmul.f32 %v3741_v56, %v3709_v45  ;;  %v3756_v19 = vmul.f32 %v3755_v63, %v8845_v23  ;;  %v3757_v49 = vmul.f32 %v3755_v63, %v8848_v37 }
 0x3bd   :  { %v3762_v10 = vmul.f32 %v3761_v9, %v8845_v23  ;;  %v3763_v5 = vmul.f32 %v3761_v9, %v8848_v37  ;;  %v3720_v2 = vadd.f32 %v3718_v18, %v3676_v51  ;;  %v3721_v47 = vadd.f32 %v3719_v41, %v3677_v14  ;;  %v3840_v14 = vpop.permute.xlu1 %3839  ;;  %v3838_v6 = vpop.permute.xlu0 %3837  ;;  %v8922_v18 = vld [vmem:[#allocation12 + $0x28] sm:$0xff] }
 0x3be   :  { %v3726_v59 = vadd.f32 %v3724_v7, %v3682_v60  ;;  %v3727_v57 = vadd.f32 %v3725_v36, %v3683_v27  ;;  %v8882_v56 = vadd.f32 %v3730_v3, %v3688_v34  ;;  %v8884_v22 = vadd.f32 %v3731_v12, %v3689_v28 }
 0x3bf   :  { %v8886_v29 = vadd.f32 %v3736_v54, %v3694_v13  ;;  %v8888_v33 = vadd.f32 %v3737_v39, %v3695_v26  ;;  %v8890_v63 = vadd.f32 %v3742_v42, %v3700_v53  ;;  %v8892_v45 = vadd.f32 %v3743_v0, %v3701_v38  ;;  %v8920_v38 = vld [vmem:[#allocation12 + $0x20] sm:$0xff] }
 0x3c0   :  { %v3768_v9 = vmul.f32 %v3767_v24, %v8845_v23  ;;  %v3769_v51 = vmul.f32 %v3767_v24, %v8848_v37  ;;  %v3758_v60 = vadd.f32 %v3756_v19, %v3714_v8  ;;  %v3759_v27 = vadd.f32 %v3757_v49, %v3715_v50 }
 0x3c1   :  { %v3764_v34 = vadd.f32 %v3762_v10, %v3720_v2  ;;  %v3765_v28 = vadd.f32 %v3763_v5, %v3721_v47  ;;  %v8903_v13 = vmul.f32 %v3773_v25, %v8845_v23  ;;  %v8908_v26 = vmul.f32 %v3773_v25, %v8848_v37  ;;  %v3884_v0 = vpop.permute.xlu1 %3883 }
 0x3c2   :  { %v3794_v24 = vsel %vm1790_vm12, %v3791_v48, %v3793_v43  ;;  %v3795_v31 = vsel %vm1790_vm12, %v3793_v43, %v3791_v48  ;;  %v3841_v25 = vsel %vm2318_vm0, %v3838_v6, %v3840_v14  ;;  %v3842_v41 = vsel %vm2318_vm0, %v3840_v14, %v3838_v6 }
 0x3c3   :  { %v8915_v1 = vmul.f32 %v3794_v24, %v8750_v58  ;;  %v8918_v53 = vmul.f32 %v3795_v31, %v8752_v40  ;;  %v3770_v7 = vadd.f32 %v3768_v9, %v3726_v59  ;;  %v3771_v36 = vadd.f32 %v3769_v51, %v3727_v57 }
 0x3c4   :  { %v8931_v43 = vmul.f32 %v3779_v52, %v8845_v23  ;;  %v8936_v58 = vmul.f32 %v3779_v52, %v8848_v37  ;;  %v10061_v3 = vstv %s10059_s17  ;;  %v8957_v39 = vmul.f32 %v3841_v25, %v8920_v38  ;;  %s10072_s17 = sld [smem:[#allocation107_spill]] }
 0x3c5   :  { %v3800_v40 = vmul.f32 %v3799_v15, %v8915_v1  ;;  %v3801_v48 = vmul.f32 %v3799_v15, %v8918_v53  ;;  %v3806_v8 = vmul.f32 %v3805_v17, %v8915_v1  ;;  %v3807_v50 = vmul.f32 %v3805_v17, %v8918_v53  ;;  %v3882_v15 = vpop.permute.xlu0 %3881 }
 0x3c6   :  { %v3812_v12 = vmul.f32 %v10061_v3, %v8915_v1  ;;  %v10062_v54 = vmov %v10061_v3  ;;  %v8960_v42 = vmul.f32 %v3842_v41, %v8922_v18  ;;  %v10064_v17 = vstv %s10060_s15 }
 0x3c7   :  { %v3813_v52 = vmul.f32 %v10062_v54, %v8918_v53  ;;  %v3802_v19 = vadd.f32 %v3800_v40, %v3758_v60  ;;  %v3803_v49 = vadd.f32 %v3801_v48, %v3759_v27  ;;  %v3808_v10 = vadd.f32 %v3806_v8, %v3764_v34  ;;  %v3928_v48 = vpop.permute.xlu1 %3927 }
 0x3c8   :  { %v3809_v5 = vadd.f32 %v3807_v50, %v3765_v28  ;;  %v8965_v2 = vmul.f32 %v10064_v17, %v8845_v23  ;;  %v10065_v47 = vmov %v10064_v17  ;;  %v3814_v57 = vadd.f32 %v3812_v12, %v3770_v7 }
 0x3c9   :  { %v8970_v59 = vmul.f32 %v10065_v47, %v8848_v37  ;;  %v3815_v9 = vadd.f32 %v3813_v52, %v3771_v36  ;;  %v4148_v51 = vadd.f32 %v8189_v16, %v3802_v19  ;;  %v4149_v14 = vadd.f32 %v8189_v16, %v3803_v49  ;;  %v3926_v8 = vpop.permute.xlu0 %3925 }
 0x3ca   :  { %v3885_v6 = vsel %vm2318_vm0, %v3882_v15, %v3884_v0  ;;  %v3886_v60 = vsel %vm2318_vm0, %v3884_v0, %v3882_v15  ;;  %v4157_v23 = vadd.f32 %v8192_v32, %v3808_v10  ;;  %v4158_v27 = vadd.f32 %v8192_v32, %v3809_v5 }
 0x3cb   :  { %v4166_v37 = vadd.f32 %v8199_v61, %v3814_v57  ;;  %v4167_v34 = vadd.f32 %v8199_v61, %v3815_v9  ;;  %v4150_v28 = vmax.f32 %v4148_v51, 0.0  ;;  %v4151_v16 = vmax.f32 %v4149_v14, 0.0 }
 0x3cc   :  { %v10068_v24 = vstv %s10063_s6  ;;  %v4159_v7 = vmax.f32 %v4157_v23, 0.0  ;;  %v4160_v36 = vmax.f32 %v4158_v27, 0.0  ;;  %v10070_v61 = vstv %s10066_s3 }
 0x3cd   :  { %v3847_v31 = vmul.f32 %v10068_v24, %v8957_v39  ;;  %v10069_v25 = vmov %v10068_v24  ;;  %v4168_v40 = vmax.f32 %v4166_v37, 0.0  ;;  %v4169_v32 = vmax.f32 %v4167_v34, 0.0  ;;  %4758 = vst [vmem:[%s10072_s17 + $0x30] sm:$0xff] %v4150_v28  ;;  %4759 = vst [vmem:[%s10072_s17 + $0x38] sm:$0xff] %v4151_v16 }
 0x3ce   :  { %v3848_v41 = vmul.f32 %v10069_v25, %v8960_v42  ;;  %v8991_v50 = vmul.f32 %v10070_v61, %v8915_v1  ;;  %v10071_v3 = vmov %v10070_v61  ;;  %v10074_v54 = vstv %s10020_s23  ;;  %4761 = vst [vmem:[%s10072_s17 + $0x40] sm:$0xff] %v4159_v7  ;;  %4762 = vst [vmem:[%s10072_s17 + $0x48] sm:$0xff] %v4160_v36 }
 0x3cf   :  { %v8996_v12 = vmul.f32 %v10071_v3, %v8918_v53  ;;  %v3853_v52 = vmul.f32 %v10074_v54, %v8957_v39  ;;  %v10075_v0 = vmov %v10074_v54  ;;  %v10076_v19 = vstv %s10067_s14  ;;  %4764 = vst [vmem:[%s10072_s17 + $0x50] sm:$0xff] %v4168_v40  ;;  %4765 = vst [vmem:[%s10072_s17 + $0x58] sm:$0xff] %v4169_v32  ;;  %s10100_s14 = sld [smem:[#allocation58_spill]] }
 0x3d0   :  { %v3854_v15 = vmul.f32 %v10075_v0, %v8960_v42  ;;  %v9013_v49 = vmul.f32 %v10076_v19, %v8915_v1  ;;  %v10077_v10 = vmov %v10076_v19  ;;  %v9033_v17 = vmul.f32 %v3885_v6, %v8920_v38 }
 0x3d1   :  { %v9018_v5 = vmul.f32 %v10077_v10, %v8918_v53  ;;  %v9036_v47 = vmul.f32 %v3886_v60, %v8922_v18  ;;  %v10078_v57 = vstv %s10021_s26  ;;  %v3929_v23 = vsel %vm2318_vm0, %v3926_v8, %v3928_v48  ;;  %s10083_s26 = sld [smem:[#allocation53_spill]] }
 0x3d2   :  { %v3859_v9 = vmul.f32 %v10078_v57, %v8957_v39  ;;  %v10079_v51 = vmov %v10078_v57  ;;  %v3930_v27 = vsel %vm2318_vm0, %v3928_v48, %v3926_v8  ;;  %v10080_v37 = vstv %s10073_s22  ;;  %s10089_s22 = sld [smem:[#allocation55_spill]] }
 0x3d3   :  { %v3860_v14 = vmul.f32 %v10079_v51, %v8960_v42  ;;  %v9051_v34 = vmul.f32 %v10080_v37, %v8915_v1  ;;  %v10081_v6 = vmov %v10080_v37  ;;  %v3849_v28 = vadd.f32 %v3847_v31, %v8583_v20 }
 0x3d4   :  { %v9056_v60 = vmul.f32 %v10081_v6, %v8918_v53  ;;  %v3850_v16 = vadd.f32 %v3848_v41, %v8567_v30  ;;  %v3855_v24 = vadd.f32 %v3853_v52, %v8585_v35  ;;  %v3856_v25 = vadd.f32 %v3854_v15, %v8570_v46  ;;  %v3972_v46 = vpop.permute.xlu1 %3971  ;;  %v3970_v41 = vpop.permute.xlu0 %3969 }
 0x3d5   :  { %v10085_v1 = vstv %s10023_s2  ;;  %v10087_v40 = vstv %s10024_s4  ;;  %v9075_v30 = vmul.f32 %v3929_v23, %v8920_v38  ;;  %v9078_v35 = vmul.f32 %v3930_v27, %v8922_v18  ;;  %s10096_s2 = sld [smem:[#allocation56_spill]]  ;;  %s10097_s4 = sld [smem:[#allocation57_spill]] }
 0x3d6   :  { %v3891_v7 = vmul.f32 %v10085_v1, %v9033_v17  ;;  %v10086_v36 = vmov %v10085_v1  ;;  %v3897_v32 = vmul.f32 %v10087_v40, %v9033_v17  ;;  %v10088_v20 = vmov %v10087_v40 }
 0x3d7   :  { %v3892_v53 = vmul.f32 %v10086_v36, %v9036_v47  ;;  %v3898_v31 = vmul.f32 %v10088_v20, %v9036_v47  ;;  %v3861_v48 = vadd.f32 %v3859_v9, %v8587_v44  ;;  %v3862_v8 = vadd.f32 %v3860_v14, %v8573_v11 }
 0x3d8   :  { %v10090_v61 = vstv %s10082_s7  ;;  %v10092_v0 = vstv %s10083_s26  ;;  %v10094_v57 = vstv %s10084_s18  ;;  %v3893_v9 = vadd.f32 %v3891_v7, %v3849_v28 }
 0x3d9   :  { %v3903_v3 = vmul.f32 %v10090_v61, %v9033_v17  ;;  %v10091_v54 = vmov %v10090_v61  ;;  %v3935_v15 = vmul.f32 %v10092_v0, %v9075_v30  ;;  %v10093_v19 = vmov %v10092_v0 }
 0x3da   :  { %v3904_v52 = vmul.f32 %v10091_v54, %v9036_v47  ;;  %v3936_v10 = vmul.f32 %v10093_v19, %v9078_v35  ;;  %v3941_v51 = vmul.f32 %v10094_v57, %v9075_v30  ;;  %v10095_v23 = vmov %v10094_v57 }
 0x3db   :  { %v3942_v44 = vmul.f32 %v10095_v23, %v9078_v35  ;;  %v3894_v11 = vadd.f32 %v3892_v53, %v3850_v16  ;;  %v3973_v14 = vsel %vm2318_vm0, %v3970_v41, %v3972_v46  ;;  %v3974_v27 = vsel %vm2318_vm0, %v3972_v46, %v3970_v41 }
 0x3dc   :  { %v3899_v37 = vadd.f32 %v3897_v32, %v3855_v24  ;;  %v3900_v6 = vadd.f32 %v3898_v31, %v3856_v25  ;;  %v10098_v1 = vstv %s10089_s22  ;;  %v3905_v16 = vadd.f32 %v3903_v3, %v3861_v48 }
 0x3dd   :  { %v3947_v36 = vmul.f32 %v10098_v1, %v9075_v30  ;;  %v10099_v40 = vmov %v10098_v1  ;;  %v3906_v7 = vadd.f32 %v3904_v52, %v3862_v8  ;;  %v9111_v53 = vmul.f32 %v3973_v14, %v8920_v38 }
 0x3de   :  { %v3948_v28 = vmul.f32 %v10099_v40, %v9078_v35  ;;  %v9114_v20 = vmul.f32 %v3974_v27, %v8922_v18  ;;  %v3937_v46 = vadd.f32 %v3935_v15, %v3893_v9  ;;  %v3938_v41 = vadd.f32 %v3936_v10, %v3894_v11 }
 0x3df   :  { %v3943_v24 = vadd.f32 %v3941_v51, %v3899_v37  ;;  %v3944_v25 = vadd.f32 %v3942_v44, %v3900_v6  ;;  %v10101_v32 = vstv %s10096_s2  ;;  %v10103_v0 = vstv %s10097_s4 }
 0x3e0   :  { %v3979_v31 = vmul.f32 %v10101_v32, %v9111_v53  ;;  %v10102_v61 = vmov %v10101_v32  ;;  %v3985_v48 = vmul.f32 %v10103_v0, %v9111_v53  ;;  %v10104_v8 = vmov %v10103_v0 }
 0x3e1   :  { %v3980_v54 = vmul.f32 %v10102_v61, %v9114_v20  ;;  %v3986_v38 = vmul.f32 %v10104_v8, %v9114_v20  ;;  %v3949_v3 = vadd.f32 %v3947_v36, %v3905_v16  ;;  %v3950_v52 = vadd.f32 %v3948_v28, %v3906_v7  ;;  %v4019_v16 = vpop.permute.xlu1 %4018 }
 0x3e2   :  { %v10105_v18 = vstv %s10100_s14  ;;  %v3981_v57 = vadd.f32 %v3979_v31, %v3937_v46  ;;  %v3987_v23 = vadd.f32 %v3985_v48, %v3943_v24  ;;  %v3777_v14 = vadd.f32 %v8908_v26, %v8884_v22  ;;  %s10120_s14 = sld [smem:[#allocation64_spill]] }
 0x3e3   :  { %v3991_v15 = vmul.f32 %v10105_v18, %v9111_v53  ;;  %v10106_v19 = vmov %v10105_v18  ;;  %v3982_v51 = vadd.f32 %v3980_v54, %v3938_v41  ;;  %v3988_v44 = vadd.f32 %v3986_v38, %v3944_v25 }
 0x3e4   :  { %v3992_v10 = vmul.f32 %v10106_v19, %v9114_v20  ;;  %v3783_v27 = vadd.f32 %v8936_v58, %v8888_v33  ;;  %v4175_v37 = vadd.f32 %v8744_v21, %v3981_v57  ;;  %v4184_v1 = vadd.f32 %v8755_v62, %v3987_v23  ;;  %v4017_v58 = vpop.permute.xlu0 %4016 }
 0x3e5   :  { %v3993_v9 = vadd.f32 %v3991_v15, %v3949_v3  ;;  %v4176_v6 = vadd.f32 %v8744_v21, %v3982_v51  ;;  %v4185_v36 = vadd.f32 %v8755_v62, %v3988_v44  ;;  %v3789_v22 = vadd.f32 %v8970_v59, %v8892_v45 }
 0x3e6   :  { %v3994_v11 = vadd.f32 %v3992_v10, %v3950_v52  ;;  %v10107_v26 = vstv %s10031_s29  ;;  %v4177_v7 = vmax.f32 %v4175_v37, 0.0  ;;  %v4186_v41 = vmax.f32 %v4184_v1, 0.0  ;;  %s10113_s29 = sld [smem:[#allocation62_spill]]  ;;  %v4045_v1 = vpop.permute.xlu1 %4044 }
 0x3e7   :  { %v4193_v40 = vadd.f32 %v8758_v4, %v3993_v9  ;;  %v3866_v33 = vmul.f32 %v10107_v26, %v8960_v42  ;;  %v4178_v46 = vmax.f32 %v4176_v6, 0.0  ;;  %v4187_v24 = vmax.f32 %v4185_v36, 0.0 }
 0x3e8   :  { %v4194_v28 = vadd.f32 %v8758_v4, %v3994_v11  ;;  %v3821_v31 = vadd.f32 %v8996_v12, %v3777_v14  ;;  %v10108_v61 = vstv %s8669_s21  ;;  %4766 = vst [vmem:[%s10072_s17 + $0x60] sm:$0xff] %v4177_v7  ;;  %4769 = vst [vmem:[%s10072_s17 + $0x70] sm:$0xff] %v4186_v41  ;;  %v3827_v59 = vadd.f32 %v9018_v5, %v3783_v27 }
 0x3e9   :  { %v4195_v25 = vmax.f32 %v4193_v40, 0.0  ;;  %v3872_v45 = vmul.f32 %v10108_v61, %v8960_v42  ;;  %4767 = vst [vmem:[%s10072_s17 + $0x68] sm:$0xff] %v4178_v46  ;;  %4770 = vst [vmem:[%s10072_s17 + $0x78] sm:$0xff] %v4187_v24  ;;  %v10109_v12 = vmov %v10107_v26  ;;  %v10110_v0 = vstv %s8672_s27 }
 0x3ea   :  { %v4196_v32 = vmax.f32 %v4194_v28, 0.0  ;;  %v3865_v54 = vmul.f32 %v10109_v12, %v8957_v39  ;;  %v3878_v48 = vmul.f32 %v10110_v0, %v8960_v42  ;;  %v10111_v8 = vstv %s8674_s25 }
 0x3eb   :  { %v3910_v38 = vmul.f32 %v10111_v8, %v9036_v47  ;;  %4772 = vst [vmem:[%s10072_s17 + $0x80] sm:$0xff] %v4195_v25  ;;  %v3833_v5 = vadd.f32 %v9056_v60, %v3789_v22  ;;  %v3868_v3 = vadd.f32 %v3866_v33, %v3821_v31  ;;  %v10112_v52 = vstv %s8680_s20  ;;  %s10141_s20 = sld [smem:[#allocation65_spill]] }
 0x3ec   :  { %4773 = vst [vmem:[%s10072_s17 + $0x88] sm:$0xff] %v4196_v32  ;;  %v3916_v42 = vmul.f32 %v10112_v52, %v9036_v47  ;;  %v10114_v18 = vstv %s8682_s0  ;;  %v10115_v19 = vmov %v10108_v61  ;;  %v10116_v57 = vmov %v10110_v0 }
 0x3ed   :  { %v3922_v15 = vmul.f32 %v10114_v18, %v9036_v47  ;;  %v3871_v10 = vmul.f32 %v10115_v19, %v8957_v39  ;;  %v3877_v51 = vmul.f32 %v10116_v57, %v8957_v39  ;;  %v10117_v23 = vmov %v10111_v8  ;;  %v4043_v39 = vpop.permute.xlu0 %4042 }
 0x3ee   :  { %v3909_v60 = vmul.f32 %v10117_v23, %v9033_v17  ;;  %v10118_v44 = vstv %s8688_s12  ;;  %v3874_v11 = vadd.f32 %v3872_v45, %v3827_v59  ;;  %v3880_v14 = vadd.f32 %v3878_v48, %v3833_v5  ;;  %s10145_s12 = sld [smem:[#allocation66_spill]] }
 0x3ef   :  { %v3954_v9 = vmul.f32 %v10118_v44, %v9078_v35  ;;  %v10119_v47 = vmov %v10112_v52  ;;  %v10121_v37 = vstv %s10035_s16  ;;  %v3912_v36 = vadd.f32 %v3910_v38, %v3868_v3  ;;  %v9235_v52 = vld [vmem:[#allocation12 + $0x30] sm:$0xff] }
 0x3f0   :  { %v3915_v27 = vmul.f32 %v10119_v47, %v9033_v17  ;;  %v3960_v6 = vmul.f32 %v10121_v37, %v9078_v35  ;;  %v10122_v40 = vmov %v10114_v18  ;;  %v10123_v22 = vmov %v10118_v44 }
 0x3f1   :  { %v3921_v28 = vmul.f32 %v10122_v40, %v9033_v17  ;;  %v3953_v26 = vmul.f32 %v10123_v22, %v9075_v30  ;;  %v10124_v33 = vstv %s10113_s29  ;;  %v3918_v46 = vadd.f32 %v3916_v42, %v3874_v11 }
 0x3f2   :  { %v3966_v7 = vmul.f32 %v10124_v33, %v9078_v35  ;;  %v3924_v41 = vadd.f32 %v3922_v15, %v3880_v14  ;;  %v10125_v24 = vmov %v10121_v37  ;;  %v10126_v32 = vmov %v10124_v33  ;;  %v9230_v35 = vld [vmem:[#allocation12 + $0x38] sm:$0xff] }
 0x3f3   :  { %v3959_v25 = vmul.f32 %v10125_v24, %v9075_v30  ;;  %v3965_v31 = vmul.f32 %v10126_v32, %v9075_v30  ;;  %v3956_v61 = vadd.f32 %v3954_v9, %v3912_v36  ;;  %v10127_v45 = vstv %s10037_s9 }
 0x3f4   :  { %v3997_v17 = vmul.f32 %v10127_v45, %v9111_v53  ;;  %v10128_v59 = vmov %v10127_v45  ;;  %v10129_v0 = vstv %s10120_s14  ;;  %v3962_v8 = vadd.f32 %v3960_v6, %v3918_v46 }
 0x3f5   :  { %v3998_v12 = vmul.f32 %v10128_v59, %v9114_v20  ;;  %v4004_v48 = vmul.f32 %v10129_v0, %v9114_v20  ;;  %v3968_v38 = vadd.f32 %v3966_v7, %v3924_v41  ;;  %v10130_v5 = vmov %v10129_v0 }
 0x3f6   :  { %v4003_v3 = vmul.f32 %v10130_v5, %v9111_v53  ;;  %v3776_v30 = vadd.f32 %v8903_v13, %v8882_v56  ;;  %v10131_v42 = vstv %s8706_s13  ;;  %v3782_v15 = vadd.f32 %v8931_v43, %v8886_v29  ;;  %v4069_v29 = vpop.permute.xlu0 %4068  ;;  %s10152_s13 = sld [smem:[#allocation68_spill]] }
 0x3f7   :  { %v4010_v18 = vmul.f32 %v10131_v42, %v9114_v20  ;;  %v4020_v19 = vsel %vm2450_vm1, %v4017_v58, %v4019_v16  ;;  %v4021_v57 = vsel %vm2450_vm1, %v4019_v16, %v4017_v58  ;;  %v10132_v23 = vmov %v10131_v42  ;;  %v4071_v20 = vpop.permute.xlu1 %4070 }
 0x3f8   :  { %v4009_v44 = vmul.f32 %v10132_v23, %v9111_v53  ;;  %v3788_v9 = vadd.f32 %v8965_v2, %v8890_v63  ;;  %v3820_v56 = vadd.f32 %v8991_v50, %v3776_v30  ;;  %v4023_v13 = vmul.f32 %v4021_v57, %v9230_v35 }
 0x3f9   :  { %v4000_v43 = vadd.f32 %v3998_v12, %v3956_v61  ;;  %v4006_v11 = vadd.f32 %v4004_v48, %v3962_v8  ;;  %v3826_v16 = vadd.f32 %v9013_v49, %v3782_v15  ;;  %v4022_v58 = vmul.f32 %v4020_v19, %v9235_v52 }
 0x3fa   :  { %v3832_v53 = vadd.f32 %v9051_v34, %v3788_v9  ;;  %v3867_v14 = vadd.f32 %v3865_v54, %v3820_v56  ;;  %v4046_v63 = vsel %vm2450_vm1, %v4043_v39, %v4045_v1  ;;  %v4047_v2 = vsel %vm2450_vm1, %v4045_v1, %v4043_v39  ;;  %v4095_v56 = vpop.permute.xlu0 %4094 }
 0x3fb   :  { %v4012_v50 = vadd.f32 %v4010_v18, %v3968_v38  ;;  %v3873_v47 = vadd.f32 %v3871_v10, %v3826_v16  ;;  %v10133_v37 = vstv %s8712_s10  ;;  %v4072_v49 = vsel %vm2450_vm1, %v4069_v29, %v4071_v20  ;;  %v4097_v9 = vpop.permute.xlu1 %4096  ;;  %s10151_s10 = sld [smem:[#allocation67_spill]] }
 0x3fc   :  { %v4027_v6 = vmul.f32 %v10133_v37, %v4023_v13  ;;  %v3879_v36 = vadd.f32 %v3877_v51, %v3832_v53  ;;  %v3911_v40 = vadd.f32 %v3909_v60, %v3867_v14  ;;  %v10134_v34 = vstv %s8714_s1  ;;  %s10155_s1 = sld [smem:[#allocation69_spill]] }
 0x3fd   :  { %v4033_v54 = vmul.f32 %v10134_v34, %v4023_v13  ;;  %v10135_v22 = vstv %s8720_s5  ;;  %v3917_v7 = vadd.f32 %v3915_v27, %v3873_v47  ;;  %v10136_v46 = vmov %v10133_v37 }
 0x3fe   :  { %v4039_v33 = vmul.f32 %v10135_v22, %v4023_v13  ;;  %v4026_v41 = vmul.f32 %v10136_v46, %v4022_v58  ;;  %v4048_v1 = vmul.f32 %v4046_v63, %v9235_v52  ;;  %v4049_v10 = vmul.f32 %v4047_v2, %v9230_v35 }
 0x3ff   :  { %v3923_v39 = vadd.f32 %v3921_v28, %v3879_v36  ;;  %v3955_v24 = vadd.f32 %v3953_v26, %v3911_v40  ;;  %v10137_v32 = vmov %v10134_v34  ;;  %v10138_v51 = vmov %v10135_v22 }
 0x400   :  { %v4032_v61 = vmul.f32 %v10137_v32, %v4022_v58  ;;  %v4038_v60 = vmul.f32 %v10138_v51, %v4022_v58  ;;  %v3961_v45 = vadd.f32 %v3959_v25, %v3917_v7  ;;  %v4029_v59 = vadd.f32 %v4027_v6, %v4000_v43 }
 0x401   :  { %v10139_v12 = vstv %s8722_s19  ;;  %v4073_v0 = vsel %vm2450_vm1, %v4071_v20, %v4069_v29  ;;  %v3967_v48 = vadd.f32 %v3965_v31, %v3923_v39  ;;  %v3999_v8 = vadd.f32 %v3997_v17, %v3955_v24 }
 0x402   :  { %v4053_v27 = vmul.f32 %v10139_v12, %v4049_v10  ;;  %v4035_v38 = vadd.f32 %v4033_v54, %v4006_v11  ;;  %v4041_v28 = vadd.f32 %v4039_v33, %v4012_v50  ;;  %v4005_v26 = vadd.f32 %v4003_v3, %v3961_v45 }
 0x403   :  { %v10140_v5 = vmov %v10139_v12  ;;  %v10142_v42 = vstv %s8728_s28  ;;  %v4074_v18 = vmul.f32 %v4072_v49, %v9235_v52  ;;  %v4011_v15 = vadd.f32 %v4009_v44, %v3967_v48 }
 0x404   :  { %v4052_v30 = vmul.f32 %v10140_v5, %v4048_v1  ;;  %v4059_v25 = vmul.f32 %v10142_v42, %v4049_v10  ;;  %v10143_v19 = vmov %v10142_v42  ;;  %v10144_v23 = vstv %s8730_s24 }
 0x405   :  { %v4058_v57 = vmul.f32 %v10143_v19, %v4048_v1  ;;  %v4064_v31 = vmul.f32 %v10144_v23, %v4048_v1  ;;  %v4075_v17 = vmul.f32 %v4073_v0, %v9230_v35  ;;  %v4028_v3 = vadd.f32 %v4026_v41, %v3999_v8 }
 0x406   :  { %v4034_v13 = vadd.f32 %v4032_v61, %v4005_v26  ;;  %v4055_v20 = vadd.f32 %v4053_v27, %v4029_v59  ;;  %v10146_v29 = vmov %v10144_v23  ;;  %v10147_v11 = vstv %s8736_s8 }
 0x407   :  { %v4065_v43 = vmul.f32 %v10146_v29, %v4049_v10  ;;  %v4078_v16 = vmul.f32 %v10147_v11, %v4074_v18  ;;  %v10148_v58 = vmov %v10147_v11  ;;  %v10149_v44 = vstv %s10141_s20 }
 0x408   :  { %v4079_v53 = vmul.f32 %v10148_v58, %v4075_v17  ;;  %v4084_v14 = vmul.f32 %v10149_v44, %v4074_v18  ;;  %v10150_v63 = vmov %v10149_v44  ;;  %v4040_v50 = vadd.f32 %v4038_v60, %v4011_v15 }
 0x409   :  { %v4085_v2 = vmul.f32 %v10150_v63, %v4075_v17  ;;  %v4054_v47 = vadd.f32 %v4052_v30, %v4028_v3  ;;  %v4061_v37 = vadd.f32 %v4059_v25, %v4035_v38  ;;  %v4098_v6 = vsel %vm2450_vm1, %v4095_v56, %v4097_v9 }
 0x40a   :  { %v4060_v49 = vadd.f32 %v4058_v57, %v4034_v13  ;;  %v10153_v36 = vstv %s10145_s12  ;;  %v4099_v22 = vsel %vm2450_vm1, %v4097_v9, %v4095_v56  ;;  %v4066_v33 = vadd.f32 %v4064_v31, %v4040_v50 }
 0x40b   :  { %v4090_v40 = vmul.f32 %v10153_v36, %v4074_v18  ;;  %v10154_v34 = vmov %v10153_v36  ;;  %v4067_v7 = vadd.f32 %v4065_v43, %v4041_v28  ;;  %v4100_v46 = vmul.f32 %v4098_v6, %v9235_v52 }
 0x40c   :  { %v4091_v54 = vmul.f32 %v10154_v34, %v4075_v17  ;;  %v4101_v41 = vmul.f32 %v4099_v22, %v9230_v35  ;;  %v4080_v1 = vadd.f32 %v4078_v16, %v4054_v47  ;;  %v4081_v10 = vadd.f32 %v4079_v53, %v4055_v20 }
 0x40d   :  { %v4086_v39 = vadd.f32 %v4084_v14, %v4060_v49  ;;  %v4087_v24 = vadd.f32 %v4085_v2, %v4061_v37  ;;  %v10156_v32 = vstv %s10151_s10  ;;  %v10158_v45 = vstv %s10152_s13 }
 0x40e   :  { %v4104_v61 = vmul.f32 %v10156_v32, %v4100_v46  ;;  %v10157_v51 = vmov %v10156_v32  ;;  %v4110_v59 = vmul.f32 %v10158_v45, %v4100_v46  ;;  %v10159_v55 = vmov %v10158_v45 }
 0x40f   :  { %v4105_v60 = vmul.f32 %v10157_v51, %v4101_v41  ;;  %v4111_v12 = vmul.f32 %v10159_v55, %v4101_v41  ;;  %v4092_v27 = vadd.f32 %v4090_v40, %v4066_v33  ;;  %v4093_v0 = vadd.f32 %v4091_v54, %v4067_v7 }
 0x410   :  { %v10160_v48 = vstv %s10155_s1  ;;  %v4106_v28 = vadd.f32 %v4104_v61, %v4080_v1  ;;  %v4112_v26 = vadd.f32 %v4110_v59, %v4086_v39 }
 0x411   :  { %v4116_v8 = vmul.f32 %v10160_v48, %v4100_v46  ;;  %v10161_v38 = vmov %v10160_v48  ;;  %v4107_v35 = vadd.f32 %v4105_v60, %v4081_v10  ;;  %v4113_v5 = vadd.f32 %v4111_v12, %v4087_v24 }
 0x412   :  { %v4117_v52 = vmul.f32 %v10161_v38, %v4101_v41  ;;  %v4202_v25 = vadd.f32 %v8744_v21, %v4106_v28  ;;  %v4211_v15 = vadd.f32 %v8755_v62, %v4112_v26 }
 0x413   :  { %v4118_v30 = vadd.f32 %v4116_v8, %v4092_v27  ;;  %v4203_v18 = vadd.f32 %v8744_v21, %v4107_v35  ;;  %v4212_v19 = vadd.f32 %v8755_v62, %v4113_v5 }
 0x414   :  { %v4119_v42 = vadd.f32 %v4117_v52, %v4093_v0  ;;  %v4204_v31 = vmax.f32 %v4202_v25, 0.0  ;;  %v4213_v9 = vmax.f32 %v4211_v15, 0.0 }
 0x415   :  { %v4220_v57 = vadd.f32 %v8758_v4, %v4118_v30  ;;  %v4205_v17 = vmax.f32 %v4203_v18, 0.0  ;;  %v4214_v56 = vmax.f32 %v4212_v19, 0.0 }
 0x416   :  { %v4221_v23 = vadd.f32 %v8758_v4, %v4119_v42  ;;  %4774 = vst [vmem:[%s10072_s17 + $0x90] sm:$0xff] %v4204_v31  ;;  %4777 = vst [vmem:[%s10072_s17 + $0xa0] sm:$0xff] %v4213_v9 }
 0x417   :  { %v4222_v3 = vmax.f32 %v4220_v57, 0.0  ;;  %4775 = vst [vmem:[%s10072_s17 + $0x98] sm:$0xff] %v4205_v17  ;;  %4778 = vst [vmem:[%s10072_s17 + $0xa8] sm:$0xff] %v4214_v56 }
 0x418   :  { %v4223_v13 = vmax.f32 %v4221_v23, 0.0 }
 0x419   :  { %4780 = vst [vmem:[%s10072_s17 + $0xb0] sm:$0xff] %v4222_v3 }
 0x41a   :  { %4781 = vst [vmem:[%s10072_s17 + $0xb8] sm:$0xff] %v4223_v13 }
 0x41b   :  { %4231 = vsyncpa [#allocation3], 1 }
 0x41c   :  { %4232 = vsyncpa [#allocation13], 1 }
 0x41d   :  { %4233 = vsyncpa [#allocation4], 1 }
 0x41e   :  { %4234 = vsyncpa [#allocation10], 1 }
 0x41f   :  { %4235 = vsyncpa [#allocation5], 1 }
 0x420   :  { %4236 = vsyncpa [#allocation8], 1 }

</bundles_post_ra>
